<compile_context>
chip_gen: v7x
topology: tpu7x:2x2x1
jax: 0.10.0
libtpu: 0.0.40
codegen_flags: <defaults>
</compile_context>

<pallas_src>
import jax
import jax.numpy as jnp
from jax.experimental import pallas as pl
from jax.experimental.pallas import tpu as pltpu

# ----------------------------- model constants -----------------------------
NODE_DIM = 40            # node feature dim D (module default)
EDGE_DIM = 10            # edge feature dim E (module default)
T_STEPS = 3              # message passing rounds (T)
LSTM_T = 2               # set2set steps
HP1 = 128                # per-gate lane padding for the H=40 set2set LSTMs
H2 = 4 * NODE_DIM        # 160: hidden/feature size of the gather set2set LSTMs
HP2 = 256                # per-gate lane padding for the H=160 gather LSTMs
LANE = 128

_F32 = jnp.float32
_BF16 = jnp.bfloat16


def _mxu(a, b, dims):
    # bf16 x bf16 MXU matmul with f32 accumulation.
    return jax.lax.dot_general(a.astype(_BF16), b.astype(_BF16),
                               (dims, ((), ())), preferred_element_type=_F32)


def _dot(a, b):     # a @ b
    return _mxu(a, b, ((1,), (0,)))


def _dot_nt(a, b):  # a @ b.T
    return _mxu(a, b, ((1,), (1,)))


def _dot_tn(a, b):  # a.T @ b
    return _mxu(a, b, ((0,), (0,)))


# ---------------------------------------------------------------------------
# Single fused Pallas kernel: whole forward pass for one (solute, solvent)
# pair per grid step.
# ---------------------------------------------------------------------------
def _cigin_kernel(
    nodes_u_ref, adj_u_ref, ef_u_ref, nodes_v_ref, adj_v_ref, ef_v_ref,
    # message passing weights (stacked over T): solute then solvent
    u_whm_ref, u_wm2_ref, u_we_ref, u_bu_ref, u_bm_ref,
    v_whm_ref, v_wm2_ref, v_we_ref, v_bu_ref, v_bm_ref,
    # node-level set2set LSTMs (gate-fused, 128-padded): solute then solvent
    su_wc_ref, su_wr_ref, su_b_ref,
    sv_wc_ref, sv_wr_ref, sv_b_ref,
    # gather-phase set2set LSTMs (gate-fused, 256-padded)
    gu_wc_ref, gu_wr_ref, gu_b_ref,
    gv_wc_ref, gv_wr_ref, gv_b_ref,
    # MLP head (first layer split over the 4 comb pieces -> no concat)
    w1a_ref, w1b_ref, w1c_ref, w1d_ref, b1_ref,
    w2_ref, b2_ref, w3_ref, b3_ref, w4_ref, b4_ref,
    out_ref,
):
    D = NODE_DIM

    # ---- dense synchronous message passing, T rounds unrolled -------------
    # message_v = deg_v*(h_v Wa + b_u) + adj@(h Wb) + esum_v We
    # h_v'      = relu(h_v Wm1 + message_v Wm2 + b_m)
    # efeat comes in transposed as (E, n, n) so esum is a lane reduction.
    def message_passing(nodes, adj, ef_t, whm_ref, wm2_ref, we_ref, bu_ref, bm_ref):
        deg = jnp.sum(adj, axis=1, keepdims=True)                   # (n, 1)
        # esum_t[e, v] = sum_w adj[v, w] * e_vw[e]  (VPU mult + lane reduce)
        esum_t = jnp.sum(adj * ef_t, axis=-1)                       # (E, n)
        h0 = nodes
        h = h0
        for k in range(T_STEPS):
            # fused h-consuming weight: [Wa | Wm1 | Wb] at 128-aligned cols
            hw = _dot(h, whm_ref[k])                                # (n, 384)
            h_wa, h_wm1, h_wb = hw[:, 0:D], hw[:, 128:128 + D], hw[:, 256:256 + D]
            msg = (deg * (h_wa + bu_ref[k])
                   + _dot(adj, h_wb)
                   + _dot_tn(esum_t, we_ref[k]))                    # (n, D)
            h = jnp.maximum(h_wm1 + _dot(msg, wm2_ref[k]) + bm_ref[k], 0.0)
        return h0, h

    def gate_split(gates, hp):                 # PyTorch gate order i, f, g, o
        i = jax.nn.sigmoid(gates[:, 0:hp])
        f = jax.nn.sigmoid(gates[:, hp:2 * hp])
        g = jnp.tanh(gates[:, 2 * hp:3 * hp])
        o = jax.nn.sigmoid(gates[:, 3 * hp:4 * hp])
        return i, f, g, o

    # ---- set2set over the 2-element set {h0, ht}, batch = nodes -----------
    # LSTM state h / attention readout r kept as (n, HP1) zero-padded; the
    # q_star = [h, r] concat is folded into the split weights wc / wr.
    def set2set_pair(h0p, htp, wc_ref, wr_ref, b_ref):
        n = h0p.shape[0]
        h = jnp.zeros((n, HP1), _F32)
        c = jnp.zeros((n, HP1), _F32)
        r = jnp.zeros((n, HP1), _F32)
        for step in range(LSTM_T):
            if step == 0:                      # q_star == 0 and hidden == 0
                gates = b_ref[...]
            else:
                gates = _dot(h, wc_ref[...]) + _dot(r, wr_ref[...]) + b_ref[...]
            i, f, g, o = gate_split(gates, HP1)
            c = f * c + i * g
            h = o * jnp.tanh(c)
            e0 = jnp.sum(h0p * h, axis=1, keepdims=True)            # (n, 1)
            e1 = jnp.sum(htp * h, axis=1, keepdims=True)
            mx = jnp.maximum(e0, e1)
            a0 = jnp.exp(e0 - mx)
            a1 = jnp.exp(e1 - mx)
            r = (a0 * h0p + a1 * htp) * pl.reciprocal(a0 + a1, approx=True)
        return h, r                            # each (n, HP1), real width D

    # ---- set2set with batch 1, set = node rows (softmax over nodes) -------
    def set2set_batch1(t, wc_ref, wr_ref, b_ref):
        h = jnp.zeros((1, HP2), _F32)
        c = jnp.zeros((1, HP2), _F32)
        r = jnp.zeros((1, H2), _F32)
        for step in range(LSTM_T):
            if step == 0:
                gates = b_ref[...]
            else:
                gates = _dot(h, wc_ref[...]) + _dot(r, wr_ref[...]) + b_ref[...]
            i, f, g, o = gate_split(gates, HP2)
            c = f * c + i * g
            h = o * jnp.tanh(c)
            e = jnp.sum(t * h[:, :H2], axis=1, keepdims=True)       # (S, 1)
            mx = jnp.max(e, axis=0, keepdims=True)
            a = jnp.exp(e - mx)
            denom = jnp.sum(a, axis=0, keepdims=True)
            r = jnp.sum(a * t, axis=0, keepdims=True) * pl.reciprocal(denom, approx=True)
        return h, r                            # (1, HP2) real H2, (1, H2)

    def pad_lanes(x, width):
        n, w = x.shape
        return jnp.concatenate([x, jnp.zeros((n, width - w), _F32)], axis=1)

    nodes_u, adj_u, ef_u = nodes_u_ref[0], adj_u_ref[0], ef_u_ref[0]
    nodes_v, adj_v, ef_v = nodes_v_ref[0], adj_v_ref[0], ef_v_ref[0]

    # solute / solvent branches
    h0u, htu = message_passing(nodes_u, adj_u, ef_u,
                               u_whm_ref, u_wm2_ref, u_we_ref, u_bu_ref, u_bm_ref)
    h0v, htv = message_passing(nodes_v, adj_v, ef_v,
                               v_whm_ref, v_wm2_ref, v_we_ref, v_bu_ref, v_bm_ref)

    hu, ru = set2set_pair(pad_lanes(h0u, HP1), pad_lanes(htu, HP1),
                          su_wc_ref, su_wr_ref, su_b_ref)   # gather_u = [hu | ru]
    hv, rv = set2set_pair(pad_lanes(h0v, HP1), pad_lanes(htv, HP1),
                          sv_wc_ref, sv_wr_ref, sv_b_ref)   # gather_v = [hv | rv]

    # pairwise interaction map (module returns the PRE-tanh map)
    imap = _dot_nt(hu, hv) + _dot_nt(ru, rv)                # (n, m)
    imt = jnp.tanh(imap)
    sa_h, sa_r = _dot(imt, hv), _dot(imt, rv)               # solute_after  (n, HP1)
    va_h, va_r = _dot_tn(imt, hu), _dot_tn(imt, ru)         # solvent_after (m, HP1)

    # dense [after_interaction | gather] rows, real width 4D = 160
    t_u = jnp.concatenate([sa_h[:, :D], sa_r[:, :D], hu[:, :D], ru[:, :D]], axis=1)
    t_v = jnp.concatenate([va_h[:, :D], va_r[:, :D], hv[:, :D], rv[:, :D]], axis=1)

    h2u, r2u = set2set_batch1(t_u, gu_wc_ref, gu_wr_ref, gu_b_ref)
    h2v, r2v = set2set_batch1(t_v, gv_wc_ref, gv_wr_ref, gv_b_ref)

    # MLP head: first-layer weight split over the four comb pieces
    x = jnp.maximum(_dot(h2u, w1a_ref[...]) + _dot(r2u, w1b_ref[...])
                    + _dot(h2v, w1c_ref[...]) + _dot(r2v, w1d_ref[...])
                    + b1_ref[...], 0.0)
    x = jnp.maximum(_dot(x, w2_ref[...]) + b2_ref[...], 0.0)
    x = jnp.maximum(_dot(x, w3_ref[...]) + b3_ref[...], 0.0)
    pred_row = _dot(x, w4_ref[...]) + b4_ref[...]           # (1, 128), scalar at [0,0]

    # single lane-dense output slab: row 0 = prediction, rows 1..n = imap
    n, m = imap.shape
    rows = out_ref.shape[1]
    parts = [pred_row,
             jnp.concatenate([imap, jnp.zeros((n, LANE - m), _F32)], axis=1)]
    if rows - 1 - n > 0:
        parts.append(jnp.zeros((rows - 1 - n, LANE), _F32))
    out_ref[0] = jnp.concatenate(parts, axis=0)


# ---------------------------------------------------------------------------
# Wrapper: one pallas_call for the whole batched forward pass.
# ---------------------------------------------------------------------------
def cigin_forward(params, nodes_u, adj_u, e_u, nodes_v, adj_v, e_v):
    B, n, _ = nodes_u.shape
    m = nodes_v.shape[1]
    rows = max(8, -(-(n + 1) // 8) * 8)

    weights = (params['mp_solute'] + params['mp_solvent']
               + params['lstm_solute'] + params['lstm_solvent']
               + params['lstm_gather_solute'] + params['lstm_gather_solvent']
               + params['mlp'])

    def batched_spec(shape):
        nd = len(shape)
        return pl.BlockSpec((1,) + tuple(shape[1:]),
                            lambda b, _n=nd: (b,) + (0,) * (_n - 1))

    def const_spec(shape):
        nd = len(shape)
        return pl.BlockSpec(tuple(shape), lambda b, _n=nd: (0,) * _n)

    in_specs = ([batched_spec(x.shape)
                 for x in (nodes_u, adj_u, e_u, nodes_v, adj_v, e_v)]
                + [const_spec(w.shape) for w in weights])

    out = pl.pallas_call(
        _cigin_kernel,
        out_shape=jax.ShapeDtypeStruct((B, rows, LANE), jnp.float32),
        grid=(B,),
        in_specs=in_specs,
        out_specs=pl.BlockSpec((1, rows, LANE), lambda b: (b, 0, 0)),
        compiler_params=pltpu.CompilerParams(
            dimension_semantics=("parallel",),        # v7x: shard batch over 2 TCs
            vmem_limit_bytes=24 * 1024 * 1024),       # actual footprint ~8 MiB
    )(nodes_u, adj_u, e_u, nodes_v, adj_v, e_v, *weights)

    pred = out[:, 0, 0:1]            # (B, 1)
    imap = out[:, 1:1 + n, :m]       # (B, n, m), pre-tanh, as in the module
    return pred, imap


# ---------------------------------------------------------------------------
# Host-side parameter packing (maps PyTorch-layout weights -> kernel layout).
# ---------------------------------------------------------------------------
def _w(key, shape, scale=0.1):
    return scale * jax.random.normal(key, shape, jnp.float32)


def _pad_to(x, shape):
    out = jnp.zeros(shape, jnp.float32)
    return out.at[tuple(slice(0, s) for s in x.shape)].set(x)


def pack_message_passing(key):
    """Per-round U_k / M_k Linear weights (PyTorch (out, in) layout) packed as
       whm (T, D, 384): cols [0:D)=Wa, [128:128+D)=Wm1, [256:256+D)=Wb (bf16),
       wm2 (T, D, D), we (T, E, D) (bf16), bu/bm (T, 1, D) (f32)."""
    D, E = NODE_DIM, EDGE_DIM
    ks = jax.random.split(key, 4 * T_STEPS)
    whm_l, wm2_l, we_l, bu_l, bm_l = [], [], [], [], []
    for k in range(T_STEPS):
        u_w = _w(ks[4 * k + 0], (D, 2 * D + E))   # U_k.weight
        u_b = _w(ks[4 * k + 1], (D,))             # U_k.bias
        m_w = _w(ks[4 * k + 2], (D, 2 * D))       # M_k.weight
        m_b = _w(ks[4 * k + 3], (D,))             # M_k.bias
        uj, mj = u_w.T, m_w.T
        wa, wb, we = uj[:D], uj[D:2 * D], uj[2 * D:]
        wm1, wm2 = mj[:D], mj[D:]
        whm = jnp.zeros((D, 3 * LANE), jnp.float32)
        whm = whm.at[:, 0:D].set(wa).at[:, LANE:LANE + D].set(wm1)
        whm = whm.at[:, 2 * LANE:2 * LANE + D].set(wb)
        whm_l.append(whm); wm2_l.append(wm2); we_l.append(we)
        bu_l.append(u_b[None, :]); bm_l.append(m_b[None, :])
    bf = lambda lst: jnp.stack(lst).astype(_BF16)
    return (bf(whm_l), bf(wm2_l), bf(we_l), jnp.stack(bu_l), jnp.stack(bm_l))


def pack_lstm(key, H, Hp, r_rows):
    """nn.LSTM(2H, H) packed for the set2set recurrence.  Gate order i,f,g,o;
       each gate's output columns padded to Hp (a 128-multiple).  Because the
       first half of q_star always equals the LSTM hidden state, W_ih[:, :H]
       and W_hh are pre-summed into `wc`.  b = b_ih + b_hh (NOTE: importing
       real PyTorch weights must also sum the two bias vectors)."""
    k1, k2, k3, k4 = jax.random.split(key, 4)
    w_ih = _w(k1, (4 * H, 2 * H))      # torch weight_ih_l0
    w_hh = _w(k2, (4 * H, H))          # torch weight_hh_l0
    b_ih = _w(k3, (4 * H,))
    b_hh = _w(k4, (4 * H,))
    wih_j, whh_j = w_ih.T, w_hh.T
    bias = b_ih + b_hh
    wc = jnp.zeros((Hp, 4 * Hp), jnp.float32)
    wr = jnp.zeros((r_rows, 4 * Hp), jnp.float32)
    b = jnp.zeros((1, 4 * Hp), jnp.float32)
    for g in range(4):
        wc = wc.at[:H, g * Hp:g * Hp + H].set(
            wih_j[:H, g * H:(g + 1) * H] + whh_j[:, g * H:(g + 1) * H])
        wr = wr.at[:H, g * Hp:g * Hp + H].set(wih_j[H:, g * H:(g + 1) * H])
        b = b.at[0, g * Hp:g * Hp + H].set(bias[g * H:(g + 1) * H])
    return wc.astype(_BF16), wr.astype(_BF16), b


def pack_mlp(key):
    D = NODE_DIM
    ks = jax.random.split(key, 8)
    w1 = _w(ks[0], (360, 16 * D)); b1 = _w(ks[1], (360,))
    w2 = _w(ks[2], (200, 360));    b2 = _w(ks[3], (200,))
    w3 = _w(ks[4], (120, 200));    b3 = _w(ks[5], (120,))
    w4 = _w(ks[6], (1, 120));      b4 = _w(ks[7], (1,))
    w1j = w1.T                                        # (640, 360)
    w1a = _pad_to(w1j[0:H2], (HP2, 384))              # acts on h2 (solute)
    w1b = _pad_to(w1j[H2:2 * H2], (H2, 384))          # acts on r2 (solute)
    w1c = _pad_to(w1j[2 * H2:3 * H2], (HP2, 384))     # acts on h2 (solvent)
    w1d = _pad_to(w1j[3 * H2:], (H2, 384))            # acts on r2 (solvent)
    b1p = _pad_to(b1[None, :], (1, 384))
    w2p = _pad_to(w2.T, (384, 256)); b2p = _pad_to(b2[None, :], (1, 256))
    w3p = _pad_to(w3.T, (256, 128)); b3p = _pad_to(b3[None, :], (1, 128))
    w4p = _pad_to(w4.T, (128, 128)); b4p = _pad_to(b4[None, :], (1, 128))
    bf = lambda x: x.astype(_BF16)
    return (bf(w1a), bf(w1b), bf(w1c), bf(w1d), b1p,
            bf(w2p), b2p, bf(w3p), b3p, bf(w4p), b4p)


def init_params(key):
    ks = jax.random.split(key, 7)
    return {
        'mp_solute': pack_message_passing(ks[0]),
        'mp_solvent': pack_message_passing(ks[1]),
        'lstm_solute': pack_lstm(ks[2], NODE_DIM, HP1, HP1),
        'lstm_solvent': pack_lstm(ks[3], NODE_DIM, HP1, HP1),
        'lstm_gather_solute': pack_lstm(ks[4], H2, HP2, H2),
        'lstm_gather_solvent': pack_lstm(ks[5], H2, HP2, H2),
        'mlp': pack_mlp(ks[6]),
    }


def make_graphs(key, batch, n):
    """Deterministic synthetic ring molecules (every atom has 2 neighbors).
       Edge features are stored pre-transposed as (B, E, n, n) so the kernel's
       esum is a simple broadcast multiply + lane reduction."""
    k1, k2 = jax.random.split(key)
    nodes = 0.1 * jax.random.normal(k1, (batch, n, NODE_DIM), jnp.float32)
    efeat = 0.1 * jax.random.normal(k2, (batch, EDGE_DIM, n, n), jnp.float32)
    idx = jnp.arange(n)
    adj = jnp.zeros((n, n), jnp.float32)
    adj = adj.at[idx, (idx + 1) % n].set(1.0)
    adj = adj.at[(idx + 1) % n, idx].set(1.0)
    adj = jnp.tile(adj[None], (batch, 1, 1))
    return nodes, adj, efeat


if __name__ == "__main__":
    key = jax.random.PRNGKey(0)
    kp, ku, kv = jax.random.split(key, 3)
    params = init_params(kp)

    B, n_solute, n_solvent = 2, 6, 5
    nodes_u, adj_u, e_u = make_graphs(ku, B, n_solute)
    nodes_v, adj_v, e_v = make_graphs(kv, B, n_solvent)

    fwd = jax.jit(cigin_forward)
    pred, imap = fwd(params, nodes_u, adj_u, e_u, nodes_v, adj_v, e_v)
    jax.block_until_ready((pred, imap))

    assert pred.shape == (B, 1), pred.shape
    assert imap.shape == (B, n_solute, n_solvent), imap.shape
    assert bool(jnp.all(jnp.isfinite(pred))) and bool(jnp.all(jnp.isfinite(imap)))
    print("KERNEL_OK")
</pallas_src>

<mosaic_0001>
module attributes {stable_mosaic.version = 11 : i64} {
  func.func @_cigin_kernel(%arg0: i32, %arg1: memref<1x6x40xf32, #tpu.memory_space<vmem>>, %arg2: memref<1x6x6xf32, #tpu.memory_space<vmem>>, %arg3: memref<1x10x6x6xf32, #tpu.memory_space<vmem>>, %arg4: memref<1x5x40xf32, #tpu.memory_space<vmem>>, %arg5: memref<1x5x5xf32, #tpu.memory_space<vmem>>, %arg6: memref<1x10x5x5xf32, #tpu.memory_space<vmem>>, %arg7: memref<3x40x384xbf16, #tpu.memory_space<vmem>>, %arg8: memref<3x40x40xbf16, #tpu.memory_space<vmem>>, %arg9: memref<3x10x40xbf16, #tpu.memory_space<vmem>>, %arg10: memref<3x1x40xf32, #tpu.memory_space<vmem>>, %arg11: memref<3x1x40xf32, #tpu.memory_space<vmem>>, %arg12: memref<3x40x384xbf16, #tpu.memory_space<vmem>>, %arg13: memref<3x40x40xbf16, #tpu.memory_space<vmem>>, %arg14: memref<3x10x40xbf16, #tpu.memory_space<vmem>>, %arg15: memref<3x1x40xf32, #tpu.memory_space<vmem>>, %arg16: memref<3x1x40xf32, #tpu.memory_space<vmem>>, %arg17: memref<128x512xbf16, #tpu.memory_space<vmem>>, %arg18: memref<128x512xbf16, #tpu.memory_space<vmem>>, %arg19: memref<1x512xf32, #tpu.memory_space<vmem>>, %arg20: memref<128x512xbf16, #tpu.memory_space<vmem>>, %arg21: memref<128x512xbf16, #tpu.memory_space<vmem>>, %arg22: memref<1x512xf32, #tpu.memory_space<vmem>>, %arg23: memref<256x1024xbf16, #tpu.memory_space<vmem>>, %arg24: memref<160x1024xbf16, #tpu.memory_space<vmem>>, %arg25: memref<1x1024xf32, #tpu.memory_space<vmem>>, %arg26: memref<256x1024xbf16, #tpu.memory_space<vmem>>, %arg27: memref<160x1024xbf16, #tpu.memory_space<vmem>>, %arg28: memref<1x1024xf32, #tpu.memory_space<vmem>>, %arg29: memref<256x384xbf16, #tpu.memory_space<vmem>>, %arg30: memref<160x384xbf16, #tpu.memory_space<vmem>>, %arg31: memref<256x384xbf16, #tpu.memory_space<vmem>>, %arg32: memref<160x384xbf16, #tpu.memory_space<vmem>>, %arg33: memref<1x384xf32, #tpu.memory_space<vmem>>, %arg34: memref<384x256xbf16, #tpu.memory_space<vmem>>, %arg35: memref<1x256xf32, #tpu.memory_space<vmem>>, %arg36: memref<256x128xbf16, #tpu.memory_space<vmem>>, %arg37: memref<1x128xf32, #tpu.memory_space<vmem>>, %arg38: memref<128x128xbf16, #tpu.memory_space<vmem>>, %arg39: memref<1x128xf32, #tpu.memory_space<vmem>>, %arg40: memref<1x8x128xf32, #tpu.memory_space<vmem>>) attributes {dimension_semantics = [#tpu.dimension_semantics<parallel>], iteration_bounds = array<i64: 2>, scalar_prefetch = 0 : i64, scratch_operands = 0 : i64, tpu.core_type = #tpu.core_type<tc>, window_params = [{transform_indices = @transform_0, window_bounds = array<i64: 1, 6, 40>}, {transform_indices = @transform_1, window_bounds = array<i64: 1, 6, 6>}, {transform_indices = @transform_2, window_bounds = array<i64: 1, 10, 6, 6>}, {transform_indices = @transform_3, window_bounds = array<i64: 1, 5, 40>}, {transform_indices = @transform_4, window_bounds = array<i64: 1, 5, 5>}, {transform_indices = @transform_5, window_bounds = array<i64: 1, 10, 5, 5>}, {pipeline_mode = #tpu.pipeline_mode<synchronous>, transform_indices = @transform_6, window_bounds = array<i64: 3, 40, 384>}, {pipeline_mode = #tpu.pipeline_mode<synchronous>, transform_indices = @transform_7, window_bounds = array<i64: 3, 40, 40>}, {pipeline_mode = #tpu.pipeline_mode<synchronous>, transform_indices = @transform_8, window_bounds = array<i64: 3, 10, 40>}, {pipeline_mode = #tpu.pipeline_mode<synchronous>, transform_indices = @transform_9, window_bounds = array<i64: 3, 1, 40>}, {pipeline_mode = #tpu.pipeline_mode<synchronous>, transform_indices = @transform_10, window_bounds = array<i64: 3, 1, 40>}, {pipeline_mode = #tpu.pipeline_mode<synchronous>, transform_indices = @transform_11, window_bounds = array<i64: 3, 40, 384>}, {pipeline_mode = #tpu.pipeline_mode<synchronous>, transform_indices = @transform_12, window_bounds = array<i64: 3, 40, 40>}, {pipeline_mode = #tpu.pipeline_mode<synchronous>, transform_indices = @transform_13, window_bounds = array<i64: 3, 10, 40>}, {pipeline_mode = #tpu.pipeline_mode<synchronous>, transform_indices = @transform_14, window_bounds = array<i64: 3, 1, 40>}, {pipeline_mode = #tpu.pipeline_mode<synchronous>, transform_indices = @transform_15, window_bounds = array<i64: 3, 1, 40>}, {pipeline_mode = #tpu.pipeline_mode<synchronous>, transform_indices = @transform_16, window_bounds = array<i64: 128, 512>}, {pipeline_mode = #tpu.pipeline_mode<synchronous>, transform_indices = @transform_17, window_bounds = array<i64: 128, 512>}, {pipeline_mode = #tpu.pipeline_mode<synchronous>, transform_indices = @transform_18, window_bounds = array<i64: 1, 512>}, {pipeline_mode = #tpu.pipeline_mode<synchronous>, transform_indices = @transform_19, window_bounds = array<i64: 128, 512>}, {pipeline_mode = #tpu.pipeline_mode<synchronous>, transform_indices = @transform_20, window_bounds = array<i64: 128, 512>}, {pipeline_mode = #tpu.pipeline_mode<synchronous>, transform_indices = @transform_21, window_bounds = array<i64: 1, 512>}, {pipeline_mode = #tpu.pipeline_mode<synchronous>, transform_indices = @transform_22, window_bounds = array<i64: 256, 1024>}, {pipeline_mode = #tpu.pipeline_mode<synchronous>, transform_indices = @transform_23, window_bounds = array<i64: 160, 1024>}, {pipeline_mode = #tpu.pipeline_mode<synchronous>, transform_indices = @transform_24, window_bounds = array<i64: 1, 1024>}, {pipeline_mode = #tpu.pipeline_mode<synchronous>, transform_indices = @transform_25, window_bounds = array<i64: 256, 1024>}, {pipeline_mode = #tpu.pipeline_mode<synchronous>, transform_indices = @transform_26, window_bounds = array<i64: 160, 1024>}, {pipeline_mode = #tpu.pipeline_mode<synchronous>, transform_indices = @transform_27, window_bounds = array<i64: 1, 1024>}, {pipeline_mode = #tpu.pipeline_mode<synchronous>, transform_indices = @transform_28, window_bounds = array<i64: 256, 384>}, {pipeline_mode = #tpu.pipeline_mode<synchronous>, transform_indices = @transform_29, window_bounds = array<i64: 160, 384>}, {pipeline_mode = #tpu.pipeline_mode<synchronous>, transform_indices = @transform_30, window_bounds = array<i64: 256, 384>}, {pipeline_mode = #tpu.pipeline_mode<synchronous>, transform_indices = @transform_31, window_bounds = array<i64: 160, 384>}, {pipeline_mode = #tpu.pipeline_mode<synchronous>, transform_indices = @transform_32, window_bounds = array<i64: 1, 384>}, {pipeline_mode = #tpu.pipeline_mode<synchronous>, transform_indices = @transform_33, window_bounds = array<i64: 384, 256>}, {pipeline_mode = #tpu.pipeline_mode<synchronous>, transform_indices = @transform_34, window_bounds = array<i64: 1, 256>}, {pipeline_mode = #tpu.pipeline_mode<synchronous>, transform_indices = @transform_35, window_bounds = array<i64: 256, 128>}, {pipeline_mode = #tpu.pipeline_mode<synchronous>, transform_indices = @transform_36, window_bounds = array<i64: 1, 128>}, {pipeline_mode = #tpu.pipeline_mode<synchronous>, transform_indices = @transform_37, window_bounds = array<i64: 128, 128>}, {pipeline_mode = #tpu.pipeline_mode<synchronous>, transform_indices = @transform_38, window_bounds = array<i64: 1, 128>}, {transform_indices = @transform_39, window_bounds = array<i64: 1, 8, 128>}]} {
    %c0 = arith.constant 0 : index
    %c0_0 = arith.constant 0 : index
    %c0_1 = arith.constant 0 : index
    %0 = vector.load %arg1[%c0, %c0_0, %c0_1] : memref<1x6x40xf32, #tpu.memory_space<vmem>>, vector<1x6x40xf32>
    %1 = vector.shape_cast %0 : vector<1x6x40xf32> to vector<6x40xf32>
    %c0_2 = arith.constant 0 : index
    %c0_3 = arith.constant 0 : index
    %c0_4 = arith.constant 0 : index
    %2 = vector.load %arg2[%c0_2, %c0_3, %c0_4] : memref<1x6x6xf32, #tpu.memory_space<vmem>>, vector<1x6x6xf32>
    %3 = vector.shape_cast %2 : vector<1x6x6xf32> to vector<6x6xf32>
    %c0_5 = arith.constant 0 : index
    %c0_6 = arith.constant 0 : index
    %c0_7 = arith.constant 0 : index
    %c0_8 = arith.constant 0 : index
    %4 = vector.load %arg3[%c0_5, %c0_6, %c0_7, %c0_8] : memref<1x10x6x6xf32, #tpu.memory_space<vmem>>, vector<1x10x6x6xf32>
    %5 = vector.shape_cast %4 : vector<1x10x6x6xf32> to vector<10x6x6xf32>
    %c0_9 = arith.constant 0 : index
    %c0_10 = arith.constant 0 : index
    %c0_11 = arith.constant 0 : index
    %6 = vector.load %arg4[%c0_9, %c0_10, %c0_11] : memref<1x5x40xf32, #tpu.memory_space<vmem>>, vector<1x5x40xf32>
    %7 = vector.shape_cast %6 : vector<1x5x40xf32> to vector<5x40xf32>
    %c0_12 = arith.constant 0 : index
    %c0_13 = arith.constant 0 : index
    %c0_14 = arith.constant 0 : index
    %8 = vector.load %arg5[%c0_12, %c0_13, %c0_14] : memref<1x5x5xf32, #tpu.memory_space<vmem>>, vector<1x5x5xf32>
    %9 = vector.shape_cast %8 : vector<1x5x5xf32> to vector<5x5xf32>
    %c0_15 = arith.constant 0 : index
    %c0_16 = arith.constant 0 : index
    %c0_17 = arith.constant 0 : index
    %c0_18 = arith.constant 0 : index
    %10 = vector.load %arg6[%c0_15, %c0_16, %c0_17, %c0_18] : memref<1x10x5x5xf32, #tpu.memory_space<vmem>>, vector<1x10x5x5xf32>
    %11 = vector.shape_cast %10 : vector<1x10x5x5xf32> to vector<10x5x5xf32>
    %cst = arith.constant dense<0.000000e+00> : vector<6xf32>
    %12 = vector.multi_reduction <add>, %3, %cst [1] : vector<6x6xf32> to vector<6xf32>
    %13 = vector.shape_cast %12 : vector<6xf32> to vector<6x1xf32>
    %14 = vector.shape_cast %3 : vector<6x6xf32> to vector<1x6x6xf32>
    %15 = vector.broadcast %14 : vector<1x6x6xf32> to vector<10x6x6xf32>
    %16 = arith.mulf %15, %5 : vector<10x6x6xf32>
    %cst_19 = arith.constant dense<0.000000e+00> : vector<10x6xf32>
    %17 = vector.multi_reduction <add>, %16, %cst_19 [2] : vector<10x6x6xf32> to vector<10x6xf32>
    %c0_20 = arith.constant 0 : index
    %c0_21 = arith.constant 0 : index
    %c0_22 = arith.constant 0 : index
    %18 = vector.load %arg7[%c0_20, %c0_21, %c0_22] : memref<3x40x384xbf16, #tpu.memory_space<vmem>>, vector<1x40x384xbf16>
    %19 = vector.shape_cast %18 : vector<1x40x384xbf16> to vector<40x384xbf16>
    %20 = arith.truncf %1 : vector<6x40xf32> to vector<6x40xbf16>
    %cst_23 = arith.constant dense<0.000000e+00> : vector<6x384xf32>
    %21 = tpu.matmul %20, %19, %cst_23 {dimension_numbers = #tpu.dot_dimension_numbers<[1], [0], [0], [1], [0, 0, 1, 1], [], []>} : vector<6x40xbf16>, vector<40x384xbf16>, vector<6x384xf32> -> vector<6x384xf32>
    %22 = vector.extract_strided_slice %21 {offsets = [0, 0], sizes = [6, 40], strides = [1, 1]} : vector<6x384xf32> to vector<6x40xf32>
    %23 = vector.extract_strided_slice %21 {offsets = [0, 128], sizes = [6, 40], strides = [1, 1]} : vector<6x384xf32> to vector<6x40xf32>
    %24 = vector.extract_strided_slice %21 {offsets = [0, 256], sizes = [6, 40], strides = [1, 1]} : vector<6x384xf32> to vector<6x40xf32>
    %c0_24 = arith.constant 0 : index
    %c0_25 = arith.constant 0 : index
    %c0_26 = arith.constant 0 : index
    %25 = vector.load %arg10[%c0_24, %c0_25, %c0_26] : memref<3x1x40xf32, #tpu.memory_space<vmem>>, vector<1x1x40xf32>
    %26 = vector.shape_cast %25 : vector<1x1x40xf32> to vector<1x40xf32>
    %27 = vector.broadcast %26 : vector<1x40xf32> to vector<6x40xf32>
    %28 = arith.addf %22, %27 : vector<6x40xf32>
    %29 = vector.broadcast %13 : vector<6x1xf32> to vector<6x40xf32>
    %30 = arith.mulf %29, %28 : vector<6x40xf32>
    %31 = arith.truncf %3 : vector<6x6xf32> to vector<6x6xbf16>
    %32 = arith.truncf %24 : vector<6x40xf32> to vector<6x40xbf16>
    %cst_27 = arith.constant dense<0.000000e+00> : vector<6x40xf32>
    %33 = tpu.matmul %31, %32, %cst_27 {dimension_numbers = #tpu.dot_dimension_numbers<[1], [0], [0], [1], [0, 0, 1, 1], [], []>} : vector<6x6xbf16>, vector<6x40xbf16>, vector<6x40xf32> -> vector<6x40xf32>
    %34 = arith.addf %30, %33 : vector<6x40xf32>
    %c0_28 = arith.constant 0 : index
    %c0_29 = arith.constant 0 : index
    %c0_30 = arith.constant 0 : index
    %35 = vector.load %arg9[%c0_28, %c0_29, %c0_30] : memref<3x10x40xbf16, #tpu.memory_space<vmem>>, vector<1x10x40xbf16>
    %36 = vector.shape_cast %35 : vector<1x10x40xbf16> to vector<10x40xbf16>
    %37 = arith.truncf %17 : vector<10x6xf32> to vector<10x6xbf16>
    %cst_31 = arith.constant dense<0.000000e+00> : vector<6x40xf32>
    %38 = tpu.matmul %37, %36, %cst_31 {dimension_numbers = #tpu.dot_dimension_numbers<[0], [0], [1], [1], [0, 1, 1, 1], [], []>} : vector<10x6xbf16>, vector<10x40xbf16>, vector<6x40xf32> -> vector<6x40xf32>
    %39 = arith.addf %34, %38 : vector<6x40xf32>
    %c0_32 = arith.constant 0 : index
    %c0_33 = arith.constant 0 : index
    %c0_34 = arith.constant 0 : index
    %40 = vector.load %arg8[%c0_32, %c0_33, %c0_34] : memref<3x40x40xbf16, #tpu.memory_space<vmem>>, vector<1x40x40xbf16>
    %41 = vector.shape_cast %40 : vector<1x40x40xbf16> to vector<40x40xbf16>
    %42 = arith.truncf %39 : vector<6x40xf32> to vector<6x40xbf16>
    %cst_35 = arith.constant dense<0.000000e+00> : vector<6x40xf32>
    %43 = tpu.matmul %42, %41, %cst_35 {dimension_numbers = #tpu.dot_dimension_numbers<[1], [0], [0], [1], [0, 0, 1, 1], [], []>} : vector<6x40xbf16>, vector<40x40xbf16>, vector<6x40xf32> -> vector<6x40xf32>
    %44 = arith.addf %23, %43 : vector<6x40xf32>
    %c0_36 = arith.constant 0 : index
    %c0_37 = arith.constant 0 : index
    %c0_38 = arith.constant 0 : index
    %45 = vector.load %arg11[%c0_36, %c0_37, %c0_38] : memref<3x1x40xf32, #tpu.memory_space<vmem>>, vector<1x1x40xf32>
    %46 = vector.shape_cast %45 : vector<1x1x40xf32> to vector<1x40xf32>
    %47 = vector.broadcast %46 : vector<1x40xf32> to vector<6x40xf32>
    %48 = arith.addf %44, %47 : vector<6x40xf32>
    %cst_39 = arith.constant 0.000000e+00 : f32
    %49 = vector.broadcast %cst_39 : f32 to vector<6x40xf32>
    %50 = arith.maximumf %48, %49 : vector<6x40xf32>
    %c1 = arith.constant 1 : index
    %c0_40 = arith.constant 0 : index
    %c0_41 = arith.constant 0 : index
    %51 = vector.load %arg7[%c1, %c0_40, %c0_41] : memref<3x40x384xbf16, #tpu.memory_space<vmem>>, vector<1x40x384xbf16>
    %52 = vector.shape_cast %51 : vector<1x40x384xbf16> to vector<40x384xbf16>
    %53 = arith.truncf %50 : vector<6x40xf32> to vector<6x40xbf16>
    %cst_42 = arith.constant dense<0.000000e+00> : vector<6x384xf32>
    %54 = tpu.matmul %53, %52, %cst_42 {dimension_numbers = #tpu.dot_dimension_numbers<[1], [0], [0], [1], [0, 0, 1, 1], [], []>} : vector<6x40xbf16>, vector<40x384xbf16>, vector<6x384xf32> -> vector<6x384xf32>
    %55 = vector.extract_strided_slice %54 {offsets = [0, 0], sizes = [6, 40], strides = [1, 1]} : vector<6x384xf32> to vector<6x40xf32>
    %56 = vector.extract_strided_slice %54 {offsets = [0, 128], sizes = [6, 40], strides = [1, 1]} : vector<6x384xf32> to vector<6x40xf32>
    %57 = vector.extract_strided_slice %54 {offsets = [0, 256], sizes = [6, 40], strides = [1, 1]} : vector<6x384xf32> to vector<6x40xf32>
    %c1_43 = arith.constant 1 : index
    %c0_44 = arith.constant 0 : index
    %c0_45 = arith.constant 0 : index
    %58 = vector.load %arg10[%c1_43, %c0_44, %c0_45] : memref<3x1x40xf32, #tpu.memory_space<vmem>>, vector<1x1x40xf32>
    %59 = vector.shape_cast %58 : vector<1x1x40xf32> to vector<1x40xf32>
    %60 = vector.broadcast %59 : vector<1x40xf32> to vector<6x40xf32>
    %61 = arith.addf %55, %60 : vector<6x40xf32>
    %62 = vector.broadcast %13 : vector<6x1xf32> to vector<6x40xf32>
    %63 = arith.mulf %62, %61 : vector<6x40xf32>
    %64 = arith.truncf %3 : vector<6x6xf32> to vector<6x6xbf16>
    %65 = arith.truncf %57 : vector<6x40xf32> to vector<6x40xbf16>
    %cst_46 = arith.constant dense<0.000000e+00> : vector<6x40xf32>
    %66 = tpu.matmul %64, %65, %cst_46 {dimension_numbers = #tpu.dot_dimension_numbers<[1], [0], [0], [1], [0, 0, 1, 1], [], []>} : vector<6x6xbf16>, vector<6x40xbf16>, vector<6x40xf32> -> vector<6x40xf32>
    %67 = arith.addf %63, %66 : vector<6x40xf32>
    %c1_47 = arith.constant 1 : index
    %c0_48 = arith.constant 0 : index
    %c0_49 = arith.constant 0 : index
    %68 = vector.load %arg9[%c1_47, %c0_48, %c0_49] : memref<3x10x40xbf16, #tpu.memory_space<vmem>>, vector<1x10x40xbf16>
    %69 = vector.shape_cast %68 : vector<1x10x40xbf16> to vector<10x40xbf16>
    %70 = arith.truncf %17 : vector<10x6xf32> to vector<10x6xbf16>
    %cst_50 = arith.constant dense<0.000000e+00> : vector<6x40xf32>
    %71 = tpu.matmul %70, %69, %cst_50 {dimension_numbers = #tpu.dot_dimension_numbers<[0], [0], [1], [1], [0, 1, 1, 1], [], []>} : vector<10x6xbf16>, vector<10x40xbf16>, vector<6x40xf32> -> vector<6x40xf32>
    %72 = arith.addf %67, %71 : vector<6x40xf32>
    %c1_51 = arith.constant 1 : index
    %c0_52 = arith.constant 0 : index
    %c0_53 = arith.constant 0 : index
    %73 = vector.load %arg8[%c1_51, %c0_52, %c0_53] : memref<3x40x40xbf16, #tpu.memory_space<vmem>>, vector<1x40x40xbf16>
    %74 = vector.shape_cast %73 : vector<1x40x40xbf16> to vector<40x40xbf16>
    %75 = arith.truncf %72 : vector<6x40xf32> to vector<6x40xbf16>
    %cst_54 = arith.constant dense<0.000000e+00> : vector<6x40xf32>
    %76 = tpu.matmul %75, %74, %cst_54 {dimension_numbers = #tpu.dot_dimension_numbers<[1], [0], [0], [1], [0, 0, 1, 1], [], []>} : vector<6x40xbf16>, vector<40x40xbf16>, vector<6x40xf32> -> vector<6x40xf32>
    %77 = arith.addf %56, %76 : vector<6x40xf32>
    %c1_55 = arith.constant 1 : index
    %c0_56 = arith.constant 0 : index
    %c0_57 = arith.constant 0 : index
    %78 = vector.load %arg11[%c1_55, %c0_56, %c0_57] : memref<3x1x40xf32, #tpu.memory_space<vmem>>, vector<1x1x40xf32>
    %79 = vector.shape_cast %78 : vector<1x1x40xf32> to vector<1x40xf32>
    %80 = vector.broadcast %79 : vector<1x40xf32> to vector<6x40xf32>
    %81 = arith.addf %77, %80 : vector<6x40xf32>
    %cst_58 = arith.constant 0.000000e+00 : f32
    %82 = vector.broadcast %cst_58 : f32 to vector<6x40xf32>
    %83 = arith.maximumf %81, %82 : vector<6x40xf32>
    %c2 = arith.constant 2 : index
    %c0_59 = arith.constant 0 : index
    %c0_60 = arith.constant 0 : index
    %84 = vector.load %arg7[%c2, %c0_59, %c0_60] : memref<3x40x384xbf16, #tpu.memory_space<vmem>>, vector<1x40x384xbf16>
    %85 = vector.shape_cast %84 : vector<1x40x384xbf16> to vector<40x384xbf16>
    %86 = arith.truncf %83 : vector<6x40xf32> to vector<6x40xbf16>
    %cst_61 = arith.constant dense<0.000000e+00> : vector<6x384xf32>
    %87 = tpu.matmul %86, %85, %cst_61 {dimension_numbers = #tpu.dot_dimension_numbers<[1], [0], [0], [1], [0, 0, 1, 1], [], []>} : vector<6x40xbf16>, vector<40x384xbf16>, vector<6x384xf32> -> vector<6x384xf32>
    %88 = vector.extract_strided_slice %87 {offsets = [0, 0], sizes = [6, 40], strides = [1, 1]} : vector<6x384xf32> to vector<6x40xf32>
    %89 = vector.extract_strided_slice %87 {offsets = [0, 128], sizes = [6, 40], strides = [1, 1]} : vector<6x384xf32> to vector<6x40xf32>
    %90 = vector.extract_strided_slice %87 {offsets = [0, 256], sizes = [6, 40], strides = [1, 1]} : vector<6x384xf32> to vector<6x40xf32>
    %c2_62 = arith.constant 2 : index
    %c0_63 = arith.constant 0 : index
    %c0_64 = arith.constant 0 : index
    %91 = vector.load %arg10[%c2_62, %c0_63, %c0_64] : memref<3x1x40xf32, #tpu.memory_space<vmem>>, vector<1x1x40xf32>
    %92 = vector.shape_cast %91 : vector<1x1x40xf32> to vector<1x40xf32>
    %93 = vector.broadcast %92 : vector<1x40xf32> to vector<6x40xf32>
    %94 = arith.addf %88, %93 : vector<6x40xf32>
    %95 = vector.broadcast %13 : vector<6x1xf32> to vector<6x40xf32>
    %96 = arith.mulf %95, %94 : vector<6x40xf32>
    %97 = arith.truncf %3 : vector<6x6xf32> to vector<6x6xbf16>
    %98 = arith.truncf %90 : vector<6x40xf32> to vector<6x40xbf16>
    %cst_65 = arith.constant dense<0.000000e+00> : vector<6x40xf32>
    %99 = tpu.matmul %97, %98, %cst_65 {dimension_numbers = #tpu.dot_dimension_numbers<[1], [0], [0], [1], [0, 0, 1, 1], [], []>} : vector<6x6xbf16>, vector<6x40xbf16>, vector<6x40xf32> -> vector<6x40xf32>
    %100 = arith.addf %96, %99 : vector<6x40xf32>
    %c2_66 = arith.constant 2 : index
    %c0_67 = arith.constant 0 : index
    %c0_68 = arith.constant 0 : index
    %101 = vector.load %arg9[%c2_66, %c0_67, %c0_68] : memref<3x10x40xbf16, #tpu.memory_space<vmem>>, vector<1x10x40xbf16>
    %102 = vector.shape_cast %101 : vector<1x10x40xbf16> to vector<10x40xbf16>
    %103 = arith.truncf %17 : vector<10x6xf32> to vector<10x6xbf16>
    %cst_69 = arith.constant dense<0.000000e+00> : vector<6x40xf32>
    %104 = tpu.matmul %103, %102, %cst_69 {dimension_numbers = #tpu.dot_dimension_numbers<[0], [0], [1], [1], [0, 1, 1, 1], [], []>} : vector<10x6xbf16>, vector<10x40xbf16>, vector<6x40xf32> -> vector<6x40xf32>
    %105 = arith.addf %100, %104 : vector<6x40xf32>
    %c2_70 = arith.constant 2 : index
    %c0_71 = arith.constant 0 : index
    %c0_72 = arith.constant 0 : index
    %106 = vector.load %arg8[%c2_70, %c0_71, %c0_72] : memref<3x40x40xbf16, #tpu.memory_space<vmem>>, vector<1x40x40xbf16>
    %107 = vector.shape_cast %106 : vector<1x40x40xbf16> to vector<40x40xbf16>
    %108 = arith.truncf %105 : vector<6x40xf32> to vector<6x40xbf16>
    %cst_73 = arith.constant dense<0.000000e+00> : vector<6x40xf32>
    %109 = tpu.matmul %108, %107, %cst_73 {dimension_numbers = #tpu.dot_dimension_numbers<[1], [0], [0], [1], [0, 0, 1, 1], [], []>} : vector<6x40xbf16>, vector<40x40xbf16>, vector<6x40xf32> -> vector<6x40xf32>
    %110 = arith.addf %89, %109 : vector<6x40xf32>
    %c2_74 = arith.constant 2 : index
    %c0_75 = arith.constant 0 : index
    %c0_76 = arith.constant 0 : index
    %111 = vector.load %arg11[%c2_74, %c0_75, %c0_76] : memref<3x1x40xf32, #tpu.memory_space<vmem>>, vector<1x1x40xf32>
    %112 = vector.shape_cast %111 : vector<1x1x40xf32> to vector<1x40xf32>
    %113 = vector.broadcast %112 : vector<1x40xf32> to vector<6x40xf32>
    %114 = arith.addf %110, %113 : vector<6x40xf32>
    %cst_77 = arith.constant 0.000000e+00 : f32
    %115 = vector.broadcast %cst_77 : f32 to vector<6x40xf32>
    %116 = arith.maximumf %114, %115 : vector<6x40xf32>
    %cst_78 = arith.constant dense<0.000000e+00> : vector<5xf32>
    %117 = vector.multi_reduction <add>, %9, %cst_78 [1] : vector<5x5xf32> to vector<5xf32>
    %118 = vector.shape_cast %117 : vector<5xf32> to vector<5x1xf32>
    %119 = vector.shape_cast %9 : vector<5x5xf32> to vector<1x5x5xf32>
    %120 = vector.broadcast %119 : vector<1x5x5xf32> to vector<10x5x5xf32>
    %121 = arith.mulf %120, %11 : vector<10x5x5xf32>
    %cst_79 = arith.constant dense<0.000000e+00> : vector<10x5xf32>
    %122 = vector.multi_reduction <add>, %121, %cst_79 [2] : vector<10x5x5xf32> to vector<10x5xf32>
    %c0_80 = arith.constant 0 : index
    %c0_81 = arith.constant 0 : index
    %c0_82 = arith.constant 0 : index
    %123 = vector.load %arg12[%c0_80, %c0_81, %c0_82] : memref<3x40x384xbf16, #tpu.memory_space<vmem>>, vector<1x40x384xbf16>
    %124 = vector.shape_cast %123 : vector<1x40x384xbf16> to vector<40x384xbf16>
    %125 = arith.truncf %7 : vector<5x40xf32> to vector<5x40xbf16>
    %cst_83 = arith.constant dense<0.000000e+00> : vector<5x384xf32>
    %126 = tpu.matmul %125, %124, %cst_83 {dimension_numbers = #tpu.dot_dimension_numbers<[1], [0], [0], [1], [0, 0, 1, 1], [], []>} : vector<5x40xbf16>, vector<40x384xbf16>, vector<5x384xf32> -> vector<5x384xf32>
    %127 = vector.extract_strided_slice %126 {offsets = [0, 0], sizes = [5, 40], strides = [1, 1]} : vector<5x384xf32> to vector<5x40xf32>
    %128 = vector.extract_strided_slice %126 {offsets = [0, 128], sizes = [5, 40], strides = [1, 1]} : vector<5x384xf32> to vector<5x40xf32>
    %129 = vector.extract_strided_slice %126 {offsets = [0, 256], sizes = [5, 40], strides = [1, 1]} : vector<5x384xf32> to vector<5x40xf32>
    %c0_84 = arith.constant 0 : index
    %c0_85 = arith.constant 0 : index
    %c0_86 = arith.constant 0 : index
    %130 = vector.load %arg15[%c0_84, %c0_85, %c0_86] : memref<3x1x40xf32, #tpu.memory_space<vmem>>, vector<1x1x40xf32>
    %131 = vector.shape_cast %130 : vector<1x1x40xf32> to vector<1x40xf32>
    %132 = vector.broadcast %131 : vector<1x40xf32> to vector<5x40xf32>
    %133 = arith.addf %127, %132 : vector<5x40xf32>
    %134 = vector.broadcast %118 : vector<5x1xf32> to vector<5x40xf32>
    %135 = arith.mulf %134, %133 : vector<5x40xf32>
    %136 = arith.truncf %9 : vector<5x5xf32> to vector<5x5xbf16>
    %137 = arith.truncf %129 : vector<5x40xf32> to vector<5x40xbf16>
    %cst_87 = arith.constant dense<0.000000e+00> : vector<5x40xf32>
    %138 = tpu.matmul %136, %137, %cst_87 {dimension_numbers = #tpu.dot_dimension_numbers<[1], [0], [0], [1], [0, 0, 1, 1], [], []>} : vector<5x5xbf16>, vector<5x40xbf16>, vector<5x40xf32> -> vector<5x40xf32>
    %139 = arith.addf %135, %138 : vector<5x40xf32>
    %c0_88 = arith.constant 0 : index
    %c0_89 = arith.constant 0 : index
    %c0_90 = arith.constant 0 : index
    %140 = vector.load %arg14[%c0_88, %c0_89, %c0_90] : memref<3x10x40xbf16, #tpu.memory_space<vmem>>, vector<1x10x40xbf16>
    %141 = vector.shape_cast %140 : vector<1x10x40xbf16> to vector<10x40xbf16>
    %142 = arith.truncf %122 : vector<10x5xf32> to vector<10x5xbf16>
    %cst_91 = arith.constant dense<0.000000e+00> : vector<5x40xf32>
    %143 = tpu.matmul %142, %141, %cst_91 {dimension_numbers = #tpu.dot_dimension_numbers<[0], [0], [1], [1], [0, 1, 1, 1], [], []>} : vector<10x5xbf16>, vector<10x40xbf16>, vector<5x40xf32> -> vector<5x40xf32>
    %144 = arith.addf %139, %143 : vector<5x40xf32>
    %c0_92 = arith.constant 0 : index
    %c0_93 = arith.constant 0 : index
    %c0_94 = arith.constant 0 : index
    %145 = vector.load %arg13[%c0_92, %c0_93, %c0_94] : memref<3x40x40xbf16, #tpu.memory_space<vmem>>, vector<1x40x40xbf16>
    %146 = vector.shape_cast %145 : vector<1x40x40xbf16> to vector<40x40xbf16>
    %147 = arith.truncf %144 : vector<5x40xf32> to vector<5x40xbf16>
    %cst_95 = arith.constant dense<0.000000e+00> : vector<5x40xf32>
    %148 = tpu.matmul %147, %146, %cst_95 {dimension_numbers = #tpu.dot_dimension_numbers<[1], [0], [0], [1], [0, 0, 1, 1], [], []>} : vector<5x40xbf16>, vector<40x40xbf16>, vector<5x40xf32> -> vector<5x40xf32>
    %149 = arith.addf %128, %148 : vector<5x40xf32>
    %c0_96 = arith.constant 0 : index
    %c0_97 = arith.constant 0 : index
    %c0_98 = arith.constant 0 : index
    %150 = vector.load %arg16[%c0_96, %c0_97, %c0_98] : memref<3x1x40xf32, #tpu.memory_space<vmem>>, vector<1x1x40xf32>
    %151 = vector.shape_cast %150 : vector<1x1x40xf32> to vector<1x40xf32>
    %152 = vector.broadcast %151 : vector<1x40xf32> to vector<5x40xf32>
    %153 = arith.addf %149, %152 : vector<5x40xf32>
    %cst_99 = arith.constant 0.000000e+00 : f32
    %154 = vector.broadcast %cst_99 : f32 to vector<5x40xf32>
    %155 = arith.maximumf %153, %154 : vector<5x40xf32>
    %c1_100 = arith.constant 1 : index
    %c0_101 = arith.constant 0 : index
    %c0_102 = arith.constant 0 : index
    %156 = vector.load %arg12[%c1_100, %c0_101, %c0_102] : memref<3x40x384xbf16, #tpu.memory_space<vmem>>, vector<1x40x384xbf16>
    %157 = vector.shape_cast %156 : vector<1x40x384xbf16> to vector<40x384xbf16>
    %158 = arith.truncf %155 : vector<5x40xf32> to vector<5x40xbf16>
    %cst_103 = arith.constant dense<0.000000e+00> : vector<5x384xf32>
    %159 = tpu.matmul %158, %157, %cst_103 {dimension_numbers = #tpu.dot_dimension_numbers<[1], [0], [0], [1], [0, 0, 1, 1], [], []>} : vector<5x40xbf16>, vector<40x384xbf16>, vector<5x384xf32> -> vector<5x384xf32>
    %160 = vector.extract_strided_slice %159 {offsets = [0, 0], sizes = [5, 40], strides = [1, 1]} : vector<5x384xf32> to vector<5x40xf32>
    %161 = vector.extract_strided_slice %159 {offsets = [0, 128], sizes = [5, 40], strides = [1, 1]} : vector<5x384xf32> to vector<5x40xf32>
    %162 = vector.extract_strided_slice %159 {offsets = [0, 256], sizes = [5, 40], strides = [1, 1]} : vector<5x384xf32> to vector<5x40xf32>
    %c1_104 = arith.constant 1 : index
    %c0_105 = arith.constant 0 : index
    %c0_106 = arith.constant 0 : index
    %163 = vector.load %arg15[%c1_104, %c0_105, %c0_106] : memref<3x1x40xf32, #tpu.memory_space<vmem>>, vector<1x1x40xf32>
    %164 = vector.shape_cast %163 : vector<1x1x40xf32> to vector<1x40xf32>
    %165 = vector.broadcast %164 : vector<1x40xf32> to vector<5x40xf32>
    %166 = arith.addf %160, %165 : vector<5x40xf32>
    %167 = vector.broadcast %118 : vector<5x1xf32> to vector<5x40xf32>
    %168 = arith.mulf %167, %166 : vector<5x40xf32>
    %169 = arith.truncf %9 : vector<5x5xf32> to vector<5x5xbf16>
    %170 = arith.truncf %162 : vector<5x40xf32> to vector<5x40xbf16>
    %cst_107 = arith.constant dense<0.000000e+00> : vector<5x40xf32>
    %171 = tpu.matmul %169, %170, %cst_107 {dimension_numbers = #tpu.dot_dimension_numbers<[1], [0], [0], [1], [0, 0, 1, 1], [], []>} : vector<5x5xbf16>, vector<5x40xbf16>, vector<5x40xf32> -> vector<5x40xf32>
    %172 = arith.addf %168, %171 : vector<5x40xf32>
    %c1_108 = arith.constant 1 : index
    %c0_109 = arith.constant 0 : index
    %c0_110 = arith.constant 0 : index
    %173 = vector.load %arg14[%c1_108, %c0_109, %c0_110] : memref<3x10x40xbf16, #tpu.memory_space<vmem>>, vector<1x10x40xbf16>
    %174 = vector.shape_cast %173 : vector<1x10x40xbf16> to vector<10x40xbf16>
    %175 = arith.truncf %122 : vector<10x5xf32> to vector<10x5xbf16>
    %cst_111 = arith.constant dense<0.000000e+00> : vector<5x40xf32>
    %176 = tpu.matmul %175, %174, %cst_111 {dimension_numbers = #tpu.dot_dimension_numbers<[0], [0], [1], [1], [0, 1, 1, 1], [], []>} : vector<10x5xbf16>, vector<10x40xbf16>, vector<5x40xf32> -> vector<5x40xf32>
    %177 = arith.addf %172, %176 : vector<5x40xf32>
    %c1_112 = arith.constant 1 : index
    %c0_113 = arith.constant 0 : index
    %c0_114 = arith.constant 0 : index
    %178 = vector.load %arg13[%c1_112, %c0_113, %c0_114] : memref<3x40x40xbf16, #tpu.memory_space<vmem>>, vector<1x40x40xbf16>
    %179 = vector.shape_cast %178 : vector<1x40x40xbf16> to vector<40x40xbf16>
    %180 = arith.truncf %177 : vector<5x40xf32> to vector<5x40xbf16>
    %cst_115 = arith.constant dense<0.000000e+00> : vector<5x40xf32>
    %181 = tpu.matmul %180, %179, %cst_115 {dimension_numbers = #tpu.dot_dimension_numbers<[1], [0], [0], [1], [0, 0, 1, 1], [], []>} : vector<5x40xbf16>, vector<40x40xbf16>, vector<5x40xf32> -> vector<5x40xf32>
    %182 = arith.addf %161, %181 : vector<5x40xf32>
    %c1_116 = arith.constant 1 : index
    %c0_117 = arith.constant 0 : index
    %c0_118 = arith.constant 0 : index
    %183 = vector.load %arg16[%c1_116, %c0_117, %c0_118] : memref<3x1x40xf32, #tpu.memory_space<vmem>>, vector<1x1x40xf32>
    %184 = vector.shape_cast %183 : vector<1x1x40xf32> to vector<1x40xf32>
    %185 = vector.broadcast %184 : vector<1x40xf32> to vector<5x40xf32>
    %186 = arith.addf %182, %185 : vector<5x40xf32>
    %cst_119 = arith.constant 0.000000e+00 : f32
    %187 = vector.broadcast %cst_119 : f32 to vector<5x40xf32>
    %188 = arith.maximumf %186, %187 : vector<5x40xf32>
    %c2_120 = arith.constant 2 : index
    %c0_121 = arith.constant 0 : index
    %c0_122 = arith.constant 0 : index
    %189 = vector.load %arg12[%c2_120, %c0_121, %c0_122] : memref<3x40x384xbf16, #tpu.memory_space<vmem>>, vector<1x40x384xbf16>
    %190 = vector.shape_cast %189 : vector<1x40x384xbf16> to vector<40x384xbf16>
    %191 = arith.truncf %188 : vector<5x40xf32> to vector<5x40xbf16>
    %cst_123 = arith.constant dense<0.000000e+00> : vector<5x384xf32>
    %192 = tpu.matmul %191, %190, %cst_123 {dimension_numbers = #tpu.dot_dimension_numbers<[1], [0], [0], [1], [0, 0, 1, 1], [], []>} : vector<5x40xbf16>, vector<40x384xbf16>, vector<5x384xf32> -> vector<5x384xf32>
    %193 = vector.extract_strided_slice %192 {offsets = [0, 0], sizes = [5, 40], strides = [1, 1]} : vector<5x384xf32> to vector<5x40xf32>
    %194 = vector.extract_strided_slice %192 {offsets = [0, 128], sizes = [5, 40], strides = [1, 1]} : vector<5x384xf32> to vector<5x40xf32>
    %195 = vector.extract_strided_slice %192 {offsets = [0, 256], sizes = [5, 40], strides = [1, 1]} : vector<5x384xf32> to vector<5x40xf32>
    %c2_124 = arith.constant 2 : index
    %c0_125 = arith.constant 0 : index
    %c0_126 = arith.constant 0 : index
    %196 = vector.load %arg15[%c2_124, %c0_125, %c0_126] : memref<3x1x40xf32, #tpu.memory_space<vmem>>, vector<1x1x40xf32>
    %197 = vector.shape_cast %196 : vector<1x1x40xf32> to vector<1x40xf32>
    %198 = vector.broadcast %197 : vector<1x40xf32> to vector<5x40xf32>
    %199 = arith.addf %193, %198 : vector<5x40xf32>
    %200 = vector.broadcast %118 : vector<5x1xf32> to vector<5x40xf32>
    %201 = arith.mulf %200, %199 : vector<5x40xf32>
    %202 = arith.truncf %9 : vector<5x5xf32> to vector<5x5xbf16>
    %203 = arith.truncf %195 : vector<5x40xf32> to vector<5x40xbf16>
    %cst_127 = arith.constant dense<0.000000e+00> : vector<5x40xf32>
    %204 = tpu.matmul %202, %203, %cst_127 {dimension_numbers = #tpu.dot_dimension_numbers<[1], [0], [0], [1], [0, 0, 1, 1], [], []>} : vector<5x5xbf16>, vector<5x40xbf16>, vector<5x40xf32> -> vector<5x40xf32>
    %205 = arith.addf %201, %204 : vector<5x40xf32>
    %c2_128 = arith.constant 2 : index
    %c0_129 = arith.constant 0 : index
    %c0_130 = arith.constant 0 : index
    %206 = vector.load %arg14[%c2_128, %c0_129, %c0_130] : memref<3x10x40xbf16, #tpu.memory_space<vmem>>, vector<1x10x40xbf16>
    %207 = vector.shape_cast %206 : vector<1x10x40xbf16> to vector<10x40xbf16>
    %208 = arith.truncf %122 : vector<10x5xf32> to vector<10x5xbf16>
    %cst_131 = arith.constant dense<0.000000e+00> : vector<5x40xf32>
    %209 = tpu.matmul %208, %207, %cst_131 {dimension_numbers = #tpu.dot_dimension_numbers<[0], [0], [1], [1], [0, 1, 1, 1], [], []>} : vector<10x5xbf16>, vector<10x40xbf16>, vector<5x40xf32> -> vector<5x40xf32>
    %210 = arith.addf %205, %209 : vector<5x40xf32>
    %c2_132 = arith.constant 2 : index
    %c0_133 = arith.constant 0 : index
    %c0_134 = arith.constant 0 : index
    %211 = vector.load %arg13[%c2_132, %c0_133, %c0_134] : memref<3x40x40xbf16, #tpu.memory_space<vmem>>, vector<1x40x40xbf16>
    %212 = vector.shape_cast %211 : vector<1x40x40xbf16> to vector<40x40xbf16>
    %213 = arith.truncf %210 : vector<5x40xf32> to vector<5x40xbf16>
    %cst_135 = arith.constant dense<0.000000e+00> : vector<5x40xf32>
    %214 = tpu.matmul %213, %212, %cst_135 {dimension_numbers = #tpu.dot_dimension_numbers<[1], [0], [0], [1], [0, 0, 1, 1], [], []>} : vector<5x40xbf16>, vector<40x40xbf16>, vector<5x40xf32> -> vector<5x40xf32>
    %215 = arith.addf %194, %214 : vector<5x40xf32>
    %c2_136 = arith.constant 2 : index
    %c0_137 = arith.constant 0 : index
    %c0_138 = arith.constant 0 : index
    %216 = vector.load %arg16[%c2_136, %c0_137, %c0_138] : memref<3x1x40xf32, #tpu.memory_space<vmem>>, vector<1x1x40xf32>
    %217 = vector.shape_cast %216 : vector<1x1x40xf32> to vector<1x40xf32>
    %218 = vector.broadcast %217 : vector<1x40xf32> to vector<5x40xf32>
    %219 = arith.addf %215, %218 : vector<5x40xf32>
    %cst_139 = arith.constant 0.000000e+00 : f32
    %220 = vector.broadcast %cst_139 : f32 to vector<5x40xf32>
    %221 = arith.maximumf %219, %220 : vector<5x40xf32>
    %cst_140 = arith.constant 0.000000e+00 : f32
    %222 = vector.broadcast %cst_140 : f32 to vector<6x88xf32>
    %223 = tpu.concatenate %1, %222 in 1 : vector<6x40xf32>, vector<6x88xf32> -> vector<6x128xf32>
    %cst_141 = arith.constant 0.000000e+00 : f32
    %224 = vector.broadcast %cst_141 : f32 to vector<6x88xf32>
    %225 = tpu.concatenate %116, %224 in 1 : vector<6x40xf32>, vector<6x88xf32> -> vector<6x128xf32>
    %cst_142 = arith.constant 0.000000e+00 : f32
    %226 = vector.broadcast %cst_142 : f32 to vector<6x128xf32>
    %c0_143 = arith.constant 0 : index
    %c0_144 = arith.constant 0 : index
    %227 = vector.load %arg19[%c0_143, %c0_144] : memref<1x512xf32, #tpu.memory_space<vmem>>, vector<1x512xf32>
    %228 = vector.extract_strided_slice %227 {offsets = [0, 0], sizes = [1, 128], strides = [1, 1]} : vector<1x512xf32> to vector<1x128xf32>
    %229 = arith.negf %228 : vector<1x128xf32>
    %230 = math.exp %229 : vector<1x128xf32>
    %cst_145 = arith.constant 1.000000e+00 : f32
    %231 = vector.broadcast %cst_145 : f32 to vector<1x128xf32>
    %232 = arith.addf %231, %230 : vector<1x128xf32>
    %233 = arith.divf %231, %232 : vector<1x128xf32>
    %234 = vector.extract_strided_slice %227 {offsets = [0, 128], sizes = [1, 128], strides = [1, 1]} : vector<1x512xf32> to vector<1x128xf32>
    %235 = arith.negf %234 : vector<1x128xf32>
    %236 = math.exp %235 : vector<1x128xf32>
    %cst_146 = arith.constant 1.000000e+00 : f32
    %237 = vector.broadcast %cst_146 : f32 to vector<1x128xf32>
    %238 = arith.addf %237, %236 : vector<1x128xf32>
    %239 = arith.divf %237, %238 : vector<1x128xf32>
    %240 = vector.extract_strided_slice %227 {offsets = [0, 256], sizes = [1, 128], strides = [1, 1]} : vector<1x512xf32> to vector<1x128xf32>
    %241 = math.tanh %240 : vector<1x128xf32>
    %242 = vector.extract_strided_slice %227 {offsets = [0, 384], sizes = [1, 128], strides = [1, 1]} : vector<1x512xf32> to vector<1x128xf32>
    %243 = arith.negf %242 : vector<1x128xf32>
    %244 = math.exp %243 : vector<1x128xf32>
    %cst_147 = arith.constant 1.000000e+00 : f32
    %245 = vector.broadcast %cst_147 : f32 to vector<1x128xf32>
    %246 = arith.addf %245, %244 : vector<1x128xf32>
    %247 = arith.divf %245, %246 : vector<1x128xf32>
    %248 = vector.broadcast %239 : vector<1x128xf32> to vector<6x128xf32>
    %249 = arith.mulf %248, %226 : vector<6x128xf32>
    %250 = arith.mulf %233, %241 : vector<1x128xf32>
    %251 = vector.broadcast %250 : vector<1x128xf32> to vector<6x128xf32>
    %252 = arith.addf %249, %251 : vector<6x128xf32>
    %253 = math.tanh %252 : vector<6x128xf32>
    %254 = vector.broadcast %247 : vector<1x128xf32> to vector<6x128xf32>
    %255 = arith.mulf %254, %253 : vector<6x128xf32>
    %256 = arith.mulf %223, %255 : vector<6x128xf32>
    %cst_148 = arith.constant dense<0.000000e+00> : vector<6xf32>
    %257 = vector.multi_reduction <add>, %256, %cst_148 [1] : vector<6x128xf32> to vector<6xf32>
    %258 = vector.shape_cast %257 : vector<6xf32> to vector<6x1xf32>
    %259 = arith.mulf %225, %255 : vector<6x128xf32>
    %cst_149 = arith.constant dense<0.000000e+00> : vector<6xf32>
    %260 = vector.multi_reduction <add>, %259, %cst_149 [1] : vector<6x128xf32> to vector<6xf32>
    %261 = vector.shape_cast %260 : vector<6xf32> to vector<6x1xf32>
    %262 = arith.maximumf %258, %261 : vector<6x1xf32>
    %263 = arith.subf %258, %262 : vector<6x1xf32>
    %264 = math.exp %263 : vector<6x1xf32>
    %265 = arith.subf %261, %262 : vector<6x1xf32>
    %266 = math.exp %265 : vector<6x1xf32>
    %267 = vector.broadcast %264 : vector<6x1xf32> to vector<6x128xf32>
    %268 = arith.mulf %267, %223 : vector<6x128xf32>
    %269 = vector.broadcast %266 : vector<6x1xf32> to vector<6x128xf32>
    %270 = arith.mulf %269, %225 : vector<6x128xf32>
    %271 = arith.addf %268, %270 : vector<6x128xf32>
    %272 = arith.addf %264, %266 : vector<6x1xf32>
    %273 = tpu.reciprocal %272 {approx = true} : vector<6x1xf32> -> vector<6x1xf32>
    %274 = vector.broadcast %273 : vector<6x1xf32> to vector<6x128xf32>
    %275 = arith.mulf %271, %274 : vector<6x128xf32>
    %c0_150 = arith.constant 0 : index
    %c0_151 = arith.constant 0 : index
    %276 = vector.load %arg17[%c0_150, %c0_151] : memref<128x512xbf16, #tpu.memory_space<vmem>>, vector<128x512xbf16>
    %277 = arith.truncf %255 : vector<6x128xf32> to vector<6x128xbf16>
    %cst_152 = arith.constant dense<0.000000e+00> : vector<6x512xf32>
    %278 = tpu.matmul %277, %276, %cst_152 {dimension_numbers = #tpu.dot_dimension_numbers<[1], [0], [0], [1], [0, 0, 1, 1], [], []>} : vector<6x128xbf16>, vector<128x512xbf16>, vector<6x512xf32> -> vector<6x512xf32>
    %c0_153 = arith.constant 0 : index
    %c0_154 = arith.constant 0 : index
    %279 = vector.load %arg18[%c0_153, %c0_154] : memref<128x512xbf16, #tpu.memory_space<vmem>>, vector<128x512xbf16>
    %280 = arith.truncf %275 : vector<6x128xf32> to vector<6x128xbf16>
    %cst_155 = arith.constant dense<0.000000e+00> : vector<6x512xf32>
    %281 = tpu.matmul %280, %279, %cst_155 {dimension_numbers = #tpu.dot_dimension_numbers<[1], [0], [0], [1], [0, 0, 1, 1], [], []>} : vector<6x128xbf16>, vector<128x512xbf16>, vector<6x512xf32> -> vector<6x512xf32>
    %282 = arith.addf %278, %281 : vector<6x512xf32>
    %c0_156 = arith.constant 0 : index
    %c0_157 = arith.constant 0 : index
    %283 = vector.load %arg19[%c0_156, %c0_157] : memref<1x512xf32, #tpu.memory_space<vmem>>, vector<1x512xf32>
    %284 = vector.broadcast %283 : vector<1x512xf32> to vector<6x512xf32>
    %285 = arith.addf %282, %284 : vector<6x512xf32>
    %286 = vector.extract_strided_slice %285 {offsets = [0, 0], sizes = [6, 128], strides = [1, 1]} : vector<6x512xf32> to vector<6x128xf32>
    %287 = arith.negf %286 : vector<6x128xf32>
    %288 = math.exp %287 : vector<6x128xf32>
    %cst_158 = arith.constant 1.000000e+00 : f32
    %289 = vector.broadcast %cst_158 : f32 to vector<6x128xf32>
    %290 = arith.addf %289, %288 : vector<6x128xf32>
    %291 = arith.divf %289, %290 : vector<6x128xf32>
    %292 = vector.extract_strided_slice %285 {offsets = [0, 128], sizes = [6, 128], strides = [1, 1]} : vector<6x512xf32> to vector<6x128xf32>
    %293 = arith.negf %292 : vector<6x128xf32>
    %294 = math.exp %293 : vector<6x128xf32>
    %cst_159 = arith.constant 1.000000e+00 : f32
    %295 = vector.broadcast %cst_159 : f32 to vector<6x128xf32>
    %296 = arith.addf %295, %294 : vector<6x128xf32>
    %297 = arith.divf %295, %296 : vector<6x128xf32>
    %298 = vector.extract_strided_slice %285 {offsets = [0, 256], sizes = [6, 128], strides = [1, 1]} : vector<6x512xf32> to vector<6x128xf32>
    %299 = math.tanh %298 : vector<6x128xf32>
    %300 = vector.extract_strided_slice %285 {offsets = [0, 384], sizes = [6, 128], strides = [1, 1]} : vector<6x512xf32> to vector<6x128xf32>
    %301 = arith.negf %300 : vector<6x128xf32>
    %302 = math.exp %301 : vector<6x128xf32>
    %cst_160 = arith.constant 1.000000e+00 : f32
    %303 = vector.broadcast %cst_160 : f32 to vector<6x128xf32>
    %304 = arith.addf %303, %302 : vector<6x128xf32>
    %305 = arith.divf %303, %304 : vector<6x128xf32>
    %306 = arith.mulf %297, %252 : vector<6x128xf32>
    %307 = arith.mulf %291, %299 : vector<6x128xf32>
    %308 = arith.addf %306, %307 : vector<6x128xf32>
    %309 = math.tanh %308 : vector<6x128xf32>
    %310 = arith.mulf %305, %309 : vector<6x128xf32>
    %311 = arith.mulf %223, %310 : vector<6x128xf32>
    %cst_161 = arith.constant dense<0.000000e+00> : vector<6xf32>
    %312 = vector.multi_reduction <add>, %311, %cst_161 [1] : vector<6x128xf32> to vector<6xf32>
    %313 = vector.shape_cast %312 : vector<6xf32> to vector<6x1xf32>
    %314 = arith.mulf %225, %310 : vector<6x128xf32>
    %cst_162 = arith.constant dense<0.000000e+00> : vector<6xf32>
    %315 = vector.multi_reduction <add>, %314, %cst_162 [1] : vector<6x128xf32> to vector<6xf32>
    %316 = vector.shape_cast %315 : vector<6xf32> to vector<6x1xf32>
    %317 = arith.maximumf %313, %316 : vector<6x1xf32>
    %318 = arith.subf %313, %317 : vector<6x1xf32>
    %319 = math.exp %318 : vector<6x1xf32>
    %320 = arith.subf %316, %317 : vector<6x1xf32>
    %321 = math.exp %320 : vector<6x1xf32>
    %322 = vector.broadcast %319 : vector<6x1xf32> to vector<6x128xf32>
    %323 = arith.mulf %322, %223 : vector<6x128xf32>
    %324 = vector.broadcast %321 : vector<6x1xf32> to vector<6x128xf32>
    %325 = arith.mulf %324, %225 : vector<6x128xf32>
    %326 = arith.addf %323, %325 : vector<6x128xf32>
    %327 = arith.addf %319, %321 : vector<6x1xf32>
    %328 = tpu.reciprocal %327 {approx = true} : vector<6x1xf32> -> vector<6x1xf32>
    %329 = vector.broadcast %328 : vector<6x1xf32> to vector<6x128xf32>
    %330 = arith.mulf %326, %329 : vector<6x128xf32>
    %cst_163 = arith.constant 0.000000e+00 : f32
    %331 = vector.broadcast %cst_163 : f32 to vector<5x88xf32>
    %332 = tpu.concatenate %7, %331 in 1 : vector<5x40xf32>, vector<5x88xf32> -> vector<5x128xf32>
    %cst_164 = arith.constant 0.000000e+00 : f32
    %333 = vector.broadcast %cst_164 : f32 to vector<5x88xf32>
    %334 = tpu.concatenate %221, %333 in 1 : vector<5x40xf32>, vector<5x88xf32> -> vector<5x128xf32>
    %cst_165 = arith.constant 0.000000e+00 : f32
    %335 = vector.broadcast %cst_165 : f32 to vector<5x128xf32>
    %c0_166 = arith.constant 0 : index
    %c0_167 = arith.constant 0 : index
    %336 = vector.load %arg22[%c0_166, %c0_167] : memref<1x512xf32, #tpu.memory_space<vmem>>, vector<1x512xf32>
    %337 = vector.extract_strided_slice %336 {offsets = [0, 0], sizes = [1, 128], strides = [1, 1]} : vector<1x512xf32> to vector<1x128xf32>
    %338 = arith.negf %337 : vector<1x128xf32>
    %339 = math.exp %338 : vector<1x128xf32>
    %cst_168 = arith.constant 1.000000e+00 : f32
    %340 = vector.broadcast %cst_168 : f32 to vector<1x128xf32>
    %341 = arith.addf %340, %339 : vector<1x128xf32>
    %342 = arith.divf %340, %341 : vector<1x128xf32>
    %343 = vector.extract_strided_slice %336 {offsets = [0, 128], sizes = [1, 128], strides = [1, 1]} : vector<1x512xf32> to vector<1x128xf32>
    %344 = arith.negf %343 : vector<1x128xf32>
    %345 = math.exp %344 : vector<1x128xf32>
    %cst_169 = arith.constant 1.000000e+00 : f32
    %346 = vector.broadcast %cst_169 : f32 to vector<1x128xf32>
    %347 = arith.addf %346, %345 : vector<1x128xf32>
    %348 = arith.divf %346, %347 : vector<1x128xf32>
    %349 = vector.extract_strided_slice %336 {offsets = [0, 256], sizes = [1, 128], strides = [1, 1]} : vector<1x512xf32> to vector<1x128xf32>
    %350 = math.tanh %349 : vector<1x128xf32>
    %351 = vector.extract_strided_slice %336 {offsets = [0, 384], sizes = [1, 128], strides = [1, 1]} : vector<1x512xf32> to vector<1x128xf32>
    %352 = arith.negf %351 : vector<1x128xf32>
    %353 = math.exp %352 : vector<1x128xf32>
    %cst_170 = arith.constant 1.000000e+00 : f32
    %354 = vector.broadcast %cst_170 : f32 to vector<1x128xf32>
    %355 = arith.addf %354, %353 : vector<1x128xf32>
    %356 = arith.divf %354, %355 : vector<1x128xf32>
    %357 = vector.broadcast %348 : vector<1x128xf32> to vector<5x128xf32>
    %358 = arith.mulf %357, %335 : vector<5x128xf32>
    %359 = arith.mulf %342, %350 : vector<1x128xf32>
    %360 = vector.broadcast %359 : vector<1x128xf32> to vector<5x128xf32>
    %361 = arith.addf %358, %360 : vector<5x128xf32>
    %362 = math.tanh %361 : vector<5x128xf32>
    %363 = vector.broadcast %356 : vector<1x128xf32> to vector<5x128xf32>
    %364 = arith.mulf %363, %362 : vector<5x128xf32>
    %365 = arith.mulf %332, %364 : vector<5x128xf32>
    %cst_171 = arith.constant dense<0.000000e+00> : vector<5xf32>
    %366 = vector.multi_reduction <add>, %365, %cst_171 [1] : vector<5x128xf32> to vector<5xf32>
    %367 = vector.shape_cast %366 : vector<5xf32> to vector<5x1xf32>
    %368 = arith.mulf %334, %364 : vector<5x128xf32>
    %cst_172 = arith.constant dense<0.000000e+00> : vector<5xf32>
    %369 = vector.multi_reduction <add>, %368, %cst_172 [1] : vector<5x128xf32> to vector<5xf32>
    %370 = vector.shape_cast %369 : vector<5xf32> to vector<5x1xf32>
    %371 = arith.maximumf %367, %370 : vector<5x1xf32>
    %372 = arith.subf %367, %371 : vector<5x1xf32>
    %373 = math.exp %372 : vector<5x1xf32>
    %374 = arith.subf %370, %371 : vector<5x1xf32>
    %375 = math.exp %374 : vector<5x1xf32>
    %376 = vector.broadcast %373 : vector<5x1xf32> to vector<5x128xf32>
    %377 = arith.mulf %376, %332 : vector<5x128xf32>
    %378 = vector.broadcast %375 : vector<5x1xf32> to vector<5x128xf32>
    %379 = arith.mulf %378, %334 : vector<5x128xf32>
    %380 = arith.addf %377, %379 : vector<5x128xf32>
    %381 = arith.addf %373, %375 : vector<5x1xf32>
    %382 = tpu.reciprocal %381 {approx = true} : vector<5x1xf32> -> vector<5x1xf32>
    %383 = vector.broadcast %382 : vector<5x1xf32> to vector<5x128xf32>
    %384 = arith.mulf %380, %383 : vector<5x128xf32>
    %c0_173 = arith.constant 0 : index
    %c0_174 = arith.constant 0 : index
    %385 = vector.load %arg20[%c0_173, %c0_174] : memref<128x512xbf16, #tpu.memory_space<vmem>>, vector<128x512xbf16>
    %386 = arith.truncf %364 : vector<5x128xf32> to vector<5x128xbf16>
    %cst_175 = arith.constant dense<0.000000e+00> : vector<5x512xf32>
    %387 = tpu.matmul %386, %385, %cst_175 {dimension_numbers = #tpu.dot_dimension_numbers<[1], [0], [0], [1], [0, 0, 1, 1], [], []>} : vector<5x128xbf16>, vector<128x512xbf16>, vector<5x512xf32> -> vector<5x512xf32>
    %c0_176 = arith.constant 0 : index
    %c0_177 = arith.constant 0 : index
    %388 = vector.load %arg21[%c0_176, %c0_177] : memref<128x512xbf16, #tpu.memory_space<vmem>>, vector<128x512xbf16>
    %389 = arith.truncf %384 : vector<5x128xf32> to vector<5x128xbf16>
    %cst_178 = arith.constant dense<0.000000e+00> : vector<5x512xf32>
    %390 = tpu.matmul %389, %388, %cst_178 {dimension_numbers = #tpu.dot_dimension_numbers<[1], [0], [0], [1], [0, 0, 1, 1], [], []>} : vector<5x128xbf16>, vector<128x512xbf16>, vector<5x512xf32> -> vector<5x512xf32>
    %391 = arith.addf %387, %390 : vector<5x512xf32>
    %c0_179 = arith.constant 0 : index
    %c0_180 = arith.constant 0 : index
    %392 = vector.load %arg22[%c0_179, %c0_180] : memref<1x512xf32, #tpu.memory_space<vmem>>, vector<1x512xf32>
    %393 = vector.broadcast %392 : vector<1x512xf32> to vector<5x512xf32>
    %394 = arith.addf %391, %393 : vector<5x512xf32>
    %395 = vector.extract_strided_slice %394 {offsets = [0, 0], sizes = [5, 128], strides = [1, 1]} : vector<5x512xf32> to vector<5x128xf32>
    %396 = arith.negf %395 : vector<5x128xf32>
    %397 = math.exp %396 : vector<5x128xf32>
    %cst_181 = arith.constant 1.000000e+00 : f32
    %398 = vector.broadcast %cst_181 : f32 to vector<5x128xf32>
    %399 = arith.addf %398, %397 : vector<5x128xf32>
    %400 = arith.divf %398, %399 : vector<5x128xf32>
    %401 = vector.extract_strided_slice %394 {offsets = [0, 128], sizes = [5, 128], strides = [1, 1]} : vector<5x512xf32> to vector<5x128xf32>
    %402 = arith.negf %401 : vector<5x128xf32>
    %403 = math.exp %402 : vector<5x128xf32>
    %cst_182 = arith.constant 1.000000e+00 : f32
    %404 = vector.broadcast %cst_182 : f32 to vector<5x128xf32>
    %405 = arith.addf %404, %403 : vector<5x128xf32>
    %406 = arith.divf %404, %405 : vector<5x128xf32>
    %407 = vector.extract_strided_slice %394 {offsets = [0, 256], sizes = [5, 128], strides = [1, 1]} : vector<5x512xf32> to vector<5x128xf32>
    %408 = math.tanh %407 : vector<5x128xf32>
    %409 = vector.extract_strided_slice %394 {offsets = [0, 384], sizes = [5, 128], strides = [1, 1]} : vector<5x512xf32> to vector<5x128xf32>
    %410 = arith.negf %409 : vector<5x128xf32>
    %411 = math.exp %410 : vector<5x128xf32>
    %cst_183 = arith.constant 1.000000e+00 : f32
    %412 = vector.broadcast %cst_183 : f32 to vector<5x128xf32>
    %413 = arith.addf %412, %411 : vector<5x128xf32>
    %414 = arith.divf %412, %413 : vector<5x128xf32>
    %415 = arith.mulf %406, %361 : vector<5x128xf32>
    %416 = arith.mulf %400, %408 : vector<5x128xf32>
    %417 = arith.addf %415, %416 : vector<5x128xf32>
    %418 = math.tanh %417 : vector<5x128xf32>
    %419 = arith.mulf %414, %418 : vector<5x128xf32>
    %420 = arith.mulf %332, %419 : vector<5x128xf32>
    %cst_184 = arith.constant dense<0.000000e+00> : vector<5xf32>
    %421 = vector.multi_reduction <add>, %420, %cst_184 [1] : vector<5x128xf32> to vector<5xf32>
    %422 = vector.shape_cast %421 : vector<5xf32> to vector<5x1xf32>
    %423 = arith.mulf %334, %419 : vector<5x128xf32>
    %cst_185 = arith.constant dense<0.000000e+00> : vector<5xf32>
    %424 = vector.multi_reduction <add>, %423, %cst_185 [1] : vector<5x128xf32> to vector<5xf32>
    %425 = vector.shape_cast %424 : vector<5xf32> to vector<5x1xf32>
    %426 = arith.maximumf %422, %425 : vector<5x1xf32>
    %427 = arith.subf %422, %426 : vector<5x1xf32>
    %428 = math.exp %427 : vector<5x1xf32>
    %429 = arith.subf %425, %426 : vector<5x1xf32>
    %430 = math.exp %429 : vector<5x1xf32>
    %431 = vector.broadcast %428 : vector<5x1xf32> to vector<5x128xf32>
    %432 = arith.mulf %431, %332 : vector<5x128xf32>
    %433 = vector.broadcast %430 : vector<5x1xf32> to vector<5x128xf32>
    %434 = arith.mulf %433, %334 : vector<5x128xf32>
    %435 = arith.addf %432, %434 : vector<5x128xf32>
    %436 = arith.addf %428, %430 : vector<5x1xf32>
    %437 = tpu.reciprocal %436 {approx = true} : vector<5x1xf32> -> vector<5x1xf32>
    %438 = vector.broadcast %437 : vector<5x1xf32> to vector<5x128xf32>
    %439 = arith.mulf %435, %438 : vector<5x128xf32>
    %440 = arith.truncf %310 : vector<6x128xf32> to vector<6x128xbf16>
    %441 = arith.truncf %419 : vector<5x128xf32> to vector<5x128xbf16>
    %cst_186 = arith.constant dense<0.000000e+00> : vector<6x5xf32>
    %442 = tpu.matmul %440, %441, %cst_186 {dimension_numbers = #tpu.dot_dimension_numbers<[1], [1], [0], [0], [0, 0, 1, 0], [], []>} : vector<6x128xbf16>, vector<5x128xbf16>, vector<6x5xf32> -> vector<6x5xf32>
    %443 = arith.truncf %330 : vector<6x128xf32> to vector<6x128xbf16>
    %444 = arith.truncf %439 : vector<5x128xf32> to vector<5x128xbf16>
    %cst_187 = arith.constant dense<0.000000e+00> : vector<6x5xf32>
    %445 = tpu.matmul %443, %444, %cst_187 {dimension_numbers = #tpu.dot_dimension_numbers<[1], [1], [0], [0], [0, 0, 1, 0], [], []>} : vector<6x128xbf16>, vector<5x128xbf16>, vector<6x5xf32> -> vector<6x5xf32>
    %446 = arith.addf %442, %445 : vector<6x5xf32>
    %447 = math.tanh %446 : vector<6x5xf32>
    %448 = arith.truncf %447 : vector<6x5xf32> to vector<6x5xbf16>
    %449 = arith.truncf %419 : vector<5x128xf32> to vector<5x128xbf16>
    %cst_188 = arith.constant dense<0.000000e+00> : vector<6x128xf32>
    %450 = tpu.matmul %448, %449, %cst_188 {dimension_numbers = #tpu.dot_dimension_numbers<[1], [0], [0], [1], [0, 0, 1, 1], [], []>} : vector<6x5xbf16>, vector<5x128xbf16>, vector<6x128xf32> -> vector<6x128xf32>
    %451 = arith.truncf %447 : vector<6x5xf32> to vector<6x5xbf16>
    %452 = arith.truncf %439 : vector<5x128xf32> to vector<5x128xbf16>
    %cst_189 = arith.constant dense<0.000000e+00> : vector<6x128xf32>
    %453 = tpu.matmul %451, %452, %cst_189 {dimension_numbers = #tpu.dot_dimension_numbers<[1], [0], [0], [1], [0, 0, 1, 1], [], []>} : vector<6x5xbf16>, vector<5x128xbf16>, vector<6x128xf32> -> vector<6x128xf32>
    %454 = arith.truncf %447 : vector<6x5xf32> to vector<6x5xbf16>
    %455 = arith.truncf %310 : vector<6x128xf32> to vector<6x128xbf16>
    %cst_190 = arith.constant dense<0.000000e+00> : vector<5x128xf32>
    %456 = tpu.matmul %454, %455, %cst_190 {dimension_numbers = #tpu.dot_dimension_numbers<[0], [0], [1], [1], [0, 1, 1, 1], [], []>} : vector<6x5xbf16>, vector<6x128xbf16>, vector<5x128xf32> -> vector<5x128xf32>
    %457 = arith.truncf %447 : vector<6x5xf32> to vector<6x5xbf16>
    %458 = arith.truncf %330 : vector<6x128xf32> to vector<6x128xbf16>
    %cst_191 = arith.constant dense<0.000000e+00> : vector<5x128xf32>
    %459 = tpu.matmul %457, %458, %cst_191 {dimension_numbers = #tpu.dot_dimension_numbers<[0], [0], [1], [1], [0, 1, 1, 1], [], []>} : vector<6x5xbf16>, vector<6x128xbf16>, vector<5x128xf32> -> vector<5x128xf32>
    %460 = vector.extract_strided_slice %450 {offsets = [0, 0], sizes = [6, 40], strides = [1, 1]} : vector<6x128xf32> to vector<6x40xf32>
    %461 = vector.extract_strided_slice %453 {offsets = [0, 0], sizes = [6, 40], strides = [1, 1]} : vector<6x128xf32> to vector<6x40xf32>
    %462 = vector.extract_strided_slice %310 {offsets = [0, 0], sizes = [6, 40], strides = [1, 1]} : vector<6x128xf32> to vector<6x40xf32>
    %463 = vector.extract_strided_slice %330 {offsets = [0, 0], sizes = [6, 40], strides = [1, 1]} : vector<6x128xf32> to vector<6x40xf32>
    %464 = tpu.concatenate %460, %461, %462, %463 in 1 : vector<6x40xf32>, vector<6x40xf32>, vector<6x40xf32>, vector<6x40xf32> -> vector<6x160xf32>
    %465 = vector.extract_strided_slice %456 {offsets = [0, 0], sizes = [5, 40], strides = [1, 1]} : vector<5x128xf32> to vector<5x40xf32>
    %466 = vector.extract_strided_slice %459 {offsets = [0, 0], sizes = [5, 40], strides = [1, 1]} : vector<5x128xf32> to vector<5x40xf32>
    %467 = vector.extract_strided_slice %419 {offsets = [0, 0], sizes = [5, 40], strides = [1, 1]} : vector<5x128xf32> to vector<5x40xf32>
    %468 = vector.extract_strided_slice %439 {offsets = [0, 0], sizes = [5, 40], strides = [1, 1]} : vector<5x128xf32> to vector<5x40xf32>
    %469 = tpu.concatenate %465, %466, %467, %468 in 1 : vector<5x40xf32>, vector<5x40xf32>, vector<5x40xf32>, vector<5x40xf32> -> vector<5x160xf32>
    %cst_192 = arith.constant 0.000000e+00 : f32
    %470 = vector.broadcast %cst_192 : f32 to vector<1x256xf32>
    %c0_193 = arith.constant 0 : index
    %c0_194 = arith.constant 0 : index
    %471 = vector.load %arg25[%c0_193, %c0_194] : memref<1x1024xf32, #tpu.memory_space<vmem>>, vector<1x1024xf32>
    %472 = vector.extract_strided_slice %471 {offsets = [0, 0], sizes = [1, 256], strides = [1, 1]} : vector<1x1024xf32> to vector<1x256xf32>
    %473 = arith.negf %472 : vector<1x256xf32>
    %474 = math.exp %473 : vector<1x256xf32>
    %cst_195 = arith.constant 1.000000e+00 : f32
    %475 = vector.broadcast %cst_195 : f32 to vector<1x256xf32>
    %476 = arith.addf %475, %474 : vector<1x256xf32>
    %477 = arith.divf %475, %476 : vector<1x256xf32>
    %478 = vector.extract_strided_slice %471 {offsets = [0, 256], sizes = [1, 256], strides = [1, 1]} : vector<1x1024xf32> to vector<1x256xf32>
    %479 = arith.negf %478 : vector<1x256xf32>
    %480 = math.exp %479 : vector<1x256xf32>
    %cst_196 = arith.constant 1.000000e+00 : f32
    %481 = vector.broadcast %cst_196 : f32 to vector<1x256xf32>
    %482 = arith.addf %481, %480 : vector<1x256xf32>
    %483 = arith.divf %481, %482 : vector<1x256xf32>
    %484 = vector.extract_strided_slice %471 {offsets = [0, 512], sizes = [1, 256], strides = [1, 1]} : vector<1x1024xf32> to vector<1x256xf32>
    %485 = math.tanh %484 : vector<1x256xf32>
    %486 = vector.extract_strided_slice %471 {offsets = [0, 768], sizes = [1, 256], strides = [1, 1]} : vector<1x1024xf32> to vector<1x256xf32>
    %487 = arith.negf %486 : vector<1x256xf32>
    %488 = math.exp %487 : vector<1x256xf32>
    %cst_197 = arith.constant 1.000000e+00 : f32
    %489 = vector.broadcast %cst_197 : f32 to vector<1x256xf32>
    %490 = arith.addf %489, %488 : vector<1x256xf32>
    %491 = arith.divf %489, %490 : vector<1x256xf32>
    %492 = arith.mulf %483, %470 : vector<1x256xf32>
    %493 = arith.mulf %477, %485 : vector<1x256xf32>
    %494 = arith.addf %492, %493 : vector<1x256xf32>
    %495 = math.tanh %494 : vector<1x256xf32>
    %496 = arith.mulf %491, %495 : vector<1x256xf32>
    %497 = vector.extract_strided_slice %496 {offsets = [0, 0], sizes = [1, 160], strides = [1, 1]} : vector<1x256xf32> to vector<1x160xf32>
    %498 = vector.broadcast %497 : vector<1x160xf32> to vector<6x160xf32>
    %499 = arith.mulf %464, %498 : vector<6x160xf32>
    %cst_198 = arith.constant dense<0.000000e+00> : vector<6xf32>
    %500 = vector.multi_reduction <add>, %499, %cst_198 [1] : vector<6x160xf32> to vector<6xf32>
    %501 = vector.shape_cast %500 : vector<6xf32> to vector<6x1xf32>
    %cst_199 = arith.constant dense<0xFF800000> : vector<1xf32>
    %502 = vector.multi_reduction <maximumf>, %501, %cst_199 [0] : vector<6x1xf32> to vector<1xf32>
    %503 = vector.shape_cast %502 : vector<1xf32> to vector<1x1xf32>
    %504 = vector.broadcast %503 : vector<1x1xf32> to vector<6x1xf32>
    %505 = arith.subf %501, %504 : vector<6x1xf32>
    %506 = math.exp %505 : vector<6x1xf32>
    %cst_200 = arith.constant dense<0.000000e+00> : vector<1xf32>
    %507 = vector.multi_reduction <add>, %506, %cst_200 [0] : vector<6x1xf32> to vector<1xf32>
    %508 = vector.shape_cast %507 : vector<1xf32> to vector<1x1xf32>
    %509 = vector.broadcast %506 : vector<6x1xf32> to vector<6x160xf32>
    %510 = arith.mulf %509, %464 : vector<6x160xf32>
    %cst_201 = arith.constant dense<0.000000e+00> : vector<160xf32>
    %511 = vector.multi_reduction <add>, %510, %cst_201 [0] : vector<6x160xf32> to vector<160xf32>
    %512 = vector.shape_cast %511 : vector<160xf32> to vector<1x160xf32>
    %513 = tpu.reciprocal %508 {approx = true} : vector<1x1xf32> -> vector<1x1xf32>
    %514 = vector.broadcast %513 : vector<1x1xf32> to vector<1x160xf32>
    %515 = arith.mulf %512, %514 : vector<1x160xf32>
    %c0_202 = arith.constant 0 : index
    %c0_203 = arith.constant 0 : index
    %516 = vector.load %arg23[%c0_202, %c0_203] : memref<256x1024xbf16, #tpu.memory_space<vmem>>, vector<256x1024xbf16>
    %517 = arith.truncf %496 : vector<1x256xf32> to vector<1x256xbf16>
    %cst_204 = arith.constant dense<0.000000e+00> : vector<1x1024xf32>
    %518 = tpu.matmul %517, %516, %cst_204 {dimension_numbers = #tpu.dot_dimension_numbers<[1], [0], [0], [1], [0, 0, 1, 1], [], []>} : vector<1x256xbf16>, vector<256x1024xbf16>, vector<1x1024xf32> -> vector<1x1024xf32>
    %c0_205 = arith.constant 0 : index
    %c0_206 = arith.constant 0 : index
    %519 = vector.load %arg24[%c0_205, %c0_206] : memref<160x1024xbf16, #tpu.memory_space<vmem>>, vector<160x1024xbf16>
    %520 = arith.truncf %515 : vector<1x160xf32> to vector<1x160xbf16>
    %cst_207 = arith.constant dense<0.000000e+00> : vector<1x1024xf32>
    %521 = tpu.matmul %520, %519, %cst_207 {dimension_numbers = #tpu.dot_dimension_numbers<[1], [0], [0], [1], [0, 0, 1, 1], [], []>} : vector<1x160xbf16>, vector<160x1024xbf16>, vector<1x1024xf32> -> vector<1x1024xf32>
    %522 = arith.addf %518, %521 : vector<1x1024xf32>
    %c0_208 = arith.constant 0 : index
    %c0_209 = arith.constant 0 : index
    %523 = vector.load %arg25[%c0_208, %c0_209] : memref<1x1024xf32, #tpu.memory_space<vmem>>, vector<1x1024xf32>
    %524 = arith.addf %522, %523 : vector<1x1024xf32>
    %525 = vector.extract_strided_slice %524 {offsets = [0, 0], sizes = [1, 256], strides = [1, 1]} : vector<1x1024xf32> to vector<1x256xf32>
    %526 = arith.negf %525 : vector<1x256xf32>
    %527 = math.exp %526 : vector<1x256xf32>
    %cst_210 = arith.constant 1.000000e+00 : f32
    %528 = vector.broadcast %cst_210 : f32 to vector<1x256xf32>
    %529 = arith.addf %528, %527 : vector<1x256xf32>
    %530 = arith.divf %528, %529 : vector<1x256xf32>
    %531 = vector.extract_strided_slice %524 {offsets = [0, 256], sizes = [1, 256], strides = [1, 1]} : vector<1x1024xf32> to vector<1x256xf32>
    %532 = arith.negf %531 : vector<1x256xf32>
    %533 = math.exp %532 : vector<1x256xf32>
    %cst_211 = arith.constant 1.000000e+00 : f32
    %534 = vector.broadcast %cst_211 : f32 to vector<1x256xf32>
    %535 = arith.addf %534, %533 : vector<1x256xf32>
    %536 = arith.divf %534, %535 : vector<1x256xf32>
    %537 = vector.extract_strided_slice %524 {offsets = [0, 512], sizes = [1, 256], strides = [1, 1]} : vector<1x1024xf32> to vector<1x256xf32>
    %538 = math.tanh %537 : vector<1x256xf32>
    %539 = vector.extract_strided_slice %524 {offsets = [0, 768], sizes = [1, 256], strides = [1, 1]} : vector<1x1024xf32> to vector<1x256xf32>
    %540 = arith.negf %539 : vector<1x256xf32>
    %541 = math.exp %540 : vector<1x256xf32>
    %cst_212 = arith.constant 1.000000e+00 : f32
    %542 = vector.broadcast %cst_212 : f32 to vector<1x256xf32>
    %543 = arith.addf %542, %541 : vector<1x256xf32>
    %544 = arith.divf %542, %543 : vector<1x256xf32>
    %545 = arith.mulf %536, %494 : vector<1x256xf32>
    %546 = arith.mulf %530, %538 : vector<1x256xf32>
    %547 = arith.addf %545, %546 : vector<1x256xf32>
    %548 = math.tanh %547 : vector<1x256xf32>
    %549 = arith.mulf %544, %548 : vector<1x256xf32>
    %550 = vector.extract_strided_slice %549 {offsets = [0, 0], sizes = [1, 160], strides = [1, 1]} : vector<1x256xf32> to vector<1x160xf32>
    %551 = vector.broadcast %550 : vector<1x160xf32> to vector<6x160xf32>
    %552 = arith.mulf %464, %551 : vector<6x160xf32>
    %cst_213 = arith.constant dense<0.000000e+00> : vector<6xf32>
    %553 = vector.multi_reduction <add>, %552, %cst_213 [1] : vector<6x160xf32> to vector<6xf32>
    %554 = vector.shape_cast %553 : vector<6xf32> to vector<6x1xf32>
    %cst_214 = arith.constant dense<0xFF800000> : vector<1xf32>
    %555 = vector.multi_reduction <maximumf>, %554, %cst_214 [0] : vector<6x1xf32> to vector<1xf32>
    %556 = vector.shape_cast %555 : vector<1xf32> to vector<1x1xf32>
    %557 = vector.broadcast %556 : vector<1x1xf32> to vector<6x1xf32>
    %558 = arith.subf %554, %557 : vector<6x1xf32>
    %559 = math.exp %558 : vector<6x1xf32>
    %cst_215 = arith.constant dense<0.000000e+00> : vector<1xf32>
    %560 = vector.multi_reduction <add>, %559, %cst_215 [0] : vector<6x1xf32> to vector<1xf32>
    %561 = vector.shape_cast %560 : vector<1xf32> to vector<1x1xf32>
    %562 = vector.broadcast %559 : vector<6x1xf32> to vector<6x160xf32>
    %563 = arith.mulf %562, %464 : vector<6x160xf32>
    %cst_216 = arith.constant dense<0.000000e+00> : vector<160xf32>
    %564 = vector.multi_reduction <add>, %563, %cst_216 [0] : vector<6x160xf32> to vector<160xf32>
    %565 = vector.shape_cast %564 : vector<160xf32> to vector<1x160xf32>
    %566 = tpu.reciprocal %561 {approx = true} : vector<1x1xf32> -> vector<1x1xf32>
    %567 = vector.broadcast %566 : vector<1x1xf32> to vector<1x160xf32>
    %568 = arith.mulf %565, %567 : vector<1x160xf32>
    %cst_217 = arith.constant 0.000000e+00 : f32
    %569 = vector.broadcast %cst_217 : f32 to vector<1x256xf32>
    %c0_218 = arith.constant 0 : index
    %c0_219 = arith.constant 0 : index
    %570 = vector.load %arg28[%c0_218, %c0_219] : memref<1x1024xf32, #tpu.memory_space<vmem>>, vector<1x1024xf32>
    %571 = vector.extract_strided_slice %570 {offsets = [0, 0], sizes = [1, 256], strides = [1, 1]} : vector<1x1024xf32> to vector<1x256xf32>
    %572 = arith.negf %571 : vector<1x256xf32>
    %573 = math.exp %572 : vector<1x256xf32>
    %cst_220 = arith.constant 1.000000e+00 : f32
    %574 = vector.broadcast %cst_220 : f32 to vector<1x256xf32>
    %575 = arith.addf %574, %573 : vector<1x256xf32>
    %576 = arith.divf %574, %575 : vector<1x256xf32>
    %577 = vector.extract_strided_slice %570 {offsets = [0, 256], sizes = [1, 256], strides = [1, 1]} : vector<1x1024xf32> to vector<1x256xf32>
    %578 = arith.negf %577 : vector<1x256xf32>
    %579 = math.exp %578 : vector<1x256xf32>
    %cst_221 = arith.constant 1.000000e+00 : f32
    %580 = vector.broadcast %cst_221 : f32 to vector<1x256xf32>
    %581 = arith.addf %580, %579 : vector<1x256xf32>
    %582 = arith.divf %580, %581 : vector<1x256xf32>
    %583 = vector.extract_strided_slice %570 {offsets = [0, 512], sizes = [1, 256], strides = [1, 1]} : vector<1x1024xf32> to vector<1x256xf32>
    %584 = math.tanh %583 : vector<1x256xf32>
    %585 = vector.extract_strided_slice %570 {offsets = [0, 768], sizes = [1, 256], strides = [1, 1]} : vector<1x1024xf32> to vector<1x256xf32>
    %586 = arith.negf %585 : vector<1x256xf32>
    %587 = math.exp %586 : vector<1x256xf32>
    %cst_222 = arith.constant 1.000000e+00 : f32
    %588 = vector.broadcast %cst_222 : f32 to vector<1x256xf32>
    %589 = arith.addf %588, %587 : vector<1x256xf32>
    %590 = arith.divf %588, %589 : vector<1x256xf32>
    %591 = arith.mulf %582, %569 : vector<1x256xf32>
    %592 = arith.mulf %576, %584 : vector<1x256xf32>
    %593 = arith.addf %591, %592 : vector<1x256xf32>
    %594 = math.tanh %593 : vector<1x256xf32>
    %595 = arith.mulf %590, %594 : vector<1x256xf32>
    %596 = vector.extract_strided_slice %595 {offsets = [0, 0], sizes = [1, 160], strides = [1, 1]} : vector<1x256xf32> to vector<1x160xf32>
    %597 = vector.broadcast %596 : vector<1x160xf32> to vector<5x160xf32>
    %598 = arith.mulf %469, %597 : vector<5x160xf32>
    %cst_223 = arith.constant dense<0.000000e+00> : vector<5xf32>
    %599 = vector.multi_reduction <add>, %598, %cst_223 [1] : vector<5x160xf32> to vector<5xf32>
    %600 = vector.shape_cast %599 : vector<5xf32> to vector<5x1xf32>
    %cst_224 = arith.constant dense<0xFF800000> : vector<1xf32>
    %601 = vector.multi_reduction <maximumf>, %600, %cst_224 [0] : vector<5x1xf32> to vector<1xf32>
    %602 = vector.shape_cast %601 : vector<1xf32> to vector<1x1xf32>
    %603 = vector.broadcast %602 : vector<1x1xf32> to vector<5x1xf32>
    %604 = arith.subf %600, %603 : vector<5x1xf32>
    %605 = math.exp %604 : vector<5x1xf32>
    %cst_225 = arith.constant dense<0.000000e+00> : vector<1xf32>
    %606 = vector.multi_reduction <add>, %605, %cst_225 [0] : vector<5x1xf32> to vector<1xf32>
    %607 = vector.shape_cast %606 : vector<1xf32> to vector<1x1xf32>
    %608 = vector.broadcast %605 : vector<5x1xf32> to vector<5x160xf32>
    %609 = arith.mulf %608, %469 : vector<5x160xf32>
    %cst_226 = arith.constant dense<0.000000e+00> : vector<160xf32>
    %610 = vector.multi_reduction <add>, %609, %cst_226 [0] : vector<5x160xf32> to vector<160xf32>
    %611 = vector.shape_cast %610 : vector<160xf32> to vector<1x160xf32>
    %612 = tpu.reciprocal %607 {approx = true} : vector<1x1xf32> -> vector<1x1xf32>
    %613 = vector.broadcast %612 : vector<1x1xf32> to vector<1x160xf32>
    %614 = arith.mulf %611, %613 : vector<1x160xf32>
    %c0_227 = arith.constant 0 : index
    %c0_228 = arith.constant 0 : index
    %615 = vector.load %arg26[%c0_227, %c0_228] : memref<256x1024xbf16, #tpu.memory_space<vmem>>, vector<256x1024xbf16>
    %616 = arith.truncf %595 : vector<1x256xf32> to vector<1x256xbf16>
    %cst_229 = arith.constant dense<0.000000e+00> : vector<1x1024xf32>
    %617 = tpu.matmul %616, %615, %cst_229 {dimension_numbers = #tpu.dot_dimension_numbers<[1], [0], [0], [1], [0, 0, 1, 1], [], []>} : vector<1x256xbf16>, vector<256x1024xbf16>, vector<1x1024xf32> -> vector<1x1024xf32>
    %c0_230 = arith.constant 0 : index
    %c0_231 = arith.constant 0 : index
    %618 = vector.load %arg27[%c0_230, %c0_231] : memref<160x1024xbf16, #tpu.memory_space<vmem>>, vector<160x1024xbf16>
    %619 = arith.truncf %614 : vector<1x160xf32> to vector<1x160xbf16>
    %cst_232 = arith.constant dense<0.000000e+00> : vector<1x1024xf32>
    %620 = tpu.matmul %619, %618, %cst_232 {dimension_numbers = #tpu.dot_dimension_numbers<[1], [0], [0], [1], [0, 0, 1, 1], [], []>} : vector<1x160xbf16>, vector<160x1024xbf16>, vector<1x1024xf32> -> vector<1x1024xf32>
    %621 = arith.addf %617, %620 : vector<1x1024xf32>
    %c0_233 = arith.constant 0 : index
    %c0_234 = arith.constant 0 : index
    %622 = vector.load %arg28[%c0_233, %c0_234] : memref<1x1024xf32, #tpu.memory_space<vmem>>, vector<1x1024xf32>
    %623 = arith.addf %621, %622 : vector<1x1024xf32>
    %624 = vector.extract_strided_slice %623 {offsets = [0, 0], sizes = [1, 256], strides = [1, 1]} : vector<1x1024xf32> to vector<1x256xf32>
    %625 = arith.negf %624 : vector<1x256xf32>
    %626 = math.exp %625 : vector<1x256xf32>
    %cst_235 = arith.constant 1.000000e+00 : f32
    %627 = vector.broadcast %cst_235 : f32 to vector<1x256xf32>
    %628 = arith.addf %627, %626 : vector<1x256xf32>
    %629 = arith.divf %627, %628 : vector<1x256xf32>
    %630 = vector.extract_strided_slice %623 {offsets = [0, 256], sizes = [1, 256], strides = [1, 1]} : vector<1x1024xf32> to vector<1x256xf32>
    %631 = arith.negf %630 : vector<1x256xf32>
    %632 = math.exp %631 : vector<1x256xf32>
    %cst_236 = arith.constant 1.000000e+00 : f32
    %633 = vector.broadcast %cst_236 : f32 to vector<1x256xf32>
    %634 = arith.addf %633, %632 : vector<1x256xf32>
    %635 = arith.divf %633, %634 : vector<1x256xf32>
    %636 = vector.extract_strided_slice %623 {offsets = [0, 512], sizes = [1, 256], strides = [1, 1]} : vector<1x1024xf32> to vector<1x256xf32>
    %637 = math.tanh %636 : vector<1x256xf32>
    %638 = vector.extract_strided_slice %623 {offsets = [0, 768], sizes = [1, 256], strides = [1, 1]} : vector<1x1024xf32> to vector<1x256xf32>
    %639 = arith.negf %638 : vector<1x256xf32>
    %640 = math.exp %639 : vector<1x256xf32>
    %cst_237 = arith.constant 1.000000e+00 : f32
    %641 = vector.broadcast %cst_237 : f32 to vector<1x256xf32>
    %642 = arith.addf %641, %640 : vector<1x256xf32>
    %643 = arith.divf %641, %642 : vector<1x256xf32>
    %644 = arith.mulf %635, %593 : vector<1x256xf32>
    %645 = arith.mulf %629, %637 : vector<1x256xf32>
    %646 = arith.addf %644, %645 : vector<1x256xf32>
    %647 = math.tanh %646 : vector<1x256xf32>
    %648 = arith.mulf %643, %647 : vector<1x256xf32>
    %649 = vector.extract_strided_slice %648 {offsets = [0, 0], sizes = [1, 160], strides = [1, 1]} : vector<1x256xf32> to vector<1x160xf32>
    %650 = vector.broadcast %649 : vector<1x160xf32> to vector<5x160xf32>
    %651 = arith.mulf %469, %650 : vector<5x160xf32>
    %cst_238 = arith.constant dense<0.000000e+00> : vector<5xf32>
    %652 = vector.multi_reduction <add>, %651, %cst_238 [1] : vector<5x160xf32> to vector<5xf32>
    %653 = vector.shape_cast %652 : vector<5xf32> to vector<5x1xf32>
    %cst_239 = arith.constant dense<0xFF800000> : vector<1xf32>
    %654 = vector.multi_reduction <maximumf>, %653, %cst_239 [0] : vector<5x1xf32> to vector<1xf32>
    %655 = vector.shape_cast %654 : vector<1xf32> to vector<1x1xf32>
    %656 = vector.broadcast %655 : vector<1x1xf32> to vector<5x1xf32>
    %657 = arith.subf %653, %656 : vector<5x1xf32>
    %658 = math.exp %657 : vector<5x1xf32>
    %cst_240 = arith.constant dense<0.000000e+00> : vector<1xf32>
    %659 = vector.multi_reduction <add>, %658, %cst_240 [0] : vector<5x1xf32> to vector<1xf32>
    %660 = vector.shape_cast %659 : vector<1xf32> to vector<1x1xf32>
    %661 = vector.broadcast %658 : vector<5x1xf32> to vector<5x160xf32>
    %662 = arith.mulf %661, %469 : vector<5x160xf32>
    %cst_241 = arith.constant dense<0.000000e+00> : vector<160xf32>
    %663 = vector.multi_reduction <add>, %662, %cst_241 [0] : vector<5x160xf32> to vector<160xf32>
    %664 = vector.shape_cast %663 : vector<160xf32> to vector<1x160xf32>
    %665 = tpu.reciprocal %660 {approx = true} : vector<1x1xf32> -> vector<1x1xf32>
    %666 = vector.broadcast %665 : vector<1x1xf32> to vector<1x160xf32>
    %667 = arith.mulf %664, %666 : vector<1x160xf32>
    %c0_242 = arith.constant 0 : index
    %c0_243 = arith.constant 0 : index
    %668 = vector.load %arg29[%c0_242, %c0_243] : memref<256x384xbf16, #tpu.memory_space<vmem>>, vector<256x384xbf16>
    %669 = arith.truncf %549 : vector<1x256xf32> to vector<1x256xbf16>
    %cst_244 = arith.constant dense<0.000000e+00> : vector<1x384xf32>
    %670 = tpu.matmul %669, %668, %cst_244 {dimension_numbers = #tpu.dot_dimension_numbers<[1], [0], [0], [1], [0, 0, 1, 1], [], []>} : vector<1x256xbf16>, vector<256x384xbf16>, vector<1x384xf32> -> vector<1x384xf32>
    %c0_245 = arith.constant 0 : index
    %c0_246 = arith.constant 0 : index
    %671 = vector.load %arg30[%c0_245, %c0_246] : memref<160x384xbf16, #tpu.memory_space<vmem>>, vector<160x384xbf16>
    %672 = arith.truncf %568 : vector<1x160xf32> to vector<1x160xbf16>
    %cst_247 = arith.constant dense<0.000000e+00> : vector<1x384xf32>
    %673 = tpu.matmul %672, %671, %cst_247 {dimension_numbers = #tpu.dot_dimension_numbers<[1], [0], [0], [1], [0, 0, 1, 1], [], []>} : vector<1x160xbf16>, vector<160x384xbf16>, vector<1x384xf32> -> vector<1x384xf32>
    %674 = arith.addf %670, %673 : vector<1x384xf32>
    %c0_248 = arith.constant 0 : index
    %c0_249 = arith.constant 0 : index
    %675 = vector.load %arg31[%c0_248, %c0_249] : memref<256x384xbf16, #tpu.memory_space<vmem>>, vector<256x384xbf16>
    %676 = arith.truncf %648 : vector<1x256xf32> to vector<1x256xbf16>
    %cst_250 = arith.constant dense<0.000000e+00> : vector<1x384xf32>
    %677 = tpu.matmul %676, %675, %cst_250 {dimension_numbers = #tpu.dot_dimension_numbers<[1], [0], [0], [1], [0, 0, 1, 1], [], []>} : vector<1x256xbf16>, vector<256x384xbf16>, vector<1x384xf32> -> vector<1x384xf32>
    %678 = arith.addf %674, %677 : vector<1x384xf32>
    %c0_251 = arith.constant 0 : index
    %c0_252 = arith.constant 0 : index
    %679 = vector.load %arg32[%c0_251, %c0_252] : memref<160x384xbf16, #tpu.memory_space<vmem>>, vector<160x384xbf16>
    %680 = arith.truncf %667 : vector<1x160xf32> to vector<1x160xbf16>
    %cst_253 = arith.constant dense<0.000000e+00> : vector<1x384xf32>
    %681 = tpu.matmul %680, %679, %cst_253 {dimension_numbers = #tpu.dot_dimension_numbers<[1], [0], [0], [1], [0, 0, 1, 1], [], []>} : vector<1x160xbf16>, vector<160x384xbf16>, vector<1x384xf32> -> vector<1x384xf32>
    %682 = arith.addf %678, %681 : vector<1x384xf32>
    %c0_254 = arith.constant 0 : index
    %c0_255 = arith.constant 0 : index
    %683 = vector.load %arg33[%c0_254, %c0_255] : memref<1x384xf32, #tpu.memory_space<vmem>>, vector<1x384xf32>
    %684 = arith.addf %682, %683 : vector<1x384xf32>
    %cst_256 = arith.constant 0.000000e+00 : f32
    %685 = vector.broadcast %cst_256 : f32 to vector<1x384xf32>
    %686 = arith.maximumf %684, %685 : vector<1x384xf32>
    %c0_257 = arith.constant 0 : index
    %c0_258 = arith.constant 0 : index
    %687 = vector.load %arg34[%c0_257, %c0_258] : memref<384x256xbf16, #tpu.memory_space<vmem>>, vector<384x256xbf16>
    %688 = arith.truncf %686 : vector<1x384xf32> to vector<1x384xbf16>
    %cst_259 = arith.constant dense<0.000000e+00> : vector<1x256xf32>
    %689 = tpu.matmul %688, %687, %cst_259 {dimension_numbers = #tpu.dot_dimension_numbers<[1], [0], [0], [1], [0, 0, 1, 1], [], []>} : vector<1x384xbf16>, vector<384x256xbf16>, vector<1x256xf32> -> vector<1x256xf32>
    %c0_260 = arith.constant 0 : index
    %c0_261 = arith.constant 0 : index
    %690 = vector.load %arg35[%c0_260, %c0_261] : memref<1x256xf32, #tpu.memory_space<vmem>>, vector<1x256xf32>
    %691 = arith.addf %689, %690 : vector<1x256xf32>
    %cst_262 = arith.constant 0.000000e+00 : f32
    %692 = vector.broadcast %cst_262 : f32 to vector<1x256xf32>
    %693 = arith.maximumf %691, %692 : vector<1x256xf32>
    %c0_263 = arith.constant 0 : index
    %c0_264 = arith.constant 0 : index
    %694 = vector.load %arg36[%c0_263, %c0_264] : memref<256x128xbf16, #tpu.memory_space<vmem>>, vector<256x128xbf16>
    %695 = arith.truncf %693 : vector<1x256xf32> to vector<1x256xbf16>
    %cst_265 = arith.constant dense<0.000000e+00> : vector<1x128xf32>
    %696 = tpu.matmul %695, %694, %cst_265 {dimension_numbers = #tpu.dot_dimension_numbers<[1], [0], [0], [1], [0, 0, 1, 1], [], []>} : vector<1x256xbf16>, vector<256x128xbf16>, vector<1x128xf32> -> vector<1x128xf32>
    %c0_266 = arith.constant 0 : index
    %c0_267 = arith.constant 0 : index
    %697 = vector.load %arg37[%c0_266, %c0_267] : memref<1x128xf32, #tpu.memory_space<vmem>>, vector<1x128xf32>
    %698 = arith.addf %696, %697 : vector<1x128xf32>
    %cst_268 = arith.constant 0.000000e+00 : f32
    %699 = vector.broadcast %cst_268 : f32 to vector<1x128xf32>
    %700 = arith.maximumf %698, %699 : vector<1x128xf32>
    %c0_269 = arith.constant 0 : index
    %c0_270 = arith.constant 0 : index
    %701 = vector.load %arg38[%c0_269, %c0_270] : memref<128x128xbf16, #tpu.memory_space<vmem>>, vector<128x128xbf16>
    %702 = arith.truncf %700 : vector<1x128xf32> to vector<1x128xbf16>
    %cst_271 = arith.constant dense<0.000000e+00> : vector<1x128xf32>
    %703 = tpu.matmul %702, %701, %cst_271 {dimension_numbers = #tpu.dot_dimension_numbers<[1], [0], [0], [1], [0, 0, 1, 1], [], []>} : vector<1x128xbf16>, vector<128x128xbf16>, vector<1x128xf32> -> vector<1x128xf32>
    %c0_272 = arith.constant 0 : index
    %c0_273 = arith.constant 0 : index
    %704 = vector.load %arg39[%c0_272, %c0_273] : memref<1x128xf32, #tpu.memory_space<vmem>>, vector<1x128xf32>
    %705 = arith.addf %703, %704 : vector<1x128xf32>
    %cst_274 = arith.constant 0.000000e+00 : f32
    %706 = vector.broadcast %cst_274 : f32 to vector<6x123xf32>
    %707 = tpu.concatenate %446, %706 in 1 : vector<6x5xf32>, vector<6x123xf32> -> vector<6x128xf32>
    %cst_275 = arith.constant 0.000000e+00 : f32
    %708 = vector.broadcast %cst_275 : f32 to vector<1x128xf32>
    %709 = tpu.concatenate %705, %707, %708 in 0 : vector<1x128xf32>, vector<6x128xf32>, vector<1x128xf32> -> vector<8x128xf32>
    %c0_276 = arith.constant 0 : index
    %c0_277 = arith.constant 0 : index
    %c0_278 = arith.constant 0 : index
    %710 = vector.load %arg40[%c0_276, %c0_277, %c0_278] : memref<1x8x128xf32, #tpu.memory_space<vmem>>, vector<1x8x128xf32>
    %711 = vector.shape_cast %710 : vector<1x8x128xf32> to vector<8x128xf32>
    %712 = vector.shape_cast %709 : vector<8x128xf32> to vector<1x8x128xf32>
    tpu.vector_store %arg40[%c0_276, %c0_277, %c0_278], %712 {strides = array<i32>} : memref<1x8x128xf32, #tpu.memory_space<vmem>>, vector<1x8x128xf32>,
    return
  }
  func.func @transform_0(%arg0: i32) -> (i32, i32, i32) {
    %c0_i32 = arith.constant 0 : i32
    %c0_i32_0 = arith.constant 0 : i32
    %c0_i32_1 = arith.constant 0 : i32
    return %arg0, %c0_i32, %c0_i32_0 : i32, i32, i32
  }
  func.func @transform_1(%arg0: i32) -> (i32, i32, i32) {
    %c0_i32 = arith.constant 0 : i32
    %c0_i32_0 = arith.constant 0 : i32
    %c0_i32_1 = arith.constant 0 : i32
    return %arg0, %c0_i32, %c0_i32_0 : i32, i32, i32
  }
  func.func @transform_2(%arg0: i32) -> (i32, i32, i32, i32) {
    %c0_i32 = arith.constant 0 : i32
    %c0_i32_0 = arith.constant 0 : i32
    %c0_i32_1 = arith.constant 0 : i32
    %c0_i32_2 = arith.constant 0 : i32
    return %arg0, %c0_i32, %c0_i32_0, %c0_i32_1 : i32, i32, i32, i32
  }
  func.func @transform_3(%arg0: i32) -> (i32, i32, i32) {
    %c0_i32 = arith.constant 0 : i32
    %c0_i32_0 = arith.constant 0 : i32
    %c0_i32_1 = arith.constant 0 : i32
    return %arg0, %c0_i32, %c0_i32_0 : i32, i32, i32
  }
  func.func @transform_4(%arg0: i32) -> (i32, i32, i32) {
    %c0_i32 = arith.constant 0 : i32
    %c0_i32_0 = arith.constant 0 : i32
    %c0_i32_1 = arith.constant 0 : i32
    return %arg0, %c0_i32, %c0_i32_0 : i32, i32, i32
  }
  func.func @transform_5(%arg0: i32) -> (i32, i32, i32, i32) {
    %c0_i32 = arith.constant 0 : i32
    %c0_i32_0 = arith.constant 0 : i32
    %c0_i32_1 = arith.constant 0 : i32
    %c0_i32_2 = arith.constant 0 : i32
    return %arg0, %c0_i32, %c0_i32_0, %c0_i32_1 : i32, i32, i32, i32
  }
  func.func @transform_6(%arg0: i32) -> (i32, i32, i32) {
    %c0_i32 = arith.constant 0 : i32
    %c0_i32_0 = arith.constant 0 : i32
    %c0_i32_1 = arith.constant 0 : i32
    %c0_i32_2 = arith.constant 0 : i32
    return %c0_i32, %c0_i32_0, %c0_i32_1 : i32, i32, i32
  }
  func.func @transform_7(%arg0: i32) -> (i32, i32, i32) {
    %c0_i32 = arith.constant 0 : i32
    %c0_i32_0 = arith.constant 0 : i32
    %c0_i32_1 = arith.constant 0 : i32
    %c0_i32_2 = arith.constant 0 : i32
    return %c0_i32, %c0_i32_0, %c0_i32_1 : i32, i32, i32
  }
  func.func @transform_8(%arg0: i32) -> (i32, i32, i32) {
    %c0_i32 = arith.constant 0 : i32
    %c0_i32_0 = arith.constant 0 : i32
    %c0_i32_1 = arith.constant 0 : i32
    %c0_i32_2 = arith.constant 0 : i32
    return %c0_i32, %c0_i32_0, %c0_i32_1 : i32, i32, i32
  }
  func.func @transform_9(%arg0: i32) -> (i32, i32, i32) {
    %c0_i32 = arith.constant 0 : i32
    %c0_i32_0 = arith.constant 0 : i32
    %c0_i32_1 = arith.constant 0 : i32
    %c0_i32_2 = arith.constant 0 : i32
    return %c0_i32, %c0_i32_0, %c0_i32_1 : i32, i32, i32
  }
  func.func @transform_10(%arg0: i32) -> (i32, i32, i32) {
    %c0_i32 = arith.constant 0 : i32
    %c0_i32_0 = arith.constant 0 : i32
    %c0_i32_1 = arith.constant 0 : i32
    %c0_i32_2 = arith.constant 0 : i32
    return %c0_i32, %c0_i32_0, %c0_i32_1 : i32, i32, i32
  }
  func.func @transform_11(%arg0: i32) -> (i32, i32, i32) {
    %c0_i32 = arith.constant 0 : i32
    %c0_i32_0 = arith.constant 0 : i32
    %c0_i32_1 = arith.constant 0 : i32
    %c0_i32_2 = arith.constant 0 : i32
    return %c0_i32, %c0_i32_0, %c0_i32_1 : i32, i32, i32
  }
  func.func @transform_12(%arg0: i32) -> (i32, i32, i32) {
    %c0_i32 = arith.constant 0 : i32
    %c0_i32_0 = arith.constant 0 : i32
    %c0_i32_1 = arith.constant 0 : i32
    %c0_i32_2 = arith.constant 0 : i32
    return %c0_i32, %c0_i32_0, %c0_i32_1 : i32, i32, i32
  }
  func.func @transform_13(%arg0: i32) -> (i32, i32, i32) {
    %c0_i32 = arith.constant 0 : i32
    %c0_i32_0 = arith.constant 0 : i32
    %c0_i32_1 = arith.constant 0 : i32
    %c0_i32_2 = arith.constant 0 : i32
    return %c0_i32, %c0_i32_0, %c0_i32_1 : i32, i32, i32
  }
  func.func @transform_14(%arg0: i32) -> (i32, i32, i32) {
    %c0_i32 = arith.constant 0 : i32
    %c0_i32_0 = arith.constant 0 : i32
    %c0_i32_1 = arith.constant 0 : i32
    %c0_i32_2 = arith.constant 0 : i32
    return %c0_i32, %c0_i32_0, %c0_i32_1 : i32, i32, i32
  }
  func.func @transform_15(%arg0: i32) -> (i32, i32, i32) {
    %c0_i32 = arith.constant 0 : i32
    %c0_i32_0 = arith.constant 0 : i32
    %c0_i32_1 = arith.constant 0 : i32
    %c0_i32_2 = arith.constant 0 : i32
    return %c0_i32, %c0_i32_0, %c0_i32_1 : i32, i32, i32
  }
  func.func @transform_16(%arg0: i32) -> (i32, i32) {
    %c0_i32 = arith.constant 0 : i32
    %c0_i32_0 = arith.constant 0 : i32
    %c0_i32_1 = arith.constant 0 : i32
    return %c0_i32, %c0_i32_0 : i32, i32
  }
  func.func @transform_17(%arg0: i32) -> (i32, i32) {
    %c0_i32 = arith.constant 0 : i32
    %c0_i32_0 = arith.constant 0 : i32
    %c0_i32_1 = arith.constant 0 : i32
    return %c0_i32, %c0_i32_0 : i32, i32
  }
  func.func @transform_18(%arg0: i32) -> (i32, i32) {
    %c0_i32 = arith.constant 0 : i32
    %c0_i32_0 = arith.constant 0 : i32
    %c0_i32_1 = arith.constant 0 : i32
    return %c0_i32, %c0_i32_0 : i32, i32
  }
  func.func @transform_19(%arg0: i32) -> (i32, i32) {
    %c0_i32 = arith.constant 0 : i32
    %c0_i32_0 = arith.constant 0 : i32
    %c0_i32_1 = arith.constant 0 : i32
    return %c0_i32, %c0_i32_0 : i32, i32
  }
  func.func @transform_20(%arg0: i32) -> (i32, i32) {
    %c0_i32 = arith.constant 0 : i32
    %c0_i32_0 = arith.constant 0 : i32
    %c0_i32_1 = arith.constant 0 : i32
    return %c0_i32, %c0_i32_0 : i32, i32
  }
  func.func @transform_21(%arg0: i32) -> (i32, i32) {
    %c0_i32 = arith.constant 0 : i32
    %c0_i32_0 = arith.constant 0 : i32
    %c0_i32_1 = arith.constant 0 : i32
    return %c0_i32, %c0_i32_0 : i32, i32
  }
  func.func @transform_22(%arg0: i32) -> (i32, i32) {
    %c0_i32 = arith.constant 0 : i32
    %c0_i32_0 = arith.constant 0 : i32
    %c0_i32_1 = arith.constant 0 : i32
    return %c0_i32, %c0_i32_0 : i32, i32
  }
  func.func @transform_23(%arg0: i32) -> (i32, i32) {
    %c0_i32 = arith.constant 0 : i32
    %c0_i32_0 = arith.constant 0 : i32
    %c0_i32_1 = arith.constant 0 : i32
    return %c0_i32, %c0_i32_0 : i32, i32
  }
  func.func @transform_24(%arg0: i32) -> (i32, i32) {
    %c0_i32 = arith.constant 0 : i32
    %c0_i32_0 = arith.constant 0 : i32
    %c0_i32_1 = arith.constant 0 : i32
    return %c0_i32, %c0_i32_0 : i32, i32
  }
  func.func @transform_25(%arg0: i32) -> (i32, i32) {
    %c0_i32 = arith.constant 0 : i32
    %c0_i32_0 = arith.constant 0 : i32
    %c0_i32_1 = arith.constant 0 : i32
    return %c0_i32, %c0_i32_0 : i32, i32
  }
  func.func @transform_26(%arg0: i32) -> (i32, i32) {
    %c0_i32 = arith.constant 0 : i32
    %c0_i32_0 = arith.constant 0 : i32
    %c0_i32_1 = arith.constant 0 : i32
    return %c0_i32, %c0_i32_0 : i32, i32
  }
  func.func @transform_27(%arg0: i32) -> (i32, i32) {
    %c0_i32 = arith.constant 0 : i32
    %c0_i32_0 = arith.constant 0 : i32
    %c0_i32_1 = arith.constant 0 : i32
    return %c0_i32, %c0_i32_0 : i32, i32
  }
  func.func @transform_28(%arg0: i32) -> (i32, i32) {
    %c0_i32 = arith.constant 0 : i32
    %c0_i32_0 = arith.constant 0 : i32
    %c0_i32_1 = arith.constant 0 : i32
    return %c0_i32, %c0_i32_0 : i32, i32
  }
  func.func @transform_29(%arg0: i32) -> (i32, i32) {
    %c0_i32 = arith.constant 0 : i32
    %c0_i32_0 = arith.constant 0 : i32
    %c0_i32_1 = arith.constant 0 : i32
    return %c0_i32, %c0_i32_0 : i32, i32
  }
  func.func @transform_30(%arg0: i32) -> (i32, i32) {
    %c0_i32 = arith.constant 0 : i32
    %c0_i32_0 = arith.constant 0 : i32
    %c0_i32_1 = arith.constant 0 : i32
    return %c0_i32, %c0_i32_0 : i32, i32
  }
  func.func @transform_31(%arg0: i32) -> (i32, i32) {
    %c0_i32 = arith.constant 0 : i32
    %c0_i32_0 = arith.constant 0 : i32
    %c0_i32_1 = arith.constant 0 : i32
    return %c0_i32, %c0_i32_0 : i32, i32
  }
  func.func @transform_32(%arg0: i32) -> (i32, i32) {
    %c0_i32 = arith.constant 0 : i32
    %c0_i32_0 = arith.constant 0 : i32
    %c0_i32_1 = arith.constant 0 : i32
    return %c0_i32, %c0_i32_0 : i32, i32
  }
  func.func @transform_33(%arg0: i32) -> (i32, i32) {
    %c0_i32 = arith.constant 0 : i32
    %c0_i32_0 = arith.constant 0 : i32
    %c0_i32_1 = arith.constant 0 : i32
    return %c0_i32, %c0_i32_0 : i32, i32
  }
  func.func @transform_34(%arg0: i32) -> (i32, i32) {
    %c0_i32 = arith.constant 0 : i32
    %c0_i32_0 = arith.constant 0 : i32
    %c0_i32_1 = arith.constant 0 : i32
    return %c0_i32, %c0_i32_0 : i32, i32
  }
  func.func @transform_35(%arg0: i32) -> (i32, i32) {
    %c0_i32 = arith.constant 0 : i32
    %c0_i32_0 = arith.constant 0 : i32
    %c0_i32_1 = arith.constant 0 : i32
    return %c0_i32, %c0_i32_0 : i32, i32
  }
  func.func @transform_36(%arg0: i32) -> (i32, i32) {
    %c0_i32 = arith.constant 0 : i32
    %c0_i32_0 = arith.constant 0 : i32
    %c0_i32_1 = arith.constant 0 : i32
    return %c0_i32, %c0_i32_0 : i32, i32
  }
  func.func @transform_37(%arg0: i32) -> (i32, i32) {
    %c0_i32 = arith.constant 0 : i32
    %c0_i32_0 = arith.constant 0 : i32
    %c0_i32_1 = arith.constant 0 : i32
    return %c0_i32, %c0_i32_0 : i32, i32
  }
  func.func @transform_38(%arg0: i32) -> (i32, i32) {
    %c0_i32 = arith.constant 0 : i32
    %c0_i32_0 = arith.constant 0 : i32
    %c0_i32_1 = arith.constant 0 : i32
    return %c0_i32, %c0_i32_0 : i32, i32
  }
  func.func @transform_39(%arg0: i32) -> (i32, i32, i32) {
    %c0_i32 = arith.constant 0 : i32
    %c0_i32_0 = arith.constant 0 : i32
    %c0_i32_1 = arith.constant 0 : i32
    return %arg0, %c0_i32, %c0_i32_0 : i32, i32, i32
  }
}

</mosaic_0001>

<bundles_post_ra>
// kernel: cigin_forward.1
= control target key start
LH: loop header
LB: loop body
LE: loop exit
PB: predicated region body
PF: predicated region fallthrough
CT: control target
= control target key end

     0   :  { %s15295_s6 = smov 1   ;;  %s15296_s10 = smov 2   ;;  %s17047_s0 = inlined_call_operand.smem [shape: u32[40], index: -1, kind: input, shape index: {}] }
   0x1   :  { %s15388_s5 = sld [smem:[%s17047_s0]]   ;;  %s15297_s14 = smov 3  }
   0x2   :  { %s15393_s9 = sld [smem:[%s17047_s0 + %s15295_s6]]   ;;  %s15298_s18 = smov 4  }
   0x3   :  { %s15398_s13 = sld [smem:[%s17047_s0 + %s15296_s10]]   ;;  %s15299_s22 = smov 5  }
   0x4   :  { %s15403_s17 = sld [smem:[%s17047_s0 + %s15297_s14]]   ;;  %s15300_s26 = smov 6  }
   0x5   :  { %s15408_s21 = sld [smem:[%s17047_s0 + %s15298_s18]]   ;;  %s15301_s30 = smov 7  }
   0x6   :  { %s15413_s25 = sld [smem:[%s17047_s0 + %s15299_s22]]   ;;  %s15302_s4 = smov 8  }
   0x7   :  { %17099 = sst [smem:[#allocation60_spill]] %s15388_s5  ;;  %s15303_s10 = smov 9  }
   0x8   :  { %17100 = sst [smem:[#allocation61_spill]] %s15393_s9  ;;  %s15304_s15 = smov 10  }
   0x9   :  { %17101 = sst [smem:[#allocation62_spill]] %s15398_s13  ;;  %s15305_s20 = smov 11  }
   0xa   :  { %17102 = sst [smem:[#allocation63_spill]] %s15403_s17  ;;  %s15307_s1 = smov 13  }
   0xb   :  { %17103 = sst [smem:[#allocation64_spill]] %s15408_s21  ;;  %s15308_s7 = smov 14  }
   0xc   :  { %17104 = sst [smem:[#allocation65_spill]] %s15413_s25  ;;  %s15310_s22 = smov 16  }
   0xd   :  { %s15418_s29 = sld [smem:[%s17047_s0 + %s15300_s26]]   ;;  %s15306_s26 = smov 12  }
   0xe   :  { %s15423_s3 = sld [smem:[%s17047_s0 + %s15301_s30]]   ;;  %s15311_s28 = smov 17  }
   0xf   :  { %s15428_s8 = sld [smem:[%s17047_s0 + %s15302_s4]]  }
  0x10   :  { %s15433_s14 = sld [smem:[%s17047_s0 + %s15303_s10]]  }
  0x11   :  { %s15438_s19 = sld [smem:[%s17047_s0 + %s15304_s15]]   ;;  %s15309_s15 = smov 15  }
  0x12   :  { %s15443_s24 = sld [smem:[%s17047_s0 + %s15305_s20]]  }
  0x13   :  { %s15448_s30 = sld [smem:[%s17047_s0 + %s15306_s26]]  }
  0x14   :  { %17105 = sst [smem:[#allocation66_spill]] %s15423_s3 }
  0x15   :  { %17106 = sst [smem:[#allocation67_spill]] %s15428_s8 }
  0x16   :  { %17107 = sst [smem:[#allocation68_spill]] %s15433_s14 }
  0x17   :  { %17108 = sst [smem:[#allocation69_spill]] %s15438_s19 }
  0x18   :  { %17109 = sst [smem:[#allocation70_spill]] %s15443_s24 }
  0x19   :  { %s15453_s6 = sld [smem:[%s17047_s0 + %s15307_s1]]  }
  0x1a   :  { %s15458_s12 = sld [smem:[%s17047_s0 + %s15308_s7]]   ;;  %s15312_s7 = smov 18  }
  0x1b   :  { %s15463_s20 = sld [smem:[%s17047_s0 + %s15309_s15]]   ;;  %s15313_s15 = smov 19  }
  0x1c   :  { %s15468_s27 = sld [smem:[%s17047_s0 + %s15310_s22]]   ;;  %s15314_s22 = smov 20  }
  0x1d   :  { %s15473_s4 = sld [smem:[%s17047_s0 + %s15311_s28]]   ;;  %s15315_s28 = smov 21  }
  0x1e   :  { %s15483_s17 = sld [smem:[%s17047_s0 + %s15313_s15]]   ;;  %s15317_s15 = smov 23  }
  0x1f   :  { %17110 = sst [smem:[#allocation71_spill]] %s15453_s6 }
  0x20   :  { %17111 = sst [smem:[#allocation72_spill]] %s15458_s12 }
  0x21   :  { %17112 = sst [smem:[#allocation73_spill]] %s15463_s20 }
  0x22   :  { %17113 = sst [smem:[#allocation74_spill]] %s15468_s27 }
  0x23   :  { %17114 = sst [smem:[#allocation75_spill]] %s15473_s4 }
  0x24   :  { %s15478_s6 = sld [smem:[%s17047_s0 + %s15312_s7]]   ;;  %s15316_s7 = smov 22  }
  0x25   :  { %s15488_s25 = sld [smem:[%s17047_s0 + %s15314_s22]]   ;;  %s15318_s22 = smov 24  }
  0x26   :  { %s15493_s21 = sld [smem:[%s17047_s0 + %s15315_s28]]   ;;  %s15319_s28 = smov 25  }
  0x27   :  { %s15498_s8 = sld [smem:[%s17047_s0 + %s15316_s7]]   ;;  %s15320_s7 = smov 26  }
  0x28   :  { %s15503_s5 = sld [smem:[%s17047_s0 + %s15317_s15]]   ;;  %s15321_s15 = smov 27  }
  0x29   :  { %s15508_s13 = sld [smem:[%s17047_s0 + %s15318_s22]]   ;;  %s15322_s22 = smov 28  }
  0x2a   :  { %17115 = sst [smem:[#allocation76_spill]] %s15478_s6 }
  0x2b   :  { %17116 = sst [smem:[#allocation77_spill]] %s15488_s25 }
  0x2c   :  { %s15513_s9 = sld [smem:[%s17047_s0 + %s15319_s28]]   ;;  %s15323_s28 = smov 29  }
  0x2d   :  { %17117 = sst [smem:[#allocation78_spill]] %s15498_s8 }
  0x2e   :  { %17118 = sst [smem:[#allocation79_spill]] %s15503_s5 }
  0x2f   :  { %17119 = sst [smem:[#allocation80_spill]] %s15508_s13 }
  0x30   :  { %s15518_s8 = sld [smem:[%s17047_s0 + %s15320_s7]]   ;;  %s15324_s7 = smov 30  }
  0x31   :  { %s15523_s5 = sld [smem:[%s17047_s0 + %s15321_s15]]   ;;  %s15325_s15 = smov 31  }
  0x32   :  { %17120 = sst [smem:[#allocation81_spill]] %s15513_s9 }
  0x33   :  { %s15528_s25 = sld [smem:[%s17047_s0 + %s15322_s22]]   ;;  %s15326_s22 = smov 32  }
  0x34   :  { %s15533_s9 = sld [smem:[%s17047_s0 + %s15323_s28]]   ;;  %s15327_s28 = smov 33  }
  0x35   :  { %s15538_s6 = sld [smem:[%s17047_s0 + %s15324_s7]]   ;;  %s15328_s7 = smov 34  }
  0x36   :  { %17121 = sst [smem:[#allocation82_spill]] %s15518_s8 }
  0x37   :  { %17122 = sst [smem:[#allocation83_spill]] %s15523_s5 }
  0x38   :  { %s15543_s5 = sld [smem:[%s17047_s0 + %s15325_s15]]   ;;  %s15329_s15 = smov 35  }
  0x39   :  { %s15548_s27 = sld [smem:[%s17047_s0 + %s15326_s22]]   ;;  %s15330_s22 = smov 36  }
  0x3a   :  { %17123 = sst [smem:[#allocation84_spill]] %s15533_s9 }
  0x3b   :  { %17124 = sst [smem:[#allocation85_spill]] %s15538_s6 }
  0x3c   :  { %s15553_s9 = sld [smem:[%s17047_s0 + %s15327_s28]]   ;;  %s15331_s28 = smov 37  }
  0x3d   :  { %s15558_s12 = sld [smem:[%s17047_s0 + %s15328_s7]]   ;;  %s15332_s7 = smov 38  }
  0x3e   :  { %17125 = sst [smem:[#allocation86_spill]] %s15543_s5 }
  0x3f   :  { %s15563_s5 = sld [smem:[%s17047_s0 + %s15329_s15]]   ;;  %s15333_s15 = smov 39  }
  0x40   :  { %s15568_s24 = sld [smem:[%s17047_s0 + %s15330_s22]]  }
  0x41   :  { %s15578_s14 = sld [smem:[%s17047_s0 + %s15332_s7]]  }
  0x42   :  { %17126 = sst [smem:[#allocation87_spill]] %s15553_s9 }
  0x43   :  { %17127 = sst [smem:[#allocation88_spill]] %s15558_s12 }
  0x44   :  { %s15573_s9 = sld [smem:[%s17047_s0 + %s15331_s28]]  }
  0x45   :  { %17128 = sst [smem:[#allocation89_spill]] %s15563_s5 }
  0x46   :  { %s15583_s5 = sld [smem:[%s17047_s0 + %s15333_s15]]  }
  0x47   :  { %84 = vsyncpa [#allocation3], 0 }
  0x48   :  { %85 = vsyncpa [#allocation5], 0 }
  0x49   :  { %86 = vsyncpa [#allocation8], 0 }
  0x4a   :  { %87 = vsyncpa [#allocation11], 0 }
  0x4b   :  { %88 = vsyncpa [#allocation14], 0 }
  0x4c   :  { %89 = vsyncpa [#allocation17], 0 }
  0x4d   :  { %90 = vsyncpa [#allocation20], 0 }
  0x4e   :  { %91 = vsyncpa [#allocation23], 0 }
  0x4f   :  { %92 = vsyncpa [#allocation26], 0 }
  0x50   :  { %93 = vsyncpa [#allocation29], 0 }
  0x51   :  { %94 = vsyncpa [#allocation32], 0 }
  0x52   :  { %95 = vsyncpa [#allocation35], 0 }
  0x53   :  { %96 = vsyncpa [#allocation38], 0 }
  0x54   :  { %97 = vsyncpa [#allocation41], 0 }
  0x55   :  { %98 = vsyncpa [#allocation44], 0  ;;  %s15585_s22 = smov 0  }
  0x56 LB: > { %s17129_s13 = sld [smem:[#allocation80_spill]]  ;;  %s17131_s8 = sld [smem:[#allocation82_spill]]  ;;  %s15293_s22 = sphi %s15585_s22, %s104_s22  }
  0x57   : > { %s17130_s12 = sld [smem:[#allocation88_spill]]  ;;  %s17132_s6 = sld [smem:[#allocation85_spill]] }
  0x58   : > { %s17133_s4 = sld [smem:[#allocation75_spill]]  ;;  %s17134_s20 = sld [smem:[#allocation73_spill]] }
  0x59   : > { %s17135_s19 = sld [smem:[#allocation69_spill]]  ;;  %s17136_s3 = sld [smem:[#allocation66_spill]] }
  0x5a   : > { %s15334_s0 = smov [#allocation4]   ;;  %s15591_s26 = sadd.s32 4294967295, %s15293_s22  }
  0x5b   : > { %s1009_s23 = sshll.u32 %s15334_s0, 4  ;;  %p11836_p0 = scmp.ge.s32.totalorder %s15293_s22, 1  ;;  %s15596_s23 = int_to_ptr.vmem [resolvable:$true] %s1009_s23 }
  0x5c   : > { %p984_p1 = scmp.lt.s32.totalorder %s15293_s22, 3  ;;  %p17064_p2 = scmp.eq.s32.totalorder %s15591_s26, 0 }
  0x5d   : > { %s15335_s2 = smov [#allocation7]   ;;  %s15336_s10 = smov [#allocation10]  }
  0x5e   : > { %p15598_p3 = pnand %p11836_p0, %p984_p1  ;;  %s1038_s7 = sshll.u32 %s15335_s2, 4  ;;  %s15610_s7 = int_to_ptr.vmem [resolvable:$true] %s1038_s7 }
  0x5f   : > { %s1064_s11 = sshll.u32 %s15336_s10, 4  ;;  %s14443_s15 = scalar_lea.hbm %s17136_s3, 960  ;;  %s15612_s11 = int_to_ptr.vmem [resolvable:$true] %s1064_s11 }
  0x60   : > { %s17137_s28 = scalar_select %p15598_p3, 1, 0 }
  0x61   : > { %p13416_p4 = pneg %p15598_p3  ;;  %p14444_p6 = scmp.ne.s32.totalorder %s17136_s3, %s14443_s15 }
  0x62   : > { %p14450_p10 = scmp.lt.u32.totalorder %s14443_s15, %s17136_s3 }
  0x63   : > { %p15606_p5 = pnand %p17064_p2, %p13416_p4 }
  0x65   : > { %p15618_p7 = pneg %p15606_p5 }
  0x67   : > { %p14446_p8 = pnand %p15618_p7, %p14444_p6 }
  0x69   : > { %p14447_p9 = pneg %p14446_p8 }
  0x6b   : > { %p14452_p11 = pnand %p14450_p10, %p14447_p9 }
  0x6d   : > { %14455 = shalt.err (!%p14452_p11)
}
  0x6e   : > { %s14456_s18 = scalar_lea.vmem %s15596_s23, 960  ;;  %p14464_p1 = scmp.lt.s32.totalorder %s15596_s23, %s15596_s23 }
  0x6f   : > { %p14457_p12 = scmp.ne.s32.totalorder %s15596_s23, %s14456_s18  ;;  %p14465_p4 = scmp.lt.s32.totalorder %s14456_s18, %s14456_s18 }
  0x71   : > { %p14459_p13 = pnand %p14457_p12, %p15618_p7  ;;  %p14466_p2 = por %p14465_p4, %p14464_p1 }
  0x73   : > { %p14460_p0 = pneg %p14459_p13 }
  0x75   : > { %p14467_p3 = pnand %p14466_p2, %p14460_p0 }
  0x77   : > { %14470 = shalt.err (!%p14467_p3)
}
  0x78   : > { %s17066_s0 = smov 64   ;;  %s17073_s2 = smov 4  }
  0x79   : > { %13422 = dma.hbm_to_vmem [thread:$0]  (!%p15606_p5), %s17136_s3, 960, %s15596_s23, [#allocation5], %s17066_s0, %s17066_s0, %s17073_s2  }
  0x7a   : > { %s14471_s10 = scalar_lea.hbm %s17135_s19, 48 }
  0x7b   : > { %p14472_p6 = scmp.ne.s32.totalorder %s17135_s19, %s14471_s10  ;;  %p14478_p3 = scmp.lt.u32.totalorder %s14471_s10, %s17135_s19 }
  0x7d   : > { %p14474_p8 = pnand %p14472_p6, %p15618_p7 }
  0x7f   : > { %p14475_p2 = pneg %p14474_p8 }
  0x81   : > { %p14480_p9 = pnand %p14478_p3, %p14475_p2 }
  0x83   : > { %14483 = shalt.err (!%p14480_p9)
}
  0x84   : > { %s14484_s15 = scalar_lea.vmem %s15610_s7, 48  ;;  %s14491_s18 = scalar_lea.vmem %s15610_s7, 64 }
  0x85   : > { %p14485_p10 = scmp.ne.s32.totalorder %s15610_s7, %s14484_s15  ;;  %p14492_p13 = scmp.lt.s32.totalorder %s15610_s7, %s15610_s7 }
  0x86   : > { %p14493_p0 = scmp.lt.s32.totalorder %s14491_s18, %s14484_s15 }
  0x87   : > { %p14487_p11 = pnand %p14485_p10, %p15618_p7 }
  0x88   : > { %p14494_p1 = por %p14493_p0, %p14492_p13 }
  0x89   : > { %p14488_p12 = pneg %p14487_p11 }
  0x8b   : > { %p14495_p4 = pnand %p14494_p1, %p14488_p12 }
  0x8d   : > { %14498 = shalt.err (!%p14495_p4)
}
  0x8e   : > { %s17068_s23 = smov 16   ;;  %s17070_s10 = smov 1  }
  0x8f   : > { %13428 = dma.hbm_to_vmem [thread:$0]  (!%p15606_p5), %s17135_s19, 48, %s15610_s7, [#allocation8], %s17068_s23, %s17068_s23, %s17070_s10  }
  0x90   : > { %s14499_s0 = scalar_lea.hbm %s15448_s30, 960 }
  0x91   : > { %p14500_p6 = scmp.ne.s32.totalorder %s15448_s30, %s14499_s0  ;;  %p14506_p3 = scmp.lt.u32.totalorder %s14499_s0, %s15448_s30 }
  0x93   : > { %p14502_p8 = pnand %p14500_p6, %p15618_p7 }
  0x95   : > { %p14503_p2 = pneg %p14502_p8 }
  0x97   : > { %p14508_p9 = pnand %p14506_p3, %p14503_p2 }
  0x99   : > { %14511 = shalt.err (!%p14508_p9)
}
  0x9a   : > { %s14512_s15 = scalar_lea.vmem %s15612_s11, 960  ;;  %p14520_p13 = scmp.lt.s32.totalorder %s15612_s11, %s15612_s11 }
  0x9b   : > { %p14513_p10 = scmp.ne.s32.totalorder %s15612_s11, %s14512_s15  ;;  %p14521_p0 = scmp.lt.s32.totalorder %s14512_s15, %s14512_s15 }
  0x9d   : > { %p14515_p11 = pnand %p14513_p10, %p15618_p7  ;;  %p14522_p1 = por %p14521_p0, %p14520_p13 }
  0x9f   : > { %p14516_p12 = pneg %p14515_p11 }
  0xa1   : > { %p14523_p4 = pnand %p14522_p1, %p14516_p12 }
  0xa3   : > { %14526 = shalt.err (!%p14523_p4)
}
  0xa4   : > { %s17140_s7 = smov 64   ;;  %s15341_s0 = smov [#allocation13]  }
  0xa5   : > { %13434 = dma.hbm_to_vmem [thread:$0]  (!%p15606_p5), %s15448_s30, 960, %s15612_s11, [#allocation11], %s17140_s7, %s17140_s7, %s17073_s2  }
  0xa6   : > { %s1093_s18 = sshll.u32 %s15341_s0, 4  ;;  %s15342_s23 = smov [#allocation16]   ;;  %s1094_s18 = int_to_ptr.vmem [resolvable:$true] %s1093_s18 }
  0xa7   : > { %s1119_s15 = sshll.u32 %s15342_s23, 4  ;;  %s14527_s10 = scalar_lea.hbm %s17134_s20, 48  ;;  %s1120_s15 = int_to_ptr.vmem [resolvable:$true] %s1119_s15 }
  0xa8   : > { %p14528_p6 = scmp.ne.s32.totalorder %s17134_s20, %s14527_s10  ;;  %p14534_p3 = scmp.lt.u32.totalorder %s14527_s10, %s17134_s20 }
  0xaa   : > { %p14530_p8 = pnand %p14528_p6, %p15618_p7 }
  0xac   : > { %p14531_p2 = pneg %p14530_p8 }
  0xae   : > { %p14536_p9 = pnand %p14534_p3, %p14531_p2 }
  0xb0   : > { %14539 = shalt.err (!%p14536_p9)
}
  0xb1   : > { %s14540_s3 = scalar_lea.vmem %s1094_s18, 48  ;;  %s14547_s11 = scalar_lea.vmem %s1094_s18, 64 }
  0xb2   : > { %p14541_p10 = scmp.ne.s32.totalorder %s1094_s18, %s14540_s3  ;;  %p14548_p13 = scmp.lt.s32.totalorder %s1094_s18, %s1094_s18 }
  0xb3   : > { %p14549_p0 = scmp.lt.s32.totalorder %s14547_s11, %s14540_s3 }
  0xb4   : > { %p14543_p11 = pnand %p14541_p10, %p15618_p7 }
  0xb5   : > { %p14550_p1 = por %p14549_p0, %p14548_p13 }
  0xb6   : > { %p14544_p12 = pneg %p14543_p11 }
  0xb8   : > { %p14551_p4 = pnand %p14550_p1, %p14544_p12 }
  0xba   : > { %14554 = shalt.err (!%p14551_p4)
}
  0xbb   : > { %s17141_s23 = smov 1   ;;  %s17142_s0 = smov 16  }
  0xbc   : > { %13440 = dma.hbm_to_vmem [thread:$0]  (!%p15606_p5), %s17134_s20, 48, %s1094_s18, [#allocation14], %s17142_s0, %s17142_s0, %s17141_s23  }
  0xbd   : > { %s14555_s10 = scalar_lea.hbm %s17133_s4, 4096 }
  0xbe   : > { %p14556_p6 = scmp.ne.s32.totalorder %s17133_s4, %s14555_s10  ;;  %p14562_p3 = scmp.lt.u32.totalorder %s14555_s10, %s17133_s4 }
  0xc0   : > { %p14558_p8 = pnand %p14556_p6, %p15618_p7 }
  0xc2   : > { %p14559_p2 = pneg %p14558_p8 }
  0xc4   : > { %p14564_p9 = pnand %p14562_p3, %p14559_p2 }
  0xc6   : > { %14567 = shalt.err (!%p14564_p9)
}
  0xc7   : > { %s14568_s3 = scalar_lea.vmem %s1120_s15, 4096  ;;  %p14576_p13 = scmp.lt.s32.totalorder %s1120_s15, %s1120_s15 }
  0xc8   : > { %p14569_p10 = scmp.ne.s32.totalorder %s1120_s15, %s14568_s3  ;;  %p14577_p0 = scmp.lt.s32.totalorder %s14568_s3, %s14568_s3 }
  0xca   : > { %p14571_p11 = pnand %p14569_p10, %p15618_p7  ;;  %p14578_p1 = por %p14577_p0, %p14576_p13 }
  0xcc   : > { %p14572_p12 = pneg %p14571_p11 }
  0xce   : > { %p14579_p4 = pnand %p14578_p1, %p14572_p12 }
  0xd0   : > { %14582 = shalt.err (!%p14579_p4)
}
  0xd1   : > { %s17077_s18 = smov 256   ;;  %s15344_s11 = smov [#allocation19]  }
  0xd2   : > { %13446 = dma.hbm_to_vmem [thread:$0]  (!%p15606_p5), %s17133_s4, 4096, %s1120_s15, [#allocation17], %s17077_s18, %s17077_s18, %s17142_s0  }
  0xd3   : > { %s1143_s10 = sshll.u32 %s15344_s11, 4  ;;  %s15345_s2 = smov [#allocation22]   ;;  %s1144_s10 = int_to_ptr.vmem [resolvable:$true] %s1143_s10 }
  0xd4   : > { %s1170_s3 = sshll.u32 %s15345_s2, 4  ;;  %s14583_s19 = scalar_lea.hbm %s15483_s17, 4096  ;;  %s1171_s3 = int_to_ptr.vmem [resolvable:$true] %s1170_s3 }
  0xd5   : > { %p14584_p6 = scmp.ne.s32.totalorder %s15483_s17, %s14583_s19  ;;  %p14590_p3 = scmp.lt.u32.totalorder %s14583_s19, %s15483_s17 }
  0xd7   : > { %p14586_p8 = pnand %p14584_p6, %p15618_p7 }
  0xd9   : > { %p14587_p2 = pneg %p14586_p8 }
  0xdb   : > { %p14592_p9 = pnand %p14590_p3, %p14587_p2 }
  0xdd   : > { %14595 = shalt.err (!%p14592_p9)
}
  0xde   : > { %s14596_s20 = scalar_lea.vmem %s1144_s10, 4096  ;;  %p14604_p13 = scmp.lt.s32.totalorder %s1144_s10, %s1144_s10 }
  0xdf   : > { %p14597_p10 = scmp.ne.s32.totalorder %s1144_s10, %s14596_s20  ;;  %p14605_p0 = scmp.lt.s32.totalorder %s14596_s20, %s14596_s20 }
  0xe1   : > { %p14599_p11 = pnand %p14597_p10, %p15618_p7  ;;  %p14606_p1 = por %p14605_p0, %p14604_p13 }
  0xe3   : > { %p14600_p12 = pneg %p14599_p11 }
  0xe5   : > { %p14607_p4 = pnand %p14606_p1, %p14600_p12 }
  0xe7   : > { %14610 = shalt.err (!%p14607_p4)
}
  0xe8   : > { %13452 = dma.hbm_to_vmem [thread:$0]  (!%p15606_p5), %s15483_s17, 4096, %s1144_s10, [#allocation20], %s17077_s18, %s17077_s18, %s17142_s0  }
  0xe9   : > { %s14611_s19 = scalar_lea.hbm %s15493_s21, 64 }
  0xea   : > { %p14612_p6 = scmp.ne.s32.totalorder %s15493_s21, %s14611_s19  ;;  %p14618_p3 = scmp.lt.u32.totalorder %s14611_s19, %s15493_s21 }
  0xec   : > { %p14614_p8 = pnand %p14612_p6, %p15618_p7 }
  0xee   : > { %p14615_p2 = pneg %p14614_p8 }
  0xf0   : > { %p14620_p9 = pnand %p14618_p3, %p14615_p2 }
  0xf2   : > { %14623 = shalt.err (!%p14620_p9)
}
  0xf3   : > { %s14624_s20 = scalar_lea.vmem %s1171_s3, 64  ;;  %p14632_p13 = scmp.lt.s32.totalorder %s1171_s3, %s1171_s3 }
  0xf4   : > { %p14625_p10 = scmp.ne.s32.totalorder %s1171_s3, %s14624_s20  ;;  %p14633_p0 = scmp.lt.s32.totalorder %s14624_s20, %s14624_s20 }
  0xf6   : > { %p14627_p11 = pnand %p14625_p10, %p15618_p7  ;;  %p14634_p1 = por %p14633_p0, %p14632_p13 }
  0xf8   : > { %p14628_p12 = pneg %p14627_p11 }
  0xfa   : > { %p14635_p4 = pnand %p14634_p1, %p14628_p12 }
  0xfc   : > { %14638 = shalt.err (!%p14635_p4)
}
  0xfd   : > { %13458 = dma.hbm_to_vmem [thread:$0]  (!%p15606_p5), %s15493_s21, 64, %s1171_s3, [#allocation23]  }
  0xfe   : > { %s15346_s2 = smov [#allocation25]   ;;  %s14639_s11 = scalar_lea.hbm %s17129_s13, 128 }
  0xff   : > { %s1197_s15 = sshll.u32 %s15346_s2, 4  ;;  %p14640_p6 = scmp.ne.s32.totalorder %s17129_s13, %s14639_s11  ;;  %s1198_s15 = int_to_ptr.vmem [resolvable:$true] %s1197_s15 }
 0x100   : > { %p14646_p3 = scmp.lt.u32.totalorder %s14639_s11, %s17129_s13 }
 0x101   : > { %p14642_p8 = pnand %p14640_p6, %p15618_p7 }
 0x103   : > { %p14643_p2 = pneg %p14642_p8 }
 0x105   : > { %p14648_p9 = pnand %p14646_p3, %p14643_p2 }
 0x107   : > { %14651 = shalt.err (!%p14648_p9)
}
 0x108   : > { %s14652_s10 = scalar_lea.vmem %s1198_s15, 128  ;;  %p14660_p13 = scmp.lt.s32.totalorder %s1198_s15, %s1198_s15 }
 0x109   : > { %p14653_p10 = scmp.ne.s32.totalorder %s1198_s15, %s14652_s10  ;;  %p14661_p0 = scmp.lt.s32.totalorder %s14652_s10, %s14652_s10 }
 0x10b   : > { %p14655_p11 = pnand %p14653_p10, %p15618_p7  ;;  %p14662_p1 = por %p14661_p0, %p14660_p13 }
 0x10d   : > { %p14656_p12 = pneg %p14655_p11 }
 0x10f   : > { %p14663_p4 = pnand %p14662_p1, %p14656_p12 }
 0x111   : > { %14666 = shalt.err (!%p14663_p4)
}
 0x112   : > { %13464 = dma.hbm_to_vmem [thread:$0]  (!%p15606_p5), %s17129_s13, 128, %s1198_s15, [#allocation26]  }
 0x113   : > { %s15347_s3 = smov [#allocation28]   ;;  %s14667_s20 = scalar_lea.hbm %s17131_s8, 10240 }
 0x114   : > { %s1220_s19 = sshll.u32 %s15347_s3, 4  ;;  %p14668_p6 = scmp.ne.s32.totalorder %s17131_s8, %s14667_s20  ;;  %s1221_s19 = int_to_ptr.vmem [resolvable:$true] %s1220_s19 }
 0x115   : > { %p14674_p3 = scmp.lt.u32.totalorder %s14667_s20, %s17131_s8 }
 0x116   : > { %p14670_p8 = pnand %p14668_p6, %p15618_p7 }
 0x118   : > { %p14671_p2 = pneg %p14670_p8 }
 0x11a   : > { %p14676_p9 = pnand %p14674_p3, %p14671_p2 }
 0x11c   : > { %14679 = shalt.err (!%p14676_p9)
}
 0x11d   : > { %s14680_s2 = scalar_lea.vmem %s1221_s19, 10240  ;;  %p14688_p13 = scmp.lt.s32.totalorder %s1221_s19, %s1221_s19 }
 0x11e   : > { %p14681_p10 = scmp.ne.s32.totalorder %s1221_s19, %s14680_s2  ;;  %p14689_p0 = scmp.lt.s32.totalorder %s14680_s2, %s14680_s2 }
 0x120   : > { %p14683_p11 = pnand %p14681_p10, %p15618_p7  ;;  %p14690_p1 = por %p14689_p0, %p14688_p13 }
 0x122   : > { %p14684_p12 = pneg %p14683_p11 }
 0x124   : > { %p14691_p4 = pnand %p14690_p1, %p14684_p12 }
 0x126   : > { %14694 = shalt.err (!%p14691_p4)
}
 0x127   : > { %s17080_s15 = smov 512   ;;  %s17082_s11 = smov 32  }
 0x128   : > { %13470 = dma.hbm_to_vmem [thread:$0]  (!%p15606_p5), %s17131_s8, 10240, %s1221_s19, [#allocation29], %s17080_s15, %s17080_s15, %s17082_s11  }
 0x129   : > { %s15350_s10 = smov [#allocation31]   ;;  %s15351_s20 = smov [#allocation34]  }
 0x12a   : > { %s1244_s3 = sshll.u32 %s15350_s10, 4  ;;  %s1270_s2 = sshll.u32 %s15351_s20, 4  ;;  %s1245_s3 = int_to_ptr.vmem [resolvable:$true] %s1244_s3  ;;  %s1271_s2 = int_to_ptr.vmem [resolvable:$true] %s1270_s2 }
 0x12b   : > { %s14695_s18 = scalar_lea.hbm %s15528_s25, 6144 }
 0x12c   : > { %p14696_p6 = scmp.ne.s32.totalorder %s15528_s25, %s14695_s18  ;;  %p14702_p3 = scmp.lt.u32.totalorder %s14695_s18, %s15528_s25 }
 0x12e   : > { %p14698_p8 = pnand %p14696_p6, %p15618_p7 }
 0x130   : > { %p14699_p2 = pneg %p14698_p8 }
 0x132   : > { %p14704_p9 = pnand %p14702_p3, %p14699_p2 }
 0x134   : > { %14707 = shalt.err (!%p14704_p9)
}
 0x135   : > { %s14708_s4 = scalar_lea.vmem %s1245_s3, 6144  ;;  %p14716_p13 = scmp.lt.s32.totalorder %s1245_s3, %s1245_s3 }
 0x136   : > { %p14709_p10 = scmp.ne.s32.totalorder %s1245_s3, %s14708_s4  ;;  %p14717_p0 = scmp.lt.s32.totalorder %s14708_s4, %s14708_s4 }
 0x138   : > { %p14711_p11 = pnand %p14709_p10, %p15618_p7  ;;  %p14718_p1 = por %p14717_p0, %p14716_p13 }
 0x13a   : > { %p14712_p12 = pneg %p14711_p11 }
 0x13c   : > { %p14719_p4 = pnand %p14718_p1, %p14712_p12 }
 0x13e   : > { %14722 = shalt.err (!%p14719_p4)
}
 0x13f   : > { %s17084_s19 = smov 192   ;;  %s17086_s18 = smov 12  }
 0x140   : > { %13476 = dma.hbm_to_vmem [thread:$0]  (!%p15606_p5), %s15528_s25, 6144, %s1245_s3, [#allocation32], %s17084_s19, %s17084_s19, %s17086_s18  }
 0x141   : > { %s14723_s10 = scalar_lea.hbm %s17132_s6, 6144 }
 0x142   : > { %p14724_p6 = scmp.ne.s32.totalorder %s17132_s6, %s14723_s10  ;;  %p14730_p3 = scmp.lt.u32.totalorder %s14723_s10, %s17132_s6 }
 0x144   : > { %p14726_p8 = pnand %p14724_p6, %p15618_p7 }
 0x146   : > { %p14727_p2 = pneg %p14726_p8 }
 0x148   : > { %p14732_p9 = pnand %p14730_p3, %p14727_p2 }
 0x14a   : > { %14735 = shalt.err (!%p14732_p9)
}
 0x14b   : > { %s14736_s4 = scalar_lea.vmem %s1271_s2, 6144  ;;  %p14744_p13 = scmp.lt.s32.totalorder %s1271_s2, %s1271_s2 }
 0x14c   : > { %p14737_p10 = scmp.ne.s32.totalorder %s1271_s2, %s14736_s4  ;;  %p14745_p0 = scmp.lt.s32.totalorder %s14736_s4, %s14736_s4 }
 0x14e   : > { %p14739_p11 = pnand %p14737_p10, %p15618_p7  ;;  %p14746_p1 = por %p14745_p0, %p14744_p13 }
 0x150   : > { %p14740_p12 = pneg %p14739_p11 }
 0x152   : > { %p14747_p4 = pnand %p14746_p1, %p14740_p12 }
 0x154   : > { %14750 = shalt.err (!%p14747_p4)
}
 0x155   : > { %13482 = dma.hbm_to_vmem [thread:$0]  (!%p15606_p5), %s17132_s6, 6144, %s1271_s2, [#allocation35], %s17084_s19, %s17084_s19, %s17086_s18  }
 0x156   : > { %s15354_s3 = smov [#allocation37]   ;;  %s15355_s10 = smov [#allocation40]  }
 0x157   : > { %s1297_s20 = sshll.u32 %s15354_s3, 4  ;;  %s1321_s15 = sshll.u32 %s15355_s10, 4  ;;  %s1298_s20 = int_to_ptr.vmem [resolvable:$true] %s1297_s20  ;;  %s1322_s15 = int_to_ptr.vmem [resolvable:$true] %s1321_s15 }
 0x158   : > { %s14751_s4 = scalar_lea.hbm %s15548_s27, 48 }
 0x159   : > { %p14752_p6 = scmp.ne.s32.totalorder %s15548_s27, %s14751_s4  ;;  %p14758_p3 = scmp.lt.u32.totalorder %s14751_s4, %s15548_s27 }
 0x15b   : > { %p14754_p8 = pnand %p14752_p6, %p15618_p7 }
 0x15d   : > { %p14755_p2 = pneg %p14754_p8 }
 0x15f   : > { %p14760_p9 = pnand %p14758_p3, %p14755_p2 }
 0x161   : > { %14763 = shalt.err (!%p14760_p9)
}
 0x162   : > { %s14764_s11 = scalar_lea.vmem %s1298_s20, 48  ;;  %s14771_s2 = scalar_lea.vmem %s1298_s20, 64 }
 0x163   : > { %p14765_p10 = scmp.ne.s32.totalorder %s1298_s20, %s14764_s11  ;;  %p14772_p13 = scmp.lt.s32.totalorder %s1298_s20, %s1298_s20 }
 0x164   : > { %p14773_p0 = scmp.lt.s32.totalorder %s14771_s2, %s14764_s11 }
 0x165   : > { %p14767_p11 = pnand %p14765_p10, %p15618_p7 }
 0x166   : > { %p14774_p1 = por %p14773_p0, %p14772_p13 }
 0x167   : > { %p14768_p12 = pneg %p14767_p11 }
 0x169   : > { %p14775_p4 = pnand %p14774_p1, %p14768_p12 }
 0x16b   : > { %14778 = shalt.err (!%p14775_p4)
}
 0x16c   : > { %13488 = dma.hbm_to_vmem [thread:$0]  (!%p15606_p5), %s15548_s27, 48, %s1298_s20, [#allocation38]  }
 0x16d   : > { %s14779_s3 = scalar_lea.hbm %s17130_s12, 32 }
 0x16e   : > { %p14780_p6 = scmp.ne.s32.totalorder %s17130_s12, %s14779_s3  ;;  %p14786_p3 = scmp.lt.u32.totalorder %s14779_s3, %s17130_s12 }
 0x170   : > { %p14782_p8 = pnand %p14780_p6, %p15618_p7 }
 0x172   : > { %p14783_p2 = pneg %p14782_p8 }
 0x174   : > { %p14788_p9 = pnand %p14786_p3, %p14783_p2 }
 0x176   : > { %14791 = shalt.err (!%p14788_p9)
}
 0x177   : > { %s14792_s11 = scalar_lea.vmem %s1322_s15, 32  ;;  %p14800_p13 = scmp.lt.s32.totalorder %s1322_s15, %s1322_s15 }
 0x178   : > { %p14793_p10 = scmp.ne.s32.totalorder %s1322_s15, %s14792_s11  ;;  %p14801_p0 = scmp.lt.s32.totalorder %s14792_s11, %s14792_s11 }
 0x17a   : > { %p14795_p11 = pnand %p14793_p10, %p15618_p7  ;;  %p14802_p1 = por %p14801_p0, %p14800_p13 }
 0x17c   : > { %p14796_p12 = pneg %p14795_p11 }
 0x17e   : > { %p14803_p4 = pnand %p14802_p1, %p14796_p12 }
 0x180   : > { %14806 = shalt.err (!%p14803_p4)
}
 0x181   : > { %13494 = dma.hbm_to_vmem [thread:$0]  (!%p15606_p5), %s17130_s12, 32, %s1322_s15, [#allocation41]  }
 0x182   : > { %s15356_s20 = smov [#allocation2]   ;;  %s15357_s4 = smov [#allocation6]  }
 0x183   : > { %s996_s10 = sshll.u32 %s15356_s20, 4  ;;  %s1025_s2 = sshll.u32 %s15357_s4, 4  ;;  %s997_s10 = int_to_ptr.vmem [resolvable:$true] %s996_s10  ;;  %s1026_s2 = int_to_ptr.vmem [resolvable:$true] %s1025_s2 }
 0x184   : > { %s14807_s3 = scalar_lea.hbm %s15418_s29, 2880 }
 0x185   : > { %p14808_p6 = scmp.ne.s32.totalorder %s15418_s29, %s14807_s3  ;;  %p14814_p3 = scmp.lt.u32.totalorder %s14807_s3, %s15418_s29 }
 0x187   : > { %p14810_p8 = pnand %p14808_p6, %p15618_p7 }
 0x189   : > { %p14811_p2 = pneg %p14810_p8 }
 0x18b   : > { %p14816_p9 = pnand %p14814_p3, %p14811_p2 }
 0x18d   : > { %14819 = shalt.err (!%p14816_p9)
}
 0x18e   : > { %s14820_s11 = scalar_lea.vmem %s997_s10, 2880  ;;  %p14828_p13 = scmp.lt.s32.totalorder %s997_s10, %s997_s10 }
 0x18f   : > { %p14821_p10 = scmp.ne.s32.totalorder %s997_s10, %s14820_s11  ;;  %p14829_p0 = scmp.lt.s32.totalorder %s14820_s11, %s14820_s11 }
 0x191   : > { %p14823_p11 = pnand %p14821_p10, %p15618_p7  ;;  %p14830_p1 = por %p14829_p0, %p14828_p13 }
 0x193   : > { %p14824_p12 = pneg %p14823_p11 }
 0x195   : > { %p14831_p4 = pnand %p14830_p1, %p14824_p12 }
 0x197   : > { %14834 = shalt.err (!%p14831_p4)
}
 0x198   : > { %s17143_s15 = sld [smem:[#allocation68_spill]] }
 0x199   : > { %13419 = dma.hbm_to_vmem [thread:$0]  (!%p15606_p5), %s15418_s29, 2880, %s997_s10, [#allocation3], %s17084_s19, %s17084_s19, %s17086_s18  }
 0x19e   : > { %s14835_s20 = scalar_lea.hbm %s17143_s15, 48 }
 0x19f   : > { %p14836_p6 = scmp.ne.s32.totalorder %s17143_s15, %s14835_s20  ;;  %p14842_p3 = scmp.lt.u32.totalorder %s14835_s20, %s17143_s15 }
 0x1a1   : > { %p14838_p8 = pnand %p14836_p6, %p15618_p7 }
 0x1a3   : > { %p14839_p2 = pneg %p14838_p8 }
 0x1a5   : > { %p14844_p9 = pnand %p14842_p3, %p14839_p2 }
 0x1a7   : > { %14847 = shalt.err (!%p14844_p9)
}
 0x1a8   : > { %s14848_s4 = scalar_lea.vmem %s1026_s2, 48  ;;  %s14855_s3 = scalar_lea.vmem %s1026_s2, 64 }
 0x1a9   : > { %p14849_p10 = scmp.ne.s32.totalorder %s1026_s2, %s14848_s4  ;;  %p14856_p13 = scmp.lt.s32.totalorder %s1026_s2, %s1026_s2 }
 0x1aa   : > { %p14857_p0 = scmp.lt.s32.totalorder %s14855_s3, %s14848_s4 }
 0x1ab   : > { %p14851_p11 = pnand %p14849_p10, %p15618_p7 }
 0x1ac   : > { %p14858_p1 = por %p14857_p0, %p14856_p13 }
 0x1ad   : > { %p14852_p12 = pneg %p14851_p11 }
 0x1af   : > { %p14859_p4 = pnand %p14858_p1, %p14852_p12 }
 0x1b1   : > { %14862 = shalt.err (!%p14859_p4)
}
 0x1b2   : > { %s17144_s10 = sld [smem:[#allocation70_spill]]  ;;  %s15358_s11 = smov [#allocation9]  }
 0x1b3   : > { %13425 = dma.hbm_to_vmem [thread:$0]  (!%p15606_p5), %s17143_s15, 48, %s1026_s2, [#allocation5], %s17142_s0, %s17142_s0, %s17141_s23  }
 0x1b4   : > { %s1051_s20 = sshll.u32 %s15358_s11, 4  ;;  %s15359_s19 = smov [#allocation12]   ;;  %s1052_s20 = int_to_ptr.vmem [resolvable:$true] %s1051_s20 }
 0x1b5   : > { %s1080_s18 = sshll.u32 %s15359_s19, 4  ;;  %s1081_s18 = int_to_ptr.vmem [resolvable:$true] %s1080_s18 }
 0x1b8   : > { %s14863_s4 = scalar_lea.hbm %s17144_s10, 2880 }
 0x1b9   : > { %p14864_p6 = scmp.ne.s32.totalorder %s17144_s10, %s14863_s4  ;;  %p14870_p3 = scmp.lt.u32.totalorder %s14863_s4, %s17144_s10 }
 0x1bb   : > { %p14866_p8 = pnand %p14864_p6, %p15618_p7 }
 0x1bd   : > { %p14867_p2 = pneg %p14866_p8 }
 0x1bf   : > { %p14872_p9 = pnand %p14870_p3, %p14867_p2 }
 0x1c1   : > { %14875 = shalt.err (!%p14872_p9)
}
 0x1c2   : > { %s14876_s3 = scalar_lea.vmem %s1052_s20, 2880  ;;  %p14884_p13 = scmp.lt.s32.totalorder %s1052_s20, %s1052_s20 }
 0x1c3   : > { %p14877_p10 = scmp.ne.s32.totalorder %s1052_s20, %s14876_s3  ;;  %p14885_p0 = scmp.lt.s32.totalorder %s14876_s3, %s14876_s3 }
 0x1c5   : > { %p14879_p11 = pnand %p14877_p10, %p15618_p7  ;;  %p14886_p1 = por %p14885_p0, %p14884_p13 }
 0x1c7   : > { %p14880_p12 = pneg %p14879_p11 }
 0x1c9   : > { %p14887_p4 = pnand %p14886_p1, %p14880_p12 }
 0x1cb   : > { %14890 = shalt.err (!%p14887_p4)
}
 0x1cc   : > { %s17145_s19 = smov 12   ;;  %s17146_s2 = smov 192  }
 0x1cd   : > { %s17147_s11 = sld [smem:[#allocation72_spill]] }
 0x1ce   : > { %13431 = dma.hbm_to_vmem [thread:$0]  (!%p15606_p5), %s17144_s10, 2880, %s1052_s20, [#allocation8], %s17146_s2, %s17146_s2, %s17145_s19  }
 0x1d3   : > { %s14891_s4 = scalar_lea.hbm %s17147_s11, 48 }
 0x1d4   : > { %p14892_p6 = scmp.ne.s32.totalorder %s17147_s11, %s14891_s4  ;;  %p14898_p3 = scmp.lt.u32.totalorder %s14891_s4, %s17147_s11 }
 0x1d6   : > { %p14894_p8 = pnand %p14892_p6, %p15618_p7 }
 0x1d8   : > { %p14895_p2 = pneg %p14894_p8 }
 0x1da   : > { %p14900_p9 = pnand %p14898_p3, %p14895_p2 }
 0x1dc   : > { %14903 = shalt.err (!%p14900_p9)
}
 0x1dd   : > { %s14904_s3 = scalar_lea.vmem %s1081_s18, 48  ;;  %s14911_s6 = scalar_lea.vmem %s1081_s18, 64 }
 0x1de   : > { %p14905_p10 = scmp.ne.s32.totalorder %s1081_s18, %s14904_s3  ;;  %p14912_p13 = scmp.lt.s32.totalorder %s1081_s18, %s1081_s18 }
 0x1df   : > { %p14913_p0 = scmp.lt.s32.totalorder %s14911_s6, %s14904_s3 }
 0x1e0   : > { %p14907_p11 = pnand %p14905_p10, %p15618_p7 }
 0x1e1   : > { %p14914_p1 = por %p14913_p0, %p14912_p13 }
 0x1e2   : > { %p14908_p12 = pneg %p14907_p11 }
 0x1e4   : > { %p14915_p4 = pnand %p14914_p1, %p14908_p12 }
 0x1e6   : > { %14918 = shalt.err (!%p14915_p4)
}
 0x1e7   : > { %s17148_s20 = sld [smem:[#allocation74_spill]]  ;;  %s15360_s4 = smov [#allocation15]  }
 0x1e8   : > { %13437 = dma.hbm_to_vmem [thread:$0]  (!%p15606_p5), %s17147_s11, 48, %s1081_s18, [#allocation11], %s17142_s0, %s17142_s0, %s17141_s23  }
 0x1e9   : > { %s1106_s8 = sshll.u32 %s15360_s4, 4  ;;  %s15361_s10 = smov [#allocation18]   ;;  %s1107_s8 = int_to_ptr.vmem [resolvable:$true] %s1106_s8 }
 0x1ea   : > { %s1133_s12 = sshll.u32 %s15361_s10, 4  ;;  %s1134_s12 = int_to_ptr.vmem [resolvable:$true] %s1133_s12 }
 0x1ed   : > { %s14919_s6 = scalar_lea.hbm %s17148_s20, 4096 }
 0x1ee   : > { %p14920_p6 = scmp.ne.s32.totalorder %s17148_s20, %s14919_s6  ;;  %p14926_p3 = scmp.lt.u32.totalorder %s14919_s6, %s17148_s20 }
 0x1f0   : > { %p14922_p8 = pnand %p14920_p6, %p15618_p7 }
 0x1f2   : > { %p14923_p2 = pneg %p14922_p8 }
 0x1f4   : > { %p14928_p9 = pnand %p14926_p3, %p14923_p2 }
 0x1f6   : > { %14931 = shalt.err (!%p14928_p9)
}
 0x1f7   : > { %s14932_s3 = scalar_lea.vmem %s1107_s8, 4096  ;;  %p14940_p13 = scmp.lt.s32.totalorder %s1107_s8, %s1107_s8 }
 0x1f8   : > { %p14933_p10 = scmp.ne.s32.totalorder %s1107_s8, %s14932_s3  ;;  %p14941_p0 = scmp.lt.s32.totalorder %s14932_s3, %s14932_s3 }
 0x1fa   : > { %p14935_p11 = pnand %p14933_p10, %p15618_p7  ;;  %p14942_p1 = por %p14941_p0, %p14940_p13 }
 0x1fc   : > { %p14936_p12 = pneg %p14935_p11 }
 0x1fe   : > { %p14943_p4 = pnand %p14942_p1, %p14936_p12 }
 0x200   : > { %14946 = shalt.err (!%p14943_p4)
}
 0x201   : > { %s17149_s23 = smov 256   ;;  %s17150_s18 = sld [smem:[#allocation76_spill]] }
 0x202   : > { %13443 = dma.hbm_to_vmem [thread:$0]  (!%p15606_p5), %s17148_s20, 4096, %s1107_s8, [#allocation14], %s17149_s23, %s17149_s23, %s17142_s0  }
 0x207   : > { %s14947_s10 = scalar_lea.hbm %s17150_s18, 64 }
 0x208   : > { %p14948_p6 = scmp.ne.s32.totalorder %s17150_s18, %s14947_s10  ;;  %p14954_p3 = scmp.lt.u32.totalorder %s14947_s10, %s17150_s18 }
 0x20a   : > { %p14950_p8 = pnand %p14948_p6, %p15618_p7 }
 0x20c   : > { %p14951_p2 = pneg %p14950_p8 }
 0x20e   : > { %p14956_p9 = pnand %p14954_p3, %p14951_p2 }
 0x210   : > { %14959 = shalt.err (!%p14956_p9)
}
 0x211   : > { %s14960_s4 = scalar_lea.vmem %s1134_s12, 64  ;;  %p14968_p13 = scmp.lt.s32.totalorder %s1134_s12, %s1134_s12 }
 0x212   : > { %p14961_p10 = scmp.ne.s32.totalorder %s1134_s12, %s14960_s4  ;;  %p14969_p0 = scmp.lt.s32.totalorder %s14960_s4, %s14960_s4 }
 0x214   : > { %p14963_p11 = pnand %p14961_p10, %p15618_p7  ;;  %p14970_p1 = por %p14969_p0, %p14968_p13 }
 0x216   : > { %p14964_p12 = pneg %p14963_p11 }
 0x218   : > { %p14971_p4 = pnand %p14970_p1, %p14964_p12 }
 0x21a   : > { %14974 = shalt.err (!%p14971_p4)
}
 0x21b   : > { %s17151_s8 = sld [smem:[#allocation77_spill]]  ;;  %s15362_s6 = smov [#allocation21]  }
 0x21c   : > { %13449 = dma.hbm_to_vmem [thread:$0]  (!%p15606_p5), %s17150_s18, 64, %s1134_s12, [#allocation17]  }
 0x21d   : > { %s1156_s3 = sshll.u32 %s15362_s6, 4  ;;  %s15363_s10 = smov [#allocation24]   ;;  %s1157_s3 = int_to_ptr.vmem [resolvable:$true] %s1156_s3 }
 0x21e   : > { %s1180_s11 = sshll.u32 %s15363_s10, 4  ;;  %s1181_s11 = int_to_ptr.vmem [resolvable:$true] %s1180_s11 }
 0x221   : > { %s14975_s13 = scalar_lea.hbm %s17151_s8, 4096 }
 0x222   : > { %p14976_p6 = scmp.ne.s32.totalorder %s17151_s8, %s14975_s13  ;;  %p14982_p3 = scmp.lt.u32.totalorder %s14975_s13, %s17151_s8 }
 0x224   : > { %p14978_p8 = pnand %p14976_p6, %p15618_p7 }
 0x226   : > { %p14979_p2 = pneg %p14978_p8 }
 0x228   : > { %p14984_p9 = pnand %p14982_p3, %p14979_p2 }
 0x22a   : > { %14987 = shalt.err (!%p14984_p9)
}
 0x22b   : > { %s14988_s4 = scalar_lea.vmem %s1157_s3, 4096  ;;  %p14996_p13 = scmp.lt.s32.totalorder %s1157_s3, %s1157_s3 }
 0x22c   : > { %p14989_p10 = scmp.ne.s32.totalorder %s1157_s3, %s14988_s4  ;;  %p14997_p0 = scmp.lt.s32.totalorder %s14988_s4, %s14988_s4 }
 0x22e   : > { %p14991_p11 = pnand %p14989_p10, %p15618_p7  ;;  %p14998_p1 = por %p14997_p0, %p14996_p13 }
 0x230   : > { %p14992_p12 = pneg %p14991_p11 }
 0x232   : > { %p14999_p4 = pnand %p14998_p1, %p14992_p12 }
 0x234   : > { %15002 = shalt.err (!%p14999_p4)
}
 0x235   : > { %s17152_s13 = sld [smem:[#allocation78_spill]] }
 0x236   : > { %13455 = dma.hbm_to_vmem [thread:$0]  (!%p15606_p5), %s17151_s8, 4096, %s1157_s3, [#allocation20], %s17149_s23, %s17149_s23, %s17142_s0  }
 0x23b   : > { %s15003_s12 = scalar_lea.hbm %s17152_s13, 16384 }
 0x23c   : > { %p15004_p6 = scmp.ne.s32.totalorder %s17152_s13, %s15003_s12  ;;  %p15010_p3 = scmp.lt.u32.totalorder %s15003_s12, %s17152_s13 }
 0x23e   : > { %p15006_p8 = pnand %p15004_p6, %p15618_p7 }
 0x240   : > { %p15007_p2 = pneg %p15006_p8 }
 0x242   : > { %p15012_p9 = pnand %p15010_p3, %p15007_p2 }
 0x244   : > { %15015 = shalt.err (!%p15012_p9)
}
 0x245   : > { %s15016_s6 = scalar_lea.vmem %s1181_s11, 16384  ;;  %p15024_p13 = scmp.lt.s32.totalorder %s1181_s11, %s1181_s11 }
 0x246   : > { %p15017_p10 = scmp.ne.s32.totalorder %s1181_s11, %s15016_s6  ;;  %p15025_p0 = scmp.lt.s32.totalorder %s15016_s6, %s15016_s6 }
 0x248   : > { %p15019_p11 = pnand %p15017_p10, %p15618_p7  ;;  %p15026_p1 = por %p15025_p0, %p15024_p13 }
 0x24a   : > { %p15020_p12 = pneg %p15019_p11 }
 0x24c   : > { %p15027_p4 = pnand %p15026_p1, %p15020_p12 }
 0x24e   : > { %15030 = shalt.err (!%p15027_p4)
}
 0x24f   : > { %s17153_s0 = smov 32   ;;  %s17154_s23 = smov 512  }
 0x250   : > { %s17155_s3 = sld [smem:[#allocation81_spill]]  ;;  %s15364_s10 = smov [#allocation27]  }
 0x251   : > { %13461 = dma.hbm_to_vmem [thread:$0]  (!%p15606_p5), %s17152_s13, 16384, %s1181_s11, [#allocation23], %s17154_s23, %s17154_s23, %s17153_s0  }
 0x252   : > { %s1207_s4 = sshll.u32 %s15364_s10, 4  ;;  %s15365_s12 = smov [#allocation30]   ;;  %s1208_s4 = int_to_ptr.vmem [resolvable:$true] %s1207_s4 }
 0x253   : > { %s1234_s8 = sshll.u32 %s15365_s12, 4  ;;  %s1235_s8 = int_to_ptr.vmem [resolvable:$true] %s1234_s8 }
 0x256   : > { %s15031_s6 = scalar_lea.hbm %s17155_s3, 16384 }
 0x257   : > { %p15032_p6 = scmp.ne.s32.totalorder %s17155_s3, %s15031_s6  ;;  %p15038_p3 = scmp.lt.u32.totalorder %s15031_s6, %s17155_s3 }
 0x259   : > { %p15034_p8 = pnand %p15032_p6, %p15618_p7 }
 0x25b   : > { %p15035_p2 = pneg %p15034_p8 }
 0x25d   : > { %p15040_p9 = pnand %p15038_p3, %p15035_p2 }
 0x25f   : > { %15043 = shalt.err (!%p15040_p9)
}
 0x260   : > { %s15044_s15 = scalar_lea.vmem %s1208_s4, 16384  ;;  %p15052_p13 = scmp.lt.s32.totalorder %s1208_s4, %s1208_s4 }
 0x261   : > { %p15045_p10 = scmp.ne.s32.totalorder %s1208_s4, %s15044_s15  ;;  %p15053_p0 = scmp.lt.s32.totalorder %s15044_s15, %s15044_s15 }
 0x263   : > { %p15047_p11 = pnand %p15045_p10, %p15618_p7  ;;  %p15054_p1 = por %p15053_p0, %p15052_p13 }
 0x265   : > { %p15048_p12 = pneg %p15047_p11 }
 0x267   : > { %p15055_p4 = pnand %p15054_p1, %p15048_p12 }
 0x269   : > { %15058 = shalt.err (!%p15055_p4)
}
 0x26a   : > { %s17156_s11 = sld [smem:[#allocation83_spill]] }
 0x26b   : > { %13467 = dma.hbm_to_vmem [thread:$0]  (!%p15606_p5), %s17155_s3, 16384, %s1208_s4, [#allocation26], %s17154_s23, %s17154_s23, %s17153_s0  }
 0x270   : > { %s15059_s10 = scalar_lea.hbm %s17156_s11, 128 }
 0x271   : > { %p15060_p6 = scmp.ne.s32.totalorder %s17156_s11, %s15059_s10  ;;  %p15066_p3 = scmp.lt.u32.totalorder %s15059_s10, %s17156_s11 }
 0x273   : > { %p15062_p8 = pnand %p15060_p6, %p15618_p7 }
 0x275   : > { %p15063_p2 = pneg %p15062_p8 }
 0x277   : > { %p15068_p9 = pnand %p15066_p3, %p15063_p2 }
 0x279   : > { %15071 = shalt.err (!%p15068_p9)
}
 0x27a   : > { %s15072_s15 = scalar_lea.vmem %s1235_s8, 128  ;;  %p15080_p13 = scmp.lt.s32.totalorder %s1235_s8, %s1235_s8 }
 0x27b   : > { %p15073_p10 = scmp.ne.s32.totalorder %s1235_s8, %s15072_s15  ;;  %p15081_p0 = scmp.lt.s32.totalorder %s15072_s15, %s15072_s15 }
 0x27d   : > { %p15075_p11 = pnand %p15073_p10, %p15618_p7  ;;  %p15082_p1 = por %p15081_p0, %p15080_p13 }
 0x27f   : > { %p15076_p12 = pneg %p15075_p11 }
 0x281   : > { %p15083_p4 = pnand %p15082_p1, %p15076_p12 }
 0x283   : > { %15086 = shalt.err (!%p15083_p4)
}
 0x284   : > { %s17157_s0 = sld [smem:[#allocation84_spill]]  ;;  %s15366_s23 = smov [#allocation33]  }
 0x285   : > { %13473 = dma.hbm_to_vmem [thread:$0]  (!%p15606_p5), %s17156_s11, 128, %s1235_s8, [#allocation29]  }
 0x286   : > { %s1257_s4 = sshll.u32 %s15366_s23, 4  ;;  %s15367_s12 = smov [#allocation36]   ;;  %s1258_s4 = int_to_ptr.vmem [resolvable:$true] %s1257_s4 }
 0x287   : > { %s1283_s6 = sshll.u32 %s15367_s12, 4  ;;  %s1284_s6 = int_to_ptr.vmem [resolvable:$true] %s1283_s6 }
 0x28a   : > { %s15087_s10 = scalar_lea.hbm %s17157_s0, 3840 }
 0x28b   : > { %p15088_p6 = scmp.ne.s32.totalorder %s17157_s0, %s15087_s10  ;;  %p15094_p3 = scmp.lt.u32.totalorder %s15087_s10, %s17157_s0 }
 0x28d   : > { %p15090_p8 = pnand %p15088_p6, %p15618_p7 }
 0x28f   : > { %p15091_p2 = pneg %p15090_p8 }
 0x291   : > { %p15096_p9 = pnand %p15094_p3, %p15091_p2 }
 0x293   : > { %15099 = shalt.err (!%p15096_p9)
}
 0x294   : > { %s15100_s15 = scalar_lea.vmem %s1258_s4, 3840  ;;  %p15108_p13 = scmp.lt.s32.totalorder %s1258_s4, %s1258_s4 }
 0x295   : > { %p15101_p10 = scmp.ne.s32.totalorder %s1258_s4, %s15100_s15  ;;  %p15109_p0 = scmp.lt.s32.totalorder %s15100_s15, %s15100_s15 }
 0x297   : > { %p15103_p11 = pnand %p15101_p10, %p15618_p7  ;;  %p15110_p1 = por %p15109_p0, %p15108_p13 }
 0x299   : > { %p15104_p12 = pneg %p15103_p11 }
 0x29b   : > { %p15111_p4 = pnand %p15110_p1, %p15104_p12 }
 0x29d   : > { %15114 = shalt.err (!%p15111_p4)
}
 0x29e   : > { %s17158_s8 = sld [smem:[#allocation86_spill]] }
 0x29f   : > { %13479 = dma.hbm_to_vmem [thread:$0]  (!%p15606_p5), %s17157_s0, 3840, %s1258_s4, [#allocation32], %s17146_s2, %s17146_s2, %s17145_s19  }
 0x2a4   : > { %s15115_s23 = scalar_lea.hbm %s17158_s8, 3840 }
 0x2a5   : > { %p15116_p6 = scmp.ne.s32.totalorder %s17158_s8, %s15115_s23  ;;  %p15122_p3 = scmp.lt.u32.totalorder %s15115_s23, %s17158_s8 }
 0x2a7   : > { %p15118_p8 = pnand %p15116_p6, %p15618_p7 }
 0x2a9   : > { %p15119_p2 = pneg %p15118_p8 }
 0x2ab   : > { %p15124_p9 = pnand %p15122_p3, %p15119_p2 }
 0x2ad   : > { %15127 = shalt.err (!%p15124_p9)
}
 0x2ae   : > { %s15128_s12 = scalar_lea.vmem %s1284_s6, 3840  ;;  %p15136_p13 = scmp.lt.s32.totalorder %s1284_s6, %s1284_s6 }
 0x2af   : > { %p15129_p10 = scmp.ne.s32.totalorder %s1284_s6, %s15128_s12  ;;  %p15137_p0 = scmp.lt.s32.totalorder %s15128_s12, %s15128_s12 }
 0x2b1   : > { %p15131_p11 = pnand %p15129_p10, %p15618_p7  ;;  %p15138_p1 = por %p15137_p0, %p15136_p13 }
 0x2b3   : > { %p15132_p12 = pneg %p15131_p11 }
 0x2b5   : > { %p15139_p4 = pnand %p15138_p1, %p15132_p12 }
 0x2b7   : > { %15142 = shalt.err (!%p15139_p4)
}
 0x2b8   : > { %s17159_s4 = sld [smem:[#allocation87_spill]]  ;;  %s15368_s10 = smov [#allocation39]  }
 0x2b9   : > { %13485 = dma.hbm_to_vmem [thread:$0]  (!%p15606_p5), %s17158_s8, 3840, %s1284_s6, [#allocation35], %s17146_s2, %s17146_s2, %s17145_s19  }
 0x2ba   : > { %s1307_s15 = sshll.u32 %s15368_s10, 4  ;;  %s1308_s15 = int_to_ptr.vmem [resolvable:$true] %s1307_s15 }
 0x2be   : > { %s15143_s23 = scalar_lea.hbm %s17159_s4, 6144 }
 0x2bf   : > { %p15144_p6 = scmp.ne.s32.totalorder %s17159_s4, %s15143_s23  ;;  %p15150_p3 = scmp.lt.u32.totalorder %s15143_s23, %s17159_s4 }
 0x2c1   : > { %p15146_p8 = pnand %p15144_p6, %p15618_p7 }
 0x2c3   : > { %p15147_p2 = pneg %p15146_p8 }
 0x2c5   : > { %p15152_p9 = pnand %p15150_p3, %p15147_p2 }
 0x2c7   : > { %15155 = shalt.err (!%p15152_p9)
}
 0x2c8   : > { %s15156_s12 = scalar_lea.vmem %s1308_s15, 6144  ;;  %p15164_p13 = scmp.lt.s32.totalorder %s1308_s15, %s1308_s15 }
 0x2c9   : > { %p15157_p10 = scmp.ne.s32.totalorder %s1308_s15, %s15156_s12  ;;  %p15165_p0 = scmp.lt.s32.totalorder %s15156_s12, %s15156_s12 }
 0x2cb   : > { %p15159_p11 = pnand %p15157_p10, %p15618_p7  ;;  %p15166_p1 = por %p15165_p0, %p15164_p13 }
 0x2cd   : > { %p15160_p12 = pneg %p15159_p11 }
 0x2cf   : > { %p15167_p4 = pnand %p15166_p1, %p15160_p12 }
 0x2d1   : > { %15170 = shalt.err (!%p15167_p4)
}
 0x2d2   : > { %s15369_s19 = smov 128   ;;  %s17160_s2 = sld [smem:[#allocation89_spill]] }
 0x2d3   : > { %s15370_s6 = smov 8   ;;  %s15371_s10 = smov [#allocation42]  }
 0x2d4   : > { %13491 = dma.hbm_to_vmem [thread:$0]  (!%p15606_p5), %s17159_s4, 6144, %s1308_s15, [#allocation38], %s15369_s19, %s15369_s19, %s15370_s6  }
 0x2d5   : > { %s1331_s23 = sshll.u32 %s15371_s10, 4  ;;  %s15372_s0 = smov [#allocation43]   ;;  %s1332_s23 = int_to_ptr.vmem [resolvable:$true] %s1331_s23 }
 0x2d6   : > { %s1347_s3 = sshll.u32 %s15372_s0, 4  ;;  %s15953_s3 = int_to_ptr.vmem [resolvable:$true] %s1347_s3 }
 0x2d8   : > { %s15171_s12 = scalar_lea.hbm %s17160_s2, 2048 }
 0x2d9   : > { %p15172_p6 = scmp.ne.s32.totalorder %s17160_s2, %s15171_s12  ;;  %p15178_p3 = scmp.lt.u32.totalorder %s15171_s12, %s17160_s2 }
 0x2db   : > { %p15174_p8 = pnand %p15172_p6, %p15618_p7 }
 0x2dd   : > { %p15175_p2 = pneg %p15174_p8 }
 0x2df   : > { %p15180_p9 = pnand %p15178_p3, %p15175_p2 }
 0x2e1   : > { %15183 = shalt.err (!%p15180_p9)
}
 0x2e2   : > { %s15184_s8 = scalar_lea.vmem %s1332_s23, 2048  ;;  %p15192_p13 = scmp.lt.s32.totalorder %s1332_s23, %s1332_s23 }
 0x2e3   : > { %p15185_p10 = scmp.ne.s32.totalorder %s1332_s23, %s15184_s8  ;;  %p15193_p0 = scmp.lt.s32.totalorder %s15184_s8, %s15184_s8 }
 0x2e5   : > { %p15187_p11 = pnand %p15185_p10, %p15618_p7  ;;  %p15194_p1 = por %p15193_p0, %p15192_p13 }
 0x2e7   : > { %p15188_p12 = pneg %p15187_p11 }
 0x2e9   : > { %p15195_p4 = pnand %p15194_p1, %p15188_p12 }
 0x2eb   : > { %15198 = shalt.err (!%p15195_p4)
}
 0x2ec   : > { %s17161_s0 = smov 4   ;;  %s15199_s15 = scalar_lea.hbm %s15573_s9, 1024 }
 0x2ed   : > { %13497 = dma.hbm_to_vmem [thread:$0]  (!%p15606_p5), %s17160_s2, 2048, %s1332_s23, [#allocation41], %s17140_s7, %s17140_s7, %s17161_s0  }
 0x2ee   : > { %p15200_p6 = scmp.ne.s32.totalorder %s15573_s9, %s15199_s15  ;;  %p15206_p3 = scmp.lt.u32.totalorder %s15199_s15, %s15573_s9 }
 0x2f0   : > { %p15202_p8 = pnand %p15200_p6, %p15618_p7 }
 0x2f2   : > { %p15203_p2 = pneg %p15202_p8 }
 0x2f4   : > { %p15208_p9 = pnand %p15206_p3, %p15203_p2 }
 0x2f6   : > { %15211 = shalt.err (!%p15208_p9)
}
 0x2f7   : > { %s15212_s8 = scalar_lea.vmem %s15953_s3, 1024  ;;  %p15220_p13 = scmp.lt.s32.totalorder %s15953_s3, %s15953_s3 }
 0x2f8   : > { %p15213_p10 = scmp.ne.s32.totalorder %s15953_s3, %s15212_s8  ;;  %p15221_p0 = scmp.lt.s32.totalorder %s15212_s8, %s15212_s8 }
 0x2fa   : > { %p15215_p11 = pnand %p15213_p10, %p15618_p7  ;;  %p15222_p1 = por %p15221_p0, %p15220_p13 }
 0x2fc   : > { %p15216_p12 = pneg %p15215_p11 }
 0x2fe   : > { %p15223_p4 = pnand %p15222_p1, %p15216_p12 }
 0x300   : > { %15226 = shalt.err (!%p15223_p4)
}
 0x301   : > { %13500 = dma.hbm_to_vmem [thread:$0]  (!%p15606_p5), %s15573_s9, 1024, %s15953_s3, [#allocation44], %s17140_s7, %s17140_s7, %s17161_s0  }
 0x302   : > { %p17162_p6 = scmp.ne.s32.totalorder %s17137_s28, 0 }
 0x303   : > { %p17163_p7 = scmp.eq.s32.totalorder (!%p17162_p6), %s15591_s26, 0 }
 0x304   : > { %1410 = sbr.rel (%p17162_p6) target bundleno = 7638 (0x1dd6), region = 176 }
 0x30b   : > { %15232 = dma.done.wait (%p17163_p7), [#allocation3], 2880   ;;  %p17164_p8 = pmov %p17163_p7 }
 0x30c   : > { %p17165_p2 = pmov %p17163_p7 }
 0x30d   : > { %15234 = vsyncadd (%p17164_p8), [#allocation3], 4294964416 }
 0x30e   : > { %15236 = dma.done.wait (%p17165_p2), [#allocation5], 1008   ;;  %p17166_p3 = pmov %p17165_p2 }
 0x30f   : > { %p17167_p9 = pmov %p17165_p2 }
 0x310   : > { %15238 = vsyncadd (%p17166_p3), [#allocation5], 4294966288 }
 0x311   : > { %15240 = dma.done.wait (%p17167_p9), [#allocation8], 2928   ;;  %p17168_p5 = pmov %p17165_p2 }
 0x312   : > { %p17169_p10 = pmov %p17165_p2 }
 0x313   : > { %15242 = vsyncadd (%p17168_p5), [#allocation8], 4294964368 }
 0x314   : > { %15244 = dma.done.wait (%p17169_p10), [#allocation11], 1008   ;;  %p17170_p11 = pmov %p17165_p2 }
 0x315   : > { %p17171_p12 = pmov %p17165_p2 }
 0x316   : > { %15246 = vsyncadd (%p17170_p11), [#allocation11], 4294966288 }
 0x317   : > { %15248 = dma.done.wait (%p17171_p12), [#allocation14], 4144   ;;  %p17172_p13 = pmov %p17165_p2 }
 0x318   : > { %p17173_p0 = pmov %p17165_p2 }
 0x319   : > { %15250 = vsyncadd (%p17172_p13), [#allocation14], 4294963152 }
 0x31a   : > { %15252 = dma.done.wait (%p17173_p0), [#allocation17], 4160   ;;  %p17174_p1 = pmov %p17173_p0 }
 0x31b   : > { %p17175_p4 = pmov %p17173_p0 }
 0x31c   : > { %15254 = vsyncadd (%p17174_p1), [#allocation17], 4294963136 }
 0x31d   : > { %15256 = dma.done.wait (%p17175_p4), [#allocation20], 8192   ;;  %p17176_p6 = pmov %p17173_p0 }
 0x31e   : > { %p17177_p7 = pmov %p17173_p0 }
 0x31f   : > { %15258 = vsyncadd (%p17176_p6), [#allocation20], 4294959104 }
 0x320   : > { %15260 = dma.done.wait (%p17177_p7), [#allocation23], 16448   ;;  %p17178_p8 = pmov %p17173_p0 }
 0x321   : > { %p17179_p2 = pmov %p17173_p0 }
 0x322   : > { %15262 = vsyncadd (%p17178_p8), [#allocation23], 4294950848 }
 0x323   : > { %15264 = dma.done.wait (%p17179_p2), [#allocation26], 16512   ;;  %p17180_p3 = pmov %p17173_p0 }
 0x324   : > { %p17181_p9 = pmov %p17173_p0 }
 0x325   : > { %15266 = vsyncadd (%p17180_p3), [#allocation26], 4294950784 }
 0x326   : > { %15268 = dma.done.wait (%p17181_p9), [#allocation29], 10368   ;;  %p17182_p5 = pmov %p17173_p0 }
 0x327   : > { %p17183_p10 = pmov %p17173_p0 }
 0x328   : > { %15270 = vsyncadd (%p17182_p5), [#allocation29], 4294956928 }
 0x329   : > { %15272 = dma.done.wait (%p17183_p10), [#allocation32], 9984   ;;  %p17184_p11 = pmov %p17173_p0 }
 0x32a   : > { %p17185_p12 = pmov %p17173_p0 }
 0x32b   : > { %15274 = vsyncadd (%p17184_p11), [#allocation32], 4294957312 }
 0x32c   : > { %15276 = dma.done.wait (%p17185_p12), [#allocation35], 9984   ;;  %p17186_p13 = pmov %p17173_p0 }
 0x32e   : > { %15278 = vsyncadd (%p17186_p13), [#allocation35], 4294957312 }
 0x32f   : > { %15280 = dma.done.wait (%p17173_p0), [#allocation38], 6192   ;;  %p17187_p1 = pmov %p17173_p0 }
 0x330   : > { %p17188_p4 = pmov %p17173_p0 }
 0x331   : > { %15282 = vsyncadd (%p17187_p1), [#allocation38], 4294961104 }
 0x332   : > { %15284 = dma.done.wait (%p17188_p4), [#allocation41], 2080   ;;  %p17189_p6 = pmov %p17173_p0 }
 0x333   : > { %p17190_p7 = pmov %p17173_p0 }
 0x334   : > { %15286 = vsyncadd (%p17189_p6), [#allocation41], 4294965216 }
 0x335   : > { %15288 = dma.done.wait (%p17190_p7), [#allocation44], 1024   ;;  %p17191_p8 = pmov %p17173_p0 }
 0x336   : > { %s17192_s28 = sld [smem:[#allocation61_spill]]  ;;  %s17193_s1 = sld [smem:[#allocation62_spill]]  ;;  %v15373_v0 = vmov 0   ;;  %v15374_v1 = vmov 0.0   ;;  %vm15375_vm0 = vmmov 0   ;;  %vm1689_vm1 = vcmask 46080  }
 0x337   : > { %15290 = vsyncadd (%p17191_p8), [#allocation44], 4294966272  ;;  %p1634_p2 = scmp.lt.s32.totalorder %s15591_s26, 1  ;;  %1830 = vmatprep.mubr.bf16.mxu1 %v15373_v0  ;;  %13025 = vmatprep.subr.bf16.mxu0 %v15374_v1  ;;  %v13650_v16 = vld [vmem:[#allocation2 + $0x4] ss:$12 sps:$4 sm:$0xff]   ;;  %s17194_s6 = sld [smem:[#allocation60_spill]]  ;;  %v1971_v48 = vlaneseq }
 0x338   : > { %13027 = vmatprep.mubr.msk.bf16.mxu0 %vm15375_vm0, %v15374_v1  ;;  %v13652_v18 = vld [vmem:[#allocation2] ss:$12 sps:$4 sm:$0xff]   ;;  %1798 = vmatprep.subr.bf16.mxu1 %v13650_v16  ;;  %v13653_v25 = vld [vmem:[#allocation2 + $0x1c] ss:$12 sps:$4 sm:$0xff]   ;;  %v13655_v26 = vld [vmem:[#allocation2 + $0x18] ss:$12 sps:$4 sm:$0xff]  }
 0x339   : > { %s17202_s26 = smov (!%p1634_p2, %s15591_s26), 1  ;;  %1799 = vmatpush1.bf16.msra.mxu1 %v13652_v18  ;;  %vm1788_vm2 = vcmask 1043456   ;;  %v1741_v28 = vld [vmem:[#allocation2 + $0x30] sm:$0xff]  ;;  %vm1784_vm3 = vcmask 326656   ;;  %v13660_v44 = vld [vmem:[#allocation2 + $0x38] ss:$0 sps:$4 sm:$0xff]  }
 0x33a   : > { %s16057_s16 = sshll.u32 %s17202_s26, 3  ;;  %s13303_s7 = smul.u32 80, %s17202_s26  ;;  %v11909_v31 = vcombine.high %v1741_v28, %v1741_v28  ;;  %v11908_v32 = vcombine.low %v1741_v28, %v1741_v28  ;;  %1800 = vmatprep.subr.bf16.mxu1 %v13653_v25  ;;  %v13658_v40 = vld [vmem:[#allocation2 + $0x8] ss:$12 sps:$4 sm:$0xff]   ;;  %v13659_v45 = vld [vmem:[#allocation2 + $0x20] ss:$12 sps:$4 sm:$0xff]  }
 0x33b   : > { %v1796_v47 = vsel %vm1788_vm2, %v13660_v44, 0  ;;  %v1972_v51 = vand.u32 127, %v1971_v48  ;;  %v16122_v52 = vshrl.u32 %v1971_v48, 7  ;;  %v13662_v54 = vld [vmem:[#allocation4] sm:$0xff]   ;;  %v13663_v55 = vld [vmem:[#allocation4 + $0x8] sm:$0xff]   ;;  %vm2013_vm4 = vcmask 1041409  }
 0x33c   : > { %s16062_s3 = scalar_lea.vmem %s17192_s28, %s16057_s16  ;;  %s16067_s19 = scalar_lea.vmem %s17193_s1, %s13303_s7  ;;  %v1790_v37 = vsel %vm1788_vm2, %v11908_v32, 0  ;;  %vm2015_vm5 = vcmask 1042434   ;;  %vm2017_vm6 = vcmask 1043459   ;;  %vm2019_vm7 = vcmask 1044484  }
 0x33d   : > { %v16070_v2 = vld [vmem:[%s16062_s3] sm:$0x3f]  ;;  %v1669_v3 = vld [vmem:[%s16067_s19 + $0x10] sm:$0x3f]  ;;  %v1670_v7 = vld [vmem:[%s16067_s19 + $0x18] sm:$0x3f]  ;;  %s16095_s10 = scalar_lea.vmem %s17194_s6, %s16057_s16  ;;  %1801 = vmatpush1.bf16.msra.mxu1 %v13655_v26  ;;  %v16126_v59 = vsub.s32 %v1972_v51, %v16122_v52 }
 0x33e   : > { %v1667_v4 = vld [vmem:[%s16067_s19] sm:$0x3f]  ;;  %v1695_v5 = vmul.f32 %v1669_v3, %v16070_v2  ;;  %v1668_v8 = vld [vmem:[%s16067_s19 + $0x8] sm:$0x3f]  ;;  %v1696_v10 = vmul.f32 %v1670_v7, %v16070_v2  ;;  %v1674_v13 = vld [vmem:[%s16067_s19 + $0x38] sm:$0x3f]  ;;  %11911 = vmatprep.subr.msk.bf16.mxu1 %vm1788_vm2, %v11909_v31 }
 0x33f   : > { %v1693_v6 = vmul.f32 %v1667_v4, %v16070_v2  ;;  %v1672_v9 = vld [vmem:[%s16067_s19 + $0x28] sm:$0x3f]  ;;  %v1694_v11 = vmul.f32 %v1668_v8, %v16070_v2  ;;  %v1671_v12 = vld [vmem:[%s16067_s19 + $0x20] sm:$0x3f]  ;;  %v1700_v22 = vmul.f32 %v1674_v13, %v16070_v2  ;;  %v1673_v23 = vld [vmem:[%s16067_s19 + $0x30] sm:$0x3f] }
 0x340   : > { %v1709_v14 = vsel %vm1689_vm1, %v1695_v5, 0.0  ;;  %v1698_v17 = vmul.f32 %v1672_v9, %v16070_v2  ;;  %v1712_v19 = vsel %vm1689_vm1, %v1696_v10, 0.0  ;;  %v1697_v21 = vmul.f32 %v1671_v12, %v16070_v2  ;;  %v1676_v24 = vld [vmem:[%s16067_s19 + $0x48] sm:$0x3f]  ;;  %v1675_v27 = vld [vmem:[%s16067_s19 + $0x40] sm:$0x3f] }
 0x341   : > { %v1703_v15 = vsel %vm1689_vm1, %v1693_v6, 0.0  ;;  %1710 = vadd.xlane.f32.xlu1 %v1709_v14  ;;  %v1706_v20 = vsel %vm1689_vm1, %v1694_v11, 0.0  ;;  %v1699_v30 = vmul.f32 %v1673_v23, %v16070_v2  ;;  %v1724_v34 = vsel %vm1689_vm1, %v1700_v22, 0.0  ;;  %v1665_v38 = vld [vmem:[%s16095_s10] sm:$0x3f]  ;;  %1803 = vmatpush1.bf16.msra.mxu1 %v1790_v37  ;;  %s17195_s23 = sld [smem:[#allocation67_spill]] }
 0x342   : > { %1704 = vadd.xlane.f32.xlu0 %v1703_v15  ;;  %v1718_v29 = vsel %vm1689_vm1, %v1698_v17, 0.0  ;;  %v1715_v33 = vsel %vm1689_vm1, %v1697_v21, 0.0  ;;  %v1702_v35 = vmul.f32 %v1676_v24, %v16070_v2  ;;  %v1701_v36 = vmul.f32 %v1675_v27, %v16070_v2  ;;  %13015 = vmatprep.subr.bf16.mxu1 %v15374_v1  ;;  %s17196_s12 = sld [smem:[#allocation64_spill]]  ;;  %s17197_s0 = sld [smem:[#allocation65_spill]] }
 0x343   : > { %v1721_v39 = vsel %vm1689_vm1, %v1699_v30, 0.0  ;;  %v1743_v41 = vpack.c.bf16 %v1665_v38, %v1665_v38  ;;  %v1690_v46 = vsel %vm1689_vm1, %v16070_v2, 0.0  ;;  %vm2021_vm8 = vcmask 1045509   ;;  %s17198_s26 = sld [smem:[#allocation63_spill]]  ;;  %s15379_s19 = smov 40  }
 0x344   : > { %v1730_v42 = vsel %vm1689_vm1, %v1702_v35, 0.0  ;;  %v1727_v43 = vsel %vm1689_vm1, %v1701_v36, 0.0  ;;  %vm2023_vm9 = vcmask 1046534   ;;  %vm2025_vm10 = vcmask 1047559   ;;  %s17199_s1 = sld [smem:[#allocation71_spill]] }
 0x345   : > { %1713 = vadd.xlane.f32.xlu1 %v1712_v19  ;;  %11912 = vmatmul.mubr.msk.bf16.vlgmr.msra.gmra.mrb[0].mxu1 %vm1784_vm3, %v1743_v41  ;;  %vm1894_vm11 = vcmask 1042432   ;;  %vm2055_vm12 = vcmask 1044480   ;;  %vm1890_vm13 = vcmask 48128   ;;  %vm2051_vm14 = vcmask 80896   ;;  %s17200_s6 = sld [smem:[#allocation79_spill]] }
 0x346   : > { %1707 = vadd.xlane.f32.xlu0 %v1706_v20  ;;  %13016 = vmatpush3.bf16.msra.mxu1 %v13658_v40  ;;  %vm2839_vm15 = vcmask 36864   ;;  %vm3042_vm1 = vcmask 1041408  }
 0x347   : > { %13021 = vmatprep.mubr.msk.bf16.mxu1 %vm15375_vm0, %v15374_v1  ;;  %13017 = vmatprep.subr.bf16.mxu1 %v15374_v1  ;;  %v13661_v48 = vld [vmem:[%s17195_s23] sm:$0x1f]  }
 0x348   : > { %s1654_s15 = scalar_lea.vmem %s17196_s12, %s16057_s16  ;;  %s16220_s8 = scalar_lea.vmem %s17197_s0, %s13303_s7 }
 0x349   : > { %1719 = vadd.xlane.f32.xlu1 %v1718_v29  ;;  %s1650_s28 = scalar_lea.vmem %s17198_s26, %s16057_s16  ;;  %s15377_s7 = smov 80  }
 0x34a   : > { %1716 = vadd.xlane.f32.xlu0 %v1715_v33  ;;  %13018 = vmatpush3.bf16.msra.mxu1 %v13659_v45 }
 0x34b   : > { %13019 = vmatprep.subr.bf16.mxu1 %v15374_v1 }
 0x34d   : > { %1725 = vadd.xlane.f32.xlu1 %v1724_v34 }
 0x34e   : > { %1722 = vadd.xlane.f32.xlu0 %v1721_v39  ;;  %13020 = vmatpush3.bf16.msra.mxu1 %v1796_v47 }
 0x34f   : > { %13037 = vmatprep.subr.bf16.mxu1 %v15374_v1 }
 0x351   : > { %1731 = vadd.xlane.f32.xlu1 %v1730_v42  ;;  %13022 = vmatmul.mubr.msk.bf16.vlgmr.msra.gmra.mrb[4].mxu1 %vm1784_vm3, %v1743_v41 }
 0x352   : > { %1728 = vadd.xlane.f32.xlu0 %v1727_v43  ;;  %13043 = vmatprep.mubr.msk.bf16.mxu1 %vm15375_vm0, %v15374_v1 }
 0x353   : > { %13038 = vmatpush3.bf16.msra.mxu1 %v13662_v54 }
 0x354   : > { %13039 = vmatprep.subr.bf16.mxu1 %v15374_v1 }
 0x355   : > { %1691 = vadd.xlane.f32.xlu1 %v1690_v46 }
 0x357   : > { %13040 = vmatpush3.bf16.msra.mxu1 %v13663_v55  ;;  %v2057_v55 = vsel %vm2055_vm12, %v13661_v48, 0 }
 0x358   : > { %13041 = vmatprep.subr.bf16.mxu1 %v15374_v1 }
 0x3ce   : > { %v1711_v49 = vpop.xlane.xlu1 %1710 }
 0x3cf   : > { %v1705_v50 = vpop.xlane.xlu0 %1704  ;;  %v1943_v56 = vpack.c.bf16 %v1711_v49, %v1711_v49 }
 0x3d0   : > { %v1941_v53 = vpack.c.bf16 %v1705_v50, %v1705_v50 }
 0x3d1   : > { %v1963_v63 = vunpack.c.l.b16 %v1943_v56 }
 0x3d2   : > { %v1714_v57 = vpop.xlane.xlu1 %1713  ;;  %v1961_v60 = vunpack.c.l.b16 %v1941_v53  ;;  %v14438_v53 = vld [vmem:[%s16062_s3] sm:$0x3f]  ;;  %s15378_s3 = smov 120  }
 0x3d3   : > { %v1708_v58 = vpop.xlane.xlu0 %1707  ;;  %v1944_v61 = vpack.c.bf16 %v1714_v57, %v1714_v57  ;;  %v1984_v10 = vrot.slane %v1963_v63, %v16126_v59  ;;  %v16152_v54 = vpack.c.bf16 %v14438_v53, %v14438_v53  ;;  %v13664_v57 = vld [vmem:[#allocation4 + $0x10] ss:$0 sps:$4 sm:$0xff]  }
 0x3d4   : > { %v1942_v62 = vpack.c.bf16 %v1708_v58, %v1708_v58  ;;  %v1976_v6 = vrot.slane %v1961_v60, %v16126_v59  ;;  %v2125_v58 = vsel %vm1788_vm2, %v13664_v57, 0  ;;  %v13667_v60 = vld [vmem:[#allocation2 + $0x40] ss:$12 sps:$4 sm:$0xff]   ;;  %v13680_v57 = vld [vmem:[#allocation2 + $0x78] ss:$12 sps:$4 sm:$0xff]  }
 0x3d5   : > { %v1964_v3 = vunpack.c.l.b16 %v1944_v61  ;;  %13042 = vmatpush3.bf16.msra.mxu1 %v2125_v58  ;;  %v13668_v61 = vld [vmem:[#allocation2 + $0x44] ss:$12 sps:$4 sm:$0xff]  }
 0x3d6   : > { %v1962_v2 = vunpack.c.l.b16 %v1942_v62  ;;  %v1720_v4 = vpop.xlane.xlu1 %1719  ;;  %2241 = vmatprep.subr.bf16.mxu1 %v13667_v60  ;;  %v11914_v62 = vld [vmem:[#allocation6] ss:$0 sm:$0xff] }
 0x3d7   : > { %v1717_v5 = vpop.xlane.xlu0 %1716  ;;  %v1946_v8 = vpack.c.bf16 %v1720_v4, %v1720_v4  ;;  %v1988_v14 = vrot.slane %v1964_v3, %v16126_v59 }
 0x3d8   : > { %v1980_v7 = vrot.slane %v1962_v2, %v16126_v59  ;;  %v1945_v9 = vpack.c.bf16 %v1717_v5, %v1717_v5 }
 0x3d9   : > { %v1966_v11 = vunpack.c.l.b16 %v1946_v8  ;;  %v13665_v8 = vld [vmem:[#allocation2 + $0x3c] ss:$12 sps:$4 sm:$0xff]  }
 0x3da   : > { %v1965_v12 = vunpack.c.l.b16 %v1945_v9  ;;  %v2014_v13 = vsel %vm2013_vm4, %v1980_v7, %v1976_v6  ;;  %v1726_v15 = vpop.xlane.xlu1 %1725 }
 0x3db   : > { %v1723_v16 = vpop.xlane.xlu0 %1722  ;;  %v2016_v17 = vsel %vm2015_vm5, %v1984_v10, %v2014_v13  ;;  %v1948_v19 = vpack.c.bf16 %v1726_v15, %v1726_v15  ;;  %v1996_v22 = vrot.slane %v1966_v11, %v16126_v59  ;;  %v13671_v11 = vld [vmem:[#allocation2 + $0x58] ss:$12 sps:$4 sm:$0xff]   ;;  %v13672_v13 = vld [vmem:[#allocation2 + $0x5c] ss:$12 sps:$4 sm:$0xff]  }
 0x3dc   : > { %v1992_v18 = vrot.slane %v1965_v12, %v16126_v59  ;;  %v1947_v20 = vpack.c.bf16 %v1723_v16, %v1723_v16  ;;  %v2018_v21 = vsel %vm2017_vm6, %v1988_v14, %v2016_v17  ;;  %v13669_v12 = vld [vmem:[#allocation2 + $0x54] ss:$12 sps:$4 sm:$0xff]   ;;  %v2186_v14 = vld [vmem:[#allocation2 + $0x6c] sm:$0xff] }
 0x3dd   : > { %v1968_v23 = vunpack.c.l.b16 %v1948_v19  ;;  %v11930_v15 = vcombine.high %v2186_v14, %v2186_v14  ;;  %v11929_v16 = vcombine.low %v2186_v14, %v2186_v14  ;;  %v13675_v17 = vld [vmem:[#allocation2 + $0x74] ss:$0 sps:$4 sm:$0xff]  }
 0x3de   : > { %v1967_v24 = vunpack.c.l.b16 %v1947_v20  ;;  %v1732_v25 = vpop.xlane.xlu1 %1731  ;;  %v2020_v27 = vsel %vm2019_vm7, %v1992_v18, %v2018_v21  ;;  %v2239_v19 = vsel %vm1788_vm2, %v13675_v17, 0  ;;  %v11922_v21 = vld [vmem:[#allocation7] ss:$0 sm:$0xff] }
 0x3df   : > { %v1729_v26 = vpop.xlane.xlu0 %1728  ;;  %v1950_v29 = vpack.c.bf16 %v1732_v25, %v1732_v25  ;;  %v2004_v31 = vrot.slane %v1968_v23, %v16126_v59  ;;  %v2022_v34 = vsel %vm2021_vm8, %v1996_v22, %v2020_v27  ;;  %v2233_v18 = vsel %vm1788_vm2, %v11929_v16, 0  ;;  %v1681_v14 = vld [vmem:[%s16220_s8 + $0x10] sm:$0x1f] }
 0x3e0   : > { %v2000_v28 = vrot.slane %v1967_v24, %v16126_v59  ;;  %v1949_v30 = vpack.c.bf16 %v1729_v26, %v1729_v26 }
 0x3e1   : > { %v1970_v32 = vunpack.c.l.b16 %v1950_v29  ;;  %v13677_v29 = vld [vmem:[#allocation4 + $0x14] sm:$0xff]  }
 0x3e2   : > { %v1969_v33 = vunpack.c.l.b16 %v1949_v30  ;;  %v2024_v35 = vsel %vm2023_vm9, %v2000_v28, %v2022_v34  ;;  %v16169_v2 = vpop.xlane.xlu1 %1691  ;;  %v13678_v30 = vld [vmem:[#allocation4 + $0x1c] sm:$0xff]  }
 0x3e3   : > { %v2012_v36 = vrot.slane %v1970_v32, %v16126_v59  ;;  %v2026_v38 = vsel %vm2025_vm10, %v2004_v31, %v2024_v35 }
 0x3e4   : > { %v2008_v37 = vrot.slane %v1969_v33, %v16126_v59 }
 0x3e6   : > { %v2027_v39 = vsel %vm2013_vm4, %v2012_v36, %v2008_v37  ;;  %v13676_v36 = vld [vmem:[%s17195_s23 + $0x8] sm:$0x1f]  }
 0x3e7   : > { %v2028_v40 = vpack.c.b16 %v2027_v39, %v2026_v38 }
 0x3e9   : > { %2030 = vxpose.xlu0.c.b16.start.end [1/1] (short) (narrow) %v2028_v40, 16 }
 0x418   : > { %v1832_v41 = vpop.f32.mrb[0].mxu1 }
 0x419   : > { %v16147_v42 = vpop.f32.mrb[1].mxu1  ;;  %v1886_v63 = vadd.f32 %v11914_v62, %v1832_v41  ;;  %v13684_v62 = vld [vmem:[#allocation2 + $0x90] ss:$12 sps:$4 sm:$0xff]  }
 0x41a   : > { %v1836_v43 = vpop.f32.mrb[2].mxu1 }
 0x41b   : > { %v1837_v44 = vpop.f32.mrb[3].mxu1  ;;  %v1887_v3 = vmul.f32 %v1886_v63, %v16169_v2  ;;  %v13679_v43 = vld [vmem:[#allocation4 + $0x24] ss:$0 sps:$4 sm:$0xff]  }
 0x41c   : > { %v2455_v44 = vsel %vm1788_vm2, %v13679_v43, 0  ;;  %v13687_v63 = vld [vmem:[#allocation2 + $0x98] ss:$12 sps:$4 sm:$0xff]  }
 0x424   : > { %v1873_v45 = vpop.f32.mrb[4].mxu1 }
 0x425   : > { %v1889_v46 = vpack.c.bf16 %v1873_v45, %v1873_v45  ;;  %v13023_v47 = vpop.f32.mrb[5].mxu1  ;;  %v13682_v45 = vld [vmem:[#allocation2 + $0x7c] ss:$12 sps:$4 sm:$0xff]  }
 0x426   : > { %v1876_v49 = vpop.f32.mrb[6].mxu1  ;;  %v11935_v47 = vld [vmem:[#allocation6 + $0x1] ss:$0 sm:$0xff] }
 0x427   : > { %v13024_v50 = vpop.f32.mrb[7].mxu1  ;;  %v1896_v51 = vsel %vm1894_vm11, %v1889_v46, 0  ;;  %v13683_v46 = vld [vmem:[#allocation2 + $0x80] ss:$12 sps:$4 sm:$0xff]  }
 0x428   : > { %13026 = vmatpush3.bf16.msra.mxu0 %v1896_v51 }
 0x429   : > { %13031 = vmatprep.subr.bf16.mxu0 %v15374_v1 }
 0x42b   : > { %13028 = vmatmul.mubr.msk.bf16.vlgmr.msra.gmra.mrb[0].mxu0 %vm1890_vm13, %v16152_v54 }
 0x42c   : > { %13032 = vmatpush3.bf16.msra.mxu0 %v2057_v55  ;;  %13033 = vmatprep.mubr.msk.bf16.mxu0 %vm15375_vm0, %v15374_v1 }
 0x42d   : > { %13047 = vmatprep.subr.bf16.mxu0 %v15374_v1 }
 0x44f   : > { %v16161_v56 = vpop.trf.xlu0 }
 0x450   : > { %13034 = vmatmul.mubr.msk.bf16.vlgmr.msra.gmra.mrb[0].mxu0 %vm2051_vm14, %v16161_v56 }
 0x451   : > { %13053 = vmatprep.mubr.msk.bf16.mxu0 %vm15375_vm0, %v15374_v1  ;;  %13048 = vmatpush3.bf16.msra.mxu0 %v13668_v61  ;;  %v13686_v61 = vld [vmem:[#allocation2 + $0x94] ss:$12 sps:$4 sm:$0xff]  }
 0x452   : > { %13049 = vmatprep.subr.bf16.mxu0 %v15374_v1 }
 0x455   : > { %13050 = vmatpush3.bf16.msra.mxu0 %v13672_v13 }
 0x456   : > { %13051 = vmatprep.subr.bf16.mxu0 %v15374_v1 }
 0x459   : > { %13052 = vmatpush3.bf16.msra.mxu0 %v2239_v19 }
 0x45a   : > { %13069 = vmatprep.subr.bf16.mxu0 %v15374_v1 }
 0x523   : > { %v2093_v4 = vpop.f32.mrb[0].mxu0 }
 0x524   : > { %v13263_v5 = vadd.f32 %v2093_v4, %v1887_v3  ;;  %v13035_v6 = vpop.f32.mrb[1].mxu0  ;;  %v2517_v3 = vld [vmem:[#allocation2 + $0xa8] sm:$0xff] }
 0x525   : > { %v2096_v7 = vpop.f32.mrb[2].mxu0  ;;  %v11953_v4 = vcombine.high %v2517_v3, %v2517_v3  ;;  %v13690_v6 = vld [vmem:[#allocation2 + $0xb0] ss:$0 sps:$4 sm:$0xff]  }
 0x526   : > { %v2105_v9 = vpack.c.bf16 %v13263_v5, %v13263_v5  ;;  %v13036_v10 = vpop.f32.mrb[3].mxu0  ;;  %v11952_v5 = vcombine.low %v2517_v3, %v2517_v3 }
 0x527   : > { %v1679_v10 = vld [vmem:[%s16220_s8] sm:$0x1f] }
 0x528   : > { %13044 = vmatmul.mubr.msk.bf16.vlgmr.msra.gmra.mrb[8].mxu1 %vm1784_vm3, %v2105_v9  ;;  %v2564_v7 = vsel %vm1788_vm2, %v11952_v5, 0  ;;  %v16222_v9 = vld [vmem:[%s1654_s15] sm:$0x1f] }
 0x529   : > { %2242 = vmatpush1.bf16.msra.mxu1 %v13665_v8  ;;  %2273 = vmatprep.mubr.bf16.mxu1 %v15373_v0  ;;  %v2570_v8 = vsel %vm1788_vm2, %v13690_v6, 0  ;;  %v2845_v17 = vmul.f32 %v1681_v14, %v16222_v9 }
 0x52a   : > { %2243 = vmatprep.subr.bf16.mxu1 %v13671_v11  ;;  %v1680_v11 = vld [vmem:[%s16220_s8 + $0x8] sm:$0x1f] }
 0x52b   : > { %v2844_v13 = vmul.f32 %v1680_v11, %v16222_v9  ;;  %v2859_v19 = vsel %vm2839_vm15, %v2845_v17, 0.0 }
 0x52d   : > { %2244 = vmatpush1.bf16.msra.mxu1 %v13669_v12  ;;  %v2843_v12 = vmul.f32 %v1679_v10, %v16222_v9  ;;  %v2856_v16 = vsel %vm2839_vm15, %v2844_v13, 0.0 }
 0x52e   : > { %11932 = vmatprep.subr.msk.bf16.mxu1 %vm1788_vm2, %v11930_v15 }
 0x52f   : > { %v2853_v15 = vsel %vm2839_vm15, %v2843_v12, 0.0 }
 0x530   : > { %2854 = vadd.xlane.f32.xlu1 %v2853_v15 }
 0x531   : > { %2246 = vmatpush1.bf16.msra.mxu1 %v2233_v18  ;;  %v1682_v18 = vld [vmem:[%s16220_s8 + $0x18] sm:$0x1f] }
 0x532   : > { %13057 = vmatprep.subr.bf16.mxu1 %v15374_v1 }
 0x534   : > { %2857 = vadd.xlane.f32.xlu1 %v2856_v16 }
 0x538   : > { %2860 = vadd.xlane.f32.xlu1 %v2859_v19 }
 0x5fb   : > { %v2161_v20 = vpop.f32.mrb[8].mxu1 }
 0x5fc   : > { %v2167_v22 = vadd.f32 %v2161_v20, %v16147_v42  ;;  %v13045_v23 = vpop.f32.mrb[9].mxu1  ;;  %v2386_v42 = vsel %vm2055_vm12, %v13676_v36, 0  ;;  %v2846_v20 = vmul.f32 %v1682_v18, %v16222_v9 }
 0x5fd   : > { %v2164_v24 = vpop.f32.mrb[10].mxu1 }
 0x5fe   : > { %v2175_v25 = vadd.f32 %v11922_v21, %v2167_v22  ;;  %v13046_v26 = vpop.f32.mrb[11].mxu1  ;;  %v1683_v21 = vld [vmem:[%s16220_s8 + $0x20] sm:$0x1f]  ;;  %v2862_v22 = vsel %vm2839_vm15, %v2846_v20, 0.0  ;;  %v1684_v24 = vld [vmem:[%s16220_s8 + $0x28] sm:$0x1f] }
 0x5ff   : > { %v2847_v23 = vmul.f32 %v1683_v21, %v16222_v9  ;;  %2863 = vadd.xlane.f32.xlu1 %v2862_v22  ;;  %v2848_v26 = vmul.f32 %v1684_v24, %v16222_v9 }
 0x600   : > { %v2176_v27 = vmax.f32 %v2175_v25, 0.0 }
 0x601   : > { %v2865_v25 = vsel %vm2839_vm15, %v2847_v23, 0.0 }
 0x602   : > { %v2188_v28 = vpack.c.bf16 %v2176_v27, %v2176_v27  ;;  %v1685_v27 = vld [vmem:[%s16220_s8 + $0x30] sm:$0x1f] }
 0x603   : > { %2866 = vadd.xlane.f32.xlu1 %v2865_v25 }
 0x604   : > { %11933 = vmatmul.mubr.msk.bf16.vlgmr.msra.gmra.mrb[12].mxu1 %vm1784_vm3, %v2188_v28  ;;  %13054 = vmatmul.mubr.msk.bf16.vlgmr.msra.gmra.mrb[4].mxu0 %vm1784_vm3, %v2188_v28  ;;  %v2868_v28 = vsel %vm2839_vm15, %v2848_v26, 0.0 }
 0x605   : > { %13059 = vmatprep.mubr.msk.bf16.mxu1 %vm15375_vm0, %v15374_v1  ;;  %13075 = vmatprep.mubr.msk.bf16.mxu0 %vm15375_vm0, %v15374_v1 }
 0x606   : > { %13070 = vmatpush3.bf16.msra.mxu0 %v13677_v29  ;;  %v2849_v29 = vmul.f32 %v1685_v27, %v16222_v9 }
 0x607   : > { %13071 = vmatprep.subr.bf16.mxu0 %v15374_v1  ;;  %2869 = vadd.xlane.f32.xlu1 %v2868_v28 }
 0x60a   : > { %13072 = vmatpush3.bf16.msra.mxu0 %v13678_v30  ;;  %v1686_v30 = vld [vmem:[%s16220_s8 + $0x38] sm:$0x1f] }
 0x60b   : > { %13073 = vmatprep.subr.bf16.mxu0 %v15374_v1 }
 0x60e   : > { %13074 = vmatpush3.bf16.msra.mxu0 %v2455_v44 }
 0x60f   : > { %2572 = vmatprep.subr.bf16.mxu0 %v13682_v45 }
 0x6d7   : > { %v2275_v31 = vpop.f32.mrb[12].mxu1  ;;  %v2316_v32 = vpop.f32.mrb[4].mxu0 }
 0x6d8   : > { %v2332_v33 = vpack.c.bf16 %v2316_v32, %v2316_v32  ;;  %v16189_v34 = vpop.f32.mrb[13].mxu1  ;;  %v13055_v35 = vpop.f32.mrb[5].mxu0  ;;  %v2330_v48 = vadd.f32 %v11935_v47, %v2275_v31  ;;  %v2871_v31 = vsel %vm2839_vm15, %v2849_v29, 0.0  ;;  %v2850_v32 = vmul.f32 %v1686_v30, %v16222_v9 }
 0x6d9   : > { %v2279_v37 = vpop.f32.mrb[14].mxu1  ;;  %v2319_v38 = vpop.f32.mrb[6].mxu0  ;;  %2872 = vadd.xlane.f32.xlu1 %v2871_v31 }
 0x6da   : > { %v2334_v39 = vsel %vm1894_vm11, %v2332_v33, 0  ;;  %v2280_v40 = vpop.f32.mrb[15].mxu1  ;;  %v13056_v41 = vpop.f32.mrb[7].mxu0  ;;  %v2331_v49 = vmul.f32 %v2330_v48, %v16169_v2  ;;  %v1687_v33 = vld [vmem:[%s16220_s8 + $0x40] sm:$0x1f]  ;;  %v2874_v35 = vsel %vm2839_vm15, %v2850_v32, 0.0 }
 0x6db   : > { %13058 = vmatpush3.bf16.msra.mxu1 %v2334_v39  ;;  %v2851_v36 = vmul.f32 %v1687_v33, %v16222_v9  ;;  %v1688_v37 = vld [vmem:[%s16220_s8 + $0x48] sm:$0x1f] }
 0x6dc   : > { %13063 = vmatprep.subr.bf16.mxu1 %v15374_v1  ;;  %v2852_v39 = vmul.f32 %v1688_v37, %v16222_v9 }
 0x6dd   : > { %2875 = vadd.xlane.f32.xlu1 %v2874_v35  ;;  %v2877_v38 = vsel %vm2839_vm15, %v2851_v36, 0.0 }
 0x6de   : > { %13060 = vmatmul.mubr.msk.bf16.vlgmr.msra.gmra.mrb[16].mxu1 %vm1890_vm13, %v16152_v54  ;;  %v2880_v40 = vsel %vm2839_vm15, %v2852_v39, 0.0 }
 0x6df   : > { %13064 = vmatpush3.bf16.msra.mxu1 %v2386_v42  ;;  %13065 = vmatprep.mubr.msk.bf16.mxu1 %vm15375_vm0, %v15374_v1  ;;  %v11945_v42 = vld [vmem:[#allocation7 + $0x1] ss:$0 sm:$0xff] }
 0x6e0   : > { %13079 = vmatprep.subr.bf16.mxu1 %v15374_v1 }
 0x6e1   : > { %2878 = vadd.xlane.f32.xlu1 %v2877_v38 }
 0x6e5   : > { %2881 = vadd.xlane.f32.xlu1 %v2880_v40 }
 0x6ea   : > { %13066 = vmatmul.mubr.msk.bf16.vlgmr.msra.gmra.mrb[16].mxu1 %vm2051_vm14, %v16161_v56 }
 0x6eb   : > { %13085 = vmatprep.mubr.msk.bf16.mxu1 %vm15375_vm0, %v15374_v1  ;;  %13080 = vmatpush3.bf16.msra.mxu1 %v13683_v46 }
 0x6ec   : > { %13081 = vmatprep.subr.bf16.mxu1 %v15374_v1 }
 0x6ef   : > { %13082 = vmatpush3.bf16.msra.mxu1 %v13687_v63 }
 0x6f0   : > { %13083 = vmatprep.subr.bf16.mxu1 %v15374_v1 }
 0x6f3   : > { %13084 = vmatpush3.bf16.msra.mxu1 %v2570_v8 }
 0x6f4   : > { %13101 = vmatprep.subr.bf16.mxu1 %v15374_v1 }
 0x7bd   : > { %v2422_v50 = vpop.f32.mrb[16].mxu1 }
 0x7be   : > { %v13264_v51 = vadd.f32 %v2422_v50, %v2331_v49  ;;  %v13067_v53 = vpop.f32.mrb[17].mxu1  ;;  %v2855_v50 = vpop.xlane.xlu1 %2854 }
 0x7bf   : > { %v2425_v55 = vpop.f32.mrb[18].mxu1 }
 0x7c0   : > { %v2435_v58 = vpack.c.bf16 %v13264_v51, %v13264_v51  ;;  %v13068_v60 = vpop.f32.mrb[19].mxu1  ;;  %v13695_v51 = vld [vmem:[#allocation4 + $0x28] sm:$0xff]  }
 0x7c2   : > { %13076 = vmatmul.mubr.msk.bf16.vlgmr.msra.gmra.mrb[8].mxu0 %vm1784_vm3, %v2435_v58  ;;  %v2858_v53 = vpop.xlane.xlu1 %2857 }
 0x7c3   : > { %2573 = vmatpush1.bf16.msra.mxu0 %v13680_v57  ;;  %2604 = vmatprep.mubr.bf16.mxu0 %v15373_v0  ;;  %v3091_v57 = vpack.c.bf16 %v2855_v50, %v2855_v50  ;;  %v3092_v58 = vpack.c.bf16 %v2858_v53, %v2858_v53  ;;  %v13691_v50 = vld [vmem:[%s17195_s23 + $0x10] sm:$0x1f]  }
 0x7c4   : > { %2574 = vmatprep.subr.bf16.mxu0 %v13686_v61 }
 0x7c5   : > { %v3112_v63 = vunpack.c.l.b16 %v3092_v58  ;;  %v13692_v58 = vld [vmem:[#allocation9 + $0x8] ss:$12 sps:$4 sm:$0xff]  }
 0x7c6   : > { %v2861_v55 = vpop.xlane.xlu1 %2860 }
 0x7c7   : > { %2575 = vmatpush1.bf16.msra.mxu0 %v13684_v62  ;;  %v3093_v61 = vpack.c.bf16 %v2861_v55, %v2861_v55  ;;  %v3111_v62 = vunpack.c.l.b16 %v3091_v57  ;;  %v2717_v57 = vsel %vm2055_vm12, %v13691_v50, 0 }
 0x7c8   : > { %11955 = vmatprep.subr.msk.bf16.mxu0 %vm1788_vm2, %v11953_v4 }
 0x7c9   : > { %v3113_v5 = vunpack.c.l.b16 %v3093_v61  ;;  %v3124_v6 = vrot.slane %v3111_v62, %v16126_v59  ;;  %v13694_v61 = vld [vmem:[#allocation9 + $0x38] ss:$0 sps:$4 sm:$0xff]  }
 0x7ca   : > { %v2864_v60 = vpop.xlane.xlu1 %2863  ;;  %v2944_v62 = vsel %vm1788_vm2, %v13694_v61, 0 }
 0x7cb   : > { %2577 = vmatpush1.bf16.msra.mxu0 %v2564_v7  ;;  %v3094_v4 = vpack.c.bf16 %v2864_v60, %v2864_v60  ;;  %v3128_v7 = vrot.slane %v3112_v63, %v16126_v59  ;;  %v3132_v12 = vrot.slane %v3113_v5, %v16126_v59  ;;  %v13693_v60 = vld [vmem:[#allocation9 + $0x20] ss:$12 sps:$4 sm:$0xff]   ;;  %v2840_v5 = vsel %vm2839_vm15, %v16222_v9, 0.0 }
 0x7cc   : > { %13089 = vmatprep.subr.bf16.mxu0 %v15374_v1  ;;  %2841 = vadd.xlane.f32.xlu0 %v2840_v5 }
 0x7cd   : > { %v3114_v11 = vunpack.c.l.b16 %v3094_v4  ;;  %v3161_v13 = vsel %vm2013_vm4, %v3128_v7, %v3124_v6  ;;  %v13700_v4 = vld [vmem:[#allocation9 + $0x4] ss:$12 sps:$4 sm:$0xff]   ;;  %v11958_v6 = vld [vmem:[#allocation6 + $0x2] ss:$0 sm:$0xff] }
 0x7ce   : > { %v2867_v3 = vpop.xlane.xlu1 %2866  ;;  %v3162_v18 = vsel %vm2015_vm5, %v3132_v12, %v3161_v13  ;;  %vm4031_vm5 = vcmask 1045504  }
 0x7cf   : > { %v3095_v8 = vpack.c.bf16 %v2867_v3, %v2867_v3  ;;  %v3136_v17 = vrot.slane %v3114_v11, %v16126_v59 }
 0x7d1   : > { %v3115_v15 = vunpack.c.l.b16 %v3095_v8  ;;  %v3163_v23 = vsel %vm2017_vm6, %v3136_v17, %v3162_v18  ;;  %v13703_v17 = vld [vmem:[#allocation9 + $0x1c] ss:$12 sps:$4 sm:$0xff]   ;;  %v2891_v18 = vld [vmem:[#allocation9 + $0x30] sm:$0xff]  ;;  %vm5658_vm6 = vcmask 982016  }
 0x7d2   : > { %v2870_v10 = vpop.xlane.xlu1 %2869 }
 0x7d3   : > { %v3096_v14 = vpack.c.bf16 %v2870_v10, %v2870_v10  ;;  %v3140_v21 = vrot.slane %v3115_v15, %v16126_v59 }
 0x7d5   : > { %v3116_v20 = vunpack.c.l.b16 %v3096_v14  ;;  %v3164_v27 = vsel %vm2019_vm7, %v3140_v21, %v3163_v23  ;;  %v13698_v14 = vld [vmem:[#allocation9] ss:$12 sps:$4 sm:$0xff]   ;;  %v11975_v21 = vcombine.low %v2891_v18, %v2891_v18  ;;  %vm5721_vm7 = vcmask 259072  }
 0x7d6   : > { %v2873_v16 = vpop.xlane.xlu1 %2872 }
 0x7d7   : > { %v3097_v19 = vpack.c.bf16 %v2873_v16, %v2873_v16  ;;  %v3144_v26 = vrot.slane %v3116_v20, %v16126_v59  ;;  %v11976_v20 = vcombine.high %v2891_v18, %v2891_v18  ;;  %v2938_v23 = vsel %vm1788_vm2, %v11975_v21, 0 }
 0x7d9   : > { %v3117_v25 = vunpack.c.l.b16 %v3097_v19  ;;  %v3165_v33 = vsel %vm2021_vm8, %v3144_v26, %v3164_v27  ;;  %v13701_v19 = vld [vmem:[#allocation9 + $0x18] ss:$12 sps:$4 sm:$0xff]   ;;  %vm7550_vm8 = vcmask 258048  }
 0x7da   : > { %v2876_v22 = vpop.xlane.xlu1 %2875 }
 0x7db   : > { %v3098_v24 = vpack.c.bf16 %v2876_v22, %v2876_v22  ;;  %v3148_v31 = vrot.slane %v3117_v25, %v16126_v59 }
 0x7dd   : > { %v3118_v29 = vunpack.c.l.b16 %v3098_v24  ;;  %v3166_v38 = vsel %vm2023_vm9, %v3148_v31, %v3165_v33  ;;  %v13706_v31 = vld [vmem:[%s17199_s1] sm:$0x1f]   ;;  %vm11410_vm9 = vcmask 1046528  }
 0x7de   : > { %v2879_v28 = vpop.xlane.xlu1 %2878  ;;  %v3196_v33 = vsel %vm2055_vm12, %v13706_v31, 0 }
 0x7df   : > { %v3099_v30 = vpack.c.bf16 %v2879_v28, %v2879_v28  ;;  %v3152_v36 = vrot.slane %v3118_v29, %v16126_v59 }
 0x7e1   : > { %v3119_v32 = vunpack.c.l.b16 %v3099_v30 }
 0x7e2   : > { %v2882_v35 = vpop.xlane.xlu1 %2881 }
 0x7e3   : > { %v3100_v37 = vpack.c.bf16 %v2882_v35, %v2882_v35  ;;  %v3156_v39 = vrot.slane %v3119_v32, %v16126_v59  ;;  %v16329_v32 = vpack.c.bf16 %v16222_v9, %v16222_v9  ;;  %v3980_v9 = vld [vmem:[#allocation18] sm:$0xf] }
 0x7e5   : > { %v3120_v40 = vunpack.c.l.b16 %v3100_v37  ;;  %v12036_v37 = vmul.f32 -1.442695, %v3980_v9 }
 0x7e7   : > { %14236 = vpow2.f32 %v12036_v37  ;;  %v13710_v37 = vld [vmem:[#allocation9 + $0x3c] ss:$12 sps:$4 sm:$0xff]  }
 0x895   : > { %v2491_v41 = vpop.f32.mrb[8].mxu0 }
 0x896   : > { %v2497_v43 = vadd.f32 %v2491_v41, %v16189_v34  ;;  %v13077_v44 = vpop.f32.mrb[9].mxu0  ;;  %v13696_v34 = vld [vmem:[#allocation4 + $0x30] sm:$0xff]   ;;  %v3160_v41 = vrot.slane %v3120_v40, %v16126_v59 }
 0x897   : > { %v2494_v45 = vpop.f32.mrb[10].mxu0 }
 0x898   : > { %v2506_v46 = vadd.f32 %v11945_v42, %v2497_v43  ;;  %v13078_v47 = vpop.f32.mrb[11].mxu0  ;;  %v3167_v42 = vsel %vm2025_vm10, %v3152_v36, %v3166_v38  ;;  %v3168_v43 = vsel %vm2013_vm4, %v3160_v41, %v3156_v39  ;;  %vm3038_vm4 = vcmask 39936   ;;  %v14237_v39 = vpop.eup %14236 }
 0x899   : > { %v3169_v44 = vpack.c.b16 %v3168_v43, %v3167_v42  ;;  %v3988_v36 = vrot.slane %v3980_v9, 1  ;;  %v3984_v41 = vadd.f32 1.0, %v14237_v39  ;;  %v3996_v42 = vrot.slane %v3980_v9, 2  ;;  %v13713_v39 = vld [vmem:[#allocation9 + $0x44] ss:$12 sps:$4 sm:$0xff]  }
 0x89a   : > { %v2507_v48 = vmax.f32 %v2506_v46, 0.0  ;;  %v3999_v43 = vrot.slane %v3980_v9, 3 }
 0x89b   : > { %3171 = vxpose.xlu1.c.b16.start.end [1/1] (short) (narrow) %v3169_v44, 16  ;;  %v12037_v38 = vmul.f32 -1.442695, %v3988_v36 }
 0x89c   : > { %v2519_v49 = vpack.c.bf16 %v2507_v48, %v2507_v48 }
 0x89d   : > { %14238 = vpow2.f32 %v12037_v38  ;;  %v13712_v38 = vld [vmem:[#allocation9 + $0x40] ss:$12 sps:$4 sm:$0xff]  }
 0x89e   : > { %11956 = vmatmul.mubr.msk.bf16.vlgmr.msra.gmra.mrb[12].mxu0 %vm1784_vm3, %v2519_v49  ;;  %13086 = vmatmul.mubr.msk.bf16.vlgmr.msra.gmra.mrb[20].mxu1 %vm1784_vm3, %v2519_v49  ;;  %14240 = vrcp.f32 %v3984_v41  ;;  %v13714_v41 = vld [vmem:[#allocation9 + $0x54] ss:$12 sps:$4 sm:$0xff]  }
 0x89f   : > { %13091 = vmatprep.mubr.msk.bf16.mxu0 %vm15375_vm0, %v15374_v1  ;;  %13107 = vmatprep.mubr.msk.bf16.mxu1 %vm15375_vm0, %v15374_v1 }
 0x8a0   : > { %13102 = vmatpush3.bf16.msra.mxu1 %v13695_v51 }
 0x8a1   : > { %13103 = vmatprep.subr.bf16.mxu1 %v15374_v1 }
 0x8a4   : > { %13104 = vmatpush3.bf16.msra.mxu1 %v13696_v34 }
 0x8a5   : > { %13105 = vmatprep.subr.bf16.mxu1 %v15374_v1 }
 0x8a7   : > { %v14239_v40 = vpop.eup %14238 }
 0x8a8   : > { %v3993_v44 = vadd.f32 1.0, %v14239_v40  ;;  %v13716_v40 = vld [vmem:[#allocation9 + $0x58] ss:$12 sps:$4 sm:$0xff]  }
 0x8aa   : > { %14242 = vrcp.f32 %v3993_v44 }
 0x8ab   : > { %14244 = vtanh.f32 %v3996_v42  ;;  %v13717_v42 = vld [vmem:[#allocation9 + $0x5c] ss:$12 sps:$4 sm:$0xff]  }
 0x901   : > { %v16337_v35 = vpop.trf.xlu1 }
 0x971   : > { %v2606_v45 = vpop.f32.mrb[12].mxu0  ;;  %v2647_v46 = vpop.f32.mrb[20].mxu1 }
 0x972   : > { %v2663_v47 = vpack.c.bf16 %v2647_v46, %v2647_v46  ;;  %v16281_v48 = vpop.f32.mrb[13].mxu0  ;;  %v13087_v49 = vpop.f32.mrb[21].mxu1  ;;  %v2661_v7 = vadd.f32 %v11958_v6, %v2606_v45  ;;  %v12038_v45 = vmul.f32 -1.442695, %v3999_v43  ;;  %v16344_v46 = vsub.s32 0, %v16122_v52  ;;  %v13707_v6 = vld [vmem:[#allocation10] sm:$0xff]  }
 0x973   : > { %v2610_v51 = vpop.f32.mrb[14].mxu0  ;;  %v2650_v34 = vpop.f32.mrb[22].mxu1  ;;  %v3325_v43 = vld [vmem:[#allocation9 + $0x6c] sm:$0xff] }
 0x974   : > { %v2665_v53 = vsel %vm1894_vm11, %v2663_v47, 0  ;;  %v2611_v55 = vpop.f32.mrb[15].mxu0  ;;  %v13088_v59 = vpop.f32.mrb[23].mxu1  ;;  %v2662_v8 = vmul.f32 %v2661_v7, %v16169_v2  ;;  %v15376_v2 = vmov 65535   ;;  %14246 = vpow2.f32 %v12038_v45  ;;  %v13708_v7 = vld [vmem:[#allocation10 + $0x8] sm:$0xff]  }
 0x975   : > { %13090 = vmatpush3.bf16.msra.mxu0 %v2665_v53  ;;  %v3043_v22 = vsel %vm3042_vm1, 4294967295, %v15376_v2  ;;  %v14241_v47 = vpop.eup %14240  ;;  %v11997_v44 = vcombine.high %v3325_v43, %v3325_v43  ;;  %v11996_v45 = vcombine.low %v3325_v43, %v3325_v43 }
 0x976   : > { %13095 = vmatprep.subr.bf16.mxu0 %v15374_v1  ;;  %v16318_v25 = vsel %vm1894_vm11, %v3043_v22, 0  ;;  %v14243_v49 = vpop.eup %14242 }
 0x977   : > { %v14245_v50 = vpop.eup %14244  ;;  %v4011_v51 = vrot.slane %v14243_v49, %v16344_v46  ;;  %v3372_v49 = vsel %vm1788_vm2, %v11996_v45, 0  ;;  %v12012_v45 = vld [vmem:[#allocation13 + $0x1] ss:$0 sm:$0xff] }
 0x978   : > { %13092 = vmatmul.mubr.msk.bf16.vlgmr.msra.gmra.mrb[16].mxu0 %vm1890_vm13, %v16152_v54  ;;  %v16299_v54 = vld [vmem:[%s1650_s28] sm:$0x1f]  ;;  %v4014_v53 = vmul.f32 %v14245_v50, %v14241_v47  ;;  %v13720_v47 = vld [vmem:[#allocation9 + $0x74] ss:$0 sps:$4 sm:$0xff]  }
 0x979   : > { %13096 = vmatpush3.bf16.msra.mxu0 %v2717_v57  ;;  %13097 = vmatprep.mubr.msk.bf16.mxu0 %vm15375_vm0, %v15374_v1  ;;  %v2893_v63 = vpack.c.bf16 %v16299_v54, %v16299_v54  ;;  %v4013_v59 = vmul.f32 0.0, %v4011_v51  ;;  %v3378_v50 = vsel %vm1788_vm2, %v13720_v47, 0 }
 0x97a   : > { %13111 = vmatprep.subr.bf16.mxu0 %v15374_v1  ;;  %v4019_v57 = vrot.slane %v4014_v53, %v16344_v46 }
 0x97e   : > { %v14247_v34 = vpop.eup %14246 }
 0x97f   : > { %v4004_v55 = vadd.f32 1.0, %v14247_v34  ;;  %v11989_v34 = vld [vmem:[#allocation13] ss:$0 sm:$0xff] }
 0x981   : > { %14248 = vrcp.f32 %v4004_v55 }
 0x984   : > { %13098 = vmatmul.mubr.msk.bf16.vlgmr.msra.gmra.mrb[16].mxu0 %vm2051_vm14, %v16161_v56  ;;  %v13697_v56 = vld [vmem:[#allocation4 + $0x38] ss:$0 sps:$4 sm:$0xff]  }
 0x985   : > { %13112 = vmatpush3.bf16.msra.mxu0 %v13692_v58  ;;  %13117 = vmatprep.mubr.msk.bf16.mxu0 %vm15375_vm0, %v15374_v1  ;;  %v2786_v3 = vsel %vm1788_vm2, %v13697_v56, 0  ;;  %v16348_v58 = vadd.f32 %v4019_v57, %v4013_v59 }
 0x986   : > { %13113 = vmatprep.subr.bf16.mxu0 %v15374_v1  ;;  %13106 = vmatpush3.bf16.msra.mxu1 %v2786_v3 }
 0x987   : > { %2946 = vmatprep.subr.bf16.mxu1 %v13700_v4  ;;  %14250 = vtanh.f32 %v16348_v58 }
 0x989   : > { %13114 = vmatpush3.bf16.msra.mxu0 %v13693_v60 }
 0x98a   : > { %13115 = vmatprep.subr.bf16.mxu0 %v15374_v1 }
 0x98b   : > { %v14249_v60 = vpop.eup %14248 }
 0x98c   : > { %v4027_v61 = vrot.slane %v14249_v60, %v16344_v46 }
 0x98d   : > { %13116 = vmatpush3.bf16.msra.mxu0 %v2944_v62 }
 0x98e   : > { %13133 = vmatprep.subr.bf16.mxu0 %v15374_v1 }
 0x990   : > { %13118 = vmatmul.mubr.msk.bf16.vlgmr.msra.gmra.mrb[20].mxu0 %vm1784_vm3, %v2893_v63 }
 0x991   : > { %13139 = vmatprep.mubr.msk.bf16.mxu0 %vm15375_vm0, %v15374_v1  ;;  %v14251_v62 = vpop.eup %14250  ;;  %13134 = vmatpush3.bf16.msra.mxu0 %v13707_v6 }
 0x992   : > { %v16356_v3 = vmul.f32 %v14251_v62, %v4027_v61  ;;  %13135 = vmatprep.subr.bf16.mxu0 %v15374_v1 }
 0x995   : > { %13136 = vmatpush3.bf16.msra.mxu0 %v13708_v7 }
 0x996   : > { %13137 = vmatprep.subr.bf16.mxu0 %v15374_v1 }
 0xa57   : > { %v2753_v10 = vpop.f32.mrb[16].mxu0 }
 0xa58   : > { %v13265_v11 = vadd.f32 %v2753_v10, %v2662_v8  ;;  %v13099_v12 = vpop.f32.mrb[17].mxu0  ;;  %v13709_v8 = vld [vmem:[#allocation10 + $0x10] ss:$0 sps:$4 sm:$0xff]  }
 0xa59   : > { %v2756_v13 = vpop.f32.mrb[18].mxu0  ;;  %v3264_v10 = vsel %vm1788_vm2, %v13709_v8, 0  ;;  %v11968_v12 = vld [vmem:[#allocation7 + $0x2] ss:$0 sm:$0xff] }
 0xa5a   : > { %v2766_v15 = vpack.c.bf16 %v13265_v11, %v13265_v11  ;;  %v13100_v16 = vpop.f32.mrb[19].mxu0  ;;  %13138 = vmatpush3.bf16.msra.mxu0 %v3264_v10 }
 0xa5b   : > { %3380 = vmatprep.subr.bf16.mxu0 %v13712_v38  ;;  %v3656_v38 = vld [vmem:[#allocation9 + $0xa8] sm:$0xff] }
 0xa5c   : > { %13108 = vmatmul.mubr.msk.bf16.vlgmr.msra.gmra.mrb[24].mxu1 %vm1784_vm3, %v2766_v15 }
 0xa5d   : > { %2947 = vmatpush1.bf16.msra.mxu1 %v13698_v14  ;;  %2978 = vmatprep.mubr.bf16.mxu1 %v15373_v0 }
 0xa5e   : > { %2948 = vmatprep.subr.bf16.mxu1 %v13703_v17 }
 0xa61   : > { %2949 = vmatpush1.bf16.msra.mxu1 %v13701_v19 }
 0xa62   : > { %11978 = vmatprep.subr.msk.bf16.mxu1 %vm1788_vm2, %v11976_v20 }
 0xa63   : > { %v3021_v24 = vpop.f32.mrb[20].mxu0 }
 0xa64   : > { %v3037_v26 = vpack.c.bf16 %v3021_v24, %v3021_v24  ;;  %v13119_v27 = vpop.f32.mrb[21].mxu0 }
 0xa65   : > { %2951 = vmatpush1.bf16.msra.mxu1 %v2938_v23  ;;  %v3024_v28 = vpop.f32.mrb[22].mxu0  ;;  %v16371_v27 = vpop.xlane.xlu0 %2841 }
 0xa66   : > { %v3046_v29 = vand.u32 %v16318_v25, %v3037_v26  ;;  %v13120_v30 = vpop.f32.mrb[23].mxu0  ;;  %13121 = vmatprep.subr.bf16.mxu1 %v15374_v1  ;;  %v11981_v26 = vld [vmem:[#allocation12] ss:$0 sm:$0xff] }
 0xa68   : > { %11979 = vmatmul.mubr.msk.bf16.vlgmr.msra.gmra.mrb[28].mxu1 %vm1784_vm3, %v2893_v63  ;;  %v14439_v63 = vld [vmem:[%s16095_s10] sm:$0x3f]  ;;  %s1663_s10 = scalar_lea.vmem %s15583_s5, %s16057_s16 }
 0xa69   : > { %13122 = vmatpush3.bf16.msra.mxu1 %v3046_v29  ;;  %13123 = vmatprep.mubr.msk.bf16.mxu1 %vm15375_vm0, %v15374_v1  ;;  %v16354_v56 = vsel %vm1784_vm3, %v14439_v63, 0.0  ;;  %v13722_v63 = vld [vmem:[#allocation10 + $0x14] sm:$0xff]  }
 0xa6a   : > { %13127 = vmatprep.subr.bf16.mxu1 %v15374_v1  ;;  %v4030_v4 = vmul.f32 %v16356_v3, %v16354_v56 }
 0xa6c   : > { %v4032_v5 = vsel %vm4031_vm5, %v4030_v4, 0.0  ;;  %v13723_v4 = vld [vmem:[#allocation10 + $0x1c] sm:$0xff]  }
 0xa6d   : > { %4033 = vadd.xlane.f32.xlu0 %v4032_v5 }
 0xa70   : > { %13124 = vmatmul.mubr.msk.bf16.vlgmr.msra.gmra.mrb[32].mxu1 %vm3038_vm4, %v16329_v32 }
 0xa71   : > { %13128 = vmatpush3.bf16.msra.mxu1 %v3196_v33  ;;  %13129 = vmatprep.mubr.msk.bf16.mxu1 %vm15375_vm0, %v15374_v1 }
 0xa72   : > { %13143 = vmatprep.subr.bf16.mxu1 %v15374_v1 }
 0xa7c   : > { %13130 = vmatmul.mubr.msk.bf16.vlgmr.msra.gmra.mrb[32].mxu1 %vm2051_vm14, %v16337_v35 }
 0xa7d   : > { %13149 = vmatprep.mubr.msk.bf16.mxu1 %vm15375_vm0, %v15374_v1  ;;  %13144 = vmatpush3.bf16.msra.mxu1 %v13713_v39  ;;  %v12020_v39 = vcombine.high %v3656_v38, %v3656_v38 }
 0xa7e   : > { %13145 = vmatprep.subr.bf16.mxu1 %v15374_v1 }
 0xa81   : > { %13146 = vmatpush3.bf16.msra.mxu1 %v13717_v42 }
 0xa82   : > { %13147 = vmatprep.subr.bf16.mxu1 %v15374_v1 }
 0xa85   : > { %13148 = vmatpush3.bf16.msra.mxu1 %v3378_v50 }
 0xa86   : > { %13165 = vmatprep.subr.bf16.mxu1 %v15374_v1 }
 0xb2f   : > { %v2822_v11 = vpop.f32.mrb[24].mxu1 }
 0xb30   : > { %v2828_v13 = vadd.f32 %v2822_v11, %v16281_v48  ;;  %v13109_v14 = vpop.f32.mrb[25].mxu1 }
 0xb31   : > { %v2825_v15 = vpop.f32.mrb[26].mxu1 }
 0xb32   : > { %v2837_v16 = vadd.f32 %v11968_v12, %v2828_v13  ;;  %v13110_v17 = vpop.f32.mrb[27].mxu1  ;;  %v13721_v13 = vld [vmem:[%s17199_s1 + $0x8] sm:$0x1f]  }
 0xb33   : > { %v3525_v17 = vsel %vm2055_vm12, %v13721_v13, 0 }
 0xb34   : > { %v2838_v18 = vmax.f32 %v2837_v16, 0.0 }
 0xb36   : > { %v16366_v19 = vsel %vm1784_vm3, %v2838_v18, 0.0  ;;  %v13724_v18 = vld [vmem:[#allocation10 + $0x24] ss:$0 sps:$4 sm:$0xff]  }
 0xb37   : > { %v4035_v20 = vmul.f32 %v16356_v3, %v16366_v19 }
 0xb39   : > { %v4036_v21 = vsel %vm4031_vm5, %v4035_v20, 0.0  ;;  %v3594_v20 = vsel %vm1788_vm2, %v13724_v18, 0 }
 0xb3a   : > { %4037 = vadd.xlane.f32.xlu0 %v4036_v21  ;;  %v13727_v21 = vld [vmem:[#allocation9 + $0x7c] ss:$12 sps:$4 sm:$0xff]  }
 0xb3b   : > { %v2980_v2 = vpop.f32.mrb[28].mxu1 }
 0xb3c   : > { %v2982_v22 = vpop.f32.mrb[29].mxu1  ;;  %v3034_v48 = vadd.f32 %v11981_v26, %v2980_v2  ;;  %v13728_v2 = vld [vmem:[#allocation9 + $0x80] ss:$12 sps:$4 sm:$0xff]  }
 0xb3d   : > { %v2984_v23 = vpop.f32.mrb[30].mxu1 }
 0xb3e   : > { %v2985_v24 = vpop.f32.mrb[31].mxu1  ;;  %v3035_v28 = vmul.f32 %v3034_v48, %v16371_v27 }
 0xb4f   : > { %v3232_v29 = vpop.f32.mrb[32].mxu1 }
 0xb50   : > { %v13266_v30 = vadd.f32 %v3232_v29, %v3035_v28  ;;  %v13131_v31 = vpop.f32.mrb[33].mxu1 }
 0xb51   : > { %v3235_v33 = vpop.f32.mrb[34].mxu1 }
 0xb52   : > { %v3244_v9 = vpack.c.bf16 %v13266_v30, %v13266_v30  ;;  %v13132_v36 = vpop.f32.mrb[35].mxu1  ;;  %v13725_v30 = vld [vmem:[#allocation9 + $0x78] ss:$12 sps:$4 sm:$0xff]  }
 0xb53   : > { %v13729_v36 = vld [vmem:[#allocation9 + $0x90] ss:$12 sps:$4 sm:$0xff]  }
 0xb54   : > { %13140 = vmatmul.mubr.msk.bf16.vlgmr.msra.gmra.mrb[24].mxu0 %vm1784_vm3, %v3244_v9  ;;  %v13731_v9 = vld [vmem:[#allocation9 + $0x94] ss:$12 sps:$4 sm:$0xff]  }
 0xb55   : > { %3412 = vmatprep.mubr.bf16.mxu0 %v15373_v0  ;;  %3381 = vmatpush1.bf16.msra.mxu0 %v13710_v37  ;;  %v13732_v37 = vld [vmem:[#allocation9 + $0x98] ss:$12 sps:$4 sm:$0xff]  }
 0xb56   : > { %3382 = vmatprep.subr.bf16.mxu0 %v13716_v40  ;;  %v12019_v40 = vcombine.low %v3656_v38, %v3656_v38 }
 0xb58   : > { %v3703_v42 = vsel %vm1788_vm2, %v12019_v40, 0  ;;  %v13760_v40 = vld [vmem:[#allocation16 + $0xec] ss:$16 sps:$4 sm:$0xff]  }
 0xb59   : > { %3383 = vmatpush1.bf16.msra.mxu0 %v13714_v41  ;;  %v13735_v41 = vld [vmem:[#allocation9 + $0xb0] ss:$0 sps:$4 sm:$0xff]  }
 0xb5a   : > { %11999 = vmatprep.subr.msk.bf16.mxu0 %vm1788_vm2, %v11997_v44  ;;  %v3709_v43 = vsel %vm1788_vm2, %v13735_v41, 0 }
 0xb5d   : > { %3385 = vmatpush1.bf16.msra.mxu0 %v3372_v49 }
 0xb5e   : > { %13153 = vmatprep.subr.bf16.mxu0 %v15374_v1 }
 0xc27   : > { %v3300_v51 = vpop.f32.mrb[24].mxu0 }
 0xc28   : > { %v3306_v53 = vadd.f32 %v3300_v51, %v2982_v22  ;;  %v13141_v55 = vpop.f32.mrb[25].mxu0  ;;  %v12002_v22 = vld [vmem:[#allocation12 + $0x1] ss:$0 sm:$0xff] }
 0xc29   : > { %v3303_v59 = vpop.f32.mrb[26].mxu0 }
 0xc2a   : > { %v3314_v57 = vadd.f32 %v11989_v34, %v3306_v53  ;;  %v13142_v60 = vpop.f32.mrb[27].mxu0  ;;  %v13785_v59 = vld [vmem:[#allocation10 + $0x28] sm:$0xff]  }
 0xc2b   : > { %v4034_v60 = vpop.xlane.xlu0 %4033 }
 0xc2c   : > { %v3315_v61 = vmax.f32 %v3314_v57, 0.0  ;;  %v13786_v57 = vld [vmem:[#allocation10 + $0x30] sm:$0xff]  }
 0xc2e   : > { %v3327_v62 = vpack.c.bf16 %v3315_v61, %v3315_v61 }
 0xc2f   : > { %v4038_v61 = vpop.xlane.xlu0 %4037 }
 0xc30   : > { %12000 = vmatmul.mubr.msk.bf16.vlgmr.msra.gmra.mrb[28].mxu0 %vm1784_vm3, %v3327_v62  ;;  %13150 = vmatmul.mubr.msk.bf16.vlgmr.msra.gmra.mrb[36].mxu1 %vm1784_vm3, %v3327_v62 }
 0xc31   : > { %13155 = vmatprep.mubr.msk.bf16.mxu0 %vm15375_vm0, %v15374_v1  ;;  %13171 = vmatprep.mubr.msk.bf16.mxu1 %vm15375_vm0, %v15374_v1 }
 0xc32   : > { %13166 = vmatpush3.bf16.msra.mxu1 %v13722_v63 }
 0xc33   : > { %13167 = vmatprep.subr.bf16.mxu1 %v15374_v1 }
 0xc36   : > { %13168 = vmatpush3.bf16.msra.mxu1 %v13723_v4 }
 0xc37   : > { %13169 = vmatprep.subr.bf16.mxu1 %v15374_v1 }
 0xc3a   : > { %13170 = vmatpush3.bf16.msra.mxu1 %v3594_v20 }
 0xc3b   : > { %3711 = vmatprep.subr.bf16.mxu1 %v13727_v21 }
 0xd03   : > { %v3414_v5 = vpop.f32.mrb[28].mxu0  ;;  %v3455_v6 = vpop.f32.mrb[36].mxu1 }
 0xd04   : > { %v3471_v7 = vpack.c.bf16 %v3455_v6, %v3455_v6  ;;  %v3416_v8 = vpop.f32.mrb[29].mxu0  ;;  %v13151_v10 = vpop.f32.mrb[37].mxu1  ;;  %v3469_v23 = vadd.f32 %v12002_v22, %v3414_v5  ;;  %v13742_v22 = vld [vmem:[#allocation16 + $0x2c] ss:$16 sps:$4 sm:$0xff]  }
 0xd05   : > { %v3418_v11 = vpop.f32.mrb[30].mxu0  ;;  %v3458_v12 = vpop.f32.mrb[38].mxu1  ;;  %v13736_v10 = vld [vmem:[%s17199_s1 + $0x10] sm:$0x1f]  }
 0xd06   : > { %v3473_v14 = vand.u32 %v3471_v7, %v16318_v25  ;;  %v3419_v15 = vpop.f32.mrb[31].mxu0  ;;  %v13152_v16 = vpop.f32.mrb[39].mxu1  ;;  %v3470_v24 = vmul.f32 %v3469_v23, %v16371_v27  ;;  %v4039_v11 = vmax.f32 %v4034_v60, %v4038_v61  ;;  %v13740_v23 = vld [vmem:[#allocation16 + $0x28] ss:$16 sps:$4 sm:$0xff]  }
 0xd07   : > { %v3856_v15 = vsel %vm2055_vm12, %v13736_v10, 0  ;;  %v13739_v16 = vld [vmem:[#allocation16 + $0xc] ss:$16 sps:$4 sm:$0xff]   ;;  %v16446_v10 = vpack.c.bf16 %v16356_v3, %v16356_v3 }
 0xd08   : > { %13154 = vmatpush3.bf16.msra.mxu0 %v3473_v14  ;;  %v4043_v18 = vsub.f32 %v4038_v61, %v4039_v11  ;;  %v13778_v61 = vld [vmem:[#allocation15 + $0xac] ss:$16 sps:$4 sm:$0xff]  }
 0xd09   : > { %13159 = vmatprep.subr.bf16.mxu0 %v15374_v1 }
 0xd0a   : > { %v4044_v21 = vmul.f32 1.442695, %v4043_v18 }
 0xd0b   : > { %13156 = vmatmul.mubr.msk.bf16.vlgmr.msra.gmra.mrb[32].mxu0 %vm3038_vm4, %v16329_v32 }
 0xd0c   : > { %13160 = vmatpush3.bf16.msra.mxu0 %v3525_v17  ;;  %13161 = vmatprep.mubr.msk.bf16.mxu0 %vm15375_vm0, %v15374_v1  ;;  %v4040_v17 = vsub.f32 %v4034_v60, %v4039_v11  ;;  %v13773_v60 = vld [vmem:[#allocation15 + $0x88] ss:$16 sps:$4 sm:$0xff]   ;;  %v13787_v11 = vld [vmem:[#allocation10 + $0x38] ss:$0 sps:$4 sm:$0xff]  }
 0xd0d   : > { %13175 = vmatprep.subr.bf16.mxu0 %v15374_v1 }
 0xd0e   : > { %v4041_v20 = vmul.f32 1.442695, %v4040_v17 }
 0xd10   : > { %14252 = vpow2.f32 %v4041_v20 }
 0xd11   : > { %14254 = vpow2.f32 %v4044_v21  ;;  %v13788_v21 = vld [vmem:[#allocation16] ss:$16 sps:$4 sm:$0xff]  }
 0xd17   : > { %13162 = vmatmul.mubr.msk.bf16.vlgmr.msra.gmra.mrb[32].mxu0 %vm2051_vm14, %v16337_v35 }
 0xd18   : > { %13181 = vmatprep.mubr.msk.bf16.mxu0 %vm15375_vm0, %v15374_v1  ;;  %13176 = vmatpush3.bf16.msra.mxu0 %v13728_v2  ;;  %v13737_v2 = vld [vmem:[#allocation16 + $0x8] ss:$16 sps:$4 sm:$0xff]  }
 0xd19   : > { %13177 = vmatprep.subr.bf16.mxu0 %v15374_v1 }
 0xd1c   : > { %13178 = vmatpush3.bf16.msra.mxu0 %v13732_v37 }
 0xd1d   : > { %13179 = vmatprep.subr.bf16.mxu0 %v15374_v1 }
 0xd20   : > { %13180 = vmatpush3.bf16.msra.mxu0 %v3709_v43  ;;  %v13758_v43 = vld [vmem:[#allocation16 + $0xe8] ss:$16 sps:$4 sm:$0xff]  }
 0xd21   : > { %13197 = vmatprep.subr.bf16.mxu0 %v15374_v1 }
 0xdea   : > { %v3561_v26 = vpop.f32.mrb[32].mxu0 }
 0xdeb   : > { %v13267_v48 = vadd.f32 %v3561_v26, %v3470_v24  ;;  %v13163_v28 = vpop.f32.mrb[33].mxu0  ;;  %v14253_v24 = vpop.eup %14252  ;;  %v13743_v26 = vld [vmem:[#allocation16 + $0x48] ss:$16 sps:$4 sm:$0xff]  }
 0xdec   : > { %v3564_v29 = vpop.f32.mrb[34].mxu0  ;;  %v13748_v28 = vld [vmem:[#allocation16 + $0x6c] ss:$16 sps:$4 sm:$0xff]   ;;  %v4046_v37 = vmul.f32 %v14253_v24, %v16354_v56 }
 0xded   : > { %v3574_v31 = vpack.c.bf16 %v13267_v48, %v13267_v48  ;;  %v13164_v33 = vpop.f32.mrb[35].mxu0  ;;  %v14255_v48 = vpop.eup %14254 }
 0xdee   : > { %v4049_v29 = vadd.f32 %v14255_v48, %v14253_v24  ;;  %v13754_v33 = vld [vmem:[#allocation16 + $0xac] ss:$16 sps:$4 sm:$0xff]   ;;  %v4047_v38 = vmul.f32 %v14255_v48, %v16366_v19  ;;  %v13796_v24 = vld [vmem:[#allocation16 + $0x44] ss:$16 sps:$4 sm:$0xff]  }
 0xdef   : > { %13172 = vmatmul.mubr.msk.bf16.vlgmr.msra.gmra.mrb[40].mxu1 %vm1784_vm3, %v3574_v31  ;;  %v13751_v31 = vld [vmem:[#allocation16 + $0x8c] ss:$16 sps:$4 sm:$0xff]   ;;  %v13802_v48 = vld [vmem:[#allocation16 + $0x84] ss:$16 sps:$4 sm:$0xff]  }
 0xdf0   : > { %3712 = vmatpush1.bf16.msra.mxu1 %v13725_v30  ;;  %3743 = vmatprep.mubr.bf16.mxu1 %v15373_v0  ;;  %v13746_v30 = vld [vmem:[#allocation16 + $0x68] ss:$16 sps:$4 sm:$0xff]   ;;  %14256 = vrcp.f32 %v4049_v29  ;;  %v13805_v29 = vld [vmem:[#allocation16 + $0xa4] ss:$16 sps:$4 sm:$0xff]  }
 0xdf1   : > { %3713 = vmatprep.subr.bf16.mxu1 %v13731_v9  ;;  %v13752_v9 = vld [vmem:[#allocation16 + $0xa8] ss:$16 sps:$4 sm:$0xff]  }
 0xdf4   : > { %3714 = vmatpush1.bf16.msra.mxu1 %v13729_v36  ;;  %v13757_v36 = vld [vmem:[#allocation16 + $0xcc] ss:$16 sps:$4 sm:$0xff]  }
 0xdf5   : > { %12022 = vmatprep.subr.msk.bf16.mxu1 %vm1788_vm2, %v12020_v39  ;;  %v13755_v39 = vld [vmem:[#allocation16 + $0xc8] ss:$16 sps:$4 sm:$0xff]  }
 0xdf8   : > { %3716 = vmatpush1.bf16.msra.mxu1 %v3703_v42  ;;  %v4048_v42 = vadd.f32 %v4047_v38, %v4046_v37 }
 0xdf9   : > { %13185 = vmatprep.subr.bf16.mxu1 %v15374_v1 }
 0xdfa   : > { %v14257_v41 = vpop.eup %14256 }
 0xec2   : > { %v3630_v44 = vpop.f32.mrb[40].mxu1 }
 0xec3   : > { %v3636_v47 = vadd.f32 %v3630_v44, %v3416_v8  ;;  %v13173_v49 = vpop.f32.mrb[41].mxu1  ;;  %v4051_v44 = vmul.f32 %v14257_v41, %v4048_v42  ;;  %v13817_v42 = vld [vmem:[#allocation15 + $0x24] ss:$16 sps:$4 sm:$0xff]  }
 0xec4   : > { %v3633_v50 = vpop.f32.mrb[42].mxu1 }
 0xec5   : > { %v3645_v51 = vadd.f32 %v12012_v45, %v3636_v47  ;;  %v13174_v34 = vpop.f32.mrb[43].mxu1  ;;  %v13763_v45 = vld [vmem:[#allocation15 + $0xc] ss:$16 sps:$4 sm:$0xff]   ;;  %v13761_v47 = vld [vmem:[#allocation15 + $0x8] ss:$16 sps:$4 sm:$0xff]   ;;  %v16440_v49 = vpack.c.bf16 %v4051_v44, %v4051_v44 }
 0xec6   : > { %v13766_v50 = vld [vmem:[#allocation15 + $0x2c] ss:$16 sps:$4 sm:$0xff]   ;;  %v13820_v44 = vld [vmem:[#allocation15 + $0x44] ss:$16 sps:$4 sm:$0xff]  }
 0xec7   : > { %v3646_v53 = vmax.f32 %v3645_v51, 0.0  ;;  %v13764_v51 = vld [vmem:[#allocation15 + $0x28] ss:$16 sps:$4 sm:$0xff]   ;;  %v13769_v34 = vld [vmem:[#allocation15 + $0x4c] ss:$16 sps:$4 sm:$0xff]  }
 0xec9   : > { %v3658_v55 = vpack.c.bf16 %v3646_v53, %v3646_v53  ;;  %v13767_v53 = vld [vmem:[#allocation15 + $0x48] ss:$16 sps:$4 sm:$0xff]  }
 0xecb   : > { %12023 = vmatmul.mubr.msk.bf16.vlgmr.msra.gmra.mrb[44].mxu1 %vm1784_vm3, %v3658_v55  ;;  %13182 = vmatmul.mubr.msk.bf16.vlgmr.msra.gmra.mrb[36].mxu0 %vm1784_vm3, %v3658_v55  ;;  %v13772_v55 = vld [vmem:[#allocation15 + $0x6c] ss:$16 sps:$4 sm:$0xff]  }
 0xecc   : > { %13187 = vmatprep.mubr.msk.bf16.mxu1 %vm15375_vm0, %v15374_v1  ;;  %13203 = vmatprep.mubr.msk.bf16.mxu0 %vm15375_vm0, %v15374_v1 }
 0xecd   : > { %13198 = vmatpush3.bf16.msra.mxu0 %v13785_v59  ;;  %v13770_v59 = vld [vmem:[#allocation15 + $0x68] ss:$16 sps:$4 sm:$0xff]  }
 0xece   : > { %13199 = vmatprep.subr.bf16.mxu0 %v15374_v1 }
 0xed1   : > { %13200 = vmatpush3.bf16.msra.mxu0 %v13786_v57  ;;  %v13775_v57 = vld [vmem:[#allocation15 + $0x8c] ss:$16 sps:$4 sm:$0xff]  }
 0xed2   : > { %13201 = vmatprep.subr.bf16.mxu0 %v15374_v1 }
 0xf9e   : > { %v16423_v62 = vpop.f32.mrb[44].mxu1  ;;  %v3786_v63 = vpop.f32.mrb[36].mxu0 }
 0xf9f   : > { %v3802_v4 = vpack.c.bf16 %v3786_v63, %v3786_v63  ;;  %v16425_v5 = vpop.f32.mrb[45].mxu1  ;;  %v13183_v6 = vpop.f32.mrb[37].mxu0  ;;  %v13776_v63 = vld [vmem:[#allocation15 + $0xa8] ss:$16 sps:$4 sm:$0xff]  }
 0xfa0   : > { %v3749_v7 = vpop.f32.mrb[46].mxu1  ;;  %v3789_v8 = vpop.f32.mrb[38].mxu0  ;;  %v13779_v6 = vld [vmem:[#allocation15 + $0xc8] ss:$16 sps:$4 sm:$0xff]  }
 0xfa1   : > { %v3804_v12 = vand.u32 %v3802_v4, %v16318_v25  ;;  %v3750_v13 = vpop.f32.mrb[47].mxu1  ;;  %v13184_v14 = vpop.f32.mrb[39].mxu0  ;;  %v13781_v4 = vld [vmem:[#allocation15 + $0xcc] ss:$16 sps:$4 sm:$0xff]   ;;  %v13782_v8 = vld [vmem:[#allocation15 + $0xe8] ss:$16 sps:$4 sm:$0xff]  }
 0xfa2   : > { %v13784_v7 = vld [vmem:[#allocation15 + $0xec] ss:$16 sps:$4 sm:$0xff]   ;;  %v13790_v13 = vld [vmem:[#allocation16 + $0x4] ss:$16 sps:$4 sm:$0xff]   ;;  %v12025_v14 = vld [vmem:[#allocation12 + $0x2] ss:$0 sm:$0xff] }
 0xfa3   : > { %13186 = vmatpush3.bf16.msra.mxu1 %v3804_v12  ;;  %v3925_v12 = vsel %vm1788_vm2, %v13787_v11, 0  ;;  %vm5656_vm2 = vcmask 654336  }
 0xfa4   : > { %13191 = vmatprep.subr.bf16.mxu1 %v15374_v1  ;;  %13202 = vmatpush3.bf16.msra.mxu0 %v3925_v12 }
 0xfa5   : > { %4278 = vmatprep.subr.bf16.mxu0 %v13790_v13  ;;  %v13833_v13 = vld [vmem:[#allocation15 + $0xe0] ss:$16 sps:$4 sm:$0xff]  }
 0xfa6   : > { %13188 = vmatmul.mubr.msk.bf16.vlgmr.msra.gmra.mrb[48].mxu1 %vm3038_vm4, %v16329_v32  ;;  %v13745_v32 = vld [vmem:[#allocation16 + $0x4c] ss:$16 sps:$4 sm:$0xff]  }
 0xfa7   : > { %13192 = vmatpush3.bf16.msra.mxu1 %v3856_v15  ;;  %13193 = vmatprep.mubr.msk.bf16.mxu1 %vm15375_vm0, %v15374_v1  ;;  %v3800_v15 = vadd.f32 %v12025_v14, %v16423_v62  ;;  %v13794_v62 = vld [vmem:[#allocation16 + $0x40] ss:$16 sps:$4 sm:$0xff]  }
 0xfa8   : > { %4319 = vmatprep.subr.bf16.mxu1 %v13739_v16 }
 0xfa9   : > { %v3801_v16 = vmul.f32 %v3800_v15, %v16371_v27  ;;  %v13799_v27 = vld [vmem:[#allocation16 + $0x64] ss:$16 sps:$4 sm:$0xff]  }
 0xfb2   : > { %13194 = vmatmul.mubr.msk.bf16.vlgmr.msra.gmra.mrb[48].mxu1 %vm2051_vm14, %v16337_v35  ;;  %v13749_v35 = vld [vmem:[#allocation16 + $0x88] ss:$16 sps:$4 sm:$0xff]  }
 0xfb3   : > { %4320 = vmatpush1.bf16.msra.mxu1 %v13737_v2  ;;  %4351 = vmatprep.mubr.bf16.mxu1 %v15373_v0 }
 0xfb4   : > { %4321 = vmatprep.subr.bf16.mxu1 %v13742_v22 }
 0xfb7   : > { %4322 = vmatpush1.bf16.msra.mxu1 %v13740_v23  ;;  %v13793_v23 = vld [vmem:[#allocation16 + $0x24] ss:$16 sps:$4 sm:$0xff]  }
 0xfb8   : > { %4323 = vmatprep.subr.bf16.mxu1 %v13745_v32  ;;  %v13791_v32 = vld [vmem:[#allocation16 + $0x20] ss:$16 sps:$4 sm:$0xff]  }
 0xfbb   : > { %4324 = vmatpush1.bf16.msra.mxu1 %v13743_v26  ;;  %v13797_v26 = vld [vmem:[#allocation16 + $0x60] ss:$16 sps:$4 sm:$0xff]  }
 0xfbc   : > { %4325 = vmatprep.subr.bf16.mxu1 %v13748_v28  ;;  %v13800_v28 = vld [vmem:[#allocation16 + $0x80] ss:$16 sps:$4 sm:$0xff]  }
 0xfbf   : > { %4326 = vmatpush1.bf16.msra.mxu1 %v13746_v30  ;;  %v13803_v30 = vld [vmem:[#allocation16 + $0xa0] ss:$16 sps:$4 sm:$0xff]  }
 0xfc0   : > { %4327 = vmatprep.subr.bf16.mxu1 %v13751_v31  ;;  %v13808_v31 = vld [vmem:[#allocation16 + $0xc4] ss:$16 sps:$4 sm:$0xff]  }
 0xfc3   : > { %4328 = vmatpush1.bf16.msra.mxu1 %v13749_v35  ;;  %v13806_v35 = vld [vmem:[#allocation16 + $0xc0] ss:$16 sps:$4 sm:$0xff]  }
 0xfc4   : > { %4329 = vmatprep.subr.bf16.mxu1 %v13754_v33  ;;  %v13811_v33 = vld [vmem:[#allocation16 + $0xe4] ss:$16 sps:$4 sm:$0xff]  }
 0xfc7   : > { %4330 = vmatpush1.bf16.msra.mxu1 %v13752_v9  ;;  %v13809_v9 = vld [vmem:[#allocation16 + $0xe0] ss:$16 sps:$4 sm:$0xff]  }
 0xfc8   : > { %4331 = vmatprep.subr.bf16.mxu1 %v13757_v36  ;;  %v13814_v36 = vld [vmem:[#allocation15 + $0x4] ss:$16 sps:$4 sm:$0xff]  }
 0xfcb   : > { %4332 = vmatpush1.bf16.msra.mxu1 %v13755_v39 }
 0xfcc   : > { %4333 = vmatprep.subr.bf16.mxu1 %v13760_v40  ;;  %v13812_v40 = vld [vmem:[#allocation15] ss:$16 sps:$4 sm:$0xff]  }
 0xfcf   : > { %4334 = vmatpush1.bf16.msra.mxu1 %v13758_v43  ;;  %v13815_v43 = vld [vmem:[#allocation15 + $0x20] ss:$16 sps:$4 sm:$0xff]  }
 0xfd0   : > { %4561 = vmatprep.subr.bf16.mxu1 %v13763_v45  ;;  %v13818_v45 = vld [vmem:[#allocation15 + $0x40] ss:$16 sps:$4 sm:$0xff]  }
 0xfd2   : > { %4352 = vmatmul.mubr.bf16.vlgmr.msra.gmra.mrb[52].mxu1 %v16440_v49 }
 0xfd3   : > { %4562 = vmatpush1.bf16.msra.mxu1 %v13761_v47  ;;  %4593 = vmatprep.mubr.bf16.mxu1 %v15373_v0  ;;  %v13823_v47 = vld [vmem:[#allocation15 + $0x64] ss:$16 sps:$4 sm:$0xff]  }
 0xfd4   : > { %4563 = vmatprep.subr.bf16.mxu1 %v13766_v50  ;;  %v16457_v50 = vld [vmem:[#allocation22] sm:$0xf] }
 0xfd5   : > { %v4689_v11 = vrot.slane %v16457_v50, 2  ;;  %v4692_v12 = vrot.slane %v16457_v50, 3 }
 0xfd7   : > { %4564 = vmatpush1.bf16.msra.mxu1 %v13764_v51  ;;  %v13821_v51 = vld [vmem:[#allocation15 + $0x60] ss:$16 sps:$4 sm:$0xff]   ;;  %v12108_v15 = vmul.f32 -1.442695, %v4692_v12 }
 0xfd8   : > { %4565 = vmatprep.subr.bf16.mxu1 %v13769_v34  ;;  %v4681_v34 = vrot.slane %v16457_v50, 1  ;;  %v13859_v12 = vld [vmem:[#allocation21 + $0x6c] ss:$16 sps:$4 sm:$0xff]  }
 0xfdb   : > { %4566 = vmatpush1.bf16.msra.mxu1 %v13767_v53  ;;  %v13826_v53 = vld [vmem:[#allocation15 + $0x84] ss:$16 sps:$4 sm:$0xff]  }
 0xfdc   : > { %4567 = vmatprep.subr.bf16.mxu1 %v13772_v55  ;;  %v12107_v55 = vmul.f32 -1.442695, %v4681_v34  ;;  %v13836_v34 = vld [vmem:[#allocation21] ss:$16 sps:$4 sm:$0xff]  }
 0xfdf   : > { %4568 = vmatpush1.bf16.msra.mxu1 %v13770_v59  ;;  %v13824_v59 = vld [vmem:[#allocation15 + $0x80] ss:$16 sps:$4 sm:$0xff]  }
 0xfe0   : > { %4569 = vmatprep.subr.bf16.mxu1 %v13775_v57  ;;  %v13829_v57 = vld [vmem:[#allocation15 + $0xa4] ss:$16 sps:$4 sm:$0xff]  }
 0xfe3   : > { %4570 = vmatpush1.bf16.msra.mxu1 %v13773_v60  ;;  %v13827_v60 = vld [vmem:[#allocation15 + $0xa0] ss:$16 sps:$4 sm:$0xff]  }
 0xfe4   : > { %4571 = vmatprep.subr.bf16.mxu1 %v13778_v61  ;;  %v13832_v61 = vld [vmem:[#allocation15 + $0xc4] ss:$16 sps:$4 sm:$0xff]  }
 0xfe7   : > { %4572 = vmatpush1.bf16.msra.mxu1 %v13776_v63  ;;  %v13830_v63 = vld [vmem:[#allocation15 + $0xc0] ss:$16 sps:$4 sm:$0xff]  }
 0xfe8   : > { %4573 = vmatprep.subr.bf16.mxu1 %v13781_v4  ;;  %v13835_v4 = vld [vmem:[#allocation15 + $0xe4] ss:$16 sps:$4 sm:$0xff]  }
 0xfeb   : > { %4574 = vmatpush1.bf16.msra.mxu1 %v13779_v6 }
 0xfec   : > { %4575 = vmatprep.subr.bf16.mxu1 %v13784_v7 }
 0xfef   : > { %4576 = vmatpush1.bf16.msra.mxu1 %v13782_v8 }
 0xff2   : > { %4594 = vmatmul.mubr.bf16.vlgmr.msra.gmra.mrb[56].mxu1 %v16446_v10 }
 0xff3   : > { %5043 = vmatprep.mubr.bf16.mxu1 %v15373_v0 }
0x1085   : > { %v3892_v17 = vpop.f32.mrb[48].mxu1 }
0x1086   : > { %v13268_v18 = vadd.f32 %v3892_v17, %v3801_v16  ;;  %v13195_v3 = vpop.f32.mrb[49].mxu1 }
0x1087   : > { %v3895_v20 = vpop.f32.mrb[50].mxu1 }
0x1088   : > { %v3905_v2 = vpack.c.bf16 %v13268_v18, %v13268_v18  ;;  %v13196_v22 = vpop.f32.mrb[51].mxu1 }
0x108a   : > { %13204 = vmatmul.mubr.msk.bf16.vlgmr.msra.gmra.mrb[40].mxu0 %vm1784_vm3, %v3905_v2 }
0x108b   : > { %4279 = vmatpush1.bf16.msra.mxu0 %v13788_v21  ;;  %4310 = vmatprep.mubr.bf16.mxu0 %v15373_v0 }
0x108c   : > { %4280 = vmatprep.subr.bf16.mxu0 %v13793_v23 }
0x108f   : > { %4281 = vmatpush1.bf16.msra.mxu0 %v13791_v32 }
0x1090   : > { %4282 = vmatprep.subr.bf16.mxu0 %v13796_v24 }
0x1093   : > { %4283 = vmatpush1.bf16.msra.mxu0 %v13794_v62 }
0x1094   : > { %4284 = vmatprep.subr.bf16.mxu0 %v13799_v27 }
0x1097   : > { %4285 = vmatpush1.bf16.msra.mxu0 %v13797_v26 }
0x1098   : > { %4286 = vmatprep.subr.bf16.mxu0 %v13802_v48 }
0x109b   : > { %4287 = vmatpush1.bf16.msra.mxu0 %v13800_v28 }
0x109c   : > { %4288 = vmatprep.subr.bf16.mxu0 %v13805_v29 }
0x109f   : > { %4289 = vmatpush1.bf16.msra.mxu0 %v13803_v30 }
0x10a0   : > { %4290 = vmatprep.subr.bf16.mxu0 %v13808_v31  ;;  %v16477_v31 = vsel %vm1784_vm3, %v16299_v54, 0.0 }
0x10a3   : > { %4291 = vmatpush1.bf16.msra.mxu0 %v13806_v35 }
0x10a4   : > { %4292 = vmatprep.subr.bf16.mxu0 %v13811_v33 }
0x10a5   : > { %v4353_v37 = vpop.f32.mrb[52].mxu1 }
0x10a6   : > { %v4355_v38 = vpop.f32.mrb[53].mxu1 }
0x10a7   : > { %4293 = vmatpush1.bf16.msra.mxu0 %v13809_v9  ;;  %v4357_v39 = vpop.f32.mrb[54].mxu1 }
0x10a8   : > { %v4358_v41 = vpop.f32.mrb[55].mxu1  ;;  %4520 = vmatprep.subr.bf16.mxu0 %v13814_v36 }
0x10aa   : > { %4311 = vmatmul.mubr.bf16.vlgmr.msra.gmra.mrb[44].mxu0 %v16440_v49  ;;  %v12106_v49 = vmul.f32 -1.442695, %v16457_v50 }
0x10ab   : > { %4521 = vmatpush1.bf16.msra.mxu0 %v13812_v40  ;;  %4552 = vmatprep.mubr.bf16.mxu0 %v15373_v0 }
0x10ac   : > { %4522 = vmatprep.subr.bf16.mxu0 %v13817_v42  ;;  %14258 = vpow2.f32 %v12106_v49  ;;  %v13847_v49 = vld [vmem:[#allocation21 + $0x2c] ss:$16 sps:$4 sm:$0xff]  }
0x10ad   : > { %14260 = vpow2.f32 %v12107_v55  ;;  %v13842_v55 = vld [vmem:[#allocation21 + $0x20] ss:$16 sps:$4 sm:$0xff]  }
0x10af   : > { %4523 = vmatpush1.bf16.msra.mxu0 %v13815_v43 }
0x10b0   : > { %4524 = vmatprep.subr.bf16.mxu0 %v13820_v44 }
0x10b3   : > { %4525 = vmatpush1.bf16.msra.mxu0 %v13818_v45 }
0x10b4   : > { %4526 = vmatprep.subr.bf16.mxu0 %v13823_v47  ;;  %v13838_v47 = vld [vmem:[#allocation21 + $0x4] ss:$16 sps:$4 sm:$0xff]  }
0x10b6   : > { %v14259_v6 = vpop.eup %14258 }
0x10b7   : > { %4527 = vmatpush1.bf16.msra.mxu0 %v13821_v51  ;;  %v14261_v7 = vpop.eup %14260  ;;  %v4677_v8 = vadd.f32 1.0, %v14259_v6  ;;  %v13841_v51 = vld [vmem:[#allocation21 + $0xc] ss:$16 sps:$4 sm:$0xff]   ;;  %v13848_v6 = vld [vmem:[#allocation21 + $0x40] ss:$16 sps:$4 sm:$0xff]  }
0x10b8   : > { %4528 = vmatprep.subr.bf16.mxu0 %v13826_v53  ;;  %v4686_v14 = vadd.f32 1.0, %v14261_v7  ;;  %v13839_v53 = vld [vmem:[#allocation21 + $0x8] ss:$16 sps:$4 sm:$0xff]   ;;  %5011 = vmatprep.subr.bf16.mxu1 %v13841_v51 }
0x10b9   : > { %14262 = vrcp.f32 %v4677_v8  ;;  %5012 = vmatpush1.bf16.msra.mxu1 %v13839_v53  ;;  %v13851_v7 = vld [vmem:[#allocation21 + $0x48] ss:$16 sps:$4 sm:$0xff]  }
0x10ba   : > { %14264 = vrcp.f32 %v4686_v14  ;;  %5013 = vmatprep.subr.bf16.mxu1 %v13847_v49  ;;  %v13857_v14 = vld [vmem:[#allocation21 + $0x68] ss:$16 sps:$4 sm:$0xff]   ;;  %v16507_v49 = vsub.s32 2, %v16122_v52 }
0x10bb   : > { %4529 = vmatpush1.bf16.msra.mxu0 %v13824_v59  ;;  %14266 = vtanh.f32 %v4689_v11  ;;  %v13845_v59 = vld [vmem:[#allocation21 + $0x28] ss:$16 sps:$4 sm:$0xff]   ;;  %v13856_v11 = vld [vmem:[#allocation21 + $0x64] ss:$16 sps:$4 sm:$0xff]  }
0x10bc   : > { %4530 = vmatprep.subr.bf16.mxu0 %v13829_v57  ;;  %14268 = vpow2.f32 %v12108_v15  ;;  %v13862_v15 = vld [vmem:[#allocation21 + $0x84] ss:$16 sps:$4 sm:$0xff]  }
0x10bd   : > { %5014 = vmatpush1.bf16.msra.mxu1 %v13845_v59 }
0x10bf   : > { %4531 = vmatpush1.bf16.msra.mxu0 %v13827_v60 }
0x10c0   : > { %4532 = vmatprep.subr.bf16.mxu0 %v13832_v61  ;;  %v13850_v61 = vld [vmem:[#allocation21 + $0x44] ss:$16 sps:$4 sm:$0xff]  }
0x10c3   : > { %4533 = vmatpush1.bf16.msra.mxu0 %v13830_v63  ;;  %v14263_v2 = vpop.eup %14262  ;;  %v13853_v63 = vld [vmem:[#allocation21 + $0x4c] ss:$16 sps:$4 sm:$0xff]  }
0x10c4   : > { %4534 = vmatprep.subr.bf16.mxu0 %v13835_v4  ;;  %v14265_v22 = vpop.eup %14264  ;;  %5015 = vmatprep.subr.bf16.mxu1 %v13853_v63 }
0x10c5   : > { %v4595_v16 = vpop.f32.mrb[56].mxu1  ;;  %v14267_v23 = vpop.eup %14266  ;;  %v4704_v32 = vrot.slane %v14265_v22, %v16344_v46  ;;  %5016 = vmatpush1.bf16.msra.mxu1 %v13851_v7  ;;  %v13869_v22 = vld [vmem:[#allocation21 + $0xa8] ss:$16 sps:$4 sm:$0xff]  }
0x10c6   : > { %v16463_v17 = vadd.f32 %v4595_v16, %v4353_v37  ;;  %v4597_v18 = vpop.f32.mrb[57].mxu1  ;;  %v14269_v24 = vpop.eup %14268  ;;  %v4707_v62 = vmul.f32 %v14267_v23, %v14263_v2  ;;  %v12035_v37 = vld [vmem:[#allocation13 + $0x2] ss:$0 sm:$0xff]  ;;  %5017 = vmatprep.subr.bf16.mxu1 %v13859_v12  ;;  %v13865_v16 = vld [vmem:[#allocation21 + $0x8c] ss:$16 sps:$4 sm:$0xff]  }
0x10c7   : > { %v16465_v3 = vadd.f32 %v4597_v18, %v4355_v38  ;;  %4535 = vmatpush1.bf16.msra.mxu0 %v13833_v13  ;;  %v4599_v20 = vpop.f32.mrb[58].mxu1  ;;  %v4697_v27 = vadd.f32 1.0, %v14269_v24  ;;  %v4706_v26 = vmul.f32 0.0, %v4704_v32  ;;  %v13854_v13 = vld [vmem:[#allocation21 + $0x60] ss:$16 sps:$4 sm:$0xff]  }
0x10c8   : > { %v4600_v21 = vpop.f32.mrb[59].mxu1  ;;  %v4712_v48 = vrot.slane %v4707_v62, %v16344_v46  ;;  %4970 = vmatprep.subr.bf16.mxu0 %v13838_v47  ;;  %v13860_v18 = vld [vmem:[#allocation21 + $0x80] ss:$16 sps:$4 sm:$0xff]   ;;  %v13863_v20 = vld [vmem:[#allocation21 + $0x88] ss:$16 sps:$4 sm:$0xff]  }
0x10c9   : > { %14270 = vrcp.f32 %v4697_v27  ;;  %5018 = vmatpush1.bf16.msra.mxu1 %v13857_v14  ;;  %v13866_v21 = vld [vmem:[#allocation21 + $0xa0] ss:$16 sps:$4 sm:$0xff]   ;;  %v13868_v2 = vld [vmem:[#allocation21 + $0xa4] ss:$16 sps:$4 sm:$0xff]   ;;  %v13871_v23 = vld [vmem:[#allocation21 + $0xac] ss:$16 sps:$4 sm:$0xff]  }
0x10ca   : > { %4553 = vmatmul.mubr.bf16.vlgmr.msra.gmra.mrb[48].mxu0 %v16446_v10  ;;  %v16471_v28 = vadd.f32 %v4712_v48, %v4706_v26  ;;  %5019 = vmatprep.subr.bf16.mxu1 %v13865_v16  ;;  %v13874_v32 = vld [vmem:[#allocation21 + $0xc4] ss:$16 sps:$4 sm:$0xff]   ;;  %v13877_v24 = vld [vmem:[#allocation21 + $0xcc] ss:$16 sps:$4 sm:$0xff]   ;;  %v13872_v62 = vld [vmem:[#allocation21 + $0xc0] ss:$16 sps:$4 sm:$0xff]  }
0x10cb   : > { %5002 = vmatprep.mubr.bf16.mxu0 %v15373_v0  ;;  %4971 = vmatpush1.bf16.msra.mxu0 %v13836_v34  ;;  %v13875_v27 = vld [vmem:[#allocation21 + $0xc8] ss:$16 sps:$4 sm:$0xff]   ;;  %v13880_v26 = vld [vmem:[#allocation21 + $0xe4] ss:$16 sps:$4 sm:$0xff]   ;;  %v13883_v48 = vld [vmem:[#allocation21 + $0xec] ss:$16 sps:$4 sm:$0xff]  }
0x10cc   : > { %14272 = vtanh.f32 %v16471_v28 }
0x10cd   : > { %5020 = vmatpush1.bf16.msra.mxu1 %v13863_v20 }
0x10ce   : > { %5021 = vmatprep.subr.bf16.mxu1 %v13871_v23 }
0x10d1   : > { %5022 = vmatpush1.bf16.msra.mxu1 %v13869_v22 }
0x10d2   : > { %5023 = vmatprep.subr.bf16.mxu1 %v13877_v24 }
0x10d3   : > { %v14271_v29 = vpop.eup %14270 }
0x10d4   : > { %v4720_v10 = vrot.slane %v14271_v29, %v16344_v46  ;;  %v13878_v29 = vld [vmem:[#allocation21 + $0xe0] ss:$16 sps:$4 sm:$0xff]  }
0x10d5   : > { %5024 = vmatpush1.bf16.msra.mxu1 %v13875_v27 }
0x10d6   : > { %v14273_v30 = vpop.eup %14272  ;;  %5025 = vmatprep.subr.bf16.mxu1 %v13883_v48 }
0x10d7   : > { %v16479_v35 = vmul.f32 %v14273_v30, %v4720_v10  ;;  %v13881_v10 = vld [vmem:[#allocation21 + $0xe8] ss:$16 sps:$4 sm:$0xff]   ;;  %v13886_v30 = vld [vmem:[#allocation19 + $0x4] ss:$16 sps:$4 sm:$0xff]  }
0x10d9   : > { %v4723_v33 = vmul.f32 %v16479_v35, %v16477_v31  ;;  %5026 = vmatpush1.bf16.msra.mxu1 %v13881_v10 }
0x10db   : > { %v4724_v9 = vsel %vm2055_vm12, %v4723_v33, 0.0  ;;  %v13889_v33 = vld [vmem:[#allocation19 + $0xc] ss:$16 sps:$4 sm:$0xff]  }
0x10dc   : > { %4725 = vadd.xlane.f32.xlu0 %v4724_v9  ;;  %5253 = vmatprep.subr.bf16.mxu1 %v13889_v33  ;;  %v16496_v9 = vsub.s32 1, %v16122_v52  ;;  %v13884_v33 = vld [vmem:[#allocation19] ss:$16 sps:$4 sm:$0xff]  }
0x115d   : > { %v3961_v36 = vpop.f32.mrb[40].mxu0 }
0x115e   : > { %v3967_v38 = vadd.f32 %v3961_v36, %v16425_v5  ;;  %v13205_v39 = vpop.f32.mrb[41].mxu0  ;;  %v13844_v5 = vld [vmem:[#allocation21 + $0x24] ss:$16 sps:$4 sm:$0xff]   ;;  %v14440_v36 = vld [vmem:[#allocation18] sm:$0xf] }
0x115f   : > { %v3964_v40 = vpop.f32.mrb[42].mxu0  ;;  %4972 = vmatprep.subr.bf16.mxu0 %v13844_v5  ;;  %v4609_v39 = vrot.slane %v14440_v36, %v16496_v9  ;;  %v4613_v59 = vrot.slane %v14440_v36, %v16507_v49 }
0x1160   : > { %v3976_v41 = vadd.f32 %v12035_v37, %v3967_v38  ;;  %v13206_v42 = vpop.f32.mrb[43].mxu0  ;;  %4973 = vmatpush1.bf16.msra.mxu0 %v13842_v55  ;;  %v4605_v37 = vrot.slane %v14440_v36, %v16344_v46 }
0x1161   : > { %4974 = vmatprep.subr.bf16.mxu0 %v13850_v61  ;;  %v16502_v42 = vsub.s32 3, %v16122_v52 }
0x1162   : > { %v3977_v43 = vmax.f32 %v3976_v41, 0.0 }
0x1163   : > { %v4617_v53 = vrot.slane %v14440_v36, %v16502_v42  ;;  %v13887_v36 = vld [vmem:[#allocation19 + $0x8] ss:$16 sps:$4 sm:$0xff]  }
0x1164   : > { %v16486_v54 = vsel %vm1784_vm3, %v3977_v43, 0.0  ;;  %4975 = vmatpush1.bf16.msra.mxu0 %v13848_v6 }
0x1165   : > { %v4727_v44 = vmul.f32 %v16479_v35, %v16486_v54  ;;  %4976 = vmatprep.subr.bf16.mxu0 %v13856_v11  ;;  %v4625_v55 = vadd.f32 %v4617_v53, %v16465_v3  ;;  %v13902_v53 = vld [vmem:[#allocation19 + $0x60] ss:$16 sps:$4 sm:$0xff]  }
0x1167   : > { %v4728_v45 = vsel %vm2055_vm12, %v4727_v44, 0.0 }
0x1168   : > { %4729 = vadd.xlane.f32.xlu0 %v4728_v45  ;;  %4977 = vmatpush1.bf16.msra.mxu0 %v13854_v13 }
0x1169   : > { %4978 = vmatprep.subr.bf16.mxu0 %v13862_v15  ;;  %v4726_v20 = vpop.xlane.xlu0 %4725 }
0x116c   : > { %4979 = vmatpush1.bf16.msra.mxu0 %v13860_v18 }
0x116d   : > { %4980 = vmatprep.subr.bf16.mxu0 %v13868_v2 }
0x1170   : > { %4981 = vmatpush1.bf16.msra.mxu0 %v13866_v21 }
0x1171   : > { %4982 = vmatprep.subr.bf16.mxu0 %v13874_v32 }
0x1174   : > { %4983 = vmatpush1.bf16.msra.mxu0 %v13872_v62 }
0x1175   : > { %4984 = vmatprep.subr.bf16.mxu0 %v13880_v26 }
0x1178   : > { %4985 = vmatpush1.bf16.msra.mxu0 %v13878_v29 }
0x1179   : > { %5212 = vmatprep.subr.bf16.mxu0 %v13886_v30 }
0x117d   : > { %v16491_v57 = vpop.f32.mrb[44].mxu0 }
0x117e   : > { %v16493_v60 = vpop.f32.mrb[45].mxu0 }
0x117f   : > { %v4316_v4 = vpop.f32.mrb[46].mxu0 }
0x1180   : > { %v4317_v8 = vpop.f32.mrb[47].mxu0 }
0x119d   : > { %v4554_v38 = vpop.f32.mrb[48].mxu0 }
0x119e   : > { %v4555_v40 = vadd.f32 %v4554_v38, %v16491_v57  ;;  %v4556_v41 = vpop.f32.mrb[49].mxu0  ;;  %v12105_v57 = vmul.f32 -1.442695, %v4625_v55  ;;  %v13892_v38 = vld [vmem:[#allocation19 + $0x24] ss:$16 sps:$4 sm:$0xff]  }
0x119f   : > { %v4557_v43 = vadd.f32 %v4556_v41, %v16493_v60  ;;  %v4558_v44 = vpop.f32.mrb[50].mxu0  ;;  %v4624_v60 = vadd.f32 %v4613_v59, %v16463_v17  ;;  %v13893_v41 = vld [vmem:[#allocation19 + $0x28] ss:$16 sps:$4 sm:$0xff]   ;;  %v13910_v55 = vld [vmem:[#allocation19 + $0x84] ss:$16 sps:$4 sm:$0xff]  }
0x11a0   : > { %v4622_v45 = vadd.f32 %v4605_v37, %v4555_v40  ;;  %v4559_v47 = vpop.f32.mrb[51].mxu0  ;;  %v13890_v40 = vld [vmem:[#allocation19 + $0x20] ss:$16 sps:$4 sm:$0xff]   ;;  %v13901_v44 = vld [vmem:[#allocation19 + $0x4c] ss:$16 sps:$4 sm:$0xff]  }
0x11a1   : > { %v4623_v51 = vadd.f32 %v4609_v39, %v4557_v43  ;;  %v13895_v39 = vld [vmem:[#allocation19 + $0x2c] ss:$16 sps:$4 sm:$0xff]   ;;  %v13898_v43 = vld [vmem:[#allocation19 + $0x44] ss:$16 sps:$4 sm:$0xff]   ;;  %v13899_v47 = vld [vmem:[#allocation19 + $0x48] ss:$16 sps:$4 sm:$0xff]  }
0x11a2   : > { %v12103_v34 = vmul.f32 -1.442695, %v4622_v45  ;;  %v13896_v45 = vld [vmem:[#allocation19 + $0x40] ss:$16 sps:$4 sm:$0xff]   ;;  %v13913_v59 = vld [vmem:[#allocation19 + $0x8c] ss:$16 sps:$4 sm:$0xff]  }
0x11a3   : > { %v12104_v5 = vmul.f32 -1.442695, %v4623_v51  ;;  %v13904_v51 = vld [vmem:[#allocation19 + $0x64] ss:$16 sps:$4 sm:$0xff]  }
0x11a4   : > { %14274 = vpow2.f32 %v12103_v34  ;;  %v13907_v34 = vld [vmem:[#allocation19 + $0x6c] ss:$16 sps:$4 sm:$0xff]  }
0x11a5   : > { %14276 = vpow2.f32 %v12104_v5  ;;  %v13905_v5 = vld [vmem:[#allocation19 + $0x68] ss:$16 sps:$4 sm:$0xff]  }
0x11a6   : > { %14278 = vpow2.f32 %v12105_v57  ;;  %v13908_v57 = vld [vmem:[#allocation19 + $0x80] ss:$16 sps:$4 sm:$0xff]  }
0x11a7   : > { %14280 = vtanh.f32 %v4624_v60  ;;  %v13911_v60 = vld [vmem:[#allocation19 + $0x88] ss:$16 sps:$4 sm:$0xff]  }
0x11ae   : > { %v14275_v61 = vpop.eup %14274 }
0x11af   : > { %v14277_v63 = vpop.eup %14276  ;;  %v4629_v4 = vadd.f32 1.0, %v14275_v61  ;;  %v13916_v61 = vld [vmem:[#allocation19 + $0xa4] ss:$16 sps:$4 sm:$0xff]  }
0x11b0   : > { %v4635_v6 = vadd.f32 1.0, %v14277_v63  ;;  %v14279_v7 = vpop.eup %14278  ;;  %v13919_v63 = vld [vmem:[#allocation19 + $0xac] ss:$16 sps:$4 sm:$0xff]  }
0x11b1   : > { %14282 = vrcp.f32 %v4629_v4  ;;  %v14281_v8 = vpop.eup %14280  ;;  %v4642_v13 = vadd.f32 1.0, %v14279_v7  ;;  %v13914_v4 = vld [vmem:[#allocation19 + $0xa0] ss:$16 sps:$4 sm:$0xff]   ;;  %v13922_v7 = vld [vmem:[#allocation19 + $0xc4] ss:$16 sps:$4 sm:$0xff]  }
0x11b2   : > { %14284 = vrcp.f32 %v4635_v6  ;;  %v13917_v6 = vld [vmem:[#allocation19 + $0xa8] ss:$16 sps:$4 sm:$0xff]  }
0x11b3   : > { %14286 = vrcp.f32 %v4642_v13  ;;  %v13928_v13 = vld [vmem:[#allocation19 + $0xe4] ss:$16 sps:$4 sm:$0xff]  }
0x11bb   : > { %v14283_v11 = vpop.eup %14282 }
0x11bc   : > { %v14285_v12 = vpop.eup %14284  ;;  %v4646_v14 = vmul.f32 %v14283_v11, %v14281_v8  ;;  %v13925_v8 = vld [vmem:[#allocation19 + $0xcc] ss:$16 sps:$4 sm:$0xff]   ;;  %v13920_v11 = vld [vmem:[#allocation19 + $0xc0] ss:$16 sps:$4 sm:$0xff]  }
0x11bd   : > { %v4645_v3 = vmul.f32 %v14285_v12, %v16348_v58  ;;  %v14287_v17 = vpop.eup %14286  ;;  %v13923_v12 = vld [vmem:[#allocation19 + $0xc8] ss:$16 sps:$4 sm:$0xff]  }
0x11bf   : > { %v4647_v15 = vadd.f32 %v4646_v14, %v4645_v3  ;;  %v13931_v14 = vld [vmem:[#allocation19 + $0xec] ss:$16 sps:$4 sm:$0xff]   ;;  %v13926_v3 = vld [vmem:[#allocation19 + $0xe0] ss:$16 sps:$4 sm:$0xff]  }
0x11c1   : > { %14288 = vtanh.f32 %v4647_v15  ;;  %v13929_v15 = vld [vmem:[#allocation19 + $0xe8] ss:$16 sps:$4 sm:$0xff]  }
0x11cb   : > { %v14289_v16 = vpop.eup %14288 }
0x11cc   : > { %v16513_v18 = vmul.f32 %v14289_v16, %v14287_v17  ;;  %v4776_v17 = vpack.c.bf16 %v16479_v35, %v16479_v35 }
0x11f5   : > { %v4730_v21 = vpop.xlane.xlu0 %4729 }
0x11f6   : > { %v4731_v2 = vmax.f32 %v4726_v20, %v4730_v21 }
0x11f8   : > { %v4732_v22 = vsub.f32 %v4726_v20, %v4731_v2  ;;  %v4735_v23 = vsub.f32 %v4730_v21, %v4731_v2 }
0x11fa   : > { %v4733_v32 = vmul.f32 1.442695, %v4732_v22  ;;  %v4736_v24 = vmul.f32 1.442695, %v4735_v23 }
0x11fc   : > { %14290 = vpow2.f32 %v4733_v32 }
0x11fd   : > { %14292 = vpow2.f32 %v4736_v24  ;;  %v5297_v24 = vrot.slane %v16457_v50, %v16344_v46 }
0x1206   : > { %v14291_v62 = vpop.eup %14290 }
0x1207   : > { %v14293_v27 = vpop.eup %14292  ;;  %v4738_v58 = vmul.f32 %v14291_v62, %v16477_v31 }
0x1208   : > { %v4741_v26 = vadd.f32 %v14293_v27, %v14291_v62  ;;  %v4739_v48 = vmul.f32 %v14293_v27, %v16486_v54 }
0x120a   : > { %14294 = vrcp.f32 %v4741_v26  ;;  %v4740_v29 = vadd.f32 %v4739_v48, %v4738_v58  ;;  %v5301_v26 = vrot.slane %v16457_v50, %v16496_v9 }
0x1214   : > { %v14295_v10 = vpop.eup %14294 }
0x1215   : > { %v4743_v30 = vmul.f32 %v14295_v10, %v4740_v29 }
0x1217   : > { %v4809_v37 = vpack.c.bf16 %v4743_v30, %v4743_v30 }
0x1219   : > { %5003 = vmatmul.mubr.bf16.vlgmr.msra.gmra.mrb[52].mxu0 %v4809_v37  ;;  %5044 = vmatmul.mubr.bf16.vlgmr.msra.gmra.mrb[60].mxu1 %v4809_v37 }
0x121a   : > { %5213 = vmatpush1.bf16.msra.mxu0 %v13884_v33  ;;  %5254 = vmatpush1.bf16.msra.mxu1 %v13887_v36 }
0x121b   : > { %5214 = vmatprep.subr.bf16.mxu0 %v13892_v38  ;;  %5255 = vmatprep.subr.bf16.mxu1 %v13895_v39 }
0x121c   : > { %5244 = vmatprep.mubr.bf16.mxu0 %v15373_v0  ;;  %5285 = vmatprep.mubr.bf16.mxu1 %v15373_v0 }
0x121e   : > { %5215 = vmatpush1.bf16.msra.mxu0 %v13890_v40  ;;  %5256 = vmatpush1.bf16.msra.mxu1 %v13893_v41 }
0x121f   : > { %5216 = vmatprep.subr.bf16.mxu0 %v13898_v43  ;;  %5257 = vmatprep.subr.bf16.mxu1 %v13901_v44 }
0x1222   : > { %5217 = vmatpush1.bf16.msra.mxu0 %v13896_v45  ;;  %5258 = vmatpush1.bf16.msra.mxu1 %v13899_v47  ;;  %v5309_v45 = vrot.slane %v16457_v50, %v16502_v42 }
0x1223   : > { %5218 = vmatprep.subr.bf16.mxu0 %v13904_v51  ;;  %5259 = vmatprep.subr.bf16.mxu1 %v13907_v34  ;;  %v5305_v51 = vrot.slane %v16457_v50, %v16507_v49 }
0x1226   : > { %5219 = vmatpush1.bf16.msra.mxu0 %v13902_v53  ;;  %5260 = vmatpush1.bf16.msra.mxu1 %v13905_v5 }
0x1227   : > { %5220 = vmatprep.subr.bf16.mxu0 %v13910_v55  ;;  %5261 = vmatprep.subr.bf16.mxu1 %v13913_v59 }
0x122a   : > { %5221 = vmatpush1.bf16.msra.mxu0 %v13908_v57  ;;  %5262 = vmatpush1.bf16.msra.mxu1 %v13911_v60 }
0x122b   : > { %5222 = vmatprep.subr.bf16.mxu0 %v13916_v61  ;;  %5263 = vmatprep.subr.bf16.mxu1 %v13919_v63 }
0x122e   : > { %5223 = vmatpush1.bf16.msra.mxu0 %v13914_v4  ;;  %5264 = vmatpush1.bf16.msra.mxu1 %v13917_v6 }
0x122f   : > { %5224 = vmatprep.subr.bf16.mxu0 %v13922_v7  ;;  %5265 = vmatprep.subr.bf16.mxu1 %v13925_v8 }
0x1232   : > { %5225 = vmatpush1.bf16.msra.mxu0 %v13920_v11  ;;  %5266 = vmatpush1.bf16.msra.mxu1 %v13923_v12 }
0x1233   : > { %5226 = vmatprep.subr.bf16.mxu0 %v13928_v13  ;;  %5267 = vmatprep.subr.bf16.mxu1 %v13931_v14 }
0x1236   : > { %5227 = vmatpush1.bf16.msra.mxu0 %v13926_v3  ;;  %5268 = vmatpush1.bf16.msra.mxu1 %v13929_v15 }
0x1237   : > { %13219 = vmatprep.subr.bf16.mxu1 %v15374_v1  ;;  %13207 = vmatprep.subr.bf16.mxu0 %v15374_v1 }
0x1239   : > { %5245 = vmatmul.mubr.bf16.vlgmr.msra.gmra.mrb[56].mxu0 %v4776_v17  ;;  %5286 = vmatmul.mubr.bf16.vlgmr.msra.gmra.mrb[64].mxu1 %v4776_v17 }
0x123a   : > { %13209 = vmatprep.mubr.msk.bf16.mxu0 %vm15375_vm0, %v15374_v1  ;;  %13221 = vmatprep.mubr.msk.bf16.mxu1 %vm15375_vm0, %v15374_v1 }
0x12ec   : > { %v5004_v16 = vpop.f32.mrb[52].mxu0  ;;  %v5045_v20 = vpop.f32.mrb[60].mxu1 }
0x12ed   : > { %v5006_v21 = vpop.f32.mrb[53].mxu0  ;;  %v5047_v2 = vpop.f32.mrb[61].mxu1 }
0x12ee   : > { %v5008_v22 = vpop.f32.mrb[54].mxu0  ;;  %v5049_v35 = vpop.f32.mrb[62].mxu1 }
0x12ef   : > { %v5009_v23 = vpop.f32.mrb[55].mxu0  ;;  %v5050_v32 = vpop.f32.mrb[63].mxu1 }
0x130c   : > { %v5246_v62 = vpop.f32.mrb[56].mxu0  ;;  %v5287_v27 = vpop.f32.mrb[64].mxu1 }
0x130d   : > { %v5247_v58 = vadd.f32 %v5246_v62, %v5004_v16  ;;  %v5288_v48 = vadd.f32 %v5287_v27, %v5045_v20  ;;  %v5248_v29 = vpop.f32.mrb[57].mxu0  ;;  %v5289_v10 = vpop.f32.mrb[65].mxu1  ;;  %v4650_v20 = vmul.f32 %v16513_v18, %v16354_v56 }
0x130e   : > { %v5249_v30 = vadd.f32 %v5248_v29, %v5006_v21  ;;  %v5290_v33 = vadd.f32 %v5289_v10, %v5047_v2  ;;  %v5250_v36 = vpop.f32.mrb[58].mxu0  ;;  %v5291_v37 = vpop.f32.mrb[66].mxu1  ;;  %v4654_v2 = vmul.f32 %v16513_v18, %v16366_v19 }
0x130f   : > { %v5314_v38 = vadd.f32 %v5297_v24, %v5247_v58  ;;  %v5251_v39 = vpop.f32.mrb[59].mxu0  ;;  %v5292_v40 = vpop.f32.mrb[67].mxu1  ;;  %v5316_v53 = vadd.f32 %v5305_v51, %v5288_v48  ;;  %v4651_v21 = vsel %vm4031_vm5, %v4650_v20, 0.0 }
0x1310   : > { %v5315_v41 = vadd.f32 %v5301_v26, %v5249_v30  ;;  %v5317_v47 = vadd.f32 %v5309_v45, %v5290_v33  ;;  %v4655_v22 = vsel %vm4031_vm5, %v4654_v2, 0.0 }
0x1311   : > { %v12173_v43 = vmul.f32 -1.442695, %v5314_v38 }
0x1312   : > { %v12174_v44 = vmul.f32 -1.442695, %v5315_v41  ;;  %v12175_v34 = vmul.f32 -1.442695, %v5317_v47 }
0x1313   : > { %14296 = vpow2.f32 %v12173_v43 }
0x1314   : > { %14298 = vpow2.f32 %v12174_v44 }
0x1315   : > { %14300 = vpow2.f32 %v12175_v34 }
0x1316   : > { %14302 = vtanh.f32 %v5316_v53 }
0x131d   : > { %v14297_v5 = vpop.eup %14296 }
0x131e   : > { %v14299_v55 = vpop.eup %14298  ;;  %v5321_v59 = vadd.f32 1.0, %v14297_v5 }
0x131f   : > { %v5327_v57 = vadd.f32 1.0, %v14299_v55  ;;  %v14301_v60 = vpop.eup %14300 }
0x1320   : > { %14304 = vrcp.f32 %v5321_v59  ;;  %v14303_v61 = vpop.eup %14302  ;;  %v5334_v7 = vadd.f32 1.0, %v14301_v60  ;;  %v5363_v60 = vpack.c.bf16 %v16513_v18, %v16513_v18 }
0x1321   : > { %14306 = vrcp.f32 %v5327_v57 }
0x1322   : > { %14308 = vrcp.f32 %v5334_v7 }
0x132a   : > { %v14305_v63 = vpop.eup %14304 }
0x132b   : > { %v14307_v4 = vpop.eup %14306  ;;  %v5338_v6 = vmul.f32 %v14305_v63, %v14303_v61 }
0x132c   : > { %v5337_v8 = vmul.f32 %v14307_v4, %v16471_v28  ;;  %v14309_v50 = vpop.eup %14308 }
0x132e   : > { %v5339_v11 = vadd.f32 %v5338_v6, %v5337_v8 }
0x1330   : > { %14310 = vtanh.f32 %v5339_v11 }
0x133a   : > { %v14311_v12 = vpop.eup %14310 }
0x133b   : > { %v16536_v13 = vmul.f32 %v14311_v12, %v14309_v50 }
0x133d   : > { %v5342_v14 = vmul.f32 %v16536_v13, %v16477_v31  ;;  %v5364_v3 = vpack.c.bf16 %v16536_v13, %v16536_v13  ;;  %v5346_v28 = vmul.f32 %v16536_v13, %v16486_v54 }
0x133f   : > { %v5343_v15 = vsel %vm2055_vm12, %v5342_v14, 0.0  ;;  %v5453_v17 = vand.u32 %v5364_v3, %v16318_v25  ;;  %v5347_v16 = vsel %vm2055_vm12, %v5346_v28, 0.0 }
0x1340   : > { %5344 = vadd.xlane.f32.xlu0 %v5343_v15 }
0x1341   : > { %13220 = vmatpush3.bf16.msra.mxu1 %v5453_v17 }
0x1342   : > { %13225 = vmatprep.subr.bf16.mxu1 %v15374_v1 }
0x1344   : > { %5348 = vadd.xlane.f32.xlu0 %v5347_v16  ;;  %v5675_v16 = vld [vmem:[#allocation25] sm:$0xff] }
0x1345   : > { %v5683_v20 = vrot.slane %v5675_v16, 2 }
0x1347   : > { %v12181_v2 = vmul.f32 -1.442695, %v5683_v20  ;;  %v5901_v20 = vld [vmem:[%s17200_s6 + $0x48] sm:$0xff] }
0x1348   : > { %4652 = vadd.xlane.f32.xlu0 %v4651_v21  ;;  %v12180_v21 = vmul.f32 -1.442695, %v5675_v16 }
0x134c   : > { %4656 = vadd.xlane.f32.xlu0 %v4655_v22 }
0x13cd   : > { %v5345_v35 = vpop.xlane.xlu0 %5344 }
0x13d1   : > { %v5349_v23 = vpop.xlane.xlu0 %5348 }
0x13d2   : > { %v5350_v32 = vmax.f32 %v5345_v35, %v5349_v23 }
0x13d4   : > { %v5351_v24 = vsub.f32 %v5345_v35, %v5350_v32  ;;  %v5354_v62 = vsub.f32 %v5349_v23, %v5350_v32 }
0x13d5   : > { %v4653_v27 = vpop.xlane.xlu0 %4652 }
0x13d6   : > { %v5352_v26 = vmul.f32 1.442695, %v5351_v24  ;;  %v5355_v58 = vmul.f32 1.442695, %v5354_v62  ;;  %v5694_v24 = vrot.slane %v5675_v16, 6  ;;  %v5691_v62 = vrot.slane %v5675_v16, 4 }
0x13d7   : > { %v5904_v16 = vld [vmem:[%s17200_s6 + $0x60] sm:$0xff] }
0x13d8   : > { %14312 = vpow2.f32 %v5352_v26 }
0x13d9   : > { %14314 = vpow2.f32 %v5355_v58  ;;  %v4657_v48 = vpop.xlane.xlu0 %4656 }
0x13da   : > { %v4658_v29 = vmax.f32 %v4653_v27, %v4657_v48 }
0x13dc   : > { %v4659_v10 = vsub.f32 %v4653_v27, %v4658_v29  ;;  %v4662_v30 = vsub.f32 %v4657_v48, %v4658_v29  ;;  %v12182_v27 = vmul.f32 -1.442695, %v5694_v24 }
0x13de   : > { %v4660_v33 = vmul.f32 1.442695, %v4659_v10  ;;  %v4663_v36 = vmul.f32 1.442695, %v4662_v30 }
0x13e0   : > { %14316 = vpow2.f32 %v4660_v33 }
0x13e1   : > { %14318 = vpow2.f32 %v4663_v36 }
0x13e2   : > { %v14313_v37 = vpop.eup %14312 }
0x13e3   : > { %v14315_v38 = vpop.eup %14314  ;;  %v5357_v43 = vmul.f32 %v14313_v37, %v16477_v31 }
0x13e4   : > { %v5360_v39 = vadd.f32 %v14315_v38, %v14313_v37  ;;  %v5358_v44 = vmul.f32 %v14315_v38, %v16486_v54 }
0x13e6   : > { %14320 = vrcp.f32 %v5360_v39  ;;  %v5359_v47 = vadd.f32 %v5358_v44, %v5357_v43 }
0x13ea   : > { %v14317_v40 = vpop.eup %14316 }
0x13eb   : > { %v14319_v41 = vpop.eup %14318  ;;  %v4665_v5 = vmul.f32 %v14317_v40, %v16354_v56  ;;  %v5558_v56 = vsel %vm1894_vm11, %v5363_v60, 0 }
0x13ec   : > { %v4668_v45 = vadd.f32 %v14319_v41, %v14317_v40  ;;  %v4666_v55 = vmul.f32 %v14319_v41, %v16366_v19 }
0x13ee   : > { %14322 = vrcp.f32 %v4668_v45  ;;  %v4667_v59 = vadd.f32 %v4666_v55, %v4665_v5 }
0x13f0   : > { %v14321_v51 = vpop.eup %14320 }
0x13f1   : > { %v16556_v34 = vmul.f32 %v14321_v51, %v5359_v47 }
0x13f3   : > { %v5366_v53 = vpack.c.bf16 %v16556_v34, %v16556_v34 }
0x13f5   : > { %13208 = vmatpush3.bf16.xpose.msra.mxu0 %v5366_v53  ;;  %v5496_v8 = vand.u32 %v5366_v53, %v16318_v25 }
0x13f6   : > { %13213 = vmatprep.subr.bf16.mxu0 %v15374_v1 }
0x13f8   : > { %v14323_v31 = vpop.eup %14322 }
0x13f9   : > { %v4670_v57 = vmul.f32 %v14323_v31, %v4667_v59 }
0x13fb   : > { %v5365_v54 = vpack.c.bf16 %v4670_v57, %v4670_v57 }
0x13fd   : > { %13210 = vmatmul.mubr.bf16.vlgmr.msra.gmra.mrb[60].mxu0 %v5365_v54  ;;  %v5601_v25 = vsel %vm1894_vm11, %v5365_v54, 0 }
0x13fe   : > { %13214 = vmatpush3.bf16.xpose.msra.mxu0 %v5364_v3  ;;  %13215 = vmatprep.mubr.msk.bf16.mxu0 %vm15375_vm0, %v15374_v1 }
0x13ff   : > { %13231 = vmatprep.subr.bf16.mxu0 %v15374_v1 }
0x1409   : > { %13216 = vmatmul.mubr.bf16.vlgmr.msra.gmra.mrb[60].mxu0 %v5363_v60 }
0x140a   : > { %13232 = vmatpush3.bf16.msra.mxu0 %v5558_v56  ;;  %13233 = vmatprep.mubr.msk.bf16.mxu0 %vm15375_vm0, %v15374_v1 }
0x14dc   : > { %v16571_v19 = vpop.f32.mrb[60].mxu0 }
0x14dd   : > { %14324 = vtanh.f32 %v16571_v19  ;;  %v13217_v61 = vpop.f32.mrb[61].mxu0 }
0x14de   : > { %v5444_v63 = vpop.f32.mrb[62].mxu0  ;;  %14326 = vpow2.f32 %v12180_v21 }
0x14df   : > { %v13218_v4 = vpop.f32.mrb[63].mxu0  ;;  %14328 = vpow2.f32 %v12181_v2 }
0x14e7   : > { %v14325_v6 = vpop.eup %14324 }
0x14e8   : > { %v5448_v7 = vpack.c.bf16 %v14325_v6, %v14325_v6  ;;  %v14327_v22 = vpop.eup %14326  ;;  %v16619_v6 = vld [vmem:[#allocation30] sm:$0xff] }
0x14e9   : > { %v14329_v35 = vpop.eup %14328  ;;  %v5679_v23 = vadd.f32 1.0, %v14327_v22  ;;  %v5905_v22 = vld [vmem:[%s17200_s6 + $0x68] sm:$0xff] }
0x14ea   : > { %5538 = vxpose.xlu1.c.b16.start.end [1/1] (short) (narrow) %v5448_v7, 16  ;;  %13222 = vmatmul.mubr.msk.bf16.vlgmr.msra.gmra.mrb[68].mxu1 %vm3038_vm4, %v5448_v7  ;;  %v5688_v32 = vadd.f32 1.0, %v14329_v35  ;;  %v5908_v35 = vld [vmem:[%s17200_s6 + $0x80] sm:$0xff]  ;;  %v12194_v24 = vcombine.high %v5901_v20, %v5905_v22 }
0x14eb   : > { %13226 = vmatpush3.bf16.msra.mxu1 %v5496_v8  ;;  %13227 = vmatprep.mubr.msk.bf16.mxu1 %vm15375_vm0, %v15374_v1  ;;  %14330 = vrcp.f32 %v5679_v23  ;;  %v5892_v8 = vld [vmem:[%s17200_s6] sm:$0xff] }
0x14ec   : > { %13237 = vmatprep.subr.bf16.mxu1 %v15374_v1  ;;  %14332 = vrcp.f32 %v5688_v32  ;;  %v5912_v23 = vld [vmem:[%s17200_s6 + $0xa0] sm:$0xff]  ;;  %v12193_v32 = vcombine.low %v5901_v20, %v5905_v22  ;;  %v5949_v22 = vld [vmem:[%s17200_s6 + $0x1c8] sm:$0xff] }
0x14ed   : > { %14334 = vtanh.f32 %v5691_v62  ;;  %v12200_v62 = vcombine.high %v5908_v35, %v5912_v23 }
0x14ee   : > { %5648 = vrot.lane.b32.xlu1 %v16513_v18, %s15377_s7  ;;  %14336 = vpow2.f32 %v12182_v27  ;;  %v5909_v27 = vld [vmem:[%s17200_s6 + $0x88] sm:$0xff] }
0x14f2   : > { %5652 = vrot.lane.b32.xlu1 %v4670_v57, %s15378_s3  ;;  %13228 = vmatmul.mubr.msk.bf16.vlgmr.msra.gmra.mrb[72].mxu1 %vm3038_vm4, %v5448_v7  ;;  %v7512_v7 = vrot.slane %v16619_v6, 2 }
0x14f3   : > { %13238 = vmatpush3.bf16.msra.mxu1 %v5601_v25  ;;  %13239 = vmatprep.mubr.msk.bf16.mxu1 %vm15375_vm0, %v15374_v1  ;;  %v5896_v25 = vld [vmem:[%s17200_s6 + $0x20] sm:$0xff] }
0x14f5   : > { %v14331_v26 = vpop.eup %14330 }
0x14f6   : > { %v14333_v58 = vpop.eup %14332 }
0x14f7   : > { %v14335_v48 = vpop.eup %14334  ;;  %v5702_v10 = vmul.f32 0.0, %v14333_v58 }
0x14f8   : > { %v14337_v29 = vpop.eup %14336  ;;  %v5703_v30 = vmul.f32 %v14335_v48, %v14331_v26  ;;  %v5913_v26 = vld [vmem:[%s17200_s6 + $0xa8] sm:$0xff]  ;;  %v5916_v48 = vld [vmem:[%s17200_s6 + $0xc0] sm:$0xff] }
0x14f9   : > { %v5699_v33 = vadd.f32 1.0, %v14337_v29  ;;  %v12202_v58 = vcombine.high %v5909_v27, %v5913_v26  ;;  %v5920_v29 = vld [vmem:[%s17200_s6 + $0xe0] sm:$0xff] }
0x14fa   : > { %v16589_v36 = vadd.f32 %v5703_v30, %v5702_v10  ;;  %v5917_v10 = vld [vmem:[%s17200_s6 + $0xc8] sm:$0xff] }
0x14fb   : > { %14338 = vrcp.f32 %v5699_v33  ;;  %v5921_v30 = vld [vmem:[%s17200_s6 + $0xe8] sm:$0xff]  ;;  %v12199_v33 = vcombine.low %v5908_v35, %v5912_v23 }
0x14fc   : > { %14340 = vtanh.f32 %v16589_v36  ;;  %v5953_v35 = vld [vmem:[%s17200_s6 + $0x1e8] sm:$0xff] }
0x1505   : > { %v14339_v47 = vpop.eup %14338 }
0x1506   : > { %v14341_v51 = vpop.eup %14340 }
0x1507   : > { %v5706_v5 = vmul.f32 %v14341_v51, %v14339_v47  ;;  %v12207_v47 = vcombine.low %v5916_v48, %v5920_v29  ;;  %v12209_v51 = vcombine.low %v5917_v10, %v5921_v30 }
0x1509   : > { %v16600_v55 = vrot.slane %v5706_v5, %v16496_v9 }
0x1550   : > { %v5546_v11 = vpop.trf.xlu1 }
0x1551   : > { %13240 = vmatmul.mubr.msk.bf16.vlgmr.msra.gmra.mrb[76].mxu1 %vm1890_vm13, %v5546_v11  ;;  %13234 = vmatmul.mubr.msk.bf16.vlgmr.msra.gmra.mrb[64].mxu0 %vm1890_vm13, %v5546_v11  ;;  %v5893_v11 = vld [vmem:[%s17200_s6 + $0x8] sm:$0xff] }
0x1560   : > { %v5649_v53 = vpop.permute.xlu1 %5648 }
0x1564   : > { %v16602_v59 = vpop.permute.xlu1 %5652 }
0x1565   : > { %v5719_v54 = vmul.f32 %v16600_v55, %v16602_v59 }
0x1567   : > { %v5722_v63 = vsel %vm5721_vm7, %v5719_v54, 0.0  ;;  %v5937_v54 = vld [vmem:[%s17200_s6 + $0x168] sm:$0xff] }
0x15bd   : > { %v5489_v50 = vpop.f32.mrb[68].mxu1 }
0x15be   : > { %v13223_v12 = vpop.f32.mrb[69].mxu1 }
0x15bf   : > { %v5492_v14 = vpop.f32.mrb[70].mxu1  ;;  %v5897_v12 = vld [vmem:[%s17200_s6 + $0x28] sm:$0xff] }
0x15c0   : > { %v13224_v18 = vpop.f32.mrb[71].mxu1  ;;  %v12401_v14 = vmul.f32 -1.442695, %v16619_v6 }
0x15c1   : > { %v12183_v18 = vcombine.low %v5892_v8, %v5896_v25 }
0x15c2   : > { %14342 = vpow2.f32 %v12401_v14  ;;  %v5945_v14 = vld [vmem:[%s17200_s6 + $0x1a8] sm:$0xff] }
0x15c5   : > { %v5532_v3 = vpop.f32.mrb[72].mxu1 }
0x15c6   : > { %5644 = vrot.lane.b32.xlu0 %v5532_v3, %s15379_s19  ;;  %v13229_v15 = vpop.f32.mrb[73].mxu1  ;;  %v12185_v3 = vcombine.low %v5893_v11, %v5897_v12 }
0x15c7   : > { %v5535_v17 = vpop.f32.mrb[74].mxu1  ;;  %v12186_v15 = vcombine.high %v5893_v11, %v5897_v12  ;;  %v5944_v11 = vld [vmem:[%s17200_s6 + $0x1a0] sm:$0xff]  ;;  %v5941_v12 = vld [vmem:[%s17200_s6 + $0x188] sm:$0xff] }
0x15c8   : > { %v13230_v28 = vpop.f32.mrb[75].mxu1  ;;  %v12402_v17 = vmul.f32 -1.442695, %v7512_v7  ;;  %v12234_v20 = vcombine.high %v5941_v12, %v5945_v14 }
0x15c9   : > { %v5900_v28 = vld [vmem:[%s17200_s6 + $0x40] sm:$0xff]  ;;  %6419 = vmatprep.subr.bf16.mxu1 %v12186_v15 }
0x15ca   : > { %v12191_v21 = vcombine.low %v5900_v28, %v5904_v16  ;;  %v12192_v2 = vcombine.high %v5900_v28, %v5904_v16  ;;  %6420 = vmatpush1.bf16.msra.mxu1 %v12185_v3  ;;  %14344 = vpow2.f32 %v12402_v17  ;;  %v7523_v3 = vrot.slane %v16619_v6, 6 }
0x15cb   : > { %6421 = vmatprep.subr.bf16.mxu1 %v12194_v24  ;;  %v7520_v17 = vrot.slane %v16619_v6, 4  ;;  %v12233_v6 = vcombine.low %v5941_v12, %v5945_v14 }
0x15cc   : > { %v12403_v23 = vmul.f32 -1.442695, %v7523_v3 }
0x15ce   : > { %6422 = vmatpush1.bf16.msra.mxu1 %v12193_v32 }
0x15cf   : > { %6423 = vmatprep.subr.bf16.mxu1 %v12202_v58  ;;  %v5957_v58 = vld [vmem:[%s17200_s6 + $0x208] sm:$0xff] }
0x1624   : > { %v5637_v37 = vpop.f32.mrb[76].mxu1  ;;  %v16591_v38 = vpop.f32.mrb[64].mxu0 }
0x1625   : > { %5661 = vrot.lane.b32.xlu0 %v5637_v37, %s15379_s19  ;;  %v13235_v39 = vpop.f32.mrb[65].mxu0  ;;  %v13241_v40 = vpop.f32.mrb[77].mxu1  ;;  %v12201_v37 = vcombine.low %v5909_v27, %v5913_v26  ;;  %v5956_v27 = vld [vmem:[%s17200_s6 + $0x200] sm:$0xff] }
0x1626   : > { %v5597_v41 = vpop.f32.mrb[66].mxu0  ;;  %v5640_v43 = vpop.f32.mrb[78].mxu1  ;;  %v12208_v39 = vcombine.high %v5916_v48, %v5920_v29  ;;  %v12210_v40 = vcombine.high %v5917_v10, %v5921_v30  ;;  %v5960_v26 = vld [vmem:[%s17200_s6 + $0x220] sm:$0xff]  ;;  %v5961_v48 = vld [vmem:[%s17200_s6 + $0x228] sm:$0xff]  ;;  %v12241_v10 = vcombine.low %v5949_v22, %v5953_v35 }
0x1627   : > { %v13236_v44 = vpop.f32.mrb[67].mxu0  ;;  %v13242_v45 = vpop.f32.mrb[79].mxu1  ;;  %v5924_v41 = vld [vmem:[%s17200_s6 + $0x100] sm:$0xff]  ;;  %6424 = vmatpush1.bf16.msra.mxu1 %v12201_v37  ;;  %v12248_v30 = vcombine.high %v5956_v27, %v5960_v26 }
0x1628   : > { %v5928_v43 = vld [vmem:[%s17200_s6 + $0x120] sm:$0xff]  ;;  %v5925_v44 = vld [vmem:[%s17200_s6 + $0x108] sm:$0xff]  ;;  %6425 = vmatprep.subr.bf16.mxu1 %v12210_v40 }
0x1629   : > { %5665 = vrot.lane.b32.xlu0 %v16536_v13, %s15377_s7  ;;  %v16605_v13 = vrot.slane %v5706_v5, %v16344_v46  ;;  %v5929_v45 = vld [vmem:[%s17200_s6 + $0x128] sm:$0xff]  ;;  %v5964_v37 = vld [vmem:[%s17200_s6 + $0x240] sm:$0xff] }
0x162a   : > { %v12218_v5 = vcombine.high %v5925_v44, %v5929_v45  ;;  %v5965_v40 = vld [vmem:[%s17200_s6 + $0x248] sm:$0xff] }
0x162b   : > { %6426 = vmatpush1.bf16.msra.mxu1 %v12209_v51 }
0x162c   : > { %6427 = vmatprep.subr.bf16.mxu1 %v12218_v5 }
0x162d   : > { %5669 = vrot.lane.b32.xlu0 %v16556_v34, %s15378_s3 }
0x1638   : > { %v5645_v31 = vpop.permute.xlu0 %5644 }
0x1639   : > { %v5655_v34 = vsel %vm1784_vm3, %v5489_v50, %v5645_v31  ;;  %v12184_v50 = vcombine.high %v5892_v8, %v5896_v25  ;;  %v5932_v31 = vld [vmem:[%s17200_s6 + $0x140] sm:$0xff] }
0x163a   : > { %v5657_v57 = vsel %vm5656_vm2, %v5655_v34, %v5649_v53  ;;  %v12216_v53 = vcombine.high %v5924_v41, %v5928_v43  ;;  %v5936_v34 = vld [vmem:[%s17200_s6 + $0x160] sm:$0xff] }
0x163b   : > { %v16613_v60 = vsel %vm5658_vm6, %v5657_v57, %v16602_v59  ;;  %6378 = vmatprep.subr.bf16.mxu0 %v12184_v50  ;;  %v5933_v57 = vld [vmem:[%s17200_s6 + $0x148] sm:$0xff]  ;;  %v12224_v7 = vcombine.high %v5932_v31, %v5936_v34  ;;  %v5940_v25 = vld [vmem:[%s17200_s6 + $0x180] sm:$0xff]  ;;  %v12223_v15 = vcombine.low %v5932_v31, %v5936_v34 }
0x163c   : > { %v5718_v56 = vmul.f32 %v16605_v13, %v16613_v60  ;;  %6379 = vmatpush1.bf16.msra.mxu0 %v12183_v18  ;;  %v12226_v8 = vcombine.high %v5933_v57, %v5937_v54  ;;  %v12225_v28 = vcombine.low %v5933_v57, %v5937_v54  ;;  %v12232_v16 = vcombine.high %v5940_v25, %v5944_v11 }
0x163d   : > { %6380 = vmatprep.subr.bf16.mxu0 %v12192_v2  ;;  %v5952_v2 = vld [vmem:[%s17200_s6 + $0x1e0] sm:$0xff]  ;;  %v12231_v32 = vcombine.low %v5940_v25, %v5944_v11  ;;  %v16677_v25 = vld [vmem:[%s17200_s6 + $0x38] sm:$0xff] }
0x163e   : > { %v5720_v61 = vsel %vm4031_vm5, %v5718_v56, 0.0  ;;  %v14343_v56 = vpop.eup %14342 }
0x163f   : > { %v5723_v4 = vadd.f32 %v5722_v63, %v5720_v61  ;;  %v12215_v61 = vcombine.low %v5924_v41, %v5928_v43  ;;  %v14345_v63 = vpop.eup %14344  ;;  %v7508_v50 = vadd.f32 1.0, %v14343_v56  ;;  %v5969_v41 = vld [vmem:[%s17200_s6 + $0x268] sm:$0xff]  ;;  %v12247_v43 = vcombine.low %v5956_v27, %v5960_v26 }
0x1640   : > { %6381 = vmatpush1.bf16.msra.mxu0 %v12191_v21  ;;  %v7517_v18 = vadd.f32 1.0, %v14345_v63  ;;  %v5948_v21 = vld [vmem:[%s17200_s6 + $0x1c0] sm:$0xff]  ;;  %v12257_v34 = vcombine.low %v5965_v40, %v5969_v41  ;;  %v16669_v63 = vld [vmem:[%s17200_s6 + $0x30] sm:$0xff] }
0x1641   : > { %5724 = vadd.xlane.f32.xlu1 %v5723_v4  ;;  %6382 = vmatprep.subr.bf16.mxu0 %v12200_v62  ;;  %v12217_v4 = vcombine.low %v5925_v44, %v5929_v45  ;;  %14346 = vrcp.f32 %v7508_v50  ;;  %v12240_v24 = vcombine.high %v5948_v21, %v5952_v2  ;;  %v12242_v62 = vcombine.high %v5949_v22, %v5953_v35 }
0x1642   : > { %14348 = vrcp.f32 %v7517_v18  ;;  %v12239_v29 = vcombine.low %v5948_v21, %v5952_v2  ;;  %v12249_v45 = vcombine.low %v5957_v58, %v5961_v48 }
0x1643   : > { %6428 = vmatpush1.bf16.msra.mxu1 %v12217_v4  ;;  %14350 = vtanh.f32 %v7520_v17  ;;  %v16672_v4 = vld [vmem:[%s17200_s6 + $0x18] sm:$0xff] }
0x1644   : > { %6383 = vmatpush1.bf16.msra.mxu0 %v12199_v33  ;;  %6429 = vmatprep.subr.bf16.mxu1 %v12226_v8  ;;  %14352 = vpow2.f32 %v12403_v23  ;;  %v12250_v33 = vcombine.high %v5957_v58, %v5961_v48  ;;  %v12189_v12 = vcombine.low %v16672_v4, %v16677_v25  ;;  %v12190_v14 = vcombine.high %v16672_v4, %v16677_v25 }
0x1645   : > { %6384 = vmatprep.subr.bf16.mxu0 %v12208_v39  ;;  %v5968_v39 = vld [vmem:[%s17200_s6 + $0x260] sm:$0xff] }
0x1646   : > { %v12255_v31 = vcombine.low %v5964_v37, %v5968_v39 }
0x1647   : > { %6430 = vmatpush1.bf16.msra.mxu1 %v12225_v28 }
0x1648   : > { %6385 = vmatpush1.bf16.msra.mxu0 %v12207_v47  ;;  %6431 = vmatprep.subr.bf16.mxu1 %v12234_v20  ;;  %v12256_v47 = vcombine.high %v5964_v37, %v5968_v39 }
0x1649   : > { %6386 = vmatprep.subr.bf16.mxu0 %v12216_v53  ;;  %v12258_v53 = vcombine.high %v5965_v40, %v5969_v41 }
0x164b   : > { %6432 = vmatpush1.bf16.msra.mxu1 %v12233_v6  ;;  %v14347_v44 = vpop.eup %14346 }
0x164c   : > { %6387 = vmatpush1.bf16.msra.mxu0 %v12215_v61  ;;  %6433 = vmatprep.subr.bf16.mxu1 %v12242_v62  ;;  %v14349_v51 = vpop.eup %14348  ;;  %v16666_v61 = vld [vmem:[%s17200_s6 + $0x10] sm:$0xff] }
0x164d   : > { %6388 = vmatprep.subr.bf16.mxu0 %v12224_v7  ;;  %v14351_v5 = vpop.eup %14350  ;;  %v7531_v54 = vmul.f32 0.0, %v14349_v51  ;;  %v12188_v8 = vcombine.high %v16666_v61, %v16669_v63  ;;  %v12187_v50 = vcombine.low %v16666_v61, %v16669_v63  ;;  %v5922_v61 = vld [vmem:[%s17200_s6 + $0xf0] sm:$0xff]  ;;  %v5919_v63 = vld [vmem:[%s17200_s6 + $0xd8] sm:$0xff] }
0x164e   : > { %v14353_v57 = vpop.eup %14352  ;;  %v7532_v56 = vmul.f32 %v14351_v5, %v14347_v44 }
0x164f   : > { %6434 = vmatpush1.bf16.msra.mxu1 %v12241_v10  ;;  %v7528_v7 = vadd.f32 1.0, %v14353_v57 }
0x1650   : > { %6389 = vmatpush1.bf16.msra.mxu0 %v12223_v15  ;;  %6435 = vmatprep.subr.bf16.mxu1 %v12250_v33  ;;  %v16679_v11 = vadd.f32 %v7532_v56, %v7531_v54 }
0x1651   : > { %6390 = vmatprep.subr.bf16.mxu0 %v12232_v16  ;;  %14354 = vrcp.f32 %v7528_v7 }
0x1652   : > { %14356 = vtanh.f32 %v16679_v11 }
0x1653   : > { %6436 = vmatpush1.bf16.msra.mxu1 %v12249_v45 }
0x1654   : > { %6391 = vmatpush1.bf16.msra.mxu0 %v12231_v32  ;;  %6437 = vmatprep.subr.bf16.mxu1 %v12258_v53 }
0x1655   : > { %6392 = vmatprep.subr.bf16.mxu0 %v12240_v24 }
0x1657   : > { %6438 = vmatpush1.bf16.msra.mxu1 %v12257_v34 }
0x1658   : > { %6393 = vmatpush1.bf16.msra.mxu0 %v12239_v29  ;;  %6501 = vmatprep.subr.bf16.mxu1 %v12190_v14 }
0x1659   : > { %6394 = vmatprep.subr.bf16.mxu0 %v12248_v30 }
0x165b   : > { %v14355_v18 = vpop.eup %14354 }
0x165c   : > { %6395 = vmatpush1.bf16.msra.mxu0 %v12247_v43  ;;  %v14357_v3 = vpop.eup %14356 }
0x165d   : > { %6396 = vmatprep.subr.bf16.mxu0 %v12256_v47  ;;  %v7535_v17 = vmul.f32 %v14357_v3, %v14355_v18 }
0x165f   : > { %v16689_v16 = vrot.slane %v7535_v17, %v16496_v9  ;;  %v16692_v20 = vrot.slane %v7535_v17, %v16344_v46 }
0x1660   : > { %6397 = vmatpush1.bf16.msra.mxu0 %v12255_v31 }
0x1661   : > { %6460 = vmatprep.subr.bf16.mxu0 %v12188_v8 }
0x1697   : > { %v5662_v15 = vpop.permute.xlu0 %5661 }
0x1698   : > { %v5672_v21 = vsel %vm1784_vm3, %v16591_v38, %v5662_v15  ;;  %vm6374_vm3 = vcmask 261120  }
0x169b   : > { %v5666_v28 = vpop.permute.xlu0 %5665 }
0x169c   : > { %v5673_v2 = vsel %vm5656_vm2, %v5672_v21, %v5666_v28 }
0x169f   : > { %v16697_v22 = vpop.permute.xlu0 %5669 }
0x16a0   : > { %v16701_v35 = vsel %vm5658_vm6, %v5673_v2, %v16697_v22  ;;  %v7548_v23 = vmul.f32 %v16689_v16, %v16697_v22 }
0x16a1   : > { %v7547_v32 = vmul.f32 %v16692_v20, %v16701_v35 }
0x16a2   : > { %v7551_v6 = vsel %vm7550_vm8, %v7548_v23, 0.0 }
0x16a3   : > { %v7549_v24 = vsel %vm2055_vm12, %v7547_v32, 0.0 }
0x16a4   : > { %v7552_v38 = vadd.f32 %v7551_v6, %v7549_v24  ;;  %v5902_v6 = vld [vmem:[%s17200_s6 + $0x50] sm:$0xff] }
0x16a5   : > { %v5906_v24 = vld [vmem:[%s17200_s6 + $0x70] sm:$0xff] }
0x16a6   : > { %7553 = vadd.xlane.f32.xlu0 %v7552_v38  ;;  %v5903_v38 = vld [vmem:[%s17200_s6 + $0x58] sm:$0xff] }
0x16ce   : > { %v5725_v62 = vpop.xlane.xlu1 %5724 }
0x16cf   : > { %v5726_v27 = vsel %vm4031_vm5, %v5725_v62, -inf }
0x16d0   : > { %v5727_v26 = vrot.slane %v5726_v27, 4 }
0x16d2   : > { %v5728_v58 = vmax.f32 %v5726_v27, %v5727_v26 }
0x16d4   : > { %v5729_v48 = vrot.slane %v5728_v58, 2 }
0x16d6   : > { %v5730_v29 = vmax.f32 %v5728_v58, %v5729_v48  ;;  %v5910_v58 = vld [vmem:[%s17200_s6 + $0x90] sm:$0xff]  ;;  %v12196_v48 = vcombine.high %v5902_v6, %v5906_v24 }
0x16d8   : > { %v5731_v10 = vrot.slane %v5730_v29, 1 }
0x16da   : > { %v5732_v30 = vmax.f32 %v5730_v29, %v5731_v10  ;;  %v5914_v10 = vld [vmem:[%s17200_s6 + $0xb0] sm:$0xff] }
0x16db   : > { %v12203_v4 = vcombine.low %v5910_v58, %v5914_v10 }
0x16dc   : > { %v5733_v33 = vsub.f32 %v5725_v62, %v5732_v30  ;;  %v5907_v62 = vld [vmem:[%s17200_s6 + $0x78] sm:$0xff] }
0x16dd   : > { %v12198_v29 = vcombine.high %v5903_v38, %v5907_v62  ;;  %v5911_v30 = vld [vmem:[%s17200_s6 + $0x98] sm:$0xff] }
0x16de   : > { %v5734_v37 = vmul.f32 1.442695, %v5733_v33  ;;  %v5915_v33 = vld [vmem:[%s17200_s6 + $0xb8] sm:$0xff] }
0x16df   : > { %v12205_v25 = vcombine.low %v5911_v30, %v5915_v33 }
0x16e0   : > { %14358 = vpow2.f32 %v5734_v37  ;;  %v12195_v37 = vcombine.low %v5902_v6, %v5906_v24 }
0x16ea   : > { %v14359_v39 = vpop.eup %14358 }
0x16eb   : > { %v5736_v40 = vsel %vm4031_vm5, %v14359_v39, 0.0  ;;  %v5744_v41 = vmul.f32 %v14359_v39, %v16602_v59  ;;  %v5743_v43 = vmul.f32 %v14359_v39, %v16613_v60  ;;  %v12197_v39 = vcombine.low %v5903_v38, %v5907_v62  ;;  %v5950_v38 = vld [vmem:[%s17200_s6 + $0x1d0] sm:$0xff] }
0x16ec   : > { %v5737_v44 = vrot.slane %v5736_v40, 4  ;;  %v5954_v62 = vld [vmem:[%s17200_s6 + $0x1f0] sm:$0xff] }
0x16ed   : > { %v5752_v45 = vsel %vm5721_vm7, %v5744_v41, 0.0  ;;  %v5745_v47 = vsel %vm4031_vm5, %v5743_v43, 0.0  ;;  %v12206_v41 = vcombine.high %v5911_v30, %v5915_v33  ;;  %v5918_v43 = vld [vmem:[%s17200_s6 + $0xd0] sm:$0xff] }
0x16ee   : > { %v5738_v51 = vadd.f32 %v5737_v44, %v5736_v40  ;;  %v5753_v53 = vrot.slane %v5752_v45, 4  ;;  %v5746_v5 = vrot.slane %v5745_v47, 4  ;;  %v12204_v40 = vcombine.high %v5910_v58, %v5914_v10  ;;  %v5955_v58 = vld [vmem:[%s17200_s6 + $0x1f8] sm:$0xff]  ;;  %v5958_v33 = vld [vmem:[%s17200_s6 + $0x210] sm:$0xff] }
0x16ef   : > { %v12244_v10 = vcombine.high %v5950_v38, %v5954_v62 }
0x16f0   : > { %v5739_v31 = vrot.slane %v5738_v51, 2  ;;  %v5754_v34 = vadd.f32 %v5753_v53, %v5752_v45  ;;  %v5747_v57 = vadd.f32 %v5746_v5, %v5745_v47  ;;  %v5926_v45 = vld [vmem:[%s17200_s6 + $0x110] sm:$0xff]  ;;  %v5931_v53 = vld [vmem:[%s17200_s6 + $0x138] sm:$0xff]  ;;  %v12211_v5 = vcombine.low %v5918_v43, %v5922_v61 }
0x16f1   : > { %v5930_v47 = vld [vmem:[%s17200_s6 + $0x130] sm:$0xff] }
0x16f2   : > { %v5740_v54 = vadd.f32 %v5739_v31, %v5738_v51  ;;  %v5755_v7 = vrot.slane %v5754_v34, 2  ;;  %v5748_v8 = vrot.slane %v5747_v57, 2  ;;  %v5927_v51 = vld [vmem:[%s17200_s6 + $0x118] sm:$0xff] }
0x16f4   : > { %v5741_v56 = vrot.slane %v5740_v54, 1  ;;  %v5756_v18 = vadd.f32 %v5755_v7, %v5754_v34  ;;  %v5749_v3 = vadd.f32 %v5748_v8, %v5747_v57  ;;  %v12220_v34 = vcombine.high %v5926_v45, %v5930_v47  ;;  %v5935_v7 = vld [vmem:[%s17200_s6 + $0x158] sm:$0xff] }
0x16f5   : > { %v12222_v57 = vcombine.high %v5927_v51, %v5931_v53  ;;  %v5939_v8 = vld [vmem:[%s17200_s6 + $0x178] sm:$0xff] }
0x16f6   : > { %v5742_v14 = vadd.f32 %v5741_v56, %v5740_v54  ;;  %v5757_v15 = vrot.slane %v5756_v18, 1  ;;  %v5750_v17 = vrot.slane %v5749_v3, 1  ;;  %v5934_v54 = vld [vmem:[%s17200_s6 + $0x150] sm:$0xff] }
0x16f7   : > { %v5938_v56 = vld [vmem:[%s17200_s6 + $0x170] sm:$0xff] }
0x16f8   : > { %14360 = vrcp.f32 %v5742_v14  ;;  %v5758_v28 = vadd.f32 %v5757_v15, %v5756_v18  ;;  %v5751_v21 = vadd.f32 %v5750_v17, %v5749_v3  ;;  %v12219_v14 = vcombine.low %v5926_v45, %v5930_v47  ;;  %v5942_v17 = vld [vmem:[%s17200_s6 + $0x190] sm:$0xff] }
0x16f9   : > { %v12221_v18 = vcombine.low %v5927_v51, %v5931_v53  ;;  %v12228_v3 = vcombine.high %v5934_v54, %v5938_v56  ;;  %v12230_v15 = vcombine.high %v5935_v7, %v5939_v8  ;;  %v5762_v53 = vld [vmem:[#allocation24] sm:$0xff] }
0x1702   : > { %v14361_v2 = vpop.eup %14360 }
0x1703   : > { %v5761_v23 = vmul.f32 %v14361_v2, %v5758_v28  ;;  %v5760_v32 = vmul.f32 %v14361_v2, %v5751_v21  ;;  %v5946_v28 = vld [vmem:[%s17200_s6 + $0x1b0] sm:$0xff]  ;;  %v5943_v21 = vld [vmem:[%s17200_s6 + $0x198] sm:$0xff] }
0x1704   : > { %v5947_v2 = vld [vmem:[%s17200_s6 + $0x1b8] sm:$0xff]  ;;  %v12236_v6 = vcombine.high %v5942_v17, %v5946_v28 }
0x1705   : > { %v5973_v27 = vpack.c.bf16 %v5761_v23, %v5761_v23  ;;  %v16719_v26 = vpack.c.bf16 %v5760_v32, %v5760_v32  ;;  %v12227_v23 = vcombine.low %v5934_v54, %v5938_v56  ;;  %v12229_v32 = vcombine.low %v5935_v7, %v5939_v8  ;;  %v5770_v8 = vld [vmem:[#allocation24 + $0x40] sm:$0xff] }
0x1706   : > { %v12238_v24 = vcombine.high %v5943_v21, %v5947_v2 }
0x1707   : > { %12263 = vmatprep.mubr.msk.bf16.mxu0 %vm6374_vm3, %v5973_v27  ;;  %12264 = vmatprep.mubr.msk.bf16.mxu1 %vm6374_vm3, %v5973_v27 }
0x1708   : > { %6411 = vmatmul.mubr.bf16.vlgmr.msra.gmra.mrb[68].mxu0 %v16719_v26  ;;  %6452 = vmatmul.mubr.bf16.vlgmr.msra.gmra.mrb[80].mxu1 %v16719_v26 }
0x1709   : > { %6461 = vmatpush1.bf16.msra.mxu0 %v12187_v50  ;;  %6502 = vmatpush1.bf16.msra.mxu1 %v12189_v12  ;;  %v5923_v50 = vld [vmem:[%s17200_s6 + $0xf8] sm:$0xff]  ;;  %v12212_v12 = vcombine.high %v5918_v43, %v5922_v61 }
0x170a   : > { %12265 = vmatprep.mubr.msk.bf16.mxu0 %vm6374_vm3, %v5973_v27  ;;  %12266 = vmatprep.mubr.msk.bf16.mxu1 %vm6374_vm3, %v5973_v27  ;;  %v12214_v44 = vcombine.high %v5919_v63, %v5923_v50  ;;  %v12213_v31 = vcombine.low %v5919_v63, %v5923_v50  ;;  %v5951_v27 = vld [vmem:[%s17200_s6 + $0x1d8] sm:$0xff]  ;;  %v5966_v50 = vld [vmem:[%s17200_s6 + $0x250] sm:$0xff] }
0x170b   : > { %6462 = vmatprep.subr.bf16.mxu0 %v12196_v48  ;;  %6503 = vmatprep.subr.bf16.mxu1 %v12198_v29  ;;  %v12235_v48 = vcombine.low %v5942_v17, %v5946_v28  ;;  %v12237_v29 = vcombine.low %v5943_v21, %v5947_v2  ;;  %v12246_v30 = vcombine.high %v5951_v27, %v5955_v58  ;;  %v5778_v2 = vld [vmem:[#allocation24 + $0x80] sm:$0xff] }
0x170c   : > { %v12245_v43 = vcombine.low %v5951_v27, %v5955_v58 }
0x170d   : > { %6463 = vmatpush1.bf16.msra.mxu0 %v12195_v37  ;;  %6504 = vmatpush1.bf16.msra.mxu1 %v12197_v39  ;;  %v5962_v37 = vld [vmem:[%s17200_s6 + $0x230] sm:$0xff]  ;;  %v5959_v39 = vld [vmem:[%s17200_s6 + $0x218] sm:$0xff] }
0x170e   : > { %6464 = vmatprep.subr.bf16.mxu0 %v12204_v40  ;;  %6505 = vmatprep.subr.bf16.mxu1 %v12206_v41  ;;  %v5963_v40 = vld [vmem:[%s17200_s6 + $0x238] sm:$0xff]  ;;  %v12243_v41 = vcombine.low %v5950_v38, %v5954_v62  ;;  %v12252_v61 = vcombine.high %v5958_v33, %v5962_v37 }
0x170f   : > { %v12254_v63 = vcombine.high %v5959_v39, %v5963_v40  ;;  %v12253_v45 = vcombine.low %v5959_v39, %v5963_v40  ;;  %v5794_v39 = vld [vmem:[#allocation24 + $0x100] sm:$0xff] }
0x1710   : > { %v5798_v40 = vld [vmem:[#allocation24 + $0x120] sm:$0xff] }
0x1711   : > { %6465 = vmatpush1.bf16.msra.mxu0 %v12203_v4  ;;  %6506 = vmatpush1.bf16.msra.mxu1 %v12205_v25  ;;  %v5970_v4 = vld [vmem:[%s17200_s6 + $0x270] sm:$0xff]  ;;  %v5967_v25 = vld [vmem:[%s17200_s6 + $0x258] sm:$0xff] }
0x1712   : > { %6466 = vmatprep.subr.bf16.mxu0 %v12212_v12  ;;  %6507 = vmatprep.subr.bf16.mxu1 %v12214_v44  ;;  %v5971_v12 = vld [vmem:[%s17200_s6 + $0x278] sm:$0xff]  ;;  %v12251_v44 = vcombine.low %v5958_v33, %v5962_v37  ;;  %v12260_v47 = vcombine.high %v5966_v50, %v5970_v4 }
0x1713   : > { %v12262_v51 = vcombine.high %v5967_v25, %v5971_v12  ;;  %v12261_v54 = vcombine.low %v5967_v25, %v5971_v12  ;;  %v5802_v25 = vld [vmem:[#allocation24 + $0x140] sm:$0xff] }
0x1714   : > { %v5806_v12 = vld [vmem:[#allocation24 + $0x160] sm:$0xff] }
0x1715   : > { %6467 = vmatpush1.bf16.msra.mxu0 %v12211_v5  ;;  %6508 = vmatpush1.bf16.msra.mxu1 %v12213_v31  ;;  %v5766_v5 = vld [vmem:[#allocation24 + $0x20] sm:$0xff]  ;;  %v5763_v31 = vld [vmem:[#allocation24 + $0x8] sm:$0xff] }
0x1716   : > { %6468 = vmatprep.subr.bf16.mxu0 %v12220_v34  ;;  %6509 = vmatprep.subr.bf16.mxu1 %v12222_v57  ;;  %v5767_v34 = vld [vmem:[#allocation24 + $0x28] sm:$0xff]  ;;  %v12259_v57 = vcombine.low %v5966_v50, %v5970_v4  ;;  %v12268_v56 = vcombine.high %v5762_v53, %v5766_v5  ;;  %v12300_v50 = vcombine.high %v5794_v39, %v5798_v40 }
0x1717   : > { %v12270_v7 = vcombine.high %v5763_v31, %v5767_v34  ;;  %v12269_v17 = vcombine.low %v5763_v31, %v5767_v34  ;;  %v5810_v31 = vld [vmem:[#allocation24 + $0x180] sm:$0xff] }
0x1718   : > { %v5814_v34 = vld [vmem:[#allocation24 + $0x1a0] sm:$0xff] }
0x1719   : > { %6469 = vmatpush1.bf16.msra.mxu0 %v12219_v14  ;;  %6510 = vmatpush1.bf16.msra.mxu1 %v12221_v18  ;;  %v5774_v14 = vld [vmem:[#allocation24 + $0x60] sm:$0xff]  ;;  %v5771_v18 = vld [vmem:[#allocation24 + $0x48] sm:$0xff] }
0x171a   : > { %6470 = vmatprep.subr.bf16.mxu0 %v12228_v3  ;;  %6511 = vmatprep.subr.bf16.mxu1 %v12230_v15  ;;  %v5775_v3 = vld [vmem:[#allocation24 + $0x68] sm:$0xff]  ;;  %v12267_v15 = vcombine.low %v5762_v53, %v5766_v5  ;;  %v12276_v28 = vcombine.high %v5770_v8, %v5774_v14  ;;  %v12275_v38 = vcombine.low %v5770_v8, %v5774_v14 }
0x171b   : > { %v12278_v21 = vcombine.high %v5771_v18, %v5775_v3  ;;  %v12277_v62 = vcombine.low %v5771_v18, %v5775_v3  ;;  %v12308_v53 = vcombine.high %v5802_v25, %v5806_v12  ;;  %v12316_v8 = vcombine.high %v5810_v31, %v5814_v34  ;;  %v5818_v18 = vld [vmem:[#allocation24 + $0x1c0] sm:$0xff] }
0x171c   : > { %v5822_v3 = vld [vmem:[#allocation24 + $0x1e0] sm:$0xff] }
0x171d   : > { %6471 = vmatpush1.bf16.msra.mxu0 %v12227_v23  ;;  %6512 = vmatpush1.bf16.msra.mxu1 %v12229_v32  ;;  %v5782_v23 = vld [vmem:[#allocation24 + $0xa0] sm:$0xff]  ;;  %v5779_v32 = vld [vmem:[#allocation24 + $0x88] sm:$0xff] }
0x171e   : > { %6472 = vmatprep.subr.bf16.mxu0 %v12236_v6  ;;  %6513 = vmatprep.subr.bf16.mxu1 %v12238_v24  ;;  %v5783_v6 = vld [vmem:[#allocation24 + $0xa8] sm:$0xff]  ;;  %v16767_v24 = vpack.c.bf16 %v16600_v55, %v16600_v55  ;;  %v12284_v27 = vcombine.high %v5778_v2, %v5782_v23  ;;  %v12283_v55 = vcombine.low %v5778_v2, %v5782_v23 }
0x171f   : > { %v12286_v58 = vcombine.high %v5779_v32, %v5783_v6  ;;  %v12324_v2 = vcombine.high %v5818_v18, %v5822_v3 }
0x1721   : > { %6473 = vmatpush1.bf16.msra.mxu0 %v12235_v48  ;;  %6514 = vmatpush1.bf16.msra.mxu1 %v12237_v29  ;;  %v5786_v48 = vld [vmem:[#allocation24 + $0xc0] sm:$0xff] }
0x1722   : > { %6474 = vmatprep.subr.bf16.mxu0 %v12244_v10  ;;  %6515 = vmatprep.subr.bf16.mxu1 %v12246_v30  ;;  %v5790_v29 = vld [vmem:[#allocation24 + $0xe0] sm:$0xff]  ;;  %v5787_v10 = vld [vmem:[#allocation24 + $0xc8] sm:$0xff] }
0x1723   : > { %v5791_v30 = vld [vmem:[#allocation24 + $0xe8] sm:$0xff]  ;;  %v12292_v33 = vcombine.high %v5786_v48, %v5790_v29 }
0x1724   : > { %v12294_v37 = vcombine.high %v5787_v10, %v5791_v30 }
0x1725   : > { %6475 = vmatpush1.bf16.msra.mxu0 %v12243_v41  ;;  %6516 = vmatpush1.bf16.msra.mxu1 %v12245_v43  ;;  %v5795_v41 = vld [vmem:[#allocation24 + $0x108] sm:$0xff] }
0x1726   : > { %6476 = vmatprep.subr.bf16.mxu0 %v12252_v61  ;;  %6517 = vmatprep.subr.bf16.mxu1 %v12254_v63  ;;  %v5799_v43 = vld [vmem:[#allocation24 + $0x128] sm:$0xff]  ;;  %v12291_v61 = vcombine.low %v5786_v48, %v5790_v29  ;;  %v12293_v63 = vcombine.low %v5787_v10, %v5791_v30  ;;  %v5834_v10 = vld [vmem:[#allocation24 + $0x240] sm:$0xff] }
0x1727   : > { %v12302_v4 = vcombine.high %v5795_v41, %v5799_v43  ;;  %v5838_v30 = vld [vmem:[#allocation24 + $0x260] sm:$0xff] }
0x1729   : > { %6477 = vmatpush1.bf16.msra.mxu0 %v12251_v44  ;;  %6518 = vmatpush1.bf16.msra.mxu1 %v12253_v45  ;;  %v5803_v44 = vld [vmem:[#allocation24 + $0x148] sm:$0xff] }
0x172a   : > { %6478 = vmatprep.subr.bf16.mxu0 %v12260_v47  ;;  %6519 = vmatprep.subr.bf16.mxu1 %v12262_v51  ;;  %v5807_v45 = vld [vmem:[#allocation24 + $0x168] sm:$0xff]  ;;  %v12299_v47 = vcombine.low %v5794_v39, %v5798_v40  ;;  %v12301_v51 = vcombine.low %v5795_v41, %v5799_v43  ;;  %v12340_v39 = vcombine.high %v5834_v10, %v5838_v30  ;;  %v5842_v41 = vld [vmem:[#allocation24 + $0x280] sm:$0xff] }
0x172b   : > { %v12310_v5 = vcombine.high %v5803_v44, %v5807_v45  ;;  %v5846_v43 = vld [vmem:[#allocation24 + $0x2a0] sm:$0xff] }
0x172d   : > { %6479 = vmatpush1.bf16.msra.mxu0 %v12259_v57  ;;  %6520 = vmatpush1.bf16.msra.mxu1 %v12261_v54  ;;  %v5811_v57 = vld [vmem:[#allocation24 + $0x188] sm:$0xff] }
0x172e   : > { %7182 = vmatprep.subr.bf16.mxu0 %v12268_v56  ;;  %7223 = vmatprep.subr.bf16.mxu1 %v12270_v7  ;;  %v5815_v54 = vld [vmem:[#allocation24 + $0x1a8] sm:$0xff]  ;;  %v12307_v56 = vcombine.low %v5802_v25, %v5806_v12  ;;  %v12309_v7 = vcombine.low %v5803_v44, %v5807_v45  ;;  %v12348_v12 = vcombine.high %v5842_v41, %v5846_v43  ;;  %v5850_v45 = vld [vmem:[#allocation24 + $0x2c0] sm:$0xff] }
0x172f   : > { %v12318_v14 = vcombine.high %v5811_v57, %v5815_v54 }
0x1730   : > { %6493 = vmatmul.mubr.bf16.vlgmr.msra.gmra.mrb[72].mxu0 %v16719_v26  ;;  %6534 = vmatmul.mubr.bf16.vlgmr.msra.gmra.mrb[84].mxu1 %v16719_v26  ;;  %v12285_v26 = vcombine.low %v5779_v32, %v5783_v6  ;;  %v5826_v32 = vld [vmem:[#allocation24 + $0x200] sm:$0xff] }
0x1731   : > { %7183 = vmatpush1.bf16.msra.mxu0 %v12267_v15  ;;  %7224 = vmatpush1.bf16.msra.mxu1 %v12269_v17  ;;  %v5819_v15 = vld [vmem:[#allocation24 + $0x1c8] sm:$0xff]  ;;  %v5830_v6 = vld [vmem:[#allocation24 + $0x220] sm:$0xff] }
0x1732   : > { %7184 = vmatprep.subr.bf16.mxu0 %v12276_v28  ;;  %7225 = vmatprep.subr.bf16.mxu1 %v12278_v21  ;;  %v5823_v17 = vld [vmem:[#allocation24 + $0x1e8] sm:$0xff]  ;;  %v12315_v28 = vcombine.low %v5810_v31, %v5814_v34  ;;  %v12317_v21 = vcombine.low %v5811_v57, %v5815_v54  ;;  %v12332_v48 = vcombine.high %v5826_v32, %v5830_v6 }
0x1733   : > { %7214 = vmatprep.mubr.bf16.mxu0 %v16767_v24  ;;  %7255 = vmatprep.mubr.bf16.mxu1 %v16767_v24  ;;  %v12326_v23 = vcombine.high %v5819_v15, %v5823_v17  ;;  %v12347_v31 = vcombine.low %v5842_v41, %v5846_v43  ;;  %v5882_v41 = vld [vmem:[#allocation24 + $0x3c0] sm:$0xff] }
0x1734   : > { %v5886_v43 = vld [vmem:[#allocation24 + $0x3e0] sm:$0xff] }
0x1735   : > { %7185 = vmatpush1.bf16.msra.mxu0 %v12275_v38  ;;  %7226 = vmatpush1.bf16.msra.mxu1 %v12277_v62  ;;  %v5827_v38 = vld [vmem:[#allocation24 + $0x208] sm:$0xff] }
0x1736   : > { %7186 = vmatprep.subr.bf16.mxu0 %v12284_v27  ;;  %7227 = vmatprep.subr.bf16.mxu1 %v12286_v58  ;;  %v5831_v62 = vld [vmem:[#allocation24 + $0x228] sm:$0xff]  ;;  %v12323_v27 = vcombine.low %v5818_v18, %v5822_v3  ;;  %v12325_v58 = vcombine.low %v5819_v15, %v5823_v17 }
0x1737   : > { %v12334_v29 = vcombine.high %v5827_v38, %v5831_v62  ;;  %v5863_v18 = vld [vmem:[#allocation24 + $0x328] sm:$0xff] }
0x1739   : > { %7187 = vmatpush1.bf16.msra.mxu0 %v12283_v55  ;;  %7228 = vmatpush1.bf16.msra.mxu1 %v12285_v26  ;;  %v5835_v55 = vld [vmem:[#allocation24 + $0x248] sm:$0xff] }
0x173a   : > { %7188 = vmatprep.subr.bf16.mxu0 %v12292_v33  ;;  %7229 = vmatprep.subr.bf16.mxu1 %v12294_v37  ;;  %v5839_v26 = vld [vmem:[#allocation24 + $0x268] sm:$0xff]  ;;  %v12331_v33 = vcombine.low %v5826_v32, %v5830_v6  ;;  %v12333_v37 = vcombine.low %v5827_v38, %v5831_v62 }
0x173b   : > { %v12342_v40 = vcombine.high %v5835_v55, %v5839_v26  ;;  %v12341_v25 = vcombine.low %v5835_v55, %v5839_v26  ;;  %v5867_v32 = vld [vmem:[#allocation24 + $0x348] sm:$0xff] }
0x173c   : > { %v5871_v6 = vld [vmem:[#allocation24 + $0x368] sm:$0xff] }
0x173d   : > { %7189 = vmatpush1.bf16.msra.mxu0 %v12291_v61  ;;  %7230 = vmatpush1.bf16.msra.mxu1 %v12293_v63  ;;  %v5843_v61 = vld [vmem:[#allocation24 + $0x288] sm:$0xff] }
0x173e   : > { %7190 = vmatprep.subr.bf16.mxu0 %v12300_v50  ;;  %7231 = vmatprep.subr.bf16.mxu1 %v12302_v4  ;;  %v5847_v63 = vld [vmem:[#allocation24 + $0x2a8] sm:$0xff]  ;;  %v16773_v50 = vpop.xlane.xlu0 %7553  ;;  %v12339_v4 = vcombine.low %v5834_v10, %v5838_v30  ;;  %v5878_v10 = vld [vmem:[#allocation24 + $0x3a0] sm:$0xff] }
0x173f   : > { %v12350_v44 = vcombine.high %v5843_v61, %v5847_v63  ;;  %v12349_v34 = vcombine.low %v5843_v61, %v5847_v63  ;;  %v5875_v30 = vld [vmem:[#allocation24 + $0x388] sm:$0xff] }
0x1740   : > { %v5879_v55 = vld [vmem:[#allocation24 + $0x3a8] sm:$0xff] }
0x1741   : > { %7191 = vmatpush1.bf16.msra.mxu0 %v12299_v47  ;;  %7232 = vmatpush1.bf16.msra.mxu1 %v12301_v51  ;;  %v7555_v47 = vsel %vm2055_vm12, %v16773_v50, -inf  ;;  %v5854_v51 = vld [vmem:[#allocation24 + $0x2e0] sm:$0xff]  ;;  %v5883_v61 = vld [vmem:[#allocation24 + $0x3c8] sm:$0xff] }
0x1742   : > { %7192 = vmatprep.subr.bf16.mxu0 %v12308_v53  ;;  %7233 = vmatprep.subr.bf16.mxu1 %v12310_v5  ;;  %v5851_v53 = vld [vmem:[#allocation24 + $0x2c8] sm:$0xff]  ;;  %v7556_v57 = vrot.slane %v7555_v47, 4  ;;  %v12356_v54 = vcombine.high %v5850_v45, %v5854_v51  ;;  %v12355_v3 = vcombine.low %v5850_v45, %v5854_v51  ;;  %v5768_v51 = vld [vmem:[#allocation24 + $0x30] sm:$0xff] }
0x1743   : > { %v5855_v5 = vld [vmem:[#allocation24 + $0x2e8] sm:$0xff] }
0x1744   : > { %v12357_v15 = vcombine.low %v5851_v53, %v5855_v5  ;;  %v7557_v17 = vmax.f32 %v7555_v47, %v7556_v57  ;;  %v5887_v63 = vld [vmem:[#allocation24 + $0x3e8] sm:$0xff]  ;;  %v5764_v47 = vld [vmem:[#allocation24 + $0x10] sm:$0xff] }
0x1745   : > { %7193 = vmatpush1.bf16.msra.mxu0 %v12307_v56  ;;  %7234 = vmatpush1.bf16.msra.mxu1 %v12309_v7  ;;  %v12358_v56 = vcombine.high %v5851_v53, %v5855_v5  ;;  %v5858_v7 = vld [vmem:[#allocation24 + $0x300] sm:$0xff]  ;;  %v12390_v45 = vcombine.high %v5883_v61, %v5887_v63  ;;  %v5765_v53 = vld [vmem:[#allocation24 + $0x18] sm:$0xff] }
0x1746   : > { %7194 = vmatprep.subr.bf16.mxu0 %v12316_v8  ;;  %7235 = vmatprep.subr.bf16.mxu1 %v12318_v14  ;;  %v5862_v8 = vld [vmem:[#allocation24 + $0x320] sm:$0xff]  ;;  %v5859_v14 = vld [vmem:[#allocation24 + $0x308] sm:$0xff]  ;;  %v5769_v5 = vld [vmem:[#allocation24 + $0x38] sm:$0xff] }
0x1747   : > { %v12363_v38 = vcombine.low %v5858_v7, %v5862_v8  ;;  %v12365_v62 = vcombine.low %v5859_v14, %v5863_v18 }
0x1749   : > { %7195 = vmatpush1.bf16.msra.mxu0 %v12315_v28  ;;  %7236 = vmatpush1.bf16.msra.mxu1 %v12317_v21  ;;  %v12364_v28 = vcombine.high %v5858_v7, %v5862_v8  ;;  %v12366_v21 = vcombine.high %v5859_v14, %v5863_v18  ;;  %v5772_v7 = vld [vmem:[#allocation24 + $0x50] sm:$0xff]  ;;  %v5773_v14 = vld [vmem:[#allocation24 + $0x58] sm:$0xff] }
0x174a   : > { %7196 = vmatprep.subr.bf16.mxu0 %v12324_v2  ;;  %7237 = vmatprep.subr.bf16.mxu1 %v12326_v23  ;;  %v5866_v2 = vld [vmem:[#allocation24 + $0x340] sm:$0xff]  ;;  %v5776_v8 = vld [vmem:[#allocation24 + $0x70] sm:$0xff]  ;;  %v5777_v18 = vld [vmem:[#allocation24 + $0x78] sm:$0xff] }
0x174b   : > { %v5870_v23 = vld [vmem:[#allocation24 + $0x360] sm:$0xff] }
0x174c   : > { %v12371_v26 = vcombine.low %v5866_v2, %v5870_v23 }
0x174d   : > { %7197 = vmatpush1.bf16.msra.mxu0 %v12323_v27  ;;  %7238 = vmatpush1.bf16.msra.mxu1 %v12325_v58  ;;  %v7558_v27 = vrot.slane %v7557_v17, 2  ;;  %v12372_v58 = vcombine.high %v5866_v2, %v5870_v23  ;;  %v12282_v2 = vcombine.high %v5773_v14, %v5777_v18  ;;  %v5780_v23 = vld [vmem:[#allocation24 + $0x90] sm:$0xff] }
0x174e   : > { %7198 = vmatprep.subr.bf16.mxu0 %v12332_v48  ;;  %7239 = vmatprep.subr.bf16.mxu1 %v12334_v29  ;;  %v12374_v48 = vcombine.high %v5867_v32, %v5871_v6  ;;  %v5874_v29 = vld [vmem:[#allocation24 + $0x380] sm:$0xff] }
0x1751   : > { %7199 = vmatpush1.bf16.msra.mxu0 %v12331_v33  ;;  %7240 = vmatpush1.bf16.msra.mxu1 %v12333_v37  ;;  %v12373_v33 = vcombine.low %v5867_v32, %v5871_v6  ;;  %v7559_v37 = vmax.f32 %v7557_v17, %v7558_v27  ;;  %v12273_v17 = vcombine.low %v5765_v53, %v5769_v5  ;;  %v5784_v32 = vld [vmem:[#allocation24 + $0xb0] sm:$0xff]  ;;  %v5781_v6 = vld [vmem:[#allocation24 + $0x98] sm:$0xff] }
0x1752   : > { %7200 = vmatprep.subr.bf16.mxu0 %v12340_v39  ;;  %7241 = vmatprep.subr.bf16.mxu1 %v12342_v40  ;;  %v12380_v39 = vcombine.high %v5874_v29, %v5878_v10  ;;  %v12382_v40 = vcombine.high %v5875_v30, %v5879_v55 }
0x1755   : > { %7201 = vmatpush1.bf16.msra.mxu0 %v12339_v4  ;;  %7242 = vmatpush1.bf16.msra.mxu1 %v12341_v25  ;;  %v12379_v4 = vcombine.low %v5874_v29, %v5878_v10  ;;  %v12381_v25 = vcombine.low %v5875_v30, %v5879_v55  ;;  %v5792_v29 = vld [vmem:[#allocation24 + $0xf0] sm:$0xff]  ;;  %v5789_v10 = vld [vmem:[#allocation24 + $0xd8] sm:$0xff]  ;;  %v12287_v55 = vcombine.low %v5780_v23, %v5784_v32 }
0x1756   : > { %7202 = vmatprep.subr.bf16.mxu0 %v12348_v12  ;;  %7243 = vmatprep.subr.bf16.mxu1 %v12350_v44  ;;  %v7560_v12 = vrot.slane %v7559_v37, 1  ;;  %v12388_v44 = vcombine.high %v5882_v41, %v5886_v43  ;;  %v5793_v30 = vld [vmem:[#allocation24 + $0xf8] sm:$0xff] }
0x1758   : > { %v7561_v57 = vmax.f32 %v7559_v37, %v7560_v12  ;;  %v12298_v37 = vcombine.high %v5789_v10, %v5793_v30  ;;  %v5808_v12 = vld [vmem:[#allocation24 + $0x170] sm:$0xff] }
0x1759   : > { %7203 = vmatpush1.bf16.msra.mxu0 %v12347_v31  ;;  %7244 = vmatpush1.bf16.msra.mxu1 %v12349_v34  ;;  %v12387_v31 = vcombine.low %v5882_v41, %v5886_v43  ;;  %v12389_v34 = vcombine.low %v5883_v61, %v5887_v63  ;;  %v5797_v41 = vld [vmem:[#allocation24 + $0x118] sm:$0xff]  ;;  %v12297_v63 = vcombine.low %v5789_v10, %v5793_v30 }
0x175a   : > { %7204 = vmatprep.subr.bf16.mxu0 %v12356_v54  ;;  %7245 = vmatprep.subr.bf16.mxu1 %v12358_v56  ;;  %v12272_v54 = vcombine.high %v5764_v47, %v5768_v51  ;;  %v12274_v56 = vcombine.high %v5765_v53, %v5769_v5  ;;  %v5801_v43 = vld [vmem:[#allocation24 + $0x138] sm:$0xff] }
0x175d   : > { %7205 = vmatpush1.bf16.msra.mxu0 %v12355_v3  ;;  %7246 = vmatpush1.bf16.msra.mxu1 %v12357_v15  ;;  %v16779_v3 = vpack.c.bf16 %v16605_v13, %v16605_v13  ;;  %v12271_v15 = vcombine.low %v5764_v47, %v5768_v51  ;;  %v12279_v13 = vcombine.low %v5772_v7, %v5776_v8 }
0x175e   : > { %7206 = vmatprep.subr.bf16.mxu0 %v12364_v28  ;;  %7247 = vmatprep.subr.bf16.mxu1 %v12366_v21  ;;  %v7562_v28 = vsub.f32 %v16773_v50, %v7561_v57  ;;  %v12280_v21 = vcombine.high %v5772_v7, %v5776_v8  ;;  %v12288_v50 = vcombine.high %v5780_v23, %v5784_v32  ;;  %v5813_v57 = vld [vmem:[#allocation24 + $0x198] sm:$0xff] }
0x175f   : > { %v12305_v51 = vcombine.low %v5797_v41, %v5801_v43 }
0x1760   : > { %v7563_v27 = vmul.f32 1.442695, %v7562_v28  ;;  %v5821_v28 = vld [vmem:[#allocation24 + $0x1d8] sm:$0xff] }
0x1761   : > { %7207 = vmatpush1.bf16.msra.mxu0 %v12363_v38  ;;  %7248 = vmatpush1.bf16.msra.mxu1 %v12365_v62  ;;  %v5785_v38 = vld [vmem:[#allocation24 + $0xb8] sm:$0xff]  ;;  %v12281_v62 = vcombine.low %v5773_v14, %v5777_v18 }
0x1762   : > { %7208 = vmatprep.subr.bf16.mxu0 %v12372_v58  ;;  %7249 = vmatprep.subr.bf16.mxu1 %v12374_v48  ;;  %v12290_v58 = vcombine.high %v5781_v6, %v5785_v38  ;;  %v5788_v48 = vld [vmem:[#allocation24 + $0xd0] sm:$0xff]  ;;  %14362 = vpow2.f32 %v7563_v27 }
0x1763   : > { %v12295_v61 = vcombine.low %v5788_v48, %v5792_v29  ;;  %v5832_v27 = vld [vmem:[#allocation24 + $0x230] sm:$0xff] }
0x1765   : > { %7209 = vmatpush1.bf16.msra.mxu0 %v12371_v26  ;;  %7250 = vmatpush1.bf16.msra.mxu1 %v12373_v33  ;;  %v12289_v26 = vcombine.low %v5781_v6, %v5785_v38  ;;  %v12296_v33 = vcombine.high %v5788_v48, %v5792_v29 }
0x1766   : > { %7210 = vmatprep.subr.bf16.mxu0 %v12380_v39  ;;  %7251 = vmatprep.subr.bf16.mxu1 %v12382_v40  ;;  %v5796_v39 = vld [vmem:[#allocation24 + $0x110] sm:$0xff] }
0x1767   : > { %v5800_v40 = vld [vmem:[#allocation24 + $0x130] sm:$0xff] }
0x1768   : > { %v12303_v47 = vcombine.low %v5796_v39, %v5800_v40 }
0x1769   : > { %7211 = vmatpush1.bf16.msra.mxu0 %v12379_v4  ;;  %7252 = vmatpush1.bf16.msra.mxu1 %v12381_v25  ;;  %v12306_v4 = vcombine.high %v5797_v41, %v5801_v43  ;;  %v5804_v25 = vld [vmem:[#allocation24 + $0x150] sm:$0xff] }
0x176a   : > { %7212 = vmatprep.subr.bf16.mxu0 %v12388_v44  ;;  %7253 = vmatprep.subr.bf16.mxu1 %v12390_v45  ;;  %v5805_v44 = vld [vmem:[#allocation24 + $0x158] sm:$0xff]  ;;  %v12312_v53 = vcombine.high %v5804_v25, %v5808_v12  ;;  %v12311_v7 = vcombine.low %v5804_v25, %v5808_v12  ;;  %v5848_v25 = vld [vmem:[#allocation24 + $0x2b0] sm:$0xff] }
0x176b   : > { %v5809_v45 = vld [vmem:[#allocation24 + $0x178] sm:$0xff] }
0x176c   : > { %v12314_v5 = vcombine.high %v5805_v44, %v5809_v45  ;;  %v12313_v8 = vcombine.low %v5805_v44, %v5809_v45  ;;  %v5845_v12 = vld [vmem:[#allocation24 + $0x298] sm:$0xff] }
0x176d   : > { %7213 = vmatpush1.bf16.msra.mxu0 %v12387_v31  ;;  %7254 = vmatpush1.bf16.msra.mxu1 %v12389_v34  ;;  %v5812_v31 = vld [vmem:[#allocation24 + $0x190] sm:$0xff]  ;;  %v5849_v44 = vld [vmem:[#allocation24 + $0x2b8] sm:$0xff] }
0x176e   : > { %7264 = vmatprep.subr.bf16.mxu0 %v12272_v54  ;;  %7305 = vmatprep.subr.bf16.mxu1 %v12274_v56  ;;  %v5816_v34 = vld [vmem:[#allocation24 + $0x1b0] sm:$0xff]  ;;  %v5817_v54 = vld [vmem:[#allocation24 + $0x1b8] sm:$0xff]  ;;  %v16786_v56 = vpop.eup %14362 }
0x176f   : > { %v12320_v14 = vcombine.high %v5812_v31, %v5816_v34  ;;  %v12322_v18 = vcombine.high %v5813_v57, %v5817_v54  ;;  %v12319_v23 = vcombine.low %v5812_v31, %v5816_v34  ;;  %v12321_v32 = vcombine.low %v5813_v57, %v5817_v54  ;;  %v5856_v57 = vld [vmem:[#allocation24 + $0x2f0] sm:$0xff]  ;;  %v5853_v54 = vld [vmem:[#allocation24 + $0x2d8] sm:$0xff] }
0x1770   : > { %7215 = vmatmul.mubr.bf16.vlgmr.msra.gmra.mrb[76].mxu0 %v16779_v3  ;;  %7256 = vmatmul.mubr.bf16.vlgmr.msra.gmra.mrb[88].mxu1 %v16779_v3 }
0x1771   : > { %7265 = vmatpush1.bf16.msra.mxu0 %v12271_v15  ;;  %7306 = vmatpush1.bf16.msra.mxu1 %v12273_v17  ;;  %v5820_v15 = vld [vmem:[#allocation24 + $0x1d0] sm:$0xff] }
0x1772   : > { %7266 = vmatprep.subr.bf16.mxu0 %v12280_v21  ;;  %7307 = vmatprep.subr.bf16.mxu1 %v12282_v2  ;;  %v5824_v17 = vld [vmem:[#allocation24 + $0x1f0] sm:$0xff]  ;;  %v5825_v21 = vld [vmem:[#allocation24 + $0x1f8] sm:$0xff]  ;;  %v7565_v2 = vsel %vm2055_vm12, %v16786_v56, 0.0 }
0x1773   : > { %7296 = vmatprep.mubr.bf16.mxu0 %v16767_v24  ;;  %7337 = vmatprep.mubr.bf16.mxu1 %v16767_v24  ;;  %v12304_v24 = vcombine.high %v5796_v39, %v5800_v40  ;;  %v12328_v6 = vcombine.high %v5820_v15, %v5824_v17  ;;  %v12330_v38 = vcombine.high %v5821_v28, %v5825_v21  ;;  %v5841_v39 = vld [vmem:[#allocation24 + $0x278] sm:$0xff] }
0x1774   : > { %v12327_v48 = vcombine.low %v5820_v15, %v5824_v17  ;;  %v12329_v29 = vcombine.low %v5821_v28, %v5825_v21  ;;  %v5860_v28 = vld [vmem:[#allocation24 + $0x310] sm:$0xff] }
0x1775   : > { %7267 = vmatpush1.bf16.msra.mxu0 %v12279_v13  ;;  %7308 = vmatpush1.bf16.msra.mxu1 %v12281_v62  ;;  %v5828_v13 = vld [vmem:[#allocation24 + $0x210] sm:$0xff]  ;;  %v7566_v62 = vrot.slane %v7565_v2, 4 }
0x1776   : > { %7268 = vmatprep.subr.bf16.mxu0 %v12288_v50  ;;  %7309 = vmatprep.subr.bf16.mxu1 %v12290_v58  ;;  %v5829_v50 = vld [vmem:[#allocation24 + $0x218] sm:$0xff]  ;;  %v12336_v10 = vcombine.high %v5828_v13, %v5832_v27  ;;  %v12335_v40 = vcombine.low %v5828_v13, %v5832_v27 }
0x1777   : > { %v5833_v58 = vld [vmem:[#allocation24 + $0x238] sm:$0xff] }
0x1778   : > { %v12338_v30 = vcombine.high %v5829_v50, %v5833_v58  ;;  %v12337_v41 = vcombine.low %v5829_v50, %v5833_v58  ;;  %v5868_v50 = vld [vmem:[#allocation24 + $0x350] sm:$0xff] }
0x1779   : > { %7269 = vmatpush1.bf16.msra.mxu0 %v12287_v55  ;;  %7310 = vmatpush1.bf16.msra.mxu1 %v12289_v26  ;;  %v5836_v55 = vld [vmem:[#allocation24 + $0x250] sm:$0xff]  ;;  %v7567_v26 = vadd.f32 %v7566_v62, %v7565_v2 }
0x177a   : > { %7270 = vmatprep.subr.bf16.mxu0 %v12296_v33  ;;  %7311 = vmatprep.subr.bf16.mxu1 %v12298_v37  ;;  %v5840_v33 = vld [vmem:[#allocation24 + $0x270] sm:$0xff]  ;;  %v5837_v37 = vld [vmem:[#allocation24 + $0x258] sm:$0xff] }
0x177b   : > { %v12344_v43 = vcombine.high %v5836_v55, %v5840_v33  ;;  %v12343_v45 = vcombine.low %v5836_v55, %v5840_v33  ;;  %v5864_v2 = vld [vmem:[#allocation24 + $0x330] sm:$0xff] }
0x177c   : > { %v12368_v62 = vcombine.high %v5860_v28, %v5864_v2 }
0x177d   : > { %7271 = vmatpush1.bf16.msra.mxu0 %v12295_v61  ;;  %7312 = vmatpush1.bf16.msra.mxu1 %v12297_v63  ;;  %v12346_v61 = vcombine.high %v5837_v37, %v5841_v39  ;;  %v5844_v63 = vld [vmem:[#allocation24 + $0x290] sm:$0xff] }
0x177e   : > { %7272 = vmatprep.subr.bf16.mxu0 %v12304_v24  ;;  %7313 = vmatprep.subr.bf16.mxu1 %v12306_v4  ;;  %v7568_v24 = vrot.slane %v7567_v26, 2  ;;  %v7573_v4 = vmul.f32 %v16786_v56, %v16697_v22 }
0x1780   : > { %v7569_v31 = vadd.f32 %v7568_v24, %v7567_v26  ;;  %v7581_v34 = vsel %vm7550_vm8, %v7573_v4, 0.0 }
0x1781   : > { %7273 = vmatpush1.bf16.msra.mxu0 %v12303_v47  ;;  %7314 = vmatpush1.bf16.msra.mxu1 %v12305_v51  ;;  %v12345_v47 = vcombine.low %v5837_v37, %v5841_v39  ;;  %v12352_v51 = vcombine.high %v5844_v63, %v5848_v25  ;;  %v5876_v39 = vld [vmem:[#allocation24 + $0x390] sm:$0xff] }
0x1782   : > { %7274 = vmatprep.subr.bf16.mxu0 %v12312_v53  ;;  %7315 = vmatprep.subr.bf16.mxu1 %v12314_v5  ;;  %v12354_v53 = vcombine.high %v5845_v12, %v5849_v44  ;;  %v5852_v5 = vld [vmem:[#allocation24 + $0x2d0] sm:$0xff]  ;;  %v7570_v21 = vrot.slane %v7569_v31, 1 }
0x1783   : > { %v12360_v15 = vcombine.high %v5852_v5, %v5856_v57 }
0x1784   : > { %v7571_v58 = vadd.f32 %v7570_v21, %v7569_v31 }
0x1785   : > { %7275 = vmatpush1.bf16.msra.mxu0 %v12311_v7  ;;  %7316 = vmatpush1.bf16.msra.mxu1 %v12313_v8  ;;  %v5857_v7 = vld [vmem:[#allocation24 + $0x2f8] sm:$0xff]  ;;  %v12351_v8 = vcombine.low %v5844_v63, %v5848_v25 }
0x1786   : > { %7276 = vmatprep.subr.bf16.mxu0 %v12320_v14  ;;  %7317 = vmatprep.subr.bf16.mxu1 %v12322_v18  ;;  %v12353_v14 = vcombine.low %v5845_v12, %v5849_v44  ;;  %v7582_v18 = vrot.slane %v7581_v34, 4  ;;  %v12362_v17 = vcombine.high %v5853_v54, %v5857_v7  ;;  %14364 = vrcp.f32 %v7571_v58  ;;  %v5884_v12 = vld [vmem:[#allocation24 + $0x3d0] sm:$0xff] }
0x1787   : > { %v5888_v44 = vld [vmem:[#allocation24 + $0x3f0] sm:$0xff] }
0x1788   : > { %v7583_v13 = vadd.f32 %v7582_v18, %v7581_v34  ;;  %v12392_v31 = vcombine.high %v5884_v12, %v5888_v44  ;;  %v12391_v18 = vcombine.low %v5884_v12, %v5888_v44  ;;  %v7757_v12 = vld [vmem:[#allocation28 + $0x120] sm:$0xff]  ;;  %v7754_v44 = vld [vmem:[#allocation28 + $0x108] sm:$0xff] }
0x1789   : > { %7277 = vmatpush1.bf16.msra.mxu0 %v12319_v23  ;;  %7318 = vmatpush1.bf16.msra.mxu1 %v12321_v32  ;;  %v5861_v23 = vld [vmem:[#allocation24 + $0x318] sm:$0xff] }
0x178a   : > { %7278 = vmatprep.subr.bf16.mxu0 %v12328_v6  ;;  %7319 = vmatprep.subr.bf16.mxu1 %v12330_v38  ;;  %v5865_v32 = vld [vmem:[#allocation24 + $0x338] sm:$0xff]  ;;  %v12359_v6 = vcombine.low %v5852_v5, %v5856_v57  ;;  %v12361_v38 = vcombine.low %v5853_v54, %v5857_v7  ;;  %v7584_v26 = vrot.slane %v7583_v13, 2  ;;  %v7721_v57 = vld [vmem:[#allocation28] sm:$0xff]  ;;  %v7722_v7 = vld [vmem:[#allocation28 + $0x8] sm:$0xff] }
0x178b   : > { %v12370_v27 = vcombine.high %v5861_v23, %v5865_v32  ;;  %v12369_v55 = vcombine.low %v5861_v23, %v5865_v32  ;;  %v7725_v54 = vld [vmem:[#allocation28 + $0x20] sm:$0xff] }
0x178c   : > { %v7585_v24 = vadd.f32 %v7584_v26, %v7583_v13  ;;  %v7729_v23 = vld [vmem:[#allocation28 + $0x40] sm:$0xff]  ;;  %v12404_v13 = vcombine.low %v7721_v57, %v7725_v54 }
0x178d   : > { %7279 = vmatpush1.bf16.msra.mxu0 %v12327_v48  ;;  %7320 = vmatpush1.bf16.msra.mxu1 %v12329_v29  ;;  %v5872_v48 = vld [vmem:[#allocation24 + $0x370] sm:$0xff]  ;;  %v5869_v29 = vld [vmem:[#allocation24 + $0x358] sm:$0xff]  ;;  %v7733_v32 = vld [vmem:[#allocation28 + $0x60] sm:$0xff] }
0x178e   : > { %7280 = vmatprep.subr.bf16.mxu0 %v12336_v10  ;;  %7321 = vmatprep.subr.bf16.mxu1 %v12338_v30  ;;  %v5873_v10 = vld [vmem:[#allocation24 + $0x378] sm:$0xff]  ;;  %v12367_v30 = vcombine.low %v5860_v28, %v5864_v2  ;;  %v12376_v33 = vcombine.high %v5868_v50, %v5872_v48  ;;  %v7586_v5 = vrot.slane %v7585_v24, 1  ;;  %v12405_v28 = vcombine.high %v7721_v57, %v7725_v54  ;;  %v7762_v57 = vld [vmem:[#allocation28 + $0x148] sm:$0xff] }
0x178f   : > { %v12378_v37 = vcombine.high %v5869_v29, %v5873_v10  ;;  %v12377_v63 = vcombine.low %v5869_v29, %v5873_v10  ;;  %v7741_v29 = vld [vmem:[#allocation28 + $0xa0] sm:$0xff]  ;;  %v7738_v10 = vld [vmem:[#allocation28 + $0x88] sm:$0xff] }
0x1790   : > { %v7766_v54 = vld [vmem:[#allocation28 + $0x168] sm:$0xff] }
0x1791   : > { %7281 = vmatpush1.bf16.msra.mxu0 %v12335_v40  ;;  %7322 = vmatpush1.bf16.msra.mxu1 %v12337_v41  ;;  %v5880_v40 = vld [vmem:[#allocation24 + $0x3b0] sm:$0xff]  ;;  %v5877_v41 = vld [vmem:[#allocation24 + $0x398] sm:$0xff] }
0x1792   : > { %7282 = vmatprep.subr.bf16.mxu0 %v12344_v43  ;;  %7323 = vmatprep.subr.bf16.mxu1 %v12346_v61  ;;  %v5881_v43 = vld [vmem:[#allocation24 + $0x3b8] sm:$0xff]  ;;  %v12375_v61 = vcombine.low %v5868_v50, %v5872_v48  ;;  %v12384_v4 = vcombine.high %v5876_v39, %v5880_v40  ;;  %v12413_v50 = vcombine.high %v7729_v23, %v7733_v32  ;;  %v7737_v48 = vld [vmem:[#allocation28 + $0x80] sm:$0xff] }
0x1793   : > { %v12386_v25 = vcombine.high %v5877_v41, %v5881_v43 }
0x1795   : > { %7283 = vmatpush1.bf16.msra.mxu0 %v12343_v45  ;;  %7324 = vmatpush1.bf16.msra.mxu1 %v12345_v47  ;;  %v5885_v45 = vld [vmem:[#allocation24 + $0x3d8] sm:$0xff] }
0x1796   : > { %7284 = vmatprep.subr.bf16.mxu0 %v12352_v51  ;;  %7325 = vmatprep.subr.bf16.mxu1 %v12354_v53  ;;  %v5889_v47 = vld [vmem:[#allocation24 + $0x3f8] sm:$0xff]  ;;  %v12383_v51 = vcombine.low %v5876_v39, %v5880_v40  ;;  %v12385_v53 = vcombine.low %v5877_v41, %v5881_v43  ;;  %v7745_v39 = vld [vmem:[#allocation28 + $0xc0] sm:$0xff]  ;;  %v7746_v41 = vld [vmem:[#allocation28 + $0xc8] sm:$0xff]  ;;  %v12420_v43 = vcombine.low %v7737_v48, %v7741_v29 }
0x1797   : > { %v12394_v34 = vcombine.high %v5885_v45, %v5889_v47  ;;  %v7749_v40 = vld [vmem:[#allocation28 + $0xe0] sm:$0xff] }
0x1799   : > { %7285 = vmatpush1.bf16.msra.mxu0 %v12351_v8  ;;  %7326 = vmatpush1.bf16.msra.mxu1 %v12353_v14  ;;  %v7726_v8 = vld [vmem:[#allocation28 + $0x28] sm:$0xff]  ;;  %v16793_v14 = vpop.eup %14364 }
0x179a   : > { %7286 = vmatprep.subr.bf16.mxu0 %v12360_v15  ;;  %7327 = vmatprep.subr.bf16.mxu1 %v12362_v17  ;;  %v12393_v15 = vcombine.low %v5885_v45, %v5889_v47  ;;  %v7587_v17 = vadd.f32 %v7586_v5, %v7585_v24  ;;  %v12407_v21 = vcombine.high %v7722_v7, %v7726_v8  ;;  %v7758_v45 = vld [vmem:[#allocation28 + $0x128] sm:$0xff] }
0x179b   : > { %v12429_v24 = vcombine.high %v7745_v39, %v7749_v40  ;;  %v12428_v47 = vcombine.low %v7745_v39, %v7749_v40  ;;  %v7789_v39 = vld [vmem:[#allocation28 + $0x220] sm:$0xff]  ;;  %v7786_v40 = vld [vmem:[#allocation28 + $0x208] sm:$0xff] }
0x179c   : > { %v7590_v2 = vmul.f32 %v16793_v14, %v7587_v17  ;;  %v12447_v17 = vcombine.high %v7762_v57, %v7766_v54 }
0x179d   : > { %7287 = vmatpush1.bf16.msra.mxu0 %v12359_v6  ;;  %7328 = vmatpush1.bf16.msra.mxu1 %v12361_v38  ;;  %v7730_v6 = vld [vmem:[#allocation28 + $0x48] sm:$0xff] }
0x179e   : > { %7288 = vmatprep.subr.bf16.mxu0 %v12368_v62  ;;  %7329 = vmatprep.subr.bf16.mxu1 %v12370_v27  ;;  %v7734_v38 = vld [vmem:[#allocation28 + $0x68] sm:$0xff]  ;;  %v12406_v62 = vcombine.low %v7722_v7, %v7726_v8  ;;  %v16796_v27 = vpack.c.bf16 %v7590_v2, %v7590_v2 }
0x179f   : > { %v12415_v58 = vcombine.high %v7730_v6, %v7734_v38  ;;  %v12414_v26 = vcombine.low %v7730_v6, %v7734_v38  ;;  %v7770_v2 = vld [vmem:[#allocation28 + $0x188] sm:$0xff]  ;;  %v12446_v38 = vcombine.low %v7762_v57, %v7766_v54  ;;  %v7724_v57 = vld [vmem:[#allocation28 + $0x18] sm:$0xff] }
0x17a0   : > { %v7728_v54 = vld [vmem:[#allocation28 + $0x38] sm:$0xff] }
0x17a1   : > { %7289 = vmatpush1.bf16.msra.mxu0 %v12367_v30  ;;  %7330 = vmatpush1.bf16.msra.mxu1 %v12369_v55  ;;  %v7742_v30 = vld [vmem:[#allocation28 + $0xa8] sm:$0xff]  ;;  %v12412_v55 = vcombine.low %v7729_v23, %v7733_v32 }
0x17a2   : > { %7290 = vmatprep.subr.bf16.mxu0 %v12376_v33  ;;  %7331 = vmatprep.subr.bf16.mxu1 %v12378_v37  ;;  %v12421_v33 = vcombine.high %v7737_v48, %v7741_v29  ;;  %v12423_v37 = vcombine.high %v7738_v10, %v7742_v30  ;;  %v7774_v23 = vld [vmem:[#allocation28 + $0x1a8] sm:$0xff] }
0x17a3   : > { %v7778_v48 = vld [vmem:[#allocation28 + $0x1c8] sm:$0xff] }
0x17a4   : > { %v7782_v29 = vld [vmem:[#allocation28 + $0x1e8] sm:$0xff] }
0x17a5   : > { %7291 = vmatpush1.bf16.msra.mxu0 %v12375_v61  ;;  %7332 = vmatpush1.bf16.msra.mxu1 %v12377_v63  ;;  %v7572_v61 = vmul.f32 %v16786_v56, %v16701_v35  ;;  %v12422_v63 = vcombine.low %v7738_v10, %v7742_v30  ;;  %v12439_v56 = vcombine.high %v7754_v44, %v7758_v45 }
0x17a6   : > { %7292 = vmatprep.subr.bf16.mxu0 %v12384_v4  ;;  %7333 = vmatprep.subr.bf16.mxu1 %v12386_v25  ;;  %v7753_v25 = vld [vmem:[#allocation28 + $0x100] sm:$0xff] }
0x17a7   : > { %v12437_v5 = vcombine.high %v7753_v25, %v7757_v12  ;;  %v12436_v8 = vcombine.low %v7753_v25, %v7757_v12  ;;  %v7797_v25 = vld [vmem:[#allocation28 + $0x260] sm:$0xff]  ;;  %v7794_v12 = vld [vmem:[#allocation28 + $0x248] sm:$0xff] }
0x17a9   : > { %7293 = vmatpush1.bf16.msra.mxu0 %v12383_v51  ;;  %7334 = vmatpush1.bf16.msra.mxu1 %v12385_v53  ;;  %v7574_v51 = vsel %vm2055_vm12, %v7572_v61, 0.0  ;;  %v12462_v61 = vcombine.low %v7778_v48, %v7782_v29 }
0x17aa   : > { %7294 = vmatprep.subr.bf16.mxu0 %v12392_v31  ;;  %7335 = vmatprep.subr.bf16.mxu1 %v12394_v34  ;;  %v7761_v31 = vld [vmem:[#allocation28 + $0x140] sm:$0xff]  ;;  %v7575_v7 = vrot.slane %v7574_v51, 4 }
0x17ab   : > { %v7765_v34 = vld [vmem:[#allocation28 + $0x160] sm:$0xff] }
0x17ac   : > { %v7576_v32 = vadd.f32 %v7575_v7, %v7574_v51  ;;  %v12444_v6 = vcombine.low %v7761_v31, %v7765_v34 }
0x17ad   : > { %7295 = vmatpush1.bf16.msra.mxu0 %v12391_v18  ;;  %7336 = vmatpush1.bf16.msra.mxu1 %v12393_v15  ;;  %v12438_v18 = vcombine.low %v7754_v44, %v7758_v45  ;;  %v12445_v15 = vcombine.high %v7761_v31, %v7765_v34  ;;  %v7798_v44 = vld [vmem:[#allocation28 + $0x268] sm:$0xff]  ;;  %v7727_v31 = vld [vmem:[#allocation28 + $0x30] sm:$0xff] }
0x17ae   : > { %8206 = vmatprep.subr.bf16.mxu0 %v12405_v28  ;;  %8247 = vmatprep.subr.bf16.mxu1 %v12407_v21  ;;  %v7769_v28 = vld [vmem:[#allocation28 + $0x180] sm:$0xff]  ;;  %v7577_v10 = vrot.slane %v7576_v32, 2 }
0x17af   : > { %v7773_v21 = vld [vmem:[#allocation28 + $0x1a0] sm:$0xff] }
0x17b0   : > { %7297 = vmatmul.mubr.bf16.vlgmr.msra.gmra.mrb[80].mxu0 %v16779_v3  ;;  %7338 = vmatmul.mubr.bf16.vlgmr.msra.gmra.mrb[92].mxu1 %v16779_v3  ;;  %v7750_v3 = vld [vmem:[#allocation28 + $0xe8] sm:$0xff]  ;;  %v12452_v30 = vcombine.low %v7769_v28, %v7773_v21 }
0x17b1   : > { %8207 = vmatpush1.bf16.msra.mxu0 %v12404_v13  ;;  %12484 = vmatprep.mubr.msk.bf16.mxu0 %vm6374_vm3, %v16796_v27  ;;  %v12431_v4 = vcombine.high %v7746_v41, %v7750_v3  ;;  %v12430_v53 = vcombine.low %v7746_v41, %v7750_v3  ;;  %v12453_v13 = vcombine.high %v7769_v28, %v7773_v21  ;;  %v7790_v41 = vld [vmem:[#allocation28 + $0x228] sm:$0xff]  ;;  %v7731_v28 = vld [vmem:[#allocation28 + $0x50] sm:$0xff] }
0x17b2   : > { %8248 = vmatpush1.bf16.msra.mxu1 %v12406_v62  ;;  %12485 = vmatprep.mubr.msk.bf16.mxu1 %vm6374_vm3, %v16796_v27  ;;  %v12455_v62 = vcombine.high %v7770_v2, %v7774_v23  ;;  %v7578_v3 = vadd.f32 %v7577_v10, %v7576_v32  ;;  %v12470_v51 = vcombine.low %v7786_v40, %v7790_v41  ;;  %v7735_v21 = vld [vmem:[#allocation28 + $0x70] sm:$0xff]  ;;  %v7736_v32 = vld [vmem:[#allocation28 + $0x78] sm:$0xff] }
0x17b3   : > { %8208 = vmatprep.subr.bf16.mxu0 %v12413_v50  ;;  %8249 = vmatprep.subr.bf16.mxu1 %v12415_v58  ;;  %v7777_v50 = vld [vmem:[#allocation28 + $0x1c0] sm:$0xff] }
0x17b4   : > { %v7781_v58 = vld [vmem:[#allocation28 + $0x1e0] sm:$0xff]  ;;  %v7579_v45 = vrot.slane %v7578_v3, 1 }
0x17b5   : > { %8209 = vmatpush1.bf16.msra.mxu0 %v12412_v55  ;;  %v12454_v55 = vcombine.low %v7770_v2, %v7774_v23  ;;  %v7732_v23 = vld [vmem:[#allocation28 + $0x58] sm:$0xff] }
0x17b6   : > { %8250 = vmatpush1.bf16.msra.mxu1 %v12414_v26  ;;  %8210 = vmatprep.subr.bf16.mxu0 %v12421_v33  ;;  %v12461_v26 = vcombine.high %v7777_v50, %v7781_v58  ;;  %v12463_v33 = vcombine.high %v7778_v48, %v7782_v29  ;;  %v7580_v34 = vadd.f32 %v7579_v45, %v7578_v3  ;;  %v7744_v48 = vld [vmem:[#allocation28 + $0xb8] sm:$0xff]  ;;  %v7755_v45 = vld [vmem:[#allocation28 + $0x110] sm:$0xff] }
0x17b7   : > { %8251 = vmatprep.subr.bf16.mxu1 %v12423_v37  ;;  %v7785_v37 = vld [vmem:[#allocation28 + $0x200] sm:$0xff]  ;;  %v12416_v29 = vcombine.low %v7731_v28, %v7735_v21  ;;  %v12418_v10 = vcombine.low %v7732_v23, %v7736_v32  ;;  %v7748_v3 = vld [vmem:[#allocation28 + $0xd8] sm:$0xff] }
0x17b9   : > { %8211 = vmatpush1.bf16.msra.mxu0 %v12420_v43  ;;  %v12460_v43 = vcombine.low %v7777_v50, %v7781_v58  ;;  %v7743_v50 = vld [vmem:[#allocation28 + $0xb0] sm:$0xff]  ;;  %v7740_v58 = vld [vmem:[#allocation28 + $0x98] sm:$0xff] }
0x17ba   : > { %8252 = vmatpush1.bf16.msra.mxu1 %v12422_v63  ;;  %8212 = vmatprep.subr.bf16.mxu0 %v12429_v24  ;;  %v12469_v63 = vcombine.high %v7785_v37, %v7789_v39  ;;  %v12471_v24 = vcombine.high %v7786_v40, %v7790_v41 }
0x17bb   : > { %8253 = vmatprep.subr.bf16.mxu1 %v12431_v4  ;;  %v7793_v4 = vld [vmem:[#allocation28 + $0x240] sm:$0xff] }
0x17bc   : > { %v12476_v7 = vcombine.low %v7793_v4, %v7797_v25 }
0x17bd   : > { %8213 = vmatpush1.bf16.msra.mxu0 %v12428_v47  ;;  %v12468_v47 = vcombine.low %v7785_v37, %v7789_v39  ;;  %v7747_v37 = vld [vmem:[#allocation28 + $0xd0] sm:$0xff] }
0x17be   : > { %8254 = vmatpush1.bf16.msra.mxu1 %v12430_v53  ;;  %8214 = vmatprep.subr.bf16.mxu0 %v12437_v5  ;;  %v12477_v53 = vcombine.high %v7793_v4, %v7797_v25  ;;  %v12479_v5 = vcombine.high %v7794_v12, %v7798_v44  ;;  %v7751_v39 = vld [vmem:[#allocation28 + $0xf0] sm:$0xff]  ;;  %v12426_v25 = vcombine.low %v7740_v58, %v7744_v48 }
0x17bf   : > { %8255 = vmatprep.subr.bf16.mxu1 %v12439_v56  ;;  %v7723_v56 = vld [vmem:[#allocation28 + $0x10] sm:$0xff] }
0x17c0   : > { %v12408_v2 = vcombine.low %v7723_v56, %v7727_v31 }
0x17c1   : > { %8215 = vmatpush1.bf16.msra.mxu0 %v12436_v8  ;;  %v12478_v8 = vcombine.low %v7794_v12, %v7798_v44  ;;  %v12433_v12 = vcombine.high %v7747_v37, %v7751_v39 }
0x17c2   : > { %8256 = vmatpush1.bf16.msra.mxu1 %v12438_v18  ;;  %8216 = vmatprep.subr.bf16.mxu0 %v12445_v15  ;;  %v7589_v18 = vmul.f32 %v16793_v14, %v7580_v34  ;;  %v12409_v15 = vcombine.high %v7723_v56, %v7727_v31  ;;  %v12419_v14 = vcombine.high %v7732_v23, %v7736_v32  ;;  %v7772_v23 = vld [vmem:[#allocation28 + $0x198] sm:$0xff] }
0x17c3   : > { %8257 = vmatprep.subr.bf16.mxu1 %v12447_v17  ;;  %v12411_v17 = vcombine.high %v7724_v57, %v7728_v54  ;;  %v7776_v32 = vld [vmem:[#allocation28 + $0x1b8] sm:$0xff] }
0x17c5   : > { %8217 = vmatpush1.bf16.msra.mxu0 %v12444_v6  ;;  %v16808_v6 = vpack.c.bf16 %v7589_v18, %v7589_v18 }
0x17c6   : > { %8258 = vmatpush1.bf16.msra.mxu1 %v12446_v38  ;;  %8218 = vmatprep.subr.bf16.mxu0 %v12453_v13  ;;  %v12410_v38 = vcombine.low %v7724_v57, %v7728_v54  ;;  %v12417_v13 = vcombine.high %v7731_v28, %v7735_v21  ;;  %v7763_v57 = vld [vmem:[#allocation28 + $0x150] sm:$0xff] }
0x17c7   : > { %8259 = vmatprep.subr.bf16.mxu1 %v12455_v62  ;;  %v7739_v62 = vld [vmem:[#allocation28 + $0x90] sm:$0xff] }
0x17c8   : > { %v7767_v54 = vld [vmem:[#allocation28 + $0x170] sm:$0xff] }
0x17c9   : > { %8219 = vmatpush1.bf16.msra.mxu0 %v12452_v30  ;;  %v12425_v30 = vcombine.high %v7739_v62, %v7743_v50  ;;  %v7771_v21 = vld [vmem:[#allocation28 + $0x190] sm:$0xff] }
0x17ca   : > { %8260 = vmatpush1.bf16.msra.mxu1 %v12454_v55  ;;  %8220 = vmatprep.subr.bf16.mxu0 %v12461_v26 }
0x17cb   : > { %8261 = vmatprep.subr.bf16.mxu1 %v12463_v33  ;;  %v12427_v33 = vcombine.high %v7740_v58, %v7744_v48  ;;  %v7783_v58 = vld [vmem:[#allocation28 + $0x1f0] sm:$0xff]  ;;  %v7780_v48 = vld [vmem:[#allocation28 + $0x1d8] sm:$0xff] }
0x17cd   : > { %8221 = vmatpush1.bf16.msra.mxu0 %v12460_v43  ;;  %v7752_v43 = vld [vmem:[#allocation28 + $0xf8] sm:$0xff] }
0x17ce   : > { %8262 = vmatpush1.bf16.msra.mxu1 %v12462_v61  ;;  %8222 = vmatprep.subr.bf16.mxu0 %v12469_v63  ;;  %v12435_v44 = vcombine.high %v7748_v3, %v7752_v43  ;;  %v12434_v56 = vcombine.low %v7748_v3, %v7752_v43  ;;  %v7791_v3 = vld [vmem:[#allocation28 + $0x230] sm:$0xff]  ;;  %v7788_v43 = vld [vmem:[#allocation28 + $0x218] sm:$0xff] }
0x17cf   : > { %8263 = vmatprep.subr.bf16.mxu1 %v12471_v24  ;;  %v12424_v24 = vcombine.low %v7739_v62, %v7743_v50  ;;  %v12459_v50 = vcombine.high %v7772_v23, %v7776_v32 }
0x17d1   : > { %8223 = vmatpush1.bf16.msra.mxu0 %v12468_v47  ;;  %v7759_v47 = vld [vmem:[#allocation28 + $0x130] sm:$0xff] }
0x17d2   : > { %8264 = vmatpush1.bf16.msra.mxu1 %v12470_v51  ;;  %8224 = vmatprep.subr.bf16.mxu0 %v12477_v53  ;;  %v7756_v51 = vld [vmem:[#allocation28 + $0x118] sm:$0xff]  ;;  %v12441_v31 = vcombine.high %v7755_v45, %v7759_v47  ;;  %v12440_v18 = vcombine.low %v7755_v45, %v7759_v47 }
0x17d3   : > { %8265 = vmatprep.subr.bf16.mxu1 %v12479_v5  ;;  %v7760_v53 = vld [vmem:[#allocation28 + $0x138] sm:$0xff]  ;;  %v12432_v5 = vcombine.low %v7747_v37, %v7751_v39  ;;  %v7787_v39 = vld [vmem:[#allocation28 + $0x210] sm:$0xff] }
0x17d4   : > { %v12443_v34 = vcombine.high %v7756_v51, %v7760_v53  ;;  %v7800_v45 = vld [vmem:[#allocation28 + $0x278] sm:$0xff]  ;;  %v12472_v47 = vcombine.low %v7787_v39, %v7791_v3 }
0x17d5   : > { %8225 = vmatpush1.bf16.msra.mxu0 %v12476_v7  ;;  %v7764_v7 = vld [vmem:[#allocation28 + $0x158] sm:$0xff] }
0x17d6   : > { %8266 = vmatpush1.bf16.msra.mxu1 %v12478_v8  ;;  %8288 = vmatprep.subr.bf16.mxu0 %v12409_v15  ;;  %v7768_v8 = vld [vmem:[#allocation28 + $0x178] sm:$0xff]  ;;  %v12442_v15 = vcombine.low %v7756_v51, %v7760_v53 }
0x17d7   : > { %8329 = vmatprep.subr.bf16.mxu1 %v12411_v17  ;;  %v12449_v17 = vcombine.high %v7763_v57, %v7767_v54  ;;  %v12451_v28 = vcombine.high %v7764_v7, %v7768_v8 }
0x17d8   : > { %8239 = vmatmul.mubr.bf16.vlgmr.msra.gmra.mrb[84].mxu0 %v16808_v6 }
0x17d9   : > { %8280 = vmatmul.mubr.bf16.vlgmr.msra.gmra.mrb[96].mxu1 %v16808_v6  ;;  %8289 = vmatpush1.bf16.msra.mxu0 %v12408_v2  ;;  %v7775_v2 = vld [vmem:[#allocation28 + $0x1b0] sm:$0xff] }
0x17da   : > { %12486 = vmatprep.mubr.msk.bf16.mxu0 %vm6374_vm3, %v16796_v27  ;;  %8330 = vmatpush1.bf16.msra.mxu1 %v12410_v38  ;;  %v12448_v38 = vcombine.low %v7763_v57, %v7767_v54  ;;  %v12457_v62 = vcombine.high %v7771_v21, %v7775_v2  ;;  %v7596_v57 = vld [vmem:[#allocation27 + $0x28] sm:$0xff] }
0x17db   : > { %12487 = vmatprep.mubr.msk.bf16.mxu1 %vm6374_vm3, %v16796_v27  ;;  %v16816_v55 = vpop.f32.mrb[68].mxu0  ;;  %v16818_v26 = vpop.f32.mrb[80].mxu1  ;;  %8290 = vmatprep.subr.bf16.mxu0 %v12417_v13  ;;  %v12450_v13 = vcombine.low %v7764_v7, %v7768_v8 }
0x17dc   : > { %8331 = vmatprep.subr.bf16.mxu1 %v12419_v14  ;;  %v16820_v40 = vpop.f32.mrb[69].mxu0  ;;  %v16822_v41 = vpop.f32.mrb[81].mxu1  ;;  %v7779_v14 = vld [vmem:[#allocation28 + $0x1d0] sm:$0xff] }
0x17dd   : > { %8291 = vmatpush1.bf16.msra.mxu0 %v12416_v29  ;;  %v6416_v61 = vpop.f32.mrb[70].mxu0  ;;  %v6457_v63 = vpop.f32.mrb[82].mxu1  ;;  %v7784_v29 = vld [vmem:[#allocation28 + $0x1f8] sm:$0xff] }
0x17de   : > { %8332 = vmatpush1.bf16.msra.mxu1 %v12418_v10  ;;  %v6417_v27 = vpop.f32.mrb[71].mxu0  ;;  %v6458_v4 = vpop.f32.mrb[83].mxu1  ;;  %8292 = vmatprep.subr.bf16.mxu0 %v12425_v30  ;;  %v12456_v10 = vcombine.low %v7771_v21, %v7775_v2  ;;  %v12458_v30 = vcombine.low %v7772_v23, %v7776_v32  ;;  %v12467_v37 = vcombine.high %v7780_v48, %v7784_v29  ;;  %v7792_v61 = vld [vmem:[#allocation28 + $0x238] sm:$0xff]  ;;  %v7604_v21 = vld [vmem:[#allocation27 + $0x68] sm:$0xff] }
0x17df   : > { %8333 = vmatprep.subr.bf16.mxu1 %v12427_v33  ;;  %v12465_v33 = vcombine.high %v7779_v14, %v7783_v58  ;;  %v12464_v63 = vcombine.low %v7779_v14, %v7783_v58  ;;  %v12473_v27 = vcombine.high %v7787_v39, %v7791_v3  ;;  %v12475_v4 = vcombine.high %v7788_v43, %v7792_v61  ;;  %v7608_v14 = vld [vmem:[#allocation27 + $0x88] sm:$0xff]  ;;  %v7619_v39 = vld [vmem:[#allocation27 + $0xe0] sm:$0xff] }
0x17e0   : > { %v12474_v51 = vcombine.low %v7788_v43, %v7792_v61  ;;  %v7612_v58 = vld [vmem:[#allocation27 + $0xa8] sm:$0xff] }
0x17e1   : > { %8293 = vmatpush1.bf16.msra.mxu0 %v12424_v24  ;;  %v12466_v24 = vcombine.low %v7780_v48, %v7784_v29  ;;  %v7620_v61 = vld [vmem:[#allocation27 + $0xe8] sm:$0xff] }
0x17e2   : > { %8334 = vmatpush1.bf16.msra.mxu1 %v12426_v25  ;;  %8294 = vmatprep.subr.bf16.mxu0 %v12433_v12  ;;  %v7795_v25 = vld [vmem:[#allocation28 + $0x250] sm:$0xff] }
0x17e3   : > { %8335 = vmatprep.subr.bf16.mxu1 %v12435_v44  ;;  %v7799_v12 = vld [vmem:[#allocation28 + $0x270] sm:$0xff]  ;;  %v7796_v44 = vld [vmem:[#allocation28 + $0x258] sm:$0xff] }
0x17e4   : > { %v12481_v53 = vcombine.high %v7795_v25, %v7799_v12  ;;  %v12480_v54 = vcombine.low %v7795_v25, %v7799_v12  ;;  %v12482_v7 = vcombine.low %v7796_v44, %v7800_v45  ;;  %v12506_v12 = vcombine.low %v7608_v14, %v7612_v58 }
0x17e5   : > { %8295 = vmatpush1.bf16.msra.mxu0 %v12432_v5  ;;  %v12483_v5 = vcombine.high %v7796_v44, %v7800_v45 }
0x17e6   : > { %8336 = vmatpush1.bf16.msra.mxu1 %v12434_v56  ;;  %8296 = vmatprep.subr.bf16.mxu0 %v12441_v31  ;;  %v7591_v56 = vld [vmem:[#allocation27] sm:$0xff] }
0x17e7   : > { %8337 = vmatprep.subr.bf16.mxu1 %v12443_v34  ;;  %v7595_v31 = vld [vmem:[#allocation27 + $0x20] sm:$0xff]  ;;  %v7592_v34 = vld [vmem:[#allocation27 + $0x8] sm:$0xff] }
0x17e8   : > { %v12489_v8 = vcombine.high %v7591_v56, %v7595_v31  ;;  %v12488_v2 = vcombine.low %v7591_v56, %v7595_v31  ;;  %v12490_v23 = vcombine.low %v7592_v34, %v7596_v57 }
0x17e9   : > { %8297 = vmatpush1.bf16.msra.mxu0 %v12440_v18  ;;  %v12491_v18 = vcombine.high %v7592_v34, %v7596_v57 }
0x17ea   : > { %8338 = vmatpush1.bf16.msra.mxu1 %v12442_v15  ;;  %8298 = vmatprep.subr.bf16.mxu0 %v12449_v17  ;;  %v7599_v15 = vld [vmem:[#allocation27 + $0x40] sm:$0xff] }
0x17eb   : > { %8339 = vmatprep.subr.bf16.mxu1 %v12451_v28  ;;  %v7603_v17 = vld [vmem:[#allocation27 + $0x60] sm:$0xff]  ;;  %v7600_v28 = vld [vmem:[#allocation27 + $0x48] sm:$0xff] }
0x17ec   : > { %v12497_v32 = vcombine.high %v7599_v15, %v7603_v17  ;;  %v12496_v48 = vcombine.low %v7599_v15, %v7603_v17  ;;  %v12498_v29 = vcombine.low %v7600_v28, %v7604_v21 }
0x17ed   : > { %8299 = vmatpush1.bf16.msra.mxu0 %v12448_v38  ;;  %v12499_v38 = vcombine.high %v7600_v28, %v7604_v21 }
0x17ee   : > { %8340 = vmatpush1.bf16.msra.mxu1 %v12450_v13  ;;  %8300 = vmatprep.subr.bf16.mxu0 %v12457_v62  ;;  %v7607_v13 = vld [vmem:[#allocation27 + $0x80] sm:$0xff] }
0x17ef   : > { %8341 = vmatprep.subr.bf16.mxu1 %v12459_v50  ;;  %v7611_v62 = vld [vmem:[#allocation27 + $0xa0] sm:$0xff]  ;;  %v16826_v50 = vpack.c.bf16 %v16689_v16, %v16689_v16 }
0x17f0   : > { %v7615_v16 = vld [vmem:[#allocation27 + $0xc0] sm:$0xff] }
0x17f1   : > { %8301 = vmatpush1.bf16.msra.mxu0 %v12456_v10  ;;  %v12505_v10 = vcombine.high %v7607_v13, %v7611_v62  ;;  %v12513_v44 = vcombine.high %v7615_v16, %v7619_v39  ;;  %v12512_v56 = vcombine.low %v7615_v16, %v7619_v39 }
0x17f2   : > { %8342 = vmatpush1.bf16.msra.mxu1 %v12458_v30  ;;  %8302 = vmatprep.subr.bf16.mxu0 %v12465_v33 }
0x17f3   : > { %8343 = vmatprep.subr.bf16.mxu1 %v12467_v37  ;;  %v12507_v37 = vcombine.high %v7608_v14, %v7612_v58 }
0x17f5   : > { %8303 = vmatpush1.bf16.msra.mxu0 %v12464_v63 }
0x17f6   : > { %8344 = vmatpush1.bf16.msra.mxu1 %v12466_v24  ;;  %8304 = vmatprep.subr.bf16.mxu0 %v12473_v27  ;;  %v12504_v27 = vcombine.low %v7607_v13, %v7611_v62 }
0x17f7   : > { %8345 = vmatprep.subr.bf16.mxu1 %v12475_v4 }
0x17f9   : > { %8305 = vmatpush1.bf16.msra.mxu0 %v12472_v47  ;;  %v7623_v47 = vld [vmem:[#allocation27 + $0x100] sm:$0xff] }
0x17fa   : > { %8346 = vmatpush1.bf16.msra.mxu1 %v12474_v51  ;;  %8306 = vmatprep.subr.bf16.mxu0 %v12481_v53  ;;  %v7627_v51 = vld [vmem:[#allocation27 + $0x120] sm:$0xff]  ;;  %v7624_v53 = vld [vmem:[#allocation27 + $0x108] sm:$0xff] }
0x17fb   : > { %8347 = vmatprep.subr.bf16.mxu1 %v12483_v5  ;;  %v7628_v5 = vld [vmem:[#allocation27 + $0x128] sm:$0xff]  ;;  %v12521_v34 = vcombine.high %v7623_v47, %v7627_v51  ;;  %v12520_v15 = vcombine.low %v7623_v47, %v7627_v51  ;;  %v7663_v47 = vld [vmem:[#allocation27 + $0x240] sm:$0xff] }
0x17fc   : > { %v12523_v57 = vcombine.high %v7624_v53, %v7628_v5  ;;  %v12522_v17 = vcombine.low %v7624_v53, %v7628_v5  ;;  %v7667_v51 = vld [vmem:[#allocation27 + $0x260] sm:$0xff]  ;;  %v7664_v53 = vld [vmem:[#allocation27 + $0x248] sm:$0xff] }
0x17fd   : > { %8307 = vmatpush1.bf16.msra.mxu0 %v12480_v54  ;;  %v7631_v54 = vld [vmem:[#allocation27 + $0x140] sm:$0xff]  ;;  %v7668_v5 = vld [vmem:[#allocation27 + $0x268] sm:$0xff] }
0x17fe   : > { %8348 = vmatpush1.bf16.msra.mxu1 %v12482_v7  ;;  %9010 = vmatprep.subr.bf16.mxu0 %v12489_v8  ;;  %v7635_v7 = vld [vmem:[#allocation27 + $0x160] sm:$0xff]  ;;  %v7632_v8 = vld [vmem:[#allocation27 + $0x148] sm:$0xff] }
0x17ff   : > { %9051 = vmatprep.subr.bf16.mxu1 %v12491_v18  ;;  %v7636_v18 = vld [vmem:[#allocation27 + $0x168] sm:$0xff]  ;;  %v12529_v28 = vcombine.high %v7631_v54, %v7635_v7  ;;  %v12528_v13 = vcombine.low %v7631_v54, %v7635_v7  ;;  %v7671_v54 = vld [vmem:[#allocation27 + $0x280] sm:$0xff] }
0x1800   : > { %8321 = vmatmul.mubr.bf16.vlgmr.msra.gmra.mrb[88].mxu0 %v16808_v6  ;;  %v12531_v21 = vcombine.high %v7632_v8, %v7636_v18  ;;  %v12530_v62 = vcombine.low %v7632_v8, %v7636_v18  ;;  %v7675_v7 = vld [vmem:[#allocation27 + $0x2a0] sm:$0xff]  ;;  %v7672_v8 = vld [vmem:[#allocation27 + $0x288] sm:$0xff] }
0x1801   : > { %8362 = vmatmul.mubr.bf16.vlgmr.msra.gmra.mrb[100].mxu1 %v16808_v6  ;;  %9011 = vmatpush1.bf16.msra.mxu0 %v12488_v2  ;;  %v7616_v6 = vld [vmem:[#allocation27 + $0xc8] sm:$0xff]  ;;  %v7639_v2 = vld [vmem:[#allocation27 + $0x180] sm:$0xff] }
0x1802   : > { %9052 = vmatpush1.bf16.msra.mxu1 %v12490_v23  ;;  %9012 = vmatprep.subr.bf16.mxu0 %v12497_v32  ;;  %v12515_v45 = vcombine.high %v7616_v6, %v7620_v61  ;;  %v12514_v31 = vcombine.low %v7616_v6, %v7620_v61  ;;  %v7643_v23 = vld [vmem:[#allocation27 + $0x1a0] sm:$0xff]  ;;  %v7640_v32 = vld [vmem:[#allocation27 + $0x188] sm:$0xff] }
0x1803   : > { %v16830_v30 = vpop.f32.mrb[72].mxu0  ;;  %v16832_v33 = vpop.f32.mrb[84].mxu1  ;;  %9053 = vmatprep.subr.bf16.mxu1 %v12499_v38  ;;  %9042 = vmatprep.mubr.bf16.mxu0 %v16826_v50  ;;  %v7644_v38 = vld [vmem:[#allocation27 + $0x1a8] sm:$0xff]  ;;  %v12537_v14 = vcombine.high %v7639_v2, %v7643_v23  ;;  %v12536_v16 = vcombine.low %v7639_v2, %v7643_v23  ;;  %v7679_v2 = vld [vmem:[#allocation27 + $0x2c0] sm:$0xff] }
0x1804   : > { %v16835_v3 = vpop.f32.mrb[73].mxu0  ;;  %v16837_v43 = vpop.f32.mrb[85].mxu1  ;;  %9083 = vmatprep.mubr.bf16.mxu1 %v16826_v50  ;;  %v12539_v58 = vcombine.high %v7640_v32, %v7644_v38  ;;  %v12538_v39 = vcombine.low %v7640_v32, %v7644_v38  ;;  %v7676_v18 = vld [vmem:[#allocation27 + $0x2a8] sm:$0xff]  ;;  %v7683_v23 = vld [vmem:[#allocation27 + $0x2e0] sm:$0xff] }
0x1805   : > { %v6498_v63 = vpop.f32.mrb[74].mxu0  ;;  %v6539_v24 = vpop.f32.mrb[86].mxu1  ;;  %9013 = vmatpush1.bf16.msra.mxu0 %v12496_v48  ;;  %v7647_v48 = vld [vmem:[#allocation27 + $0x1c0] sm:$0xff]  ;;  %v7680_v32 = vld [vmem:[#allocation27 + $0x2c8] sm:$0xff] }
0x1806   : > { %9054 = vmatpush1.bf16.msra.mxu1 %v12498_v29  ;;  %v6499_v4 = vpop.f32.mrb[75].mxu0  ;;  %v6540_v25 = vpop.f32.mrb[87].mxu1  ;;  %9014 = vmatprep.subr.bf16.mxu0 %v12505_v10  ;;  %v7651_v29 = vld [vmem:[#allocation27 + $0x1e0] sm:$0xff]  ;;  %v7648_v10 = vld [vmem:[#allocation27 + $0x1c8] sm:$0xff] }
0x1807   : > { %9055 = vmatprep.subr.bf16.mxu1 %v12507_v37  ;;  %v7652_v37 = vld [vmem:[#allocation27 + $0x1e8] sm:$0xff]  ;;  %v12545_v6 = vcombine.high %v7647_v48, %v7651_v29  ;;  %v7655_v63 = vld [vmem:[#allocation27 + $0x200] sm:$0xff]  ;;  %v12544_v25 = vcombine.low %v7647_v48, %v7651_v29 }
0x1808   : > { %v12547_v61 = vcombine.high %v7648_v10, %v7652_v37  ;;  %v7659_v24 = vld [vmem:[#allocation27 + $0x220] sm:$0xff]  ;;  %v7660_v4 = vld [vmem:[#allocation27 + $0x228] sm:$0xff] }
0x1809   : > { %9015 = vmatpush1.bf16.msra.mxu0 %v12504_v27  ;;  %v7656_v27 = vld [vmem:[#allocation27 + $0x208] sm:$0xff]  ;;  %v7687_v48 = vld [vmem:[#allocation27 + $0x300] sm:$0xff] }
0x180a   : > { %9056 = vmatpush1.bf16.msra.mxu1 %v12506_v12  ;;  %9016 = vmatprep.subr.bf16.mxu0 %v12513_v44  ;;  %v12546_v12 = vcombine.low %v7648_v10, %v7652_v37  ;;  %v12553_v44 = vcombine.high %v7655_v63, %v7659_v24  ;;  %v7684_v38 = vld [vmem:[#allocation27 + $0x2e8] sm:$0xff]  ;;  %v7691_v29 = vld [vmem:[#allocation27 + $0x320] sm:$0xff] }
0x180b   : > { %9057 = vmatprep.subr.bf16.mxu1 %v12515_v45  ;;  %v12555_v45 = vcombine.high %v7656_v27, %v7660_v4  ;;  %v7688_v10 = vld [vmem:[#allocation27 + $0x308] sm:$0xff] }
0x180c   : > { %v7692_v37 = vld [vmem:[#allocation27 + $0x328] sm:$0xff] }
0x180d   : > { %9017 = vmatpush1.bf16.msra.mxu0 %v12512_v56  ;;  %v12552_v56 = vcombine.low %v7655_v63, %v7659_v24  ;;  %v7695_v63 = vld [vmem:[#allocation27 + $0x340] sm:$0xff] }
0x180e   : > { %9058 = vmatpush1.bf16.msra.mxu1 %v12514_v31  ;;  %9018 = vmatprep.subr.bf16.mxu0 %v12521_v34  ;;  %v12554_v31 = vcombine.low %v7656_v27, %v7660_v4  ;;  %v12561_v34 = vcombine.high %v7663_v47, %v7667_v51  ;;  %v7699_v24 = vld [vmem:[#allocation27 + $0x360] sm:$0xff]  ;;  %v7696_v27 = vld [vmem:[#allocation27 + $0x348] sm:$0xff] }
0x180f   : > { %9059 = vmatprep.subr.bf16.mxu1 %v12523_v57  ;;  %v12563_v57 = vcombine.high %v7664_v53, %v7668_v5  ;;  %v7700_v4 = vld [vmem:[#allocation27 + $0x368] sm:$0xff] }
0x1811   : > { %9019 = vmatpush1.bf16.msra.mxu0 %v12520_v15  ;;  %v12560_v15 = vcombine.low %v7663_v47, %v7667_v51  ;;  %v7703_v47 = vld [vmem:[#allocation27 + $0x380] sm:$0xff] }
0x1812   : > { %9060 = vmatpush1.bf16.msra.mxu1 %v12522_v17  ;;  %9020 = vmatprep.subr.bf16.mxu0 %v12529_v28  ;;  %v12562_v17 = vcombine.low %v7664_v53, %v7668_v5  ;;  %v12569_v28 = vcombine.high %v7671_v54, %v7675_v7  ;;  %v7707_v51 = vld [vmem:[#allocation27 + $0x3a0] sm:$0xff]  ;;  %v7704_v53 = vld [vmem:[#allocation27 + $0x388] sm:$0xff] }
0x1813   : > { %9061 = vmatprep.subr.bf16.mxu1 %v12531_v21  ;;  %v12571_v21 = vcombine.high %v7672_v8, %v7676_v18  ;;  %v7708_v5 = vld [vmem:[#allocation27 + $0x3a8] sm:$0xff] }
0x1815   : > { %9021 = vmatpush1.bf16.msra.mxu0 %v12528_v13  ;;  %v12568_v13 = vcombine.low %v7671_v54, %v7675_v7  ;;  %v7711_v54 = vld [vmem:[#allocation27 + $0x3c0] sm:$0xff] }
0x1816   : > { %9062 = vmatpush1.bf16.msra.mxu1 %v12530_v62  ;;  %9022 = vmatprep.subr.bf16.mxu0 %v12537_v14  ;;  %v12570_v62 = vcombine.low %v7672_v8, %v7676_v18  ;;  %v12577_v14 = vcombine.high %v7679_v2, %v7683_v23  ;;  %v7715_v7 = vld [vmem:[#allocation27 + $0x3e0] sm:$0xff]  ;;  %v7712_v8 = vld [vmem:[#allocation27 + $0x3c8] sm:$0xff] }
0x1817   : > { %9063 = vmatprep.subr.bf16.mxu1 %v12539_v58  ;;  %v12579_v58 = vcombine.high %v7680_v32, %v7684_v38  ;;  %v7716_v18 = vld [vmem:[#allocation27 + $0x3e8] sm:$0xff] }
0x1819   : > { %9023 = vmatpush1.bf16.msra.mxu0 %v12536_v16  ;;  %v12576_v16 = vcombine.low %v7679_v2, %v7683_v23  ;;  %v7593_v2 = vld [vmem:[#allocation27 + $0x10] sm:$0xff] }
0x181a   : > { %9064 = vmatpush1.bf16.msra.mxu1 %v12538_v39  ;;  %9024 = vmatprep.subr.bf16.mxu0 %v12545_v6  ;;  %v12578_v39 = vcombine.low %v7680_v32, %v7684_v38  ;;  %v12585_v6 = vcombine.high %v7687_v48, %v7691_v29  ;;  %v7597_v23 = vld [vmem:[#allocation27 + $0x30] sm:$0xff]  ;;  %v7594_v32 = vld [vmem:[#allocation27 + $0x18] sm:$0xff] }
0x181b   : > { %9065 = vmatprep.subr.bf16.mxu1 %v12547_v61  ;;  %v12587_v61 = vcombine.high %v7688_v10, %v7692_v37  ;;  %v7598_v38 = vld [vmem:[#allocation27 + $0x38] sm:$0xff] }
0x181d   : > { %9025 = vmatpush1.bf16.msra.mxu0 %v12544_v25  ;;  %v12584_v25 = vcombine.low %v7687_v48, %v7691_v29  ;;  %v7601_v48 = vld [vmem:[#allocation27 + $0x50] sm:$0xff] }
0x181e   : > { %9066 = vmatpush1.bf16.msra.mxu1 %v12546_v12  ;;  %9026 = vmatprep.subr.bf16.mxu0 %v12553_v44  ;;  %v12586_v12 = vcombine.low %v7688_v10, %v7692_v37  ;;  %v12593_v44 = vcombine.high %v7695_v63, %v7699_v24  ;;  %v7605_v29 = vld [vmem:[#allocation27 + $0x70] sm:$0xff]  ;;  %v16842_v10 = vpack.c.bf16 %v16692_v20, %v16692_v20  ;;  %v7602_v37 = vld [vmem:[#allocation27 + $0x58] sm:$0xff] }
0x181f   : > { %9067 = vmatprep.subr.bf16.mxu1 %v12555_v45  ;;  %v12595_v45 = vcombine.high %v7696_v27, %v7700_v4  ;;  %v12500_v20 = vcombine.low %v7601_v48, %v7605_v29 }
0x1821   : > { %9027 = vmatpush1.bf16.msra.mxu0 %v12552_v56  ;;  %v12592_v56 = vcombine.low %v7695_v63, %v7699_v24  ;;  %v7609_v24 = vld [vmem:[#allocation27 + $0x90] sm:$0xff] }
0x1822   : > { %9068 = vmatpush1.bf16.msra.mxu1 %v12554_v31  ;;  %9028 = vmatprep.subr.bf16.mxu0 %v12561_v34  ;;  %v12594_v31 = vcombine.low %v7696_v27, %v7700_v4  ;;  %v12601_v34 = vcombine.high %v7703_v47, %v7707_v51  ;;  %v7613_v27 = vld [vmem:[#allocation27 + $0xb0] sm:$0xff]  ;;  %v7610_v4 = vld [vmem:[#allocation27 + $0x98] sm:$0xff] }
0x1823   : > { %9069 = vmatprep.subr.bf16.mxu1 %v12563_v57  ;;  %v12603_v57 = vcombine.high %v7704_v53, %v7708_v5 }
0x1825   : > { %9029 = vmatpush1.bf16.msra.mxu0 %v12560_v15  ;;  %v12600_v15 = vcombine.low %v7703_v47, %v7707_v51 }
0x1826   : > { %9070 = vmatpush1.bf16.msra.mxu1 %v12562_v17  ;;  %9030 = vmatprep.subr.bf16.mxu0 %v12569_v28  ;;  %v12602_v17 = vcombine.low %v7704_v53, %v7708_v5  ;;  %v12609_v28 = vcombine.high %v7711_v54, %v7715_v7  ;;  %v7617_v53 = vld [vmem:[#allocation27 + $0xd0] sm:$0xff] }
0x1827   : > { %9071 = vmatprep.subr.bf16.mxu1 %v12571_v21  ;;  %v12611_v21 = vcombine.high %v7712_v8, %v7716_v18  ;;  %v7621_v5 = vld [vmem:[#allocation27 + $0xf0] sm:$0xff] }
0x1829   : > { %9031 = vmatpush1.bf16.msra.mxu0 %v12568_v13  ;;  %v12608_v13 = vcombine.low %v7711_v54, %v7715_v7  ;;  %v7618_v54 = vld [vmem:[#allocation27 + $0xd8] sm:$0xff] }
0x182a   : > { %9072 = vmatpush1.bf16.msra.mxu1 %v12570_v62  ;;  %9032 = vmatprep.subr.bf16.mxu0 %v12577_v14  ;;  %v12610_v62 = vcombine.low %v7712_v8, %v7716_v18  ;;  %v12493_v14 = vcombine.high %v7593_v2, %v7597_v23  ;;  %v7622_v7 = vld [vmem:[#allocation27 + $0xf8] sm:$0xff] }
0x182b   : > { %9073 = vmatprep.subr.bf16.mxu1 %v12579_v58  ;;  %v12495_v58 = vcombine.high %v7594_v32, %v7598_v38 }
0x182d   : > { %9033 = vmatpush1.bf16.msra.mxu0 %v12576_v16  ;;  %v7606_v16 = vld [vmem:[#allocation27 + $0x78] sm:$0xff] }
0x182e   : > { %9074 = vmatpush1.bf16.msra.mxu1 %v12578_v39  ;;  %9034 = vmatprep.subr.bf16.mxu0 %v12585_v6  ;;  %v12492_v39 = vcombine.low %v7593_v2, %v7597_v23  ;;  %v12494_v6 = vcombine.low %v7594_v32, %v7598_v38  ;;  %v12503_v63 = vcombine.high %v7602_v37, %v7606_v16  ;;  %v7625_v32 = vld [vmem:[#allocation27 + $0x110] sm:$0xff]  ;;  %v7626_v38 = vld [vmem:[#allocation27 + $0x118] sm:$0xff] }
0x182f   : > { %9075 = vmatprep.subr.bf16.mxu1 %v12587_v61  ;;  %v12501_v61 = vcombine.high %v7601_v48, %v7605_v29  ;;  %v12517_v2 = vcombine.high %v7617_v53, %v7621_v5  ;;  %v12519_v23 = vcombine.high %v7618_v54, %v7622_v7  ;;  %v7637_v48 = vld [vmem:[#allocation27 + $0x170] sm:$0xff]  ;;  %v7634_v29 = vld [vmem:[#allocation27 + $0x158] sm:$0xff] }
0x1831   : > { %9035 = vmatpush1.bf16.msra.mxu0 %v12584_v25  ;;  %v7614_v25 = vld [vmem:[#allocation27 + $0xb8] sm:$0xff] }
0x1832   : > { %9076 = vmatpush1.bf16.msra.mxu1 %v12586_v12  ;;  %9036 = vmatprep.subr.bf16.mxu0 %v12593_v44  ;;  %v12502_v12 = vcombine.low %v7602_v37, %v7606_v16  ;;  %v12509_v44 = vcombine.high %v7609_v24, %v7613_v27  ;;  %v12511_v51 = vcombine.high %v7610_v4, %v7614_v25  ;;  %v7638_v37 = vld [vmem:[#allocation27 + $0x178] sm:$0xff] }
0x1833   : > { %9077 = vmatprep.subr.bf16.mxu1 %v12595_v45 }
0x1835   : > { %9037 = vmatpush1.bf16.msra.mxu0 %v12592_v56 }
0x1836   : > { %9078 = vmatpush1.bf16.msra.mxu1 %v12594_v31  ;;  %9038 = vmatprep.subr.bf16.mxu0 %v12601_v34 }
0x1837   : > { %9079 = vmatprep.subr.bf16.mxu1 %v12603_v57 }
0x1839   : > { %9039 = vmatpush1.bf16.msra.mxu0 %v12600_v15 }
0x183a   : > { %9080 = vmatpush1.bf16.msra.mxu1 %v12602_v17  ;;  %9040 = vmatprep.subr.bf16.mxu0 %v12609_v28 }
0x183b   : > { %9081 = vmatprep.subr.bf16.mxu1 %v12611_v21 }
0x183d   : > { %9041 = vmatpush1.bf16.msra.mxu0 %v12608_v13  ;;  %v12516_v13 = vcombine.low %v7617_v53, %v7621_v5  ;;  %v7654_v53 = vld [vmem:[#allocation27 + $0x1f8] sm:$0xff] }
0x183e   : > { %9082 = vmatpush1.bf16.msra.mxu1 %v12610_v62  ;;  %9092 = vmatprep.subr.bf16.mxu0 %v12493_v14 }
0x183f   : > { %9133 = vmatprep.subr.bf16.mxu1 %v12495_v58  ;;  %v7633_v58 = vld [vmem:[#allocation27 + $0x150] sm:$0xff] }
0x1840   : > { %9043 = vmatmul.mubr.bf16.vlgmr.msra.gmra.mrb[92].mxu0 %v16842_v10 }
0x1841   : > { %9084 = vmatmul.mubr.bf16.vlgmr.msra.gmra.mrb[104].mxu1 %v16842_v10  ;;  %9093 = vmatpush1.bf16.msra.mxu0 %v12492_v39 }
0x1842   : > { %9134 = vmatpush1.bf16.msra.mxu1 %v12494_v6  ;;  %9094 = vmatprep.subr.bf16.mxu0 %v12501_v61  ;;  %v12533_v6 = vcombine.high %v7633_v58, %v7637_v48  ;;  %v12535_v61 = vcombine.high %v7634_v29, %v7638_v37 }
0x1843   : > { %v7216_v45 = vpop.f32.mrb[76].mxu0  ;;  %v7257_v47 = vpop.f32.mrb[88].mxu1  ;;  %9135 = vmatprep.subr.bf16.mxu1 %v12503_v63  ;;  %9124 = vmatprep.mubr.bf16.mxu0 %v16826_v50  ;;  %v7641_v63 = vld [vmem:[#allocation27 + $0x190] sm:$0xff] }
0x1844   : > { %v16848_v56 = vadd.f32 %v7216_v45, %v16816_v55  ;;  %v16851_v31 = vadd.f32 %v7257_v47, %v16818_v26  ;;  %v7218_v34 = vpop.f32.mrb[77].mxu0  ;;  %v7259_v57 = vpop.f32.mrb[89].mxu1  ;;  %9165 = vmatprep.mubr.bf16.mxu1 %v16826_v50  ;;  %v12508_v55 = vcombine.low %v7609_v24, %v7613_v27  ;;  %v12510_v26 = vcombine.low %v7610_v4, %v7614_v25  ;;  %v7629_v50 = vld [vmem:[#allocation27 + $0x130] sm:$0xff]  ;;  %v7642_v27 = vld [vmem:[#allocation27 + $0x198] sm:$0xff] }
0x1845   : > { %v16855_v8 = vadd.f32 %v7218_v34, %v16820_v40  ;;  %v16858_v18 = vadd.f32 %v7259_v57, %v16822_v41  ;;  %9095 = vmatpush1.bf16.msra.mxu0 %v12500_v20  ;;  %v7220_v15 = vpop.f32.mrb[78].mxu0  ;;  %v7261_v17 = vpop.f32.mrb[90].mxu1  ;;  %v7630_v40 = vld [vmem:[#allocation27 + $0x138] sm:$0xff]  ;;  %v12518_v41 = vcombine.low %v7618_v54, %v7622_v7  ;;  %v12525_v62 = vcombine.high %v7625_v32, %v7629_v50  ;;  %v7645_v24 = vld [vmem:[#allocation27 + $0x1b0] sm:$0xff] }
0x1846   : > { %9136 = vmatpush1.bf16.msra.mxu1 %v12502_v12  ;;  %9096 = vmatprep.subr.bf16.mxu0 %v12509_v44  ;;  %v7221_v28 = vpop.f32.mrb[79].mxu0  ;;  %v7262_v21 = vpop.f32.mrb[91].mxu1  ;;  %v12527_v14 = vcombine.high %v7626_v38, %v7630_v40  ;;  %v12524_v16 = vcombine.low %v7625_v32, %v7629_v50  ;;  %v12526_v39 = vcombine.low %v7626_v38, %v7630_v40  ;;  %v7646_v4 = vld [vmem:[#allocation27 + $0x1b8] sm:$0xff]  ;;  %v7649_v45 = vld [vmem:[#allocation27 + $0x1d0] sm:$0xff] }
0x1847   : > { %9137 = vmatprep.subr.bf16.mxu1 %v12511_v51  ;;  %v12532_v25 = vcombine.low %v7633_v58, %v7637_v48  ;;  %v12534_v20 = vcombine.low %v7634_v29, %v7638_v37  ;;  %v12541_v12 = vcombine.high %v7641_v63, %v7645_v24  ;;  %v12543_v44 = vcombine.high %v7642_v27, %v7646_v4  ;;  %v7653_v47 = vld [vmem:[#allocation27 + $0x1f0] sm:$0xff]  ;;  %v7650_v51 = vld [vmem:[#allocation27 + $0x1d8] sm:$0xff] }
0x1848   : > { %v12540_v5 = vcombine.low %v7641_v63, %v7645_v24  ;;  %v12542_v34 = vcombine.low %v7642_v27, %v7646_v4  ;;  %v12549_v57 = vcombine.high %v7649_v45, %v7653_v47  ;;  %v12551_v54 = vcombine.high %v7650_v51, %v7654_v53  ;;  %v7657_v7 = vld [vmem:[#allocation27 + $0x210] sm:$0xff]  ;;  %v7658_v17 = vld [vmem:[#allocation27 + $0x218] sm:$0xff] }
0x1849   : > { %9097 = vmatpush1.bf16.msra.mxu0 %v12508_v55  ;;  %v7661_v15 = vld [vmem:[#allocation27 + $0x230] sm:$0xff]  ;;  %v7662_v55 = vld [vmem:[#allocation27 + $0x238] sm:$0xff]  ;;  %v12550_v28 = vcombine.low %v7650_v51, %v7654_v53 }
0x184a   : > { %9138 = vmatpush1.bf16.msra.mxu1 %v12510_v26  ;;  %9098 = vmatprep.subr.bf16.mxu0 %v12517_v2  ;;  %v12548_v26 = vcombine.low %v7649_v45, %v7653_v47  ;;  %v12557_v21 = vcombine.high %v7657_v7, %v7661_v15  ;;  %v12559_v2 = vcombine.high %v7658_v17, %v7662_v55  ;;  %v7669_v32 = vld [vmem:[#allocation27 + $0x270] sm:$0xff]  ;;  %v7666_v50 = vld [vmem:[#allocation27 + $0x258] sm:$0xff] }
0x184b   : > { %9139 = vmatprep.subr.bf16.mxu1 %v12519_v23  ;;  %v7665_v23 = vld [vmem:[#allocation27 + $0x250] sm:$0xff]  ;;  %v7670_v38 = vld [vmem:[#allocation27 + $0x278] sm:$0xff]  ;;  %v12556_v40 = vcombine.low %v7657_v7, %v7661_v15 }
0x184c   : > { %v7677_v58 = vld [vmem:[#allocation27 + $0x2b0] sm:$0xff]  ;;  %v7674_v48 = vld [vmem:[#allocation27 + $0x298] sm:$0xff]  ;;  %v12564_v37 = vcombine.low %v7665_v23, %v7669_v32 }
0x184d   : > { %9099 = vmatpush1.bf16.msra.mxu0 %v12516_v13  ;;  %v12558_v13 = vcombine.low %v7658_v17, %v7662_v55  ;;  %v7678_v29 = vld [vmem:[#allocation27 + $0x2b8] sm:$0xff]  ;;  %v7685_v63 = vld [vmem:[#allocation27 + $0x2f0] sm:$0xff] }
0x184e   : > { %9140 = vmatpush1.bf16.msra.mxu1 %v12518_v41  ;;  %9100 = vmatprep.subr.bf16.mxu0 %v12525_v62  ;;  %v12565_v41 = vcombine.high %v7665_v23, %v7669_v32  ;;  %v12567_v62 = vcombine.high %v7666_v50, %v7670_v38  ;;  %v7682_v24 = vld [vmem:[#allocation27 + $0x2d8] sm:$0xff]  ;;  %v7689_v47 = vld [vmem:[#allocation27 + $0x310] sm:$0xff] }
0x184f   : > { %9141 = vmatprep.subr.bf16.mxu1 %v12527_v14  ;;  %v7673_v14 = vld [vmem:[#allocation27 + $0x290] sm:$0xff]  ;;  %v7686_v27 = vld [vmem:[#allocation27 + $0x2f8] sm:$0xff] }
0x1850   : > { %v12572_v4 = vcombine.low %v7673_v14, %v7677_v58  ;;  %v12583_v45 = vcombine.high %v7682_v24, %v7686_v27  ;;  %v7693_v51 = vld [vmem:[#allocation27 + $0x330] sm:$0xff]  ;;  %v12582_v15 = vcombine.low %v7682_v24, %v7686_v27  ;;  %v7698_v23 = vld [vmem:[#allocation27 + $0x358] sm:$0xff] }
0x1851   : > { %9101 = vmatpush1.bf16.msra.mxu0 %v12524_v16  ;;  %v12566_v16 = vcombine.low %v7666_v50, %v7670_v38  ;;  %v12589_v17 = vcombine.high %v7689_v47, %v7693_v51  ;;  %v7702_v32 = vld [vmem:[#allocation27 + $0x378] sm:$0xff]  ;;  %v12588_v38 = vcombine.low %v7689_v47, %v7693_v51 }
0x1852   : > { %9142 = vmatpush1.bf16.msra.mxu1 %v12526_v39  ;;  %9102 = vmatprep.subr.bf16.mxu0 %v12533_v6  ;;  %v12573_v39 = vcombine.high %v7673_v14, %v7677_v58  ;;  %v12575_v6 = vcombine.high %v7674_v48, %v7678_v29  ;;  %v7705_v14 = vld [vmem:[#allocation27 + $0x390] sm:$0xff]  ;;  %v7714_v24 = vld [vmem:[#allocation27 + $0x3d8] sm:$0xff] }
0x1853   : > { %9143 = vmatprep.subr.bf16.mxu1 %v12535_v61  ;;  %v7681_v61 = vld [vmem:[#allocation27 + $0x2d0] sm:$0xff]  ;;  %v7718_v27 = vld [vmem:[#allocation27 + $0x3f8] sm:$0xff] }
0x1854   : > { %v7709_v58 = vld [vmem:[#allocation27 + $0x3b0] sm:$0xff]  ;;  %v12614_v47 = vcombine.low %v7714_v24, %v7718_v27 }
0x1855   : > { %9103 = vmatpush1.bf16.msra.mxu0 %v12532_v25  ;;  %v12574_v25 = vcombine.low %v7674_v48, %v7678_v29  ;;  %v7706_v29 = vld [vmem:[#allocation27 + $0x398] sm:$0xff] }
0x1856   : > { %9144 = vmatpush1.bf16.msra.mxu1 %v12534_v20  ;;  %9104 = vmatprep.subr.bf16.mxu0 %v12541_v12  ;;  %v12581_v20 = vcombine.high %v7681_v61, %v7685_v63  ;;  %v16860_v12 = vld [vmem:[#allocation25] sm:$0xff] }
0x1857   : > { %9145 = vmatprep.subr.bf16.mxu1 %v12543_v44  ;;  %v7349_v44 = vrot.slane %v16860_v12, %v16344_v46  ;;  %v7357_v53 = vrot.slane %v16860_v12, %v16507_v49  ;;  %v7361_v7 = vrot.slane %v16860_v12, %v16502_v42 }
0x1859   : > { %9105 = vmatpush1.bf16.msra.mxu0 %v12540_v5  ;;  %v7690_v5 = vld [vmem:[#allocation27 + $0x318] sm:$0xff]  ;;  %v7386_v55 = vadd.f32 %v7349_v44, %v16848_v56  ;;  %v12599_v56 = vcombine.high %v7698_v23, %v7702_v32  ;;  %v12615_v44 = vcombine.high %v7714_v24, %v7718_v27 }
0x185a   : > { %9146 = vmatpush1.bf16.msra.mxu1 %v12542_v34  ;;  %9106 = vmatprep.subr.bf16.mxu0 %v12549_v57  ;;  %v7694_v34 = vld [vmem:[#allocation27 + $0x338] sm:$0xff]  ;;  %v7353_v57 = vrot.slane %v16860_v12, %v16496_v9 }
0x185b   : > { %9147 = vmatprep.subr.bf16.mxu1 %v12551_v54  ;;  %v12580_v54 = vcombine.low %v7681_v61, %v7685_v63  ;;  %v7713_v61 = vld [vmem:[#allocation27 + $0x3d0] sm:$0xff] }
0x185c   : > { %v7387_v50 = vadd.f32 %v7353_v57, %v16855_v8  ;;  %v7717_v63 = vld [vmem:[#allocation27 + $0x3f0] sm:$0xff] }
0x185d   : > { %9107 = vmatpush1.bf16.msra.mxu0 %v12548_v26  ;;  %v12591_v26 = vcombine.high %v7690_v5, %v7694_v34 }
0x185e   : > { %9148 = vmatpush1.bf16.msra.mxu1 %v12550_v28  ;;  %9108 = vmatprep.subr.bf16.mxu0 %v12557_v21  ;;  %v7697_v28 = vld [vmem:[#allocation27 + $0x350] sm:$0xff] }
0x185f   : > { %9149 = vmatprep.subr.bf16.mxu1 %v12559_v2  ;;  %v7701_v21 = vld [vmem:[#allocation27 + $0x370] sm:$0xff]  ;;  %v7388_v2 = vadd.f32 %v7357_v53, %v16851_v31  ;;  %v7710_v31 = vld [vmem:[#allocation27 + $0x3b8] sm:$0xff] }
0x1861   : > { %9109 = vmatpush1.bf16.msra.mxu0 %v12556_v40  ;;  %v7389_v40 = vadd.f32 %v7361_v7, %v16858_v18  ;;  %v12397_v48 = vmul.f32 -1.442695, %v7388_v2  ;;  %v12605_v18 = vcombine.high %v7705_v14, %v7709_v58  ;;  %v7376_v7 = vsub.s32 7, %v16122_v52 }
0x1862   : > { %9150 = vmatpush1.bf16.msra.mxu1 %v12558_v13  ;;  %9110 = vmatprep.subr.bf16.mxu0 %v12565_v41  ;;  %v12590_v13 = vcombine.low %v7690_v5, %v7694_v34  ;;  %v12597_v41 = vcombine.high %v7697_v28, %v7701_v21  ;;  %v7364_v5 = vsub.s32 4, %v16122_v52  ;;  %v7372_v34 = vsub.s32 6, %v16122_v52 }
0x1863   : > { %9151 = vmatprep.subr.bf16.mxu1 %v12567_v62  ;;  %v12395_v62 = vmul.f32 -1.442695, %v7386_v55  ;;  %v12398_v8 = vmul.f32 -1.442695, %v7389_v40 }
0x1865   : > { %9111 = vmatpush1.bf16.msra.mxu0 %v12564_v37  ;;  %v12396_v37 = vmul.f32 -1.442695, %v7387_v50  ;;  %14366 = vpow2.f32 %v12395_v62 }
0x1866   : > { %9152 = vmatpush1.bf16.msra.mxu1 %v12566_v16  ;;  %9112 = vmatprep.subr.bf16.mxu0 %v12573_v39  ;;  %v12596_v16 = vcombine.low %v7697_v28, %v7701_v21  ;;  %v12598_v39 = vcombine.low %v7698_v23, %v7702_v32  ;;  %14368 = vpow2.f32 %v12397_v48  ;;  %v7365_v28 = vrot.slane %v16860_v12, %v7364_v5 }
0x1867   : > { %9153 = vmatprep.subr.bf16.mxu1 %v12575_v6  ;;  %v12607_v6 = vcombine.high %v7706_v29, %v7710_v31  ;;  %14370 = vpow2.f32 %v12396_v37  ;;  %v7373_v21 = vrot.slane %v16860_v12, %v7372_v34 }
0x1868   : > { %14372 = vpow2.f32 %v12398_v8 }
0x1869   : > { %9113 = vmatpush1.bf16.msra.mxu0 %v12572_v4  ;;  %v12604_v4 = vcombine.low %v7705_v14, %v7709_v58 }
0x186a   : > { %9154 = vmatpush1.bf16.msra.mxu1 %v12574_v25  ;;  %9114 = vmatprep.subr.bf16.mxu0 %v12581_v20  ;;  %v12606_v25 = vcombine.low %v7706_v29, %v7710_v31  ;;  %v12613_v20 = vcombine.high %v7713_v61, %v7717_v63 }
0x186b   : > { %9155 = vmatprep.subr.bf16.mxu1 %v12583_v45  ;;  %v12612_v45 = vcombine.low %v7713_v61, %v7717_v63 }
0x186d   : > { %9115 = vmatpush1.bf16.msra.mxu0 %v12580_v54  ;;  %v7368_v54 = vsub.s32 5, %v16122_v52 }
0x186e   : > { %9156 = vmatpush1.bf16.msra.mxu1 %v12582_v15  ;;  %9116 = vmatprep.subr.bf16.mxu0 %v12589_v17 }
0x186f   : > { %9157 = vmatprep.subr.bf16.mxu1 %v12591_v26  ;;  %v14367_v51 = vpop.eup %14366  ;;  %v7369_v50 = vrot.slane %v16860_v12, %v7368_v54 }
0x1870   : > { %v14369_v53 = vpop.eup %14368  ;;  %v7400_v17 = vadd.f32 1.0, %v14367_v51 }
0x1871   : > { %9117 = vmatpush1.bf16.msra.mxu0 %v12588_v38  ;;  %v14371_v57 = vpop.eup %14370  ;;  %v7412_v55 = vadd.f32 1.0, %v14369_v53 }
0x1872   : > { %9158 = vmatpush1.bf16.msra.mxu1 %v12590_v13  ;;  %9118 = vmatprep.subr.bf16.mxu0 %v12597_v41  ;;  %v14373_v15 = vpop.eup %14372  ;;  %v7401_v26 = vadd.f32 1.0, %v14371_v57  ;;  %14374 = vrcp.f32 %v7400_v17 }
0x1873   : > { %9159 = vmatprep.subr.bf16.mxu1 %v12599_v56  ;;  %v7413_v2 = vadd.f32 1.0, %v14373_v15  ;;  %14376 = vrcp.f32 %v7412_v55 }
0x1874   : > { %14378 = vrcp.f32 %v7401_v26 }
0x1875   : > { %9119 = vmatpush1.bf16.msra.mxu0 %v12596_v16  ;;  %14380 = vrcp.f32 %v7413_v2 }
0x1876   : > { %9160 = vmatpush1.bf16.msra.mxu1 %v12598_v39  ;;  %9120 = vmatprep.subr.bf16.mxu0 %v12605_v18  ;;  %v7440_v18 = vrot.slane %v16589_v36, %v16496_v9 }
0x1877   : > { %9161 = vmatprep.subr.bf16.mxu1 %v12607_v6 }
0x1879   : > { %9121 = vmatpush1.bf16.msra.mxu0 %v12604_v4 }
0x187a   : > { %9162 = vmatpush1.bf16.msra.mxu1 %v12606_v25  ;;  %9122 = vmatprep.subr.bf16.mxu0 %v12613_v20 }
0x187b   : > { %9163 = vmatprep.subr.bf16.mxu1 %v12615_v44 }
0x187c   : > { %v14375_v8 = vpop.eup %14374 }
0x187d   : > { %9123 = vmatpush1.bf16.msra.mxu0 %v12612_v45 }
0x187e   : > { %9164 = vmatpush1.bf16.msra.mxu1 %v12614_v47 }
0x187f   : > { %9644 = vmatprep.subr.bf16.mxu1 %v15373_v0 }
0x1880   : > { %9125 = vmatmul.mubr.bf16.vlgmr.msra.gmra.mrb[96].mxu0 %v16842_v10 }
0x1881   : > { %9166 = vmatmul.mubr.bf16.vlgmr.msra.gmra.mrb[108].mxu1 %v16842_v10  ;;  %v7377_v10 = vrot.slane %v16860_v12, %v7376_v7 }
0x1883   : > { %v7298_v23 = vpop.f32.mrb[80].mxu0  ;;  %v7339_v32 = vpop.f32.mrb[92].mxu1 }
0x1884   : > { %v7299_v38 = vadd.f32 %v7298_v23, %v16830_v30  ;;  %v7340_v40 = vadd.f32 %v7339_v32, %v16832_v33  ;;  %v7300_v13 = vpop.f32.mrb[81].mxu0  ;;  %v7341_v41 = vpop.f32.mrb[93].mxu1 }
0x1885   : > { %v7301_v62 = vadd.f32 %v7300_v13, %v16835_v3  ;;  %v7342_v56 = vadd.f32 %v7341_v41, %v16837_v43  ;;  %v7302_v14 = vpop.f32.mrb[82].mxu0  ;;  %v7343_v58 = vpop.f32.mrb[94].mxu1  ;;  %v7436_v43 = vrot.slane %v16589_v36, %v16344_v46 }
0x1886   : > { %v7390_v48 = vadd.f32 %v7365_v28, %v7299_v38  ;;  %v7392_v29 = vadd.f32 %v7373_v21, %v7340_v40  ;;  %v7303_v31 = vpop.f32.mrb[83].mxu0  ;;  %v7344_v37 = vpop.f32.mrb[95].mxu1 }
0x1887   : > { %v7391_v12 = vadd.f32 %v7369_v50, %v7301_v62  ;;  %v7393_v16 = vadd.f32 %v7377_v10, %v7342_v56  ;;  %v14377_v3 = vpop.eup %14376  ;;  %v13935_v31 = vld [vmem:[#allocation33 + $0x8] ss:$12 sps:$4 sm:$0xff]   ;;  %v13936_v37 = vld [vmem:[#allocation33 + $0x18] ss:$12 sps:$4 sm:$0xff]  }
0x1888   : > { %14382 = vtanh.f32 %v7390_v48  ;;  %v12399_v30 = vmul.f32 -1.442695, %v7392_v29  ;;  %v14379_v39 = vpop.eup %14378  ;;  %v7443_v24 = vmul.f32 %v14377_v3, %v7436_v43  ;;  %v13934_v48 = vld [vmem:[#allocation33 + $0x4] ss:$12 sps:$4 sm:$0xff]   ;;  %v13932_v29 = vld [vmem:[#allocation33] ss:$12 sps:$4 sm:$0xff]   ;;  %9645 = vmatpush1.bf16.msra.mxu1 %v13935_v31 }
0x1889   : > { %14384 = vtanh.f32 %v7391_v12  ;;  %v12400_v33 = vmul.f32 -1.442695, %v7393_v16  ;;  %v14381_v6 = vpop.eup %14380  ;;  %9603 = vmatprep.subr.bf16.mxu0 %v13934_v48  ;;  %v13938_v12 = vld [vmem:[#allocation33 + $0x1c] ss:$12 sps:$4 sm:$0xff]   ;;  %v13939_v16 = vld [vmem:[#allocation33 + $0x20] ss:$12 sps:$4 sm:$0xff]   ;;  %9646 = vmatprep.subr.bf16.mxu1 %v15373_v0 }
0x188a   : > { %14386 = vpow2.f32 %v12399_v30  ;;  %v7444_v25 = vmul.f32 %v14381_v6, %v7440_v18  ;;  %9604 = vmatpush1.bf16.msra.mxu0 %v13932_v29  ;;  %v13942_v30 = vld [vmem:[#allocation33 + $0x34] ss:$12 sps:$4 sm:$0xff]   ;;  %v13943_v3 = vld [vmem:[#allocation33 + $0x38] ss:$12 sps:$4 sm:$0xff]  }
0x188b   : > { %14388 = vpow2.f32 %v12400_v33  ;;  %9605 = vmatprep.subr.bf16.mxu0 %v13938_v12  ;;  %v13940_v33 = vld [vmem:[#allocation33 + $0x30] ss:$12 sps:$4 sm:$0xff]  }
0x188c   : > { %9647 = vmatpush1.bf16.msra.mxu1 %v13939_v16 }
0x188d   : > { %9648 = vmatprep.subr.bf16.mxu1 %v15373_v0 }
0x188e   : > { %9606 = vmatpush1.bf16.msra.mxu0 %v13936_v37 }
0x188f   : > { %9607 = vmatprep.subr.bf16.mxu0 %v13942_v30 }
0x1890   : > { %9649 = vmatpush1.bf16.msra.mxu1 %v13943_v3 }
0x1891   : > { %9650 = vmatprep.subr.bf16.mxu1 %v15373_v0 }
0x1892   : > { %v14383_v61 = vpop.eup %14382  ;;  %9608 = vmatpush1.bf16.msra.mxu0 %v13940_v33 }
0x1893   : > { %v14385_v63 = vpop.eup %14384  ;;  %v7445_v27 = vmul.f32 %v14383_v61, %v14375_v8 }
0x1894   : > { %v14387_v4 = vpop.eup %14386  ;;  %v7446_v20 = vmul.f32 %v14385_v63, %v14379_v39 }
0x1895   : > { %v14389_v44 = vpop.eup %14388  ;;  %v7447_v45 = vadd.f32 %v7445_v27, %v7443_v24  ;;  %v7426_v47 = vadd.f32 1.0, %v14387_v4  ;;  %v13946_v24 = vld [vmem:[#allocation33 + $0x4c] ss:$12 sps:$4 sm:$0xff]   ;;  %v13944_v4 = vld [vmem:[#allocation33 + $0x48] ss:$12 sps:$4 sm:$0xff]  }
0x1896   : > { %v7448_v51 = vadd.f32 %v7446_v20, %v7444_v25  ;;  %v7427_v53 = vadd.f32 1.0, %v14389_v44  ;;  %v13947_v25 = vld [vmem:[#allocation33 + $0x50] ss:$12 sps:$4 sm:$0xff]   ;;  %9609 = vmatprep.subr.bf16.mxu0 %v13946_v24  ;;  %v13948_v44 = vld [vmem:[#allocation33 + $0x60] ss:$12 sps:$4 sm:$0xff]  }
0x1897   : > { %14390 = vtanh.f32 %v7447_v45  ;;  %9610 = vmatpush1.bf16.msra.mxu0 %v13944_v4  ;;  %9651 = vmatpush1.bf16.msra.mxu1 %v13947_v25  ;;  %v13950_v20 = vld [vmem:[#allocation33 + $0x64] ss:$12 sps:$4 sm:$0xff]   ;;  %v13951_v45 = vld [vmem:[#allocation33 + $0x68] ss:$12 sps:$4 sm:$0xff]  }
0x1898   : > { %14392 = vrcp.f32 %v7426_v47  ;;  %9652 = vmatprep.subr.bf16.mxu1 %v15373_v0  ;;  %9611 = vmatprep.subr.bf16.mxu0 %v13950_v20  ;;  %v13954_v47 = vld [vmem:[#allocation33 + $0x7c] ss:$12 sps:$4 sm:$0xff]  }
0x1899   : > { %14394 = vtanh.f32 %v7448_v51  ;;  %v13952_v51 = vld [vmem:[#allocation33 + $0x78] ss:$12 sps:$4 sm:$0xff]  }
0x189a   : > { %14396 = vrcp.f32 %v7427_v53  ;;  %v13955_v53 = vld [vmem:[#allocation33 + $0x80] ss:$12 sps:$4 sm:$0xff]  }
0x189b   : > { %9612 = vmatpush1.bf16.msra.mxu0 %v13948_v44  ;;  %9653 = vmatpush1.bf16.msra.mxu1 %v13951_v45 }
0x189c   : > { %9654 = vmatprep.subr.bf16.mxu1 %v15373_v0  ;;  %9613 = vmatprep.subr.bf16.mxu0 %v13954_v47 }
0x189f   : > { %9614 = vmatpush1.bf16.msra.mxu0 %v13952_v51  ;;  %9655 = vmatpush1.bf16.msra.mxu1 %v13955_v53 }
0x18a0   : > { %9656 = vmatprep.subr.bf16.mxu1 %v15373_v0 }
0x18a1   : > { %v14391_v57 = vpop.eup %14390 }
0x18a2   : > { %v14393_v15 = vpop.eup %14392 }
0x18a3   : > { %v14395_v36 = vpop.eup %14394  ;;  %v16901_v17 = vmul.f32 %v14393_v15, %v14391_v57  ;;  %v13958_v57 = vld [vmem:[#allocation33 + $0x94] ss:$12 sps:$4 sm:$0xff]   ;;  %v13956_v15 = vld [vmem:[#allocation33 + $0x90] ss:$12 sps:$4 sm:$0xff]  }
0x18a4   : > { %v14397_v55 = vpop.eup %14396  ;;  %9615 = vmatprep.subr.bf16.mxu0 %v13958_v57 }
0x18a5   : > { %v16903_v26 = vmul.f32 %v14397_v55, %v14395_v36  ;;  %v7456_v28 = vrot.slane %v16901_v17, %v16344_v46  ;;  %v13959_v36 = vld [vmem:[#allocation33 + $0x98] ss:$12 sps:$4 sm:$0xff]   ;;  %9616 = vmatpush1.bf16.msra.mxu0 %v13956_v15 }
0x18a6   : > { %9657 = vmatpush1.bf16.msra.mxu1 %v13959_v36  ;;  %v13962_v55 = vld [vmem:[#allocation33 + $0xac] ss:$12 sps:$4 sm:$0xff]  }
0x18a7   : > { %v7460_v21 = vrot.slane %v16903_v26, %v16344_v46  ;;  %v7461_v2 = vmul.f32 %v7456_v28, %v16613_v60  ;;  %9658 = vmatprep.subr.bf16.mxu1 %v15373_v0  ;;  %v13960_v28 = vld [vmem:[#allocation33 + $0xa8] ss:$12 sps:$4 sm:$0xff]   ;;  %9617 = vmatprep.subr.bf16.mxu0 %v13962_v55 }
0x18a9   : > { %v7462_v23 = vmul.f32 %v7460_v21, %v16602_v59  ;;  %v7463_v32 = vsel %vm4031_vm5, %v7461_v2, 0.0  ;;  %v13963_v21 = vld [vmem:[#allocation33 + $0xb0] ss:$12 sps:$4 sm:$0xff]   ;;  %9618 = vmatpush1.bf16.msra.mxu0 %v13960_v28  ;;  %v13964_v2 = vld [vmem:[#allocation33 + $0xc0] ss:$12 sps:$4 sm:$0xff]  }
0x18aa   : > { %9659 = vmatpush1.bf16.msra.mxu1 %v13963_v21 }
0x18ab   : > { %v16912_v50 = vpop.f32.mrb[84].mxu0  ;;  %v7464_v10 = vsel %vm5721_vm7, %v7462_v23, 0.0  ;;  %v13966_v23 = vld [vmem:[#allocation33 + $0xc4] ss:$12 sps:$4 sm:$0xff]   ;;  %9660 = vmatprep.subr.bf16.mxu1 %v15373_v0 }
0x18ac   : > { %v16915_v38 = vpop.f32.mrb[96].mxu1  ;;  %v16917_v40 = vpop.f32.mrb[85].mxu0  ;;  %v7465_v13 = vadd.f32 %v7464_v10, %v7463_v32  ;;  %v13967_v32 = vld [vmem:[#allocation33 + $0xc8] ss:$12 sps:$4 sm:$0xff]   ;;  %9619 = vmatprep.subr.bf16.mxu0 %v13966_v23 }
0x18ad   : > { %v16919_v41 = vpop.f32.mrb[97].mxu1  ;;  %v8244_v62 = vpop.f32.mrb[86].mxu0  ;;  %v13970_v10 = vld [vmem:[#allocation33 + $0xdc] ss:$12 sps:$4 sm:$0xff]   ;;  %9620 = vmatpush1.bf16.msra.mxu0 %v13964_v2 }
0x18ae   : > { %7466 = vadd.xlane.f32.xlu1 %v7465_v13  ;;  %v8285_v56 = vpop.f32.mrb[98].mxu1  ;;  %v8245_v14 = vpop.f32.mrb[87].mxu0  ;;  %9661 = vmatpush1.bf16.msra.mxu1 %v13967_v32  ;;  %v13968_v13 = vld [vmem:[#allocation33 + $0xd8] ss:$12 sps:$4 sm:$0xff]   ;;  %v13971_v62 = vld [vmem:[#allocation33 + $0xe0] ss:$12 sps:$4 sm:$0xff]  }
0x18af   : > { %v8286_v58 = vpop.f32.mrb[99].mxu1  ;;  %9621 = vmatprep.subr.bf16.mxu0 %v13970_v10  ;;  %9662 = vmatprep.subr.bf16.mxu1 %v15373_v0  ;;  %v13974_v56 = vld [vmem:[#allocation31 + $0x4] ss:$12 sps:$4 sm:$0xff]   ;;  %v13975_v14 = vld [vmem:[#allocation31 + $0xc8] ss:$12 sps:$4 sm:$0xff]  }
0x18b1   : > { %9622 = vmatpush1.bf16.msra.mxu0 %v13968_v13 }
0x18b2   : > { %9663 = vmatpush1.bf16.msra.mxu1 %v13971_v62  ;;  %9940 = vmatprep.subr.bf16.mxu0 %v13974_v56 }
0x18b3   : > { %12940 = vmatprep.subr.bf16.mxu1 %v13975_v14 }
0x18d3   : > { %v16923_v8 = vpop.f32.mrb[88].mxu0 }
0x18d4   : > { %v16925_v43 = vpop.f32.mrb[100].mxu1  ;;  %v16927_v39 = vpop.f32.mrb[89].mxu0 }
0x18d5   : > { %v16929_v18 = vpop.f32.mrb[101].mxu1  ;;  %v8326_v6 = vpop.f32.mrb[90].mxu0 }
0x18d6   : > { %v8367_v61 = vpop.f32.mrb[102].mxu1  ;;  %v8327_v63 = vpop.f32.mrb[91].mxu0 }
0x18d7   : > { %v8368_v27 = vpop.f32.mrb[103].mxu1  ;;  %v14442_v63 = vld [vmem:[#allocation30] sm:$0xff] }
0x18d8   : > { %v9177_v24 = vrot.slane %v14442_v63, %v16344_v46  ;;  %v9185_v27 = vrot.slane %v14442_v63, %v16507_v49  ;;  %v9189_v4 = vrot.slane %v14442_v63, %v16502_v42 }
0x1913   : > { %v9044_v58 = vpop.f32.mrb[92].mxu0 }
0x1914   : > { %v9045_v48 = vadd.f32 %v9044_v58, %v16912_v50  ;;  %v9085_v29 = vpop.f32.mrb[104].mxu1  ;;  %v9046_v31 = vpop.f32.mrb[93].mxu0  ;;  %v9181_v50 = vrot.slane %v14442_v63, %v16496_v9  ;;  %v9193_v58 = vrot.slane %v14442_v63, %v7364_v5 }
0x1915   : > { %v9086_v37 = vadd.f32 %v9085_v29, %v16915_v38  ;;  %v9047_v12 = vadd.f32 %v9046_v31, %v16917_v40  ;;  %v9087_v16 = vpop.f32.mrb[105].mxu1  ;;  %v9048_v30 = vpop.f32.mrb[94].mxu0  ;;  %v9201_v31 = vrot.slane %v14442_v63, %v7372_v34 }
0x1916   : > { %v9088_v33 = vadd.f32 %v9087_v16, %v16919_v41  ;;  %v9089_v3 = vpop.f32.mrb[106].mxu1  ;;  %v9049_v6 = vpop.f32.mrb[95].mxu0  ;;  %v9214_v25 = vadd.f32 %v9177_v24, %v9045_v48 }
0x1917   : > { %v9090_v61 = vpop.f32.mrb[107].mxu1  ;;  %v9216_v20 = vadd.f32 %v9185_v27, %v9086_v37  ;;  %v9215_v44 = vadd.f32 %v9181_v50, %v9047_v12  ;;  %v9197_v37 = vrot.slane %v14442_v63, %v7368_v54 }
0x1918   : > { %v9217_v41 = vadd.f32 %v9189_v4, %v9088_v33  ;;  %v12616_v47 = vmul.f32 -1.442695, %v9214_v25  ;;  %v9205_v33 = vrot.slane %v14442_v63, %v7376_v7 }
0x1919   : > { %v12618_v53 = vmul.f32 -1.442695, %v9216_v20  ;;  %v12617_v57 = vmul.f32 -1.442695, %v9215_v44 }
0x191a   : > { %v12619_v36 = vmul.f32 -1.442695, %v9217_v41  ;;  %14398 = vpow2.f32 %v12616_v47 }
0x191b   : > { %14400 = vpow2.f32 %v12618_v53 }
0x191c   : > { %14402 = vpow2.f32 %v12617_v57 }
0x191d   : > { %14404 = vpow2.f32 %v12619_v36 }
0x1924   : > { %v14399_v23 = vpop.eup %14398 }
0x1925   : > { %v14401_v32 = vpop.eup %14400  ;;  %v9228_v62 = vadd.f32 1.0, %v14399_v23 }
0x1926   : > { %v14403_v10 = vpop.eup %14402  ;;  %v9240_v56 = vadd.f32 1.0, %v14401_v32 }
0x1927   : > { %v14405_v13 = vpop.eup %14404  ;;  %v9229_v14 = vadd.f32 1.0, %v14403_v10 }
0x1928   : > { %v9241_v48 = vadd.f32 1.0, %v14405_v13 }
0x193b   : > { %v7467_v38 = vpop.xlane.xlu1 %7466 }
0x193c   : > { %v7468_v40 = vsel %vm4031_vm5, %v7467_v38, -inf }
0x193d   : > { %v7469_v45 = vrot.slane %v7468_v40, 4 }
0x193f   : > { %v7470_v51 = vmax.f32 %v7468_v40, %v7469_v45 }
0x1941   : > { %v7471_v15 = vrot.slane %v7470_v51, 2 }
0x1943   : > { %v7472_v55 = vmax.f32 %v7470_v51, %v7471_v15  ;;  %v9264_v15 = vrot.slane %v16679_v11, %v16344_v46 }
0x1945   : > { %v7473_v28 = vrot.slane %v7472_v55, 1 }
0x1947   : > { %v7474_v42 = vmax.f32 %v7472_v55, %v7473_v28  ;;  %v9268_v55 = vrot.slane %v16679_v11, %v16496_v9 }
0x1949   : > { %v7475_v21 = vsub.f32 %v7467_v38, %v7474_v42 }
0x194b   : > { %v7476_v2 = vmul.f32 1.442695, %v7475_v21 }
0x194d   : > { %14406 = vpow2.f32 %v7476_v2 }
0x194e   : > { %14408 = vrcp.f32 %v9228_v62 }
0x194f   : > { %14410 = vrcp.f32 %v9240_v56 }
0x1950   : > { %14412 = vrcp.f32 %v9229_v14 }
0x1951   : > { %14414 = vrcp.f32 %v9241_v48 }
0x1953   : > { %v9126_v29 = vpop.f32.mrb[96].mxu0 }
0x1954   : > { %v9127_v12 = vadd.f32 %v9126_v29, %v16923_v8  ;;  %v9167_v16 = vpop.f32.mrb[108].mxu1  ;;  %v9128_v30 = vpop.f32.mrb[97].mxu0 }
0x1955   : > { %v9168_v3 = vadd.f32 %v9167_v16, %v16925_v43  ;;  %v9129_v5 = vadd.f32 %v9128_v30, %v16927_v39  ;;  %v9169_v6 = vpop.f32.mrb[109].mxu1  ;;  %v9130_v61 = vpop.f32.mrb[98].mxu0 }
0x1956   : > { %v9218_v34 = vadd.f32 %v9193_v58, %v9127_v12  ;;  %v9170_v24 = vadd.f32 %v9169_v6, %v16929_v18  ;;  %v9171_v54 = vpop.f32.mrb[110].mxu1  ;;  %v9131_v27 = vpop.f32.mrb[99].mxu0 }
0x1957   : > { %v14407_v50 = vpop.eup %14406  ;;  %v9220_v8 = vadd.f32 %v9201_v31, %v9168_v3  ;;  %v9219_v4 = vadd.f32 %v9197_v37, %v9129_v5  ;;  %v9172_v25 = vpop.f32.mrb[111].mxu1 }
0x1958   : > { %14416 = vtanh.f32 %v9218_v34  ;;  %v9221_v52 = vadd.f32 %v9205_v33, %v9170_v24  ;;  %v7478_v7 = vsel %vm4031_vm5, %v14407_v50, 0.0  ;;  %v7486_v43 = vmul.f32 %v14407_v50, %v16602_v59  ;;  %v14409_v51 = vpop.eup %14408 }
0x1959   : > { %v12620_v39 = vmul.f32 -1.442695, %v9220_v8  ;;  %14418 = vtanh.f32 %v9219_v4  ;;  %v7479_v63 = vrot.slane %v7478_v7, 4  ;;  %v7485_v38 = vmul.f32 %v14407_v50, %v16613_v60  ;;  %v14411_v59 = vpop.eup %14410  ;;  %v13972_v50 = vld [vmem:[#allocation31] ss:$12 sps:$4 sm:$0xff]  }
0x195a   : > { %v12621_v20 = vmul.f32 -1.442695, %v9221_v52  ;;  %v7494_v18 = vsel %vm5721_vm7, %v7486_v43, 0.0  ;;  %v14413_v60 = vpop.eup %14412  ;;  %v9271_v10 = vmul.f32 %v14411_v59, %v9264_v15  ;;  %v13976_v4 = vld [vmem:[#allocation31 + $0x8] ss:$12 sps:$4 sm:$0xff]  }
0x195b   : > { %14420 = vpow2.f32 %v12620_v39  ;;  %v7480_v40 = vadd.f32 %v7479_v63, %v7478_v7  ;;  %v7495_v44 = vrot.slane %v7494_v18, 4  ;;  %v7487_v45 = vsel %vm4031_vm5, %v7485_v38, 0.0  ;;  %v14415_v28 = vpop.eup %14414  ;;  %v13979_v43 = vld [vmem:[#allocation31 + $0x1c] ss:$12 sps:$4 sm:$0xff]   ;;  %v13980_v39 = vld [vmem:[#allocation31 + $0xe0] ss:$12 sps:$4 sm:$0xff]  }
0x195c   : > { %14422 = vpow2.f32 %v12621_v20  ;;  %v7488_v41 = vrot.slane %v7487_v45, 4  ;;  %v9272_v56 = vmul.f32 %v14415_v28, %v9268_v55  ;;  %v9397_v63 = vpack.c.bf16 %v16903_v26, %v16903_v26  ;;  %v13989_v15 = vld [vmem:[#allocation31 + $0x4c] ss:$12 sps:$4 sm:$0xff]   ;;  %v13987_v55 = vld [vmem:[#allocation31 + $0x48] ss:$12 sps:$4 sm:$0xff]  }
0x195d   : > { %v7481_v47 = vrot.slane %v7480_v40, 2  ;;  %v7496_v53 = vadd.f32 %v7495_v44, %v7494_v18  ;;  %v13977_v18 = vld [vmem:[#allocation31 + $0x18] ss:$12 sps:$4 sm:$0xff]   ;;  %v13984_v44 = vld [vmem:[#allocation31 + $0x34] ss:$12 sps:$4 sm:$0xff]  }
0x195e   : > { %v7489_v57 = vadd.f32 %v7488_v41, %v7487_v45  ;;  %v13985_v45 = vld [vmem:[#allocation31 + $0xf8] ss:$12 sps:$4 sm:$0xff]   ;;  %v13991_v28 = vld [vmem:[#allocation31 + $0x50] ss:$12 sps:$4 sm:$0xff]  }
0x195f   : > { %v7482_v36 = vadd.f32 %v7481_v47, %v7480_v40  ;;  %v7497_v2 = vrot.slane %v7496_v53, 2  ;;  %v13981_v40 = vld [vmem:[#allocation31 + $0x20] ss:$12 sps:$4 sm:$0xff]  }
0x1960   : > { %v7490_v23 = vrot.slane %v7489_v57, 2 }
0x1961   : > { %v7483_v42 = vrot.slane %v7482_v36, 1  ;;  %v7498_v12 = vadd.f32 %v7497_v2, %v7496_v53  ;;  %v13982_v53 = vld [vmem:[#allocation31 + $0x30] ss:$12 sps:$4 sm:$0xff]   ;;  %v13992_v2 = vld [vmem:[#allocation31 + $0x60] ss:$12 sps:$4 sm:$0xff]  }
0x1962   : > { %v14417_v21 = vpop.eup %14416  ;;  %v7491_v16 = vadd.f32 %v7490_v23, %v7489_v57  ;;  %v13986_v57 = vld [vmem:[#allocation31 + $0x38] ss:$12 sps:$4 sm:$0xff]   ;;  %v13996_v23 = vld [vmem:[#allocation31 + $0x68] ss:$12 sps:$4 sm:$0xff]  }
0x1963   : > { %v14419_v32 = vpop.eup %14418  ;;  %v9273_v13 = vmul.f32 %v14417_v21, %v14409_v51  ;;  %v7484_v62 = vadd.f32 %v7483_v42, %v7482_v36  ;;  %v7499_v30 = vrot.slane %v7498_v12, 1  ;;  %v13994_v42 = vld [vmem:[#allocation31 + $0x64] ss:$12 sps:$4 sm:$0xff]   ;;  %v13995_v21 = vld [vmem:[#allocation31 + $0x128] ss:$12 sps:$4 sm:$0xff]  }
0x1964   : > { %v9274_v14 = vmul.f32 %v14419_v32, %v14413_v60  ;;  %v7492_v33 = vrot.slane %v7491_v16, 1  ;;  %v13990_v60 = vld [vmem:[#allocation31 + $0x110] ss:$12 sps:$4 sm:$0xff]  }
0x1965   : > { %v14421_v58 = vpop.eup %14420  ;;  %v9275_v48 = vadd.f32 %v9273_v13, %v9271_v10  ;;  %14424 = vrcp.f32 %v7484_v62  ;;  %v7500_v3 = vadd.f32 %v7499_v30, %v7498_v12  ;;  %v13999_v32 = vld [vmem:[#allocation31 + $0x7c] ss:$12 sps:$4 sm:$0xff]   ;;  %v14000_v10 = vld [vmem:[#allocation31 + $0x140] ss:$12 sps:$4 sm:$0xff]   ;;  %v13997_v13 = vld [vmem:[#allocation31 + $0x78] ss:$12 sps:$4 sm:$0xff]  }
0x1966   : > { %v14423_v29 = vpop.eup %14422  ;;  %v9254_v31 = vadd.f32 1.0, %v14421_v58  ;;  %v9276_v37 = vadd.f32 %v9274_v14, %v9272_v56  ;;  %v7493_v5 = vadd.f32 %v7492_v33, %v7491_v16  ;;  %v14001_v62 = vld [vmem:[#allocation31 + $0x80] ss:$12 sps:$4 sm:$0xff]   ;;  %v14005_v14 = vld [vmem:[#allocation31 + $0x158] ss:$12 sps:$4 sm:$0xff]  }
0x1967   : > { %14426 = vtanh.f32 %v9275_v48  ;;  %v9255_v11 = vadd.f32 1.0, %v14423_v29  ;;  %v14004_v56 = vld [vmem:[#allocation31 + $0x94] ss:$12 sps:$4 sm:$0xff]   ;;  %v14002_v58 = vld [vmem:[#allocation31 + $0x90] ss:$12 sps:$4 sm:$0xff]  }
0x1968   : > { %14428 = vrcp.f32 %v9254_v31  ;;  %v14006_v48 = vld [vmem:[#allocation31 + $0x98] ss:$12 sps:$4 sm:$0xff]   ;;  %v14010_v31 = vld [vmem:[#allocation31 + $0x170] ss:$12 sps:$4 sm:$0xff]   ;;  %v14012_v30 = vld [vmem:[#allocation31 + $0xc0] ss:$12 sps:$4 sm:$0xff]  }
0x1969   : > { %14430 = vtanh.f32 %v9276_v37  ;;  %v14009_v29 = vld [vmem:[#allocation31 + $0xac] ss:$12 sps:$4 sm:$0xff]   ;;  %v14007_v37 = vld [vmem:[#allocation31 + $0xa8] ss:$12 sps:$4 sm:$0xff]   ;;  %v14011_v12 = vld [vmem:[#allocation31 + $0xb0] ss:$12 sps:$4 sm:$0xff]  }
0x196a   : > { %14432 = vrcp.f32 %v9255_v11  ;;  %v14014_v16 = vld [vmem:[#allocation31 + $0xc4] ss:$12 sps:$4 sm:$0xff]   ;;  %v14017_v11 = vld [vmem:[#allocation34 + $0x4] ss:$12 sps:$4 sm:$0xff]  }
0x196b   : > { %v14015_v33 = vld [vmem:[#allocation34] ss:$12 sps:$4 sm:$0xff]  }
0x196f   : > { %v14425_v6 = vpop.eup %14424 }
0x1970   : > { %v7503_v61 = vmul.f32 %v14425_v6, %v7500_v3  ;;  %v7502_v34 = vmul.f32 %v14425_v6, %v7493_v5  ;;  %v16986_v3 = vpack.c.bf16 %v16901_v17, %v16901_v17  ;;  %v14020_v5 = vld [vmem:[#allocation31 + $0xdc] ss:$12 sps:$4 sm:$0xff]   ;;  %v14023_v6 = vld [vmem:[#allocation34 + $0x1c] ss:$12 sps:$4 sm:$0xff]  }
0x1971   : > { %v14427_v24 = vpop.eup %14426  ;;  %v14024_v17 = vld [vmem:[#allocation31 + $0xf0] ss:$12 sps:$4 sm:$0xff]  }
0x1972   : > { %v14429_v54 = vpop.eup %14428  ;;  %v9439_v27 = vpack.c.bf16 %v7503_v61, %v7503_v61  ;;  %v9438_v8 = vpack.c.bf16 %v7502_v34, %v7502_v34  ;;  %v14018_v34 = vld [vmem:[#allocation31 + $0xd8] ss:$12 sps:$4 sm:$0xff]  }
0x1973   : > { %v14431_v25 = vpop.eup %14430  ;;  %v16968_v52 = vmul.f32 %v14429_v54, %v14427_v24  ;;  %v14021_v24 = vld [vmem:[#allocation34 + $0x18] ss:$12 sps:$4 sm:$0xff]  }
0x1974   : > { %v14433_v7 = vpop.eup %14432  ;;  %12652 = vmatprep.mubr.msk.bf16.mxu0 %vm6374_vm3, %v9439_v27  ;;  %12653 = vmatprep.mubr.msk.bf16.mxu1 %vm6374_vm3, %v9439_v27  ;;  %v14026_v54 = vld [vmem:[#allocation31 + $0xf4] ss:$12 sps:$4 sm:$0xff]   ;;  %v14029_v27 = vld [vmem:[#allocation34 + $0x34] ss:$12 sps:$4 sm:$0xff]  }
0x1975   : > { %9636 = vmatmul.mubr.bf16.vlgmr.msra.gmra.mrb[100].mxu0 %v9438_v8  ;;  %9677 = vmatmul.mubr.bf16.vlgmr.msra.gmra.mrb[112].mxu1 %v9438_v8  ;;  %v16974_v38 = vmul.f32 %v14433_v7, %v14431_v25  ;;  %v9284_v20 = vrot.slane %v16968_v52, %v16344_v46  ;;  %v14032_v8 = vld [vmem:[#allocation31 + $0x10c] ss:$12 sps:$4 sm:$0xff]   ;;  %v14030_v25 = vld [vmem:[#allocation31 + $0x108] ss:$12 sps:$4 sm:$0xff]  }
0x1976   : > { %9941 = vmatpush1.bf16.msra.mxu0 %v13972_v50  ;;  %12941 = vmatpush3.bf16.msra.mxu1 %v13976_v4  ;;  %v14027_v50 = vld [vmem:[#allocation34 + $0x30] ss:$12 sps:$4 sm:$0xff]   ;;  %v14035_v4 = vld [vmem:[#allocation34 + $0x4c] ss:$12 sps:$4 sm:$0xff]   ;;  %v14033_v7 = vld [vmem:[#allocation34 + $0x48] ss:$12 sps:$4 sm:$0xff]  }
0x1977   : > { %9972 = vmatprep.mubr.bf16.mxu0 %v9397_v63  ;;  %10013 = vmatprep.mubr.bf16.mxu1 %v9397_v63  ;;  %v9288_v41 = vrot.slane %v16974_v38, %v16344_v46  ;;  %v9289_v47 = vmul.f32 %v9284_v20, %v16701_v35  ;;  %v16991_v61 = vpack.c.bf16 %v16974_v38, %v16974_v38  ;;  %v14036_v63 = vld [vmem:[#allocation31 + $0x120] ss:$12 sps:$4 sm:$0xff]   ;;  %v14039_v38 = vld [vmem:[#allocation34 + $0x60] ss:$12 sps:$4 sm:$0xff]  }
0x1978   : > { %9942 = vmatprep.subr.bf16.mxu0 %v13979_v43  ;;  %12942 = vmatprep.subr.bf16.mxu1 %v13980_v39  ;;  %v14038_v43 = vld [vmem:[#allocation31 + $0x124] ss:$12 sps:$4 sm:$0xff]   ;;  %v14041_v39 = vld [vmem:[#allocation34 + $0x64] ss:$12 sps:$4 sm:$0xff]   ;;  %v14044_v20 = vld [vmem:[#allocation31 + $0x13c] ss:$12 sps:$4 sm:$0xff]  }
0x1979   : > { %v9290_v26 = vmul.f32 %v9288_v41, %v16697_v22  ;;  %v9291_v51 = vsel %vm2055_vm12, %v9289_v47, 0.0  ;;  %v14053_v41 = vld [vmem:[#allocation34 + $0x94] ss:$12 sps:$4 sm:$0xff]  }
0x197a   : > { %9943 = vmatpush1.bf16.msra.mxu0 %v13977_v18  ;;  %12943 = vmatpush3.bf16.msra.mxu1 %v13981_v40  ;;  %v14047_v18 = vld [vmem:[#allocation34 + $0x7c] ss:$12 sps:$4 sm:$0xff]   ;;  %v14048_v47 = vld [vmem:[#allocation31 + $0x150] ss:$12 sps:$4 sm:$0xff]  }
0x197b   : > { %9944 = vmatprep.subr.bf16.mxu0 %v13984_v44  ;;  %12944 = vmatprep.subr.bf16.mxu1 %v13985_v45  ;;  %v9292_v59 = vsel %vm7550_vm8, %v9290_v26, 0.0  ;;  %v14042_v40 = vld [vmem:[#allocation31 + $0x138] ss:$12 sps:$4 sm:$0xff]   ;;  %v14045_v44 = vld [vmem:[#allocation34 + $0x78] ss:$12 sps:$4 sm:$0xff]  }
0x197c   : > { %v9293_v36 = vadd.f32 %v9292_v59, %v9291_v51  ;;  %v14050_v45 = vld [vmem:[#allocation31 + $0x154] ss:$12 sps:$4 sm:$0xff]   ;;  %v14056_v51 = vld [vmem:[#allocation31 + $0x16c] ss:$12 sps:$4 sm:$0xff]  }
0x197d   : > { %v14051_v26 = vld [vmem:[#allocation34 + $0x90] ss:$12 sps:$4 sm:$0xff]   ;;  %v14057_v59 = vld [vmem:[#allocation34 + $0xa8] ss:$12 sps:$4 sm:$0xff]  }
0x197e   : > { %9945 = vmatpush1.bf16.msra.mxu0 %v13982_v53  ;;  %12945 = vmatpush3.bf16.msra.mxu1 %v13986_v57  ;;  %v14059_v53 = vld [vmem:[#allocation34 + $0xac] ss:$12 sps:$4 sm:$0xff]  }
0x197f   : > { %9294 = vadd.xlane.f32.xlu1 %v9293_v36  ;;  %9946 = vmatprep.subr.bf16.mxu0 %v13989_v15  ;;  %v14054_v57 = vld [vmem:[#allocation31 + $0x168] ss:$12 sps:$4 sm:$0xff]   ;;  %v14063_v36 = vld [vmem:[#allocation34 + $0xc8] ss:$12 sps:$4 sm:$0xff]  }
0x1980   : > { %12946 = vmatprep.subr.bf16.mxu1 %v13990_v60  ;;  %v14062_v15 = vld [vmem:[#allocation34 + $0xc4] ss:$12 sps:$4 sm:$0xff]   ;;  %v14060_v60 = vld [vmem:[#allocation34 + $0xc0] ss:$12 sps:$4 sm:$0xff]  }
0x1982   : > { %9947 = vmatpush1.bf16.msra.mxu0 %v13987_v55  ;;  %12947 = vmatpush3.bf16.msra.mxu1 %v13991_v28  ;;  %v14064_v55 = vld [vmem:[#allocation34 + $0x8] ss:$12 sps:$4 sm:$0xff]  }
0x1983   : > { %9948 = vmatprep.subr.bf16.mxu0 %v13994_v42  ;;  %12948 = vmatprep.subr.bf16.mxu1 %v13995_v21  ;;  %v14067_v28 = vld [vmem:[#allocation34 + $0xdc] ss:$12 sps:$4 sm:$0xff]   ;;  %v14068_v42 = vld [vmem:[#allocation34 + $0xe0] ss:$12 sps:$4 sm:$0xff]   ;;  %v14065_v21 = vld [vmem:[#allocation34 + $0xd8] ss:$12 sps:$4 sm:$0xff]  }
0x1986   : > { %9949 = vmatpush1.bf16.msra.mxu0 %v13992_v2  ;;  %12949 = vmatpush3.bf16.msra.mxu1 %v13996_v23  ;;  %v14069_v2 = vld [vmem:[#allocation34 + $0x20] ss:$12 sps:$4 sm:$0xff]  }
0x1987   : > { %9950 = vmatprep.subr.bf16.mxu0 %v13999_v32  ;;  %12950 = vmatprep.subr.bf16.mxu1 %v14000_v10  ;;  %v14072_v23 = vld [vmem:[#allocation34 + $0xf4] ss:$12 sps:$4 sm:$0xff]   ;;  %v14073_v32 = vld [vmem:[#allocation34 + $0xf8] ss:$12 sps:$4 sm:$0xff]   ;;  %v14070_v10 = vld [vmem:[#allocation34 + $0xf0] ss:$12 sps:$4 sm:$0xff]  }
0x198a   : > { %9951 = vmatpush1.bf16.msra.mxu0 %v13997_v13  ;;  %12951 = vmatpush3.bf16.msra.mxu1 %v14001_v62  ;;  %v14074_v13 = vld [vmem:[#allocation34 + $0x38] ss:$12 sps:$4 sm:$0xff]  }
0x198b   : > { %9952 = vmatprep.subr.bf16.mxu0 %v14004_v56  ;;  %12952 = vmatprep.subr.bf16.mxu1 %v14005_v14  ;;  %v14077_v62 = vld [vmem:[#allocation34 + $0x10c] ss:$12 sps:$4 sm:$0xff]   ;;  %v14078_v56 = vld [vmem:[#allocation34 + $0x110] ss:$12 sps:$4 sm:$0xff]   ;;  %v14075_v14 = vld [vmem:[#allocation34 + $0x108] ss:$12 sps:$4 sm:$0xff]  }
0x198e   : > { %9953 = vmatpush1.bf16.msra.mxu0 %v14002_v58  ;;  %12953 = vmatpush3.bf16.msra.mxu1 %v14006_v48  ;;  %v14079_v58 = vld [vmem:[#allocation34 + $0x50] ss:$12 sps:$4 sm:$0xff]  }
0x198f   : > { %9954 = vmatprep.subr.bf16.mxu0 %v14009_v29  ;;  %12954 = vmatprep.subr.bf16.mxu1 %v14010_v31  ;;  %v14082_v48 = vld [vmem:[#allocation34 + $0x124] ss:$12 sps:$4 sm:$0xff]   ;;  %v14083_v29 = vld [vmem:[#allocation34 + $0x128] ss:$12 sps:$4 sm:$0xff]   ;;  %v14080_v31 = vld [vmem:[#allocation34 + $0x120] ss:$12 sps:$4 sm:$0xff]  }
0x1992   : > { %9955 = vmatpush1.bf16.msra.mxu0 %v14007_v37  ;;  %12955 = vmatpush3.bf16.msra.mxu1 %v14011_v12  ;;  %v14084_v37 = vld [vmem:[#allocation34 + $0x68] ss:$12 sps:$4 sm:$0xff]  }
0x1993   : > { %9956 = vmatprep.subr.bf16.mxu0 %v14014_v16  ;;  %10343 = vmatprep.subr.bf16.mxu1 %v14017_v11  ;;  %v14087_v12 = vld [vmem:[#allocation34 + $0x13c] ss:$12 sps:$4 sm:$0xff]   ;;  %v14088_v16 = vld [vmem:[#allocation34 + $0x140] ss:$12 sps:$4 sm:$0xff]   ;;  %v14085_v11 = vld [vmem:[#allocation34 + $0x138] ss:$12 sps:$4 sm:$0xff]  }
0x1995   : > { %10014 = vmatmul.mubr.bf16.vlgmr.msra.gmra.mrb[116].mxu1 %v16986_v3 }
0x1996   : > { %9957 = vmatpush1.bf16.msra.mxu0 %v14012_v30  ;;  %10344 = vmatpush1.bf16.msra.mxu1 %v14015_v33  ;;  %v14089_v30 = vld [vmem:[#allocation34 + $0x80] ss:$12 sps:$4 sm:$0xff]  }
0x1997   : > { %10375 = vmatprep.mubr.bf16.mxu1 %v16991_v61  ;;  %9958 = vmatprep.subr.bf16.mxu0 %v14020_v5  ;;  %v14092_v33 = vld [vmem:[#allocation34 + $0x154] ss:$12 sps:$4 sm:$0xff]   ;;  %v14090_v5 = vld [vmem:[#allocation34 + $0x150] ss:$12 sps:$4 sm:$0xff]  }
0x1998   : > { %10345 = vmatprep.subr.bf16.mxu1 %v14023_v6  ;;  %v14094_v6 = vld [vmem:[#allocation34 + $0x98] ss:$12 sps:$4 sm:$0xff]  }
0x199a   : > { %9959 = vmatpush1.bf16.msra.mxu0 %v14018_v34  ;;  %10346 = vmatpush1.bf16.msra.mxu1 %v14021_v24  ;;  %v14098_v34 = vld [vmem:[#allocation34 + $0x170] ss:$12 sps:$4 sm:$0xff]   ;;  %v14095_v24 = vld [vmem:[#allocation34 + $0x168] ss:$12 sps:$4 sm:$0xff]  }
0x199b   : > { %9960 = vmatprep.subr.bf16.mxu0 %v14026_v54  ;;  %10347 = vmatprep.subr.bf16.mxu1 %v14029_v27  ;;  %v14099_v54 = vld [vmem:[#allocation34 + $0xb0] ss:$12 sps:$4 sm:$0xff]  }
0x199c   : > { %v14102_v27 = vld [vmem:[#allocation36 + $0x4] ss:$12 sps:$4 sm:$0xff]  }
0x199e   : > { %9961 = vmatpush1.bf16.msra.mxu0 %v14024_v17  ;;  %10348 = vmatpush1.bf16.msra.mxu1 %v14027_v50  ;;  %v14100_v17 = vld [vmem:[#allocation36] ss:$12 sps:$4 sm:$0xff]   ;;  %v14103_v50 = vld [vmem:[#allocation36 + $0x8] ss:$12 sps:$4 sm:$0xff]  }
0x199f   : > { %9962 = vmatprep.subr.bf16.mxu0 %v14032_v8  ;;  %10349 = vmatprep.subr.bf16.mxu1 %v14035_v4  ;;  %v10085_v8 = vpack.c.bf16 %v16968_v52, %v16968_v52  ;;  %v14106_v4 = vld [vmem:[#allocation36 + $0x1c] ss:$12 sps:$4 sm:$0xff]   ;;  %v14114_v52 = vld [vmem:[#allocation36 + $0x4c] ss:$12 sps:$4 sm:$0xff]  }
0x19a2   : > { %9963 = vmatpush1.bf16.msra.mxu0 %v14030_v25  ;;  %10350 = vmatpush1.bf16.msra.mxu1 %v14033_v7  ;;  %v14104_v25 = vld [vmem:[#allocation36 + $0x18] ss:$12 sps:$4 sm:$0xff]   ;;  %v14107_v7 = vld [vmem:[#allocation36 + $0x20] ss:$12 sps:$4 sm:$0xff]  }
0x19a3   : > { %9964 = vmatprep.subr.bf16.mxu0 %v14038_v43  ;;  %10351 = vmatprep.subr.bf16.mxu1 %v14041_v39  ;;  %v14110_v43 = vld [vmem:[#allocation36 + $0x34] ss:$12 sps:$4 sm:$0xff]   ;;  %v14108_v39 = vld [vmem:[#allocation36 + $0x30] ss:$12 sps:$4 sm:$0xff]  }
0x19a6   : > { %9965 = vmatpush1.bf16.msra.mxu0 %v14036_v63  ;;  %10352 = vmatpush1.bf16.msra.mxu1 %v14039_v38  ;;  %v14111_v63 = vld [vmem:[#allocation36 + $0x38] ss:$12 sps:$4 sm:$0xff]   ;;  %v14112_v38 = vld [vmem:[#allocation36 + $0x48] ss:$12 sps:$4 sm:$0xff]  }
0x19a7   : > { %9966 = vmatprep.subr.bf16.mxu0 %v14044_v20  ;;  %10353 = vmatprep.subr.bf16.mxu1 %v14047_v18  ;;  %v14115_v20 = vld [vmem:[#allocation36 + $0x50] ss:$12 sps:$4 sm:$0xff]  }
0x19a8   : > { %v14118_v18 = vld [vmem:[#allocation36 + $0x64] ss:$12 sps:$4 sm:$0xff]  }
0x19aa   : > { %9967 = vmatpush1.bf16.msra.mxu0 %v14042_v40  ;;  %10354 = vmatpush1.bf16.msra.mxu1 %v14045_v44  ;;  %v14116_v40 = vld [vmem:[#allocation36 + $0x60] ss:$12 sps:$4 sm:$0xff]   ;;  %v14119_v44 = vld [vmem:[#allocation36 + $0x68] ss:$12 sps:$4 sm:$0xff]  }
0x19ab   : > { %9968 = vmatprep.subr.bf16.mxu0 %v14050_v45  ;;  %10355 = vmatprep.subr.bf16.mxu1 %v14053_v41  ;;  %v14122_v45 = vld [vmem:[#allocation36 + $0x7c] ss:$12 sps:$4 sm:$0xff]   ;;  %v14120_v41 = vld [vmem:[#allocation36 + $0x78] ss:$12 sps:$4 sm:$0xff]  }
0x19ae   : > { %9969 = vmatpush1.bf16.msra.mxu0 %v14048_v47  ;;  %10356 = vmatpush1.bf16.msra.mxu1 %v14051_v26  ;;  %v14123_v47 = vld [vmem:[#allocation36 + $0x80] ss:$12 sps:$4 sm:$0xff]  }
0x19af   : > { %9970 = vmatprep.subr.bf16.mxu0 %v14056_v51  ;;  %10357 = vmatprep.subr.bf16.mxu1 %v14059_v53  ;;  %v14126_v26 = vld [vmem:[#allocation36 + $0x94] ss:$12 sps:$4 sm:$0xff]   ;;  %v14124_v51 = vld [vmem:[#allocation36 + $0x90] ss:$12 sps:$4 sm:$0xff]   ;;  %v14127_v53 = vld [vmem:[#allocation36 + $0x98] ss:$12 sps:$4 sm:$0xff]  }
0x19b2   : > { %9971 = vmatpush1.bf16.msra.mxu0 %v14054_v57  ;;  %10358 = vmatpush1.bf16.msra.mxu1 %v14057_v59  ;;  %v14130_v57 = vld [vmem:[#allocation36 + $0xac] ss:$12 sps:$4 sm:$0xff]   ;;  %v14128_v59 = vld [vmem:[#allocation36 + $0xa8] ss:$12 sps:$4 sm:$0xff]  }
0x19b3   : > { %10359 = vmatprep.subr.bf16.mxu1 %v14062_v15  ;;  %12962 = vmatprep.subr.bf16.mxu0 %v14063_v36  ;;  %v14131_v15 = vld [vmem:[#allocation36 + $0xb0] ss:$12 sps:$4 sm:$0xff]  }
0x19b4   : > { %v14134_v36 = vld [vmem:[#allocation36 + $0xc4] ss:$12 sps:$4 sm:$0xff]  }
0x19b5   : > { %9973 = vmatmul.mubr.bf16.vlgmr.msra.gmra.mrb[104].mxu0 %v16986_v3  ;;  %v14093_v3 = vld [vmem:[#allocation34 + $0x158] ss:$12 sps:$4 sm:$0xff]  }
0x19b6   : > { %10360 = vmatpush1.bf16.msra.mxu1 %v14060_v60  ;;  %12963 = vmatpush3.bf16.msra.mxu0 %v14064_v55  ;;  %v14132_v60 = vld [vmem:[#allocation36 + $0xc0] ss:$12 sps:$4 sm:$0xff]   ;;  %v14135_v55 = vld [vmem:[#allocation36 + $0xc8] ss:$12 sps:$4 sm:$0xff]  }
0x19b7   : > { %10416 = vmatprep.mubr.bf16.mxu0 %v16991_v61  ;;  %10361 = vmatprep.subr.bf16.mxu1 %v14067_v28  ;;  %v14097_v61 = vld [vmem:[#allocation34 + $0x16c] ss:$12 sps:$4 sm:$0xff]   ;;  %v14138_v28 = vld [vmem:[#allocation36 + $0xdc] ss:$12 sps:$4 sm:$0xff]  }
0x19b8   : > { %12964 = vmatprep.subr.bf16.mxu0 %v14068_v42  ;;  %v14136_v42 = vld [vmem:[#allocation36 + $0xd8] ss:$12 sps:$4 sm:$0xff]  }
0x19ba   : > { %10362 = vmatpush1.bf16.msra.mxu1 %v14065_v21  ;;  %12965 = vmatpush3.bf16.msra.mxu0 %v14069_v2  ;;  %v14139_v21 = vld [vmem:[#allocation36 + $0xe0] ss:$12 sps:$4 sm:$0xff]  }
0x19bb   : > { %10363 = vmatprep.subr.bf16.mxu1 %v14072_v23  ;;  %12966 = vmatprep.subr.bf16.mxu0 %v14073_v32 }
0x19be   : > { %10364 = vmatpush1.bf16.msra.mxu1 %v14070_v10  ;;  %12967 = vmatpush3.bf16.msra.mxu0 %v14074_v13 }
0x19bf   : > { %10365 = vmatprep.subr.bf16.mxu1 %v14077_v62  ;;  %12968 = vmatprep.subr.bf16.mxu0 %v14078_v56 }
0x19c2   : > { %10366 = vmatpush1.bf16.msra.mxu1 %v14075_v14  ;;  %12969 = vmatpush3.bf16.msra.mxu0 %v14079_v58 }
0x19c3   : > { %10367 = vmatprep.subr.bf16.mxu1 %v14082_v48  ;;  %12970 = vmatprep.subr.bf16.mxu0 %v14083_v29 }
0x19c6   : > { %10368 = vmatpush1.bf16.msra.mxu1 %v14080_v31  ;;  %12971 = vmatpush3.bf16.msra.mxu0 %v14084_v37 }
0x19c7   : > { %10369 = vmatprep.subr.bf16.mxu1 %v14087_v12  ;;  %12972 = vmatprep.subr.bf16.mxu0 %v14088_v16 }
0x19ca   : > { %10370 = vmatpush1.bf16.msra.mxu1 %v14085_v11  ;;  %12973 = vmatpush3.bf16.msra.mxu0 %v14089_v30 }
0x19cb   : > { %10371 = vmatprep.subr.bf16.mxu1 %v14092_v33  ;;  %12974 = vmatprep.subr.bf16.mxu0 %v14093_v3  ;;  %v14142_v33 = vld [vmem:[#allocation39 + $0x4] ss:$8 sps:$4 sm:$0xff]  }
0x19ce   : > { %10372 = vmatpush1.bf16.msra.mxu1 %v14090_v5  ;;  %12975 = vmatpush3.bf16.msra.mxu0 %v14094_v6 }
0x19cf   : > { %10373 = vmatprep.subr.bf16.mxu1 %v14097_v61  ;;  %12976 = vmatprep.subr.bf16.mxu0 %v14098_v34 }
0x19d2   : > { %10374 = vmatpush1.bf16.msra.mxu1 %v14095_v24  ;;  %12977 = vmatpush3.bf16.msra.mxu0 %v14099_v54 }
0x19d3   : > { %10632 = vmatprep.subr.bf16.mxu0 %v14102_v27  ;;  %10673 = vmatprep.subr.bf16.mxu1 %v15373_v0 }
0x19d5   : > { %10376 = vmatmul.mubr.bf16.vlgmr.msra.gmra.mrb[120].mxu1 %v10085_v8  ;;  %10417 = vmatmul.mubr.bf16.vlgmr.msra.gmra.mrb[108].mxu0 %v10085_v8 }
0x19d6   : > { %10633 = vmatpush1.bf16.msra.mxu0 %v14100_v17  ;;  %10674 = vmatpush1.bf16.msra.mxu1 %v14103_v50 }
0x19d7   : > { %10634 = vmatprep.subr.bf16.mxu0 %v14106_v4  ;;  %10675 = vmatprep.subr.bf16.mxu1 %v15373_v0 }
0x19da   : > { %10635 = vmatpush1.bf16.msra.mxu0 %v14104_v25  ;;  %10676 = vmatpush1.bf16.msra.mxu1 %v14107_v7 }
0x19db   : > { %10636 = vmatprep.subr.bf16.mxu0 %v14110_v43  ;;  %10677 = vmatprep.subr.bf16.mxu1 %v15373_v0 }
0x19de   : > { %10637 = vmatpush1.bf16.msra.mxu0 %v14108_v39  ;;  %10678 = vmatpush1.bf16.msra.mxu1 %v14111_v63 }
0x19df   : > { %10638 = vmatprep.subr.bf16.mxu0 %v14114_v52  ;;  %10679 = vmatprep.subr.bf16.mxu1 %v15373_v0 }
0x19e2   : > { %10639 = vmatpush1.bf16.msra.mxu0 %v14112_v38  ;;  %10680 = vmatpush1.bf16.msra.mxu1 %v14115_v20 }
0x19e3   : > { %10640 = vmatprep.subr.bf16.mxu0 %v14118_v18  ;;  %10681 = vmatprep.subr.bf16.mxu1 %v15373_v0  ;;  %v14140_v18 = vld [vmem:[#allocation39] ss:$8 sps:$4 sm:$0xff]  }
0x19e6   : > { %10641 = vmatpush1.bf16.msra.mxu0 %v14116_v40  ;;  %10682 = vmatpush1.bf16.msra.mxu1 %v14119_v44  ;;  %v14145_v40 = vld [vmem:[#allocation39 + $0x14] ss:$8 sps:$4 sm:$0xff]   ;;  %v14143_v44 = vld [vmem:[#allocation39 + $0x10] ss:$8 sps:$4 sm:$0xff]  }
0x19e7   : > { %10642 = vmatprep.subr.bf16.mxu0 %v14122_v45  ;;  %10683 = vmatprep.subr.bf16.mxu1 %v15373_v0 }
0x19ea   : > { %10643 = vmatpush1.bf16.msra.mxu0 %v14120_v41  ;;  %10684 = vmatpush1.bf16.msra.mxu1 %v14123_v47  ;;  %v14148_v47 = vld [vmem:[#allocation39 + $0x24] ss:$8 sps:$4 sm:$0xff]  }
0x19eb   : > { %10644 = vmatprep.subr.bf16.mxu0 %v14126_v26  ;;  %10685 = vmatprep.subr.bf16.mxu1 %v15373_v0 }
0x19ee   : > { %10645 = vmatpush1.bf16.msra.mxu0 %v14124_v51  ;;  %10686 = vmatpush1.bf16.msra.mxu1 %v14127_v53 }
0x19ef   : > { %10646 = vmatprep.subr.bf16.mxu0 %v14130_v57  ;;  %10687 = vmatprep.subr.bf16.mxu1 %v15373_v0 }
0x19f2   : > { %10647 = vmatpush1.bf16.msra.mxu0 %v14128_v59  ;;  %10688 = vmatpush1.bf16.msra.mxu1 %v14131_v15 }
0x19f3   : > { %10648 = vmatprep.subr.bf16.mxu0 %v14134_v36  ;;  %10689 = vmatprep.subr.bf16.mxu1 %v15373_v0  ;;  %v14146_v36 = vld [vmem:[#allocation39 + $0x20] ss:$8 sps:$4 sm:$0xff]  }
0x19f6   : > { %10649 = vmatpush1.bf16.msra.mxu0 %v14132_v60  ;;  %10690 = vmatpush1.bf16.msra.mxu1 %v14135_v55  ;;  %v14151_v60 = vld [vmem:[#allocation39 + $0x34] ss:$8 sps:$4 sm:$0xff]   ;;  %v14149_v55 = vld [vmem:[#allocation39 + $0x30] ss:$8 sps:$4 sm:$0xff]  }
0x19f7   : > { %10650 = vmatprep.subr.bf16.mxu0 %v14138_v28  ;;  %10691 = vmatprep.subr.bf16.mxu1 %v15373_v0  ;;  %v14154_v28 = vld [vmem:[#allocation39 + $0x44] ss:$8 sps:$4 sm:$0xff]  }
0x19fa   : > { %10651 = vmatpush1.bf16.msra.mxu0 %v14136_v42  ;;  %10692 = vmatpush1.bf16.msra.mxu1 %v14139_v21  ;;  %v14152_v42 = vld [vmem:[#allocation39 + $0x40] ss:$8 sps:$4 sm:$0xff]   ;;  %v14157_v21 = vld [vmem:[#allocation39 + $0x54] ss:$8 sps:$4 sm:$0xff]  }
0x19fb   : > { %11042 = vmatprep.subr.bf16.mxu0 %v14142_v33  ;;  %v14175_v33 = vld [vmem:[#allocation39 + $0xb4] ss:$8 sps:$4 sm:$0xff]  }
0x1a0c   : > { %v9295_v2 = vpop.xlane.xlu1 %9294 }
0x1a0d   : > { %v9296_v23 = vsel %vm2055_vm12, %v9295_v2, -inf }
0x1a0e   : > { %v9297_v32 = vrot.slane %v9296_v23, 4 }
0x1a10   : > { %v9298_v10 = vmax.f32 %v9296_v23, %v9297_v32  ;;  %v14160_v23 = vld [vmem:[#allocation39 + $0x64] ss:$8 sps:$4 sm:$0xff]   ;;  %v14158_v32 = vld [vmem:[#allocation39 + $0x60] ss:$8 sps:$4 sm:$0xff]  }
0x1a12   : > { %v9299_v13 = vrot.slane %v9298_v10, 2 }
0x1a14   : > { %v9300_v62 = vmax.f32 %v9298_v10, %v9299_v13  ;;  %v14163_v10 = vld [vmem:[#allocation39 + $0x74] ss:$8 sps:$4 sm:$0xff]   ;;  %v14161_v13 = vld [vmem:[#allocation39 + $0x70] ss:$8 sps:$4 sm:$0xff]  }
0x1a16   : > { %v9301_v56 = vrot.slane %v9300_v62, 1 }
0x1a18   : > { %v9302_v14 = vmax.f32 %v9300_v62, %v9301_v56  ;;  %v14166_v62 = vld [vmem:[#allocation39 + $0x84] ss:$8 sps:$4 sm:$0xff]   ;;  %v14164_v56 = vld [vmem:[#allocation39 + $0x80] ss:$8 sps:$4 sm:$0xff]  }
0x1a1a   : > { %v9303_v58 = vsub.f32 %v9295_v2, %v9302_v14  ;;  %v14155_v2 = vld [vmem:[#allocation39 + $0x50] ss:$8 sps:$4 sm:$0xff]   ;;  %v14169_v14 = vld [vmem:[#allocation39 + $0x94] ss:$8 sps:$4 sm:$0xff]  }
0x1a1c   : > { %v9304_v48 = vmul.f32 1.442695, %v9303_v58  ;;  %v14167_v58 = vld [vmem:[#allocation39 + $0x90] ss:$8 sps:$4 sm:$0xff]  }
0x1a1e   : > { %14434 = vpow2.f32 %v9304_v48 }
0x1a28   : > { %v14435_v29 = vpop.eup %14434 }
0x1a29   : > { %v9306_v31 = vsel %vm2055_vm12, %v14435_v29, 0.0  ;;  %v9314_v37 = vmul.f32 %v14435_v29, %v16697_v22  ;;  %v9313_v12 = vmul.f32 %v14435_v29, %v16701_v35  ;;  %v14172_v29 = vld [vmem:[#allocation39 + $0xa4] ss:$8 sps:$4 sm:$0xff]  }
0x1a2a   : > { %v9307_v16 = vrot.slane %v9306_v31, 4 }
0x1a2b   : > { %v9322_v11 = vsel %vm7550_vm8, %v9314_v37, 0.0  ;;  %v9315_v30 = vsel %vm2055_vm12, %v9313_v12, 0.0 }
0x1a2c   : > { %v9308_v3 = vadd.f32 %v9307_v16, %v9306_v31  ;;  %v9323_v5 = vrot.slane %v9322_v11, 4  ;;  %v9316_v6 = vrot.slane %v9315_v30, 4 }
0x1a2e   : > { %v9309_v61 = vrot.slane %v9308_v3, 2  ;;  %v9324_v34 = vadd.f32 %v9323_v5, %v9322_v11  ;;  %v9317_v24 = vadd.f32 %v9316_v6, %v9315_v30  ;;  %v14170_v11 = vld [vmem:[#allocation39 + $0xa0] ss:$8 sps:$4 sm:$0xff]   ;;  %v14178_v5 = vld [vmem:[#allocation39 + $0xc4] ss:$8 sps:$4 sm:$0xff]  }
0x1a2f   : > { %v14176_v6 = vld [vmem:[#allocation39 + $0xc0] ss:$8 sps:$4 sm:$0xff]  }
0x1a30   : > { %v9310_v54 = vadd.f32 %v9309_v61, %v9308_v3  ;;  %v9325_v17 = vrot.slane %v9324_v34, 2  ;;  %v9318_v50 = vrot.slane %v9317_v24, 2  ;;  %v14173_v3 = vld [vmem:[#allocation39 + $0xb0] ss:$8 sps:$4 sm:$0xff]   ;;  %v14181_v61 = vld [vmem:[#allocation39 + $0xd4] ss:$8 sps:$4 sm:$0xff]  }
0x1a32   : > { %v9311_v27 = vrot.slane %v9310_v54, 1  ;;  %v9326_v35 = vadd.f32 %v9325_v17, %v9324_v34  ;;  %v9319_v8 = vadd.f32 %v9318_v50, %v9317_v24  ;;  %v14179_v34 = vld [vmem:[#allocation39 + $0xd0] ss:$8 sps:$4 sm:$0xff]  }
0x1a34   : > { %v9312_v22 = vadd.f32 %v9311_v27, %v9310_v54  ;;  %v9327_v4 = vrot.slane %v9326_v35, 1  ;;  %v9320_v25 = vrot.slane %v9319_v8, 1 }
0x1a36   : > { %14436 = vrcp.f32 %v9312_v22  ;;  %v9328_v7 = vadd.f32 %v9327_v4, %v9326_v35  ;;  %v9321_v43 = vadd.f32 %v9320_v25, %v9319_v8  ;;  %v14184_v35 = vld [vmem:[#allocation39 + $0xe4] ss:$8 sps:$4 sm:$0xff]   ;;  %v14182_v8 = vld [vmem:[#allocation39 + $0xe0] ss:$8 sps:$4 sm:$0xff]   ;;  %v14187_v4 = vld [vmem:[#allocation39 + $0xf4] ss:$8 sps:$4 sm:$0xff]  }
0x1a37   : > { %v14185_v25 = vld [vmem:[#allocation39 + $0xf0] ss:$8 sps:$4 sm:$0xff]  }
0x1a40   : > { %v14437_v39 = vpop.eup %14436 }
0x1a41   : > { %v9331_v63 = vmul.f32 %v14437_v39, %v9328_v7  ;;  %v9330_v52 = vmul.f32 %v14437_v39, %v9321_v43  ;;  %v14190_v7 = vld [vmem:[#allocation39 + $0x104] ss:$8 sps:$4 sm:$0xff]  }
0x1a43   : > { %v10468_v38 = vpack.c.bf16 %v9331_v63, %v9331_v63  ;;  %v10467_v20 = vpack.c.bf16 %v9330_v52, %v9330_v52 }
0x1a45   : > { %12780 = vmatprep.mubr.msk.bf16.mxu0 %vm6374_vm3, %v10468_v38  ;;  %12781 = vmatprep.mubr.msk.bf16.mxu1 %vm6374_vm3, %v10468_v38 }
0x1a46   : > { %10665 = vmatmul.mubr.bf16.vlgmr.msra.gmra.mrb[112].mxu0 %v10467_v20  ;;  %10706 = vmatmul.mubr.bf16.vlgmr.msra.gmra.mrb[124].mxu1 %v10467_v20 }
0x1a47   : > { %11043 = vmatpush1.bf16.msra.mxu0 %v14140_v18 }
0x1a48   : > { %v17016_v45 = vpop.f32.mrb[100].mxu0  ;;  %v9678_v41 = vpop.f32.mrb[112].mxu1  ;;  %11044 = vmatprep.subr.bf16.mxu0 %v14145_v40 }
0x1a49   : > { %v17018_v26 = vpop.f32.mrb[101].mxu0  ;;  %v9680_v51 = vpop.f32.mrb[113].mxu1 }
0x1a4a   : > { %v9641_v53 = vpop.f32.mrb[102].mxu0  ;;  %v9681_v57 = vpop.f32.mrb[114].mxu1  ;;  %v14213_v51 = vld [vmem:[#allocation42] sm:$0xff]  }
0x1a4b   : > { %v9642_v59 = vpop.f32.mrb[103].mxu0  ;;  %v9682_v15 = vpop.f32.mrb[115].mxu1  ;;  %11045 = vmatpush1.bf16.msra.mxu0 %v14143_v44  ;;  %v14214_v53 = vld [vmem:[#allocation42 + $0x48] sm:$0xff]  }
0x1a4c   : > { %11046 = vmatprep.subr.bf16.mxu0 %v14148_v47  ;;  %v14215_v57 = vld [vmem:[#allocation42 + $0x8] sm:$0xff]   ;;  %v14216_v59 = vld [vmem:[#allocation42 + $0x50] sm:$0xff]  }
0x1a4d   : > { %v14217_v15 = vld [vmem:[#allocation42 + $0x10] sm:$0xff]  }
0x1a4f   : > { %11047 = vmatpush1.bf16.msra.mxu0 %v14146_v36  ;;  %v14218_v36 = vld [vmem:[#allocation42 + $0x58] sm:$0xff]  }
0x1a50   : > { %11048 = vmatprep.subr.bf16.mxu0 %v14151_v60  ;;  %v14219_v60 = vld [vmem:[#allocation42 + $0x18] sm:$0xff]  }
0x1a53   : > { %11049 = vmatpush1.bf16.msra.mxu0 %v14149_v55  ;;  %v14220_v55 = vld [vmem:[#allocation42 + $0x60] sm:$0xff]  }
0x1a54   : > { %11050 = vmatprep.subr.bf16.mxu0 %v14154_v28  ;;  %v14221_v28 = vld [vmem:[#allocation42 + $0x20] sm:$0xff]  }
0x1a57   : > { %11051 = vmatpush1.bf16.msra.mxu0 %v14152_v42  ;;  %v14222_v42 = vld [vmem:[#allocation42 + $0x68] sm:$0xff]  }
0x1a58   : > { %11052 = vmatprep.subr.bf16.mxu0 %v14157_v21  ;;  %v14223_v21 = vld [vmem:[#allocation42 + $0x28] sm:$0xff]  }
0x1a5b   : > { %11053 = vmatpush1.bf16.msra.mxu0 %v14155_v2  ;;  %v10716_v2 = vld [vmem:[#allocation37] sm:$0x7] }
0x1a5c   : > { %11054 = vmatprep.subr.bf16.mxu0 %v14160_v23  ;;  %v10721_v23 = vrot.slane %v10716_v2, %v16344_v46 }
0x1a5f   : > { %11055 = vmatpush1.bf16.msra.mxu0 %v14158_v32 }
0x1a60   : > { %11056 = vmatprep.subr.bf16.mxu0 %v14163_v10 }
0x1a63   : > { %11057 = vmatpush1.bf16.msra.mxu0 %v14161_v13  ;;  %v10725_v13 = vrot.slane %v10716_v2, %v16496_v9 }
0x1a64   : > { %11058 = vmatprep.subr.bf16.mxu0 %v14166_v62 }
0x1a67   : > { %11059 = vmatpush1.bf16.msra.mxu0 %v14164_v56 }
0x1a68   : > { %v12956_v48 = vpop.f32.mrb[116].mxu1  ;;  %11060 = vmatprep.subr.bf16.mxu0 %v14169_v14 }
0x1a69   : > { %v12957_v31 = vpop.f32.mrb[117].mxu1 }
0x1a6a   : > { %v12958_v37 = vadd.f32 %v12957_v31, %v12956_v48  ;;  %v12959_v12 = vpop.f32.mrb[118].mxu1 }
0x1a6b   : > { %v12960_v16 = vpop.f32.mrb[119].mxu1  ;;  %11061 = vmatpush1.bf16.msra.mxu0 %v14167_v58 }
0x1a6c   : > { %v10016_v30 = vadd.f32 %v12958_v37, %v9678_v41  ;;  %11062 = vmatprep.subr.bf16.mxu0 %v14172_v29 }
0x1a6f   : > { %11063 = vmatpush1.bf16.msra.mxu0 %v14170_v11 }
0x1a70   : > { %11064 = vmatprep.subr.bf16.mxu0 %v14175_v33 }
0x1a73   : > { %11065 = vmatpush1.bf16.msra.mxu0 %v14173_v3 }
0x1a74   : > { %11066 = vmatprep.subr.bf16.mxu0 %v14178_v5  ;;  %v14188_v5 = vld [vmem:[#allocation39 + $0x100] ss:$8 sps:$4 sm:$0xff]  }
0x1a77   : > { %11067 = vmatpush1.bf16.msra.mxu0 %v14176_v6 }
0x1a78   : > { %11068 = vmatprep.subr.bf16.mxu0 %v14181_v61  ;;  %v14193_v61 = vld [vmem:[#allocation39 + $0x114] ss:$8 sps:$4 sm:$0xff]  }
0x1a7b   : > { %11069 = vmatpush1.bf16.msra.mxu0 %v14179_v34  ;;  %v14191_v34 = vld [vmem:[#allocation39 + $0x110] ss:$8 sps:$4 sm:$0xff]  }
0x1a7c   : > { %11070 = vmatprep.subr.bf16.mxu0 %v14184_v35  ;;  %v14205_v35 = vld [vmem:[#allocation39 + $0x154] ss:$8 sps:$4 sm:$0xff]  }
0x1a7f   : > { %11071 = vmatpush1.bf16.msra.mxu0 %v14182_v8  ;;  %v14203_v8 = vld [vmem:[#allocation39 + $0x150] ss:$8 sps:$4 sm:$0xff]  }
0x1a80   : > { %11072 = vmatprep.subr.bf16.mxu0 %v14187_v4  ;;  %v10729_v4 = vrot.slane %v10716_v2, %v16507_v49  ;;  %v14227_v49 = vld [vmem:[#allocation42 + $0x38] sm:$0xff]   ;;  %v14234_v2 = vld [vmem:[#allocation43 + $0x30] sm:$0xff]  }
0x1a83   : > { %11073 = vmatpush1.bf16.msra.mxu0 %v14185_v25  ;;  %v14206_v25 = vld [vmem:[#allocation39 + $0x160] ss:$8 sps:$4 sm:$0xff]  }
0x1a84   : > { %11083 = vmatprep.subr.bf16.mxu0 %v14190_v7 }
0x1a88   : > { %v9974_v24 = vpop.f32.mrb[104].mxu0 }
0x1a89   : > { %v9975_v54 = vadd.f32 %v9974_v24, %v17016_v45  ;;  %v9976_v27 = vpop.f32.mrb[105].mxu0  ;;  %v14196_v24 = vld [vmem:[#allocation39 + $0x124] ss:$8 sps:$4 sm:$0xff]  }
0x1a8a   : > { %v9977_v17 = vadd.f32 %v9976_v27, %v17018_v26  ;;  %v9978_v50 = vpop.f32.mrb[106].mxu0  ;;  %v14212_v26 = vld [vmem:[#allocation42 + $0x40] sm:$0xff]   ;;  %v14199_v27 = vld [vmem:[#allocation39 + $0x134] ss:$8 sps:$4 sm:$0xff]  }
0x1a8b   : > { %v9979_v22 = vpop.f32.mrb[107].mxu0  ;;  %12984 = vmatprep.subr.bf16.mxu1 %v14212_v26  ;;  %v14202_v50 = vld [vmem:[#allocation39 + $0x144] ss:$8 sps:$4 sm:$0xff]  }
0x1a8c   : > { %12985 = vmatpush3.bf16.msra.mxu1 %v14213_v51  ;;  %v14200_v22 = vld [vmem:[#allocation39 + $0x140] ss:$8 sps:$4 sm:$0xff]  }
0x1a8d   : > { %12986 = vmatprep.subr.bf16.mxu1 %v14214_v53 }
0x1a90   : > { %12987 = vmatpush3.bf16.msra.mxu1 %v14215_v57 }
0x1a91   : > { %12988 = vmatprep.subr.bf16.mxu1 %v14216_v59 }
0x1a94   : > { %12989 = vmatpush3.bf16.msra.mxu1 %v14217_v15 }
0x1a95   : > { %12990 = vmatprep.subr.bf16.mxu1 %v14218_v36 }
0x1a98   : > { %12991 = vmatpush3.bf16.msra.mxu1 %v14219_v60  ;;  %v14228_v60 = vld [vmem:[#allocation43] sm:$0xff]  }
0x1a99   : > { %12992 = vmatprep.subr.bf16.mxu1 %v14220_v55 }
0x1a9c   : > { %12993 = vmatpush3.bf16.msra.mxu1 %v14221_v28  ;;  %v14229_v28 = vld [vmem:[#allocation43 + $0x8] sm:$0xff]  }
0x1a9d   : > { %12994 = vmatprep.subr.bf16.mxu1 %v14222_v42  ;;  %v14232_v42 = vld [vmem:[#allocation43 + $0x20] sm:$0xff]  }
0x1aa0   : > { %12995 = vmatpush3.bf16.msra.mxu1 %v14223_v21  ;;  %v14233_v21 = vld [vmem:[#allocation43 + $0x28] sm:$0xff]  }
0x1aa8   : > { %v10377_v43 = vpop.f32.mrb[120].mxu1  ;;  %v12978_v39 = vpop.f32.mrb[108].mxu0 }
0x1aa9   : > { %v10424_v63 = vadd.f32 %v10377_v43, %v9975_v54  ;;  %v10379_v52 = vpop.f32.mrb[121].mxu1  ;;  %v12979_v38 = vpop.f32.mrb[109].mxu0  ;;  %v14194_v54 = vld [vmem:[#allocation39 + $0x120] ss:$8 sps:$4 sm:$0xff]   ;;  %v14211_v43 = vld [vmem:[#allocation39 + $0x174] ss:$8 sps:$4 sm:$0xff]  }
0x1aaa   : > { %v10425_v20 = vadd.f32 %v10379_v52, %v9977_v17  ;;  %v12980_v18 = vadd.f32 %v12979_v38, %v12978_v39  ;;  %v10381_v40 = vpop.f32.mrb[122].mxu1  ;;  %v12981_v44 = vpop.f32.mrb[110].mxu0  ;;  %v14197_v17 = vld [vmem:[#allocation39 + $0x130] ss:$8 sps:$4 sm:$0xff]  }
0x1aab   : > { %v10382_v45 = vpop.f32.mrb[123].mxu1  ;;  %v12982_v41 = vpop.f32.mrb[111].mxu0  ;;  %v14209_v39 = vld [vmem:[#allocation39 + $0x170] ss:$8 sps:$4 sm:$0xff]   ;;  %v10790_v40 = vld [vmem:[#allocation40] sm:$0x3] }
0x1aac   : > { %v10426_v47 = vadd.f32 %v12980_v18, %v10016_v30  ;;  %v14224_v38 = vld [vmem:[#allocation42 + $0x70] sm:$0xff]   ;;  %v14226_v18 = vld [vmem:[#allocation42 + $0x78] sm:$0xff]   ;;  %v11035_v44 = vrot.slane %v10790_v40, %v16344_v46  ;;  %v11039_v45 = vrot.slane %v10790_v40, %v16496_v9 }
0x1aad   : > { %12996 = vmatprep.subr.bf16.mxu1 %v14224_v38  ;;  %v14230_v46 = vld [vmem:[#allocation43 + $0x10] sm:$0xff]   ;;  %v14231_v9 = vld [vmem:[#allocation43 + $0x18] sm:$0xff]  }
0x1b19   : > { %v10666_v32 = vpop.f32.mrb[112].mxu0  ;;  %v10707_v10 = vpop.f32.mrb[124].mxu1 }
0x1b1a   : > { %v10713_v62 = vadd.f32 %v10666_v32, %v10424_v63  ;;  %v10715_v56 = vadd.f32 %v10707_v10, %v10426_v47  ;;  %v10668_v14 = vpop.f32.mrb[113].mxu0  ;;  %v10709_v58 = vpop.f32.mrb[125].mxu1  ;;  %v11160_v10 = vld [vmem:[%s15568_s24] sm:$0x1] }
0x1b1b   : > { %v10714_v48 = vadd.f32 %v10668_v14, %v10425_v20  ;;  %v10670_v29 = vpop.f32.mrb[114].mxu0  ;;  %v10710_v31 = vpop.f32.mrb[126].mxu1  ;;  %v14225_v20 = vld [vmem:[#allocation42 + $0x30] sm:$0xff]  }
0x1b1c   : > { %v10733_v37 = vadd.f32 %v10721_v23, %v10713_v62  ;;  %v10671_v12 = vpop.f32.mrb[115].mxu0  ;;  %v10711_v16 = vpop.f32.mrb[127].mxu1  ;;  %v10735_v7 = vadd.f32 %v10729_v4, %v10715_v56  ;;  %12997 = vmatpush3.bf16.msra.mxu1 %v14225_v20  ;;  %v14235_v23 = vld [vmem:[#allocation43 + $0x38] sm:$0xff]   ;;  %v11404_v31 = vsel %vm3038_vm4, %v16571_v19, 0.0 }
0x1b1d   : > { %v10734_v11 = vadd.f32 %v10725_v13, %v10714_v48  ;;  %12998 = vmatprep.subr.bf16.mxu1 %v14226_v18 }
0x1b1e   : > { %v10736_v30 = vmax.f32 %v10733_v37, 0.0  ;;  %v10738_v63 = vmax.f32 %v10735_v7, 0.0  ;;  %v11315_v37 = vld [vmem:[%s15578_s14] sm:$0x1] }
0x1b1f   : > { %v10737_v33 = vmax.f32 %v10734_v11, 0.0 }
0x1b20   : > { %v10787_v6 = vpack.c.bf16 %v10736_v30, %v10736_v30  ;;  %v10789_v52 = vpack.c.bf16 %v10738_v63, %v10738_v63  ;;  %12999 = vmatpush3.bf16.msra.mxu1 %v14227_v49 }
0x1b21   : > { %v10788_v3 = vpack.c.bf16 %v10737_v33, %v10737_v33  ;;  %13243 = vmatprep.subr.bf16.mxu1 %v15374_v1 }
0x1b23   : > { %11074 = vmatprep.mubr.bf16.mxu0 %v10788_v3 }
0x1b24   : > { %11075 = vmatmul.mubr.bf16.vlgmr.msra.gmra.mrb[116].mxu0 %v10787_v6 }
0x1b25   : > { %11084 = vmatpush1.bf16.msra.mxu0 %v14188_v5  ;;  %11115 = vmatprep.mubr.bf16.mxu0 %v15373_v0  ;;  %v14208_v0 = vld [vmem:[#allocation39 + $0x164] ss:$8 sps:$4 sm:$0xff]  }
0x1b26   : > { %11085 = vmatprep.subr.bf16.mxu0 %v14193_v61 }
0x1b29   : > { %11086 = vmatpush1.bf16.msra.mxu0 %v14191_v34 }
0x1b2a   : > { %11087 = vmatprep.subr.bf16.mxu0 %v14196_v24 }
0x1b2d   : > { %11088 = vmatpush1.bf16.msra.mxu0 %v14194_v54 }
0x1b2e   : > { %11089 = vmatprep.subr.bf16.mxu0 %v14199_v27 }
0x1b31   : > { %11090 = vmatpush1.bf16.msra.mxu0 %v14197_v17 }
0x1b32   : > { %11091 = vmatprep.subr.bf16.mxu0 %v14202_v50 }
0x1b35   : > { %11092 = vmatpush1.bf16.msra.mxu0 %v14200_v22 }
0x1b36   : > { %11093 = vmatprep.subr.bf16.mxu0 %v14205_v35 }
0x1b39   : > { %11094 = vmatpush1.bf16.msra.mxu0 %v14203_v8 }
0x1b3a   : > { %11095 = vmatprep.subr.bf16.mxu0 %v14208_v0 }
0x1b3d   : > { %11096 = vmatpush1.bf16.msra.mxu0 %v14206_v25 }
0x1b3e   : > { %11097 = vmatprep.subr.bf16.mxu0 %v14211_v43 }
0x1b41   : > { %11098 = vmatpush1.bf16.msra.mxu0 %v14209_v39 }
0x1b44   : > { %11116 = vmatmul.mubr.bf16.vlgmr.msra.gmra.mrb[116].mxu0 %v10789_v52 }
0x1c17   : > { %v11117_v41 = vpop.f32.mrb[116].mxu0 }
0x1c18   : > { %v13269_v47 = vadd.f32 %v11117_v41, %v11035_v44  ;;  %v11119_v26 = vpop.f32.mrb[117].mxu0 }
0x1c19   : > { %v13270_v51 = vadd.f32 %v11119_v26, %v11039_v45  ;;  %v11121_v53 = vpop.f32.mrb[118].mxu0 }
0x1c1a   : > { %v11124_v57 = vmax.f32 %v13269_v47, 0.0  ;;  %v11122_v59 = vpop.f32.mrb[119].mxu0 }
0x1c1b   : > { %v11125_v15 = vmax.f32 %v13270_v51, 0.0 }
0x1c1c   : > { %v11158_v55 = vpack.c.bf16 %v11124_v57, %v11124_v57 }
0x1c1d   : > { %v11159_v36 = vpack.c.bf16 %v11125_v15, %v11125_v15 }
0x1c1f   : > { %11289 = vmatprep.mubr.bf16.mxu1 %v11159_v36 }
0x1c20   : > { %11290 = vmatmul.mubr.bf16.vlgmr.msra.gmra.mrb[128].mxu1 %v11158_v55 }
0x1c21   : > { %13244 = vmatpush3.bf16.msra.mxu1 %v14228_v60  ;;  %13259 = vmatprep.mubr.msk.bf16.mxu1 %vm15375_vm0, %v15374_v1  ;;  %vm11408_vm0 = vcmask 1040384  }
0x1c22   : > { %13245 = vmatprep.subr.bf16.mxu1 %v15374_v1 }
0x1c25   : > { %13246 = vmatpush3.bf16.msra.mxu1 %v14229_v28 }
0x1c26   : > { %13247 = vmatprep.subr.bf16.mxu1 %v15374_v1 }
0x1c29   : > { %13248 = vmatpush3.bf16.msra.mxu1 %v14230_v46 }
0x1c2a   : > { %13249 = vmatprep.subr.bf16.mxu1 %v15374_v1 }
0x1c2d   : > { %13250 = vmatpush3.bf16.msra.mxu1 %v14231_v9 }
0x1c2e   : > { %13251 = vmatprep.subr.bf16.mxu1 %v15374_v1 }
0x1c31   : > { %13252 = vmatpush3.bf16.msra.mxu1 %v14232_v42 }
0x1c32   : > { %13253 = vmatprep.subr.bf16.mxu1 %v15374_v1 }
0x1c35   : > { %13254 = vmatpush3.bf16.msra.mxu1 %v14233_v21 }
0x1c36   : > { %13255 = vmatprep.subr.bf16.mxu1 %v15374_v1 }
0x1c39   : > { %13256 = vmatpush3.bf16.msra.mxu1 %v14234_v2 }
0x1c3a   : > { %13257 = vmatprep.subr.bf16.mxu1 %v15374_v1  ;;  %v11406_v1 = vrot.slane %v11404_v31, 7 }
0x1c3d   : > { %13258 = vmatpush3.bf16.msra.mxu1 %v14235_v23 }
0x1cf3   : > { %v13000_v32 = vpop.f32.mrb[128].mxu1 }
0x1cf4   : > { %v13001_v13 = vpop.f32.mrb[129].mxu1 }
0x1cf5   : > { %v13002_v62 = vadd.f32 %v13001_v13, %v13000_v32  ;;  %v13003_v56 = vpop.f32.mrb[130].mxu1 }
0x1cf6   : > { %v13004_v14 = vpop.f32.mrb[131].mxu1 }
0x1cf7   : > { %v11292_v58 = vadd.f32 %v13002_v62, %v11160_v10 }
0x1cf9   : > { %v11297_v48 = vmax.f32 %v11292_v58, 0.0 }
0x1cfb   : > { %v11314_v29 = vpack.c.bf16 %v11297_v48, %v11297_v48 }
0x1cfd   : > { %13260 = vmatmul.mubr.bf16.vlgmr.msra.gmra.mrb[132].mxu1 %v11314_v29 }
0x1dd0   : > { %v11398_v12 = vpop.f32.mrb[132].mxu1 }
0x1dd1   : > { %v11399_v16 = vadd.f32 %v11398_v12, %v11315_v37  ;;  %v13261_v11 = vpop.f32.mrb[133].mxu1 }
0x1dd2   : > { %v11401_v30 = vpop.f32.mrb[134].mxu1 }
0x1dd3   : > { %v11409_v33 = vsel %vm11408_vm0, %v11399_v16, %v11406_v1  ;;  %v13262_v3 = vpop.f32.mrb[135].mxu1 }
0x1dd4   : > { %v11411_v5 = vsel %vm11410_vm9, %v11409_v33, 0.0 }
0x1dd5   : > { %11412 = vst [vmem:[%s1663_s10] sm:$0xff] %v11411_v5 }
0x1dd6 PF: > { %s104_s22 = sadd.s32 1, %s15293_s22  }
0x1dd7   : > { %p101_p3 = scmp.ge.s32.totalorder %s104_s22, 4  }
0x1dd9   :  { %103 = sbr.rel (!%p101_p3) target bundleno = 86 (0x56), region = 393 }
0x1de0   :  { %11432 = vsyncpa [#allocation3], 1 }
0x1de1   :  { %11434 = vsyncpa [#allocation3 + $0x1], 1 }
0x1de2   :  { %11435 = vsyncpa [#allocation5], 1 }
0x1de3   :  { %11436 = vsyncpa [#allocation8], 1 }
0x1de4   :  { %11437 = vsyncpa [#allocation11], 1 }
0x1de5   :  { %11438 = vsyncpa [#allocation14], 1 }
0x1de6   :  { %11439 = vsyncpa [#allocation17], 1 }
0x1de7   :  { %11440 = vsyncpa [#allocation20], 1 }
0x1de8   :  { %11441 = vsyncpa [#allocation23], 1 }
0x1de9   :  { %11442 = vsyncpa [#allocation26], 1 }
0x1dea   :  { %11443 = vsyncpa [#allocation29], 1 }
0x1deb   :  { %11444 = vsyncpa [#allocation32], 1 }
0x1dec   :  { %11445 = vsyncpa [#allocation35], 1 }
0x1ded   :  { %11446 = vsyncpa [#allocation38], 1 }
0x1dee   :  { %11447 = vsyncpa [#allocation41], 1 }
0x1def   :  { %11448 = vsyncpa [#allocation44], 1 }

</bundles_post_ra>
